<compile_context>
chip_gen: v7x
topology: tpu7x:2x2x1
jax: 0.10.0
libtpu: 0.0.40
codegen_flags: <defaults>
</compile_context>

<pallas_src>
import functools

import jax
import jax.numpy as jnp
import numpy as np
from jax import lax
from jax.experimental import pallas as pl
from jax.experimental.pallas import tpu as pltpu

BN_EPS = 1e-5
_TAPS = [(dy, dx) for dy in range(3) for dx in range(3)]   # tap order == HWIO reshape


# ----------------------------------------------------------------------------
# Fused BasicBlock kernel
# ----------------------------------------------------------------------------
def _make_basic_block_kernel(stride, ho, wo, cin, cout, proj_skip):
    s = stride
    two_cout = 2 * cout

    def body(xph_ref, w1_ref, s1_ref, b1_ref, w2_ref, bias_ref,
             wsk_ref, xid_ref, o_ref, xr_ref, hpad_ref):
        # ---- ReLU_1 + bf16, done ONCE for the whole block (not per tap) ----
        xr_ref[...] = jnp.maximum(xph_ref[0], 0)          # bf16 relu'd copy in VMEM

        def tap_relu(dy, dx):
            # Tap (dy, dx) of the relu'd zero-padded input at stride s, read from
            # the stride-phase decomposition (phase dy%s,dx%s / offset dy//s,dx//s).
            p = (dy % s) * s + (dx % s)
            r0, c0 = dy // s, dx // s
            return xr_ref[p, r0:r0 + ho, c0:c0 + wo, :].reshape(ho * wo, cin)

        def tap_raw(dy, dx):                              # same, but without ReLU
            p = (dy % s) * s + (dx % s)
            r0, c0 = dy // s, dx // s
            return xph_ref[0, p, r0:r0 + ho, c0:c0 + wo, :].reshape(ho * wo, cin)

        # ---- stage 1: ReLU -> conv3x3(stride) for BOTH branches -------------
        # Per-tap MXU accumulation: 9 x (ho*wo, cin) x (cin, 2*cout); no im2col slab.
        acc1 = jnp.zeros((ho * wo, two_cout), jnp.float32)
        for t, (dy, dx) in enumerate(_TAPS):
            acc1 = acc1 + jnp.dot(tap_relu(dy, dx), w1_ref[t],
                                  preferred_element_type=jnp.float32)
        # BN1 + ReLU_2 epilogue stays in f32 (scale1 NOT folded into bf16 weights).
        h = jnp.maximum(acc1 * s1_ref[...] + b1_ref[...], 0.0)

        # ---- conv2's zero-padded input lives in a bf16 VMEM scratch ----------
        # Interior + left/right halo columns as ONE full-width (unmasked) store;
        # only the two tiny top/bottom halo rows are zeroed, every step, so the
        # kernel stays correct when the "parallel" batch axis is core-partitioned.
        zc = jnp.zeros((ho, 1, two_cout), jnp.bfloat16)
        hpad_ref[1:ho + 1, :, :] = jnp.concatenate(
            [zc, h.astype(jnp.bfloat16).reshape(ho, wo, two_cout), zc], axis=1)
        zr = jnp.zeros((1, wo + 2, two_cout), jnp.bfloat16)
        hpad_ref[0:1, :, :] = zr
        hpad_ref[ho + 1:ho + 2, :, :] = zr

        # ---- stage 2 (+ skip): per-tap accumulation into ONE f32 accumulator --
        # Branches packed along K, 0.5*BN2 folded into w2 -> shake mix is free.
        acc2 = jnp.zeros((ho * wo, cout), jnp.float32)
        for t, (dy, dx) in enumerate(_TAPS):
            lhs = hpad_ref[dy:dy + ho, dx:dx + wo, :].reshape(ho * wo, two_cout)
            acc2 = acc2 + jnp.dot(lhs, w2_ref[t],
                                  preferred_element_type=jnp.float32)

        if proj_skip:
            # Skip: a = relu(x)[::s,::s]; b = F.pad(x[:,1:,1:],(0,1,0,1))[::s,::s]
            # Folded into the same accumulator (block-diagonal 1x1 weight, skip-BN
            # shift already folded into bias) -> no separate epilogue add.
            sk = jnp.concatenate([tap_relu(1, 1), tap_raw(2, 2)], axis=-1)
            acc2 = acc2 + jnp.dot(sk, wsk_ref[...],
                                  preferred_element_type=jnp.float32)
            o_ref[0] = acc2 + bias_ref[...]
        else:
            # Identity skip: add the raw input in f32 (bf16 xph only feeds the MXU).
            o_ref[0] = acc2 + bias_ref[...] + xid_ref[0]

    if proj_skip:
        def kernel(xph_ref, w1_ref, s1_ref, b1_ref, w2_ref, bias_ref, wsk_ref,
                   o_ref, xr_ref, hpad_ref):
            body(xph_ref, w1_ref, s1_ref, b1_ref, w2_ref, bias_ref,
                 wsk_ref, None, o_ref, xr_ref, hpad_ref)
    else:
        def kernel(xph_ref, w1_ref, s1_ref, b1_ref, w2_ref, bias_ref, xid_ref,
                   o_ref, xr_ref, hpad_ref):
            body(xph_ref, w1_ref, s1_ref, b1_ref, w2_ref, bias_ref,
                 None, xid_ref, o_ref, xr_ref, hpad_ref)
    return kernel


# ----------------------------------------------------------------------------
# BasicBlock forward (NHWC) wrapper: weight packing + phase split + pallas_call
# ----------------------------------------------------------------------------
def basic_block_forward_nhwc(x, params, stride, *, single_buffer_weights=True):
    n, h, w, cin = x.shape
    s = stride
    ho = (h - 1) // s + 1
    wo = (w - 1) // s + 1

    bp1, bp2 = params["branch1"], params["branch2"]
    cout = bp1["w1"].shape[-1]
    two_cout = 2 * cout
    proj_skip = "skip" in params

    # ---- weight packing / BN folding (trace-time glue, outside the kernel) ----
    # conv1: (3,3,cin,cout) -> (9,cin,cout); both branches packed along N.
    w1p = jnp.concatenate([bp1["w1"].reshape(9, cin, cout),
                           bp2["w1"].reshape(9, cin, cout)],
                          axis=-1).astype(jnp.bfloat16)              # (9, cin, 2*cout)
    s1c = jnp.concatenate([bp1["scale1"], bp2["scale1"]], axis=-1)   # (1, 2*cout) f32
    b1c = jnp.concatenate([bp1["shift1"], bp2["shift1"]], axis=-1)

    # conv2: 0.5*BN2 scale folded into the weights, branches packed along K.
    w2a = bp1["w2"].reshape(9, cout, cout) * (0.5 * bp1["scale2"]).reshape(1, 1, cout)
    w2b = bp2["w2"].reshape(9, cout, cout) * (0.5 * bp2["scale2"]).reshape(1, 1, cout)
    w2p = jnp.concatenate([w2a, w2b], axis=1).astype(jnp.bfloat16)   # (9, 2*cout, cout)
    bias = 0.5 * (bp1["shift2"] + bp2["shift2"])                     # (1, cout) f32

    if proj_skip:
        sp = params["skip"]
        half = cout // 2
        wsk = jnp.zeros((2 * cin, cout), jnp.float32)
        wsk = wsk.at[:cin, :half].set(sp["w1"])      # relu(x) path  -> first half
        wsk = wsk.at[cin:, half:].set(sp["w2"])      # shifted path  -> second half
        wsk = (wsk * sp["scale"]).astype(jnp.bfloat16)        # fold skip-BN scale
        bias = bias + sp["shift"]                             # fold skip-BN shift

    # ---- zero-pad once, split into stride-phase sub-grids (no 9x replication),
    #      ship as bf16 (halves the input DMA; the MXU wants bf16 anyway).
    R = 2 // s + ho
    C = 2 // s + wo
    pad_b = max(s * R - h - 1, 0)
    pad_r = max(s * C - w - 1, 0)
    xpad = jnp.pad(x, ((0, 0), (1, pad_b), (1, pad_r), (0, 0)))
    phases = [xpad[:, py:py + (R - 1) * s + 1:s, px:px + (C - 1) * s + 1:s, :]
              for py in range(s) for px in range(s)]
    xph = jnp.stack(phases, axis=1).astype(jnp.bfloat16)      # (n, s*s, R, C, cin)

    # Grid-constant operands: single-buffer them (their index_map never changes,
    # so a second pipeline buffer is pure VMEM waste at real widths).
    def const_spec(shape):
        idx = lambda i: (0,) * len(shape)
        if single_buffer_weights:
            return pl.BlockSpec(shape, idx, pipeline_mode=pl.Buffered(1))
        return pl.BlockSpec(shape, idx)

    in_specs = [
        pl.BlockSpec((1, s * s, R, C, cin), lambda i: (i, 0, 0, 0, 0)),
        const_spec((9, cin, two_cout)),
        const_spec((1, two_cout)),
        const_spec((1, two_cout)),
        const_spec((9, two_cout, cout)),
        const_spec((1, cout)),
    ]
    args = [xph, w1p, s1c, b1c, w2p, bias]
    if proj_skip:
        in_specs.append(const_spec((2 * cin, cout)))
        args.append(wsk)
    else:
        # f32 identity-skip path (keeps the residual add full precision).
        in_specs.append(pl.BlockSpec((1, h * w, cin), lambda i: (i, 0, 0)))
        args.append(x.reshape(n, h * w, cin))

    kernel = _make_basic_block_kernel(s, ho, wo, cin, cout, proj_skip)

    # Output stays in the matmul-native (ho*wo, cout) layout (lane-dense whenever
    # cout >= 128, true at real ShakeShake widths); reshaped to NHWC outside.
    # TODO(synk): for large spatial sizes on v7x (64 MiB VMEM) add a second
    # "parallel" grid axis tiling ho into row strips (recompute a 1-row stage-1
    # halo per strip); pad cout up to a lane multiple for small-width blocks;
    # optional fp8 weights on v7x if accuracy validation passes.
    out = pl.pallas_call(
        kernel,
        out_shape=jax.ShapeDtypeStruct((n, ho * wo, cout), jnp.float32),
        grid=(n,),
        in_specs=in_specs,
        out_specs=pl.BlockSpec((1, ho * wo, cout), lambda i: (i, 0, 0)),
        scratch_shapes=[pltpu.VMEM((s * s, R, C, cin), jnp.bfloat16),        # relu'd input
                        pltpu.VMEM((ho + 2, wo + 2, two_cout), jnp.bfloat16)],  # conv2 pad
        compiler_params=pltpu.CompilerParams(
            dimension_semantics=("parallel",),        # independent batch -> 2 TCs on v7x
            vmem_limit_bytes=64 * 1024 * 1024),       # above 16/32 MiB scoped defaults
    )(*args)
    return out.reshape(n, ho, wo, cout)


def _run_block(x, params, stride):
    """Run the fused block; fall back to default weight double-buffering if this
    JAX/Mosaic build rejects pl.Buffered(1) for grid-constant operands."""
    last_err = None
    for sb in (True, False):
        try:
            fn = jax.jit(functools.partial(basic_block_forward_nhwc,
                                           stride=stride, single_buffer_weights=sb))
            return jax.block_until_ready(fn(x, params))
        except Exception as e:      # noqa: BLE001 - intentional capability fallback
            last_err = e
    raise last_err


# ----------------------------------------------------------------------------
# Deterministic parameter init (synthetic; folds eval-mode BatchNorm)
# ----------------------------------------------------------------------------
def _fold_bn(gamma, beta, mean, var):
    scale = gamma / jnp.sqrt(var + BN_EPS)
    shift = beta - mean * scale
    return scale.reshape(1, -1), shift.reshape(1, -1)


def _bn_params(key, c):
    k1, k2, k3, k4 = jax.random.split(key, 4)
    gamma = 1.0 + 0.1 * jax.random.normal(k1, (c,), jnp.float32)
    beta = 0.1 * jax.random.normal(k2, (c,), jnp.float32)
    mean = 0.1 * jax.random.normal(k3, (c,), jnp.float32)
    var = 1.0 + 0.5 * jax.random.uniform(k4, (c,), jnp.float32)
    return _fold_bn(gamma, beta, mean, var)


def init_params(key, cin, cout):
    ks = jax.random.split(key, 12)

    def branch(kw1, kb1, kw2, kb2):
        w1 = 0.1 * jax.random.normal(kw1, (3, 3, cin, cout), jnp.float32)   # HWIO
        w2 = 0.1 * jax.random.normal(kw2, (3, 3, cout, cout), jnp.float32)  # HWIO
        s1, sh1 = _bn_params(kb1, cout)
        s2, sh2 = _bn_params(kb2, cout)
        return {"w1": w1, "scale1": s1, "shift1": sh1,
                "w2": w2, "scale2": s2, "shift2": sh2}

    params = {
        "branch1": branch(ks[0], ks[1], ks[2], ks[3]),
        "branch2": branch(ks[4], ks[5], ks[6], ks[7]),
    }
    if cin != cout:
        ws1 = 0.1 * jax.random.normal(ks[8], (cin, cout // 2), jnp.float32)
        ws2 = 0.1 * jax.random.normal(ks[9], (cin, cout // 2), jnp.float32)
        ssc, ssh = _bn_params(ks[10], cout)
        params["skip"] = {"w1": ws1, "w2": ws2, "scale": ssc, "shift": ssh}
    return params


# ----------------------------------------------------------------------------
# Pure-JAX reference (uses lax.conv) for numerical verification
# ----------------------------------------------------------------------------
def ref_forward_nhwc(x, params, stride):
    def conv3x3(h, w, s):
        return lax.conv_general_dilated(
            h, w, (s, s), ((1, 1), (1, 1)),
            dimension_numbers=("NHWC", "HWIO", "NHWC"))

    def affine(h, scale, shift):
        return h * scale.reshape(1, 1, 1, -1) + shift.reshape(1, 1, 1, -1)

    def branch(bp):
        h = conv3x3(jax.nn.relu(x), bp["w1"], stride)
        h = affine(h, bp["scale1"], bp["shift1"])
        h = conv3x3(jax.nn.relu(h), bp["w2"], 1)
        return affine(h, bp["scale2"], bp["shift2"])

    x1 = branch(params["branch1"])
    x2 = branch(params["branch2"])
    out = 0.5 * x1 + 0.5 * x2
    if "skip" in params:
        sp = params["skip"]
        a = jax.nn.relu(x)[:, ::stride, ::stride, :]
        a = jnp.einsum("nhwc,cd->nhwd", a, sp["w1"])
        b = jnp.pad(x[:, 1:, 1:, :],
                    ((0, 0), (0, 1), (0, 1), (0, 0)))[:, ::stride, ::stride, :]
        b = jnp.einsum("nhwc,cd->nhwd", b, sp["w2"])
        skip = affine(jnp.concatenate([a, b], axis=-1), sp["scale"], sp["shift"])
    else:
        skip = x
    return out + skip


if __name__ == "__main__":
    key = jax.random.PRNGKey(0)
    kx, kp, kx2, kp2 = jax.random.split(key, 4)

    # Case 1: BasicBlock(n_input_plane=4, n_output_plane=8, stride=2) -> projection skip
    N, C_IN, H, W = 2, 4, 16, 16
    C_OUT, STRIDE = 8, 2
    x_nchw = jax.random.normal(kx, (N, C_IN, H, W), jnp.float32)
    x = jnp.transpose(x_nchw, (0, 2, 3, 1))            # NCHW -> NHWC
    params = init_params(kp, C_IN, C_OUT)

    out = jnp.transpose(_run_block(x, params, STRIDE), (0, 3, 1, 2))   # -> NCHW
    ref = jnp.transpose(ref_forward_nhwc(x, params, STRIDE), (0, 3, 1, 2))
    # bf16 MXU operands in the Pallas path -> slightly relaxed tolerance.
    np.testing.assert_allclose(np.asarray(out), np.asarray(ref), atol=2e-2, rtol=2e-2)

    # Case 2: BasicBlock(n_input_plane=8, n_output_plane=8, stride=1) -> identity skip
    x2_nchw = jax.random.normal(kx2, (N, C_OUT, H, W), jnp.float32)
    x2 = jnp.transpose(x2_nchw, (0, 2, 3, 1))
    params2 = init_params(kp2, C_OUT, C_OUT)

    out2 = jnp.transpose(_run_block(x2, params2, 1), (0, 3, 1, 2))
    ref2 = jnp.transpose(ref_forward_nhwc(x2, params2, 1), (0, 3, 1, 2))
    np.testing.assert_allclose(np.asarray(out2), np.asarray(ref2), atol=2e-2, rtol=2e-2)

    print("KERNEL_OK")
</pallas_src>

<mosaic_0001>
module attributes {stable_mosaic.version = 11 : i64} {
  func.func @kernel(%arg0: i32, %arg1: memref<1x4x9x9x4xbf16, #tpu.memory_space<vmem>>, %arg2: memref<9x4x16xbf16, #tpu.memory_space<vmem>>, %arg3: memref<1x16xf32, #tpu.memory_space<vmem>>, %arg4: memref<1x16xf32, #tpu.memory_space<vmem>>, %arg5: memref<9x16x8xbf16, #tpu.memory_space<vmem>>, %arg6: memref<1x8xf32, #tpu.memory_space<vmem>>, %arg7: memref<8x8xbf16, #tpu.memory_space<vmem>>, %arg8: memref<1x64x8xf32, #tpu.memory_space<vmem>>, %arg9: memref<4x9x9x4xbf16, #tpu.memory_space<vmem>>, %arg10: memref<10x10x16xbf16, #tpu.memory_space<vmem>>) attributes {dimension_semantics = [#tpu.dimension_semantics<parallel>], iteration_bounds = array<i64: 2>, scalar_prefetch = 0 : i64, scratch_operands = 2 : i64, tpu.core_type = #tpu.core_type<tc>, window_params = [{transform_indices = @transform_0, window_bounds = array<i64: 1, 4, 9, 9, 4>}, {pipeline_mode = #tpu.pipeline_mode<synchronous>, transform_indices = @transform_1, window_bounds = array<i64: 9, 4, 16>}, {pipeline_mode = #tpu.pipeline_mode<synchronous>, transform_indices = @transform_2, window_bounds = array<i64: 1, 16>}, {pipeline_mode = #tpu.pipeline_mode<synchronous>, transform_indices = @transform_3, window_bounds = array<i64: 1, 16>}, {pipeline_mode = #tpu.pipeline_mode<synchronous>, transform_indices = @transform_4, window_bounds = array<i64: 9, 16, 8>}, {pipeline_mode = #tpu.pipeline_mode<synchronous>, transform_indices = @transform_5, window_bounds = array<i64: 1, 8>}, {pipeline_mode = #tpu.pipeline_mode<synchronous>, transform_indices = @transform_6, window_bounds = array<i64: 8, 8>}, {transform_indices = @transform_7, window_bounds = array<i64: 1, 64, 8>}]} {
    %c0 = arith.constant 0 : index
    %c0_0 = arith.constant 0 : index
    %c0_1 = arith.constant 0 : index
    %c0_2 = arith.constant 0 : index
    %c0_3 = arith.constant 0 : index
    %0 = vector.load %arg1[%c0, %c0_0, %c0_1, %c0_2, %c0_3] : memref<1x4x9x9x4xbf16, #tpu.memory_space<vmem>>, vector<1x4x9x9x4xbf16>
    %1 = vector.shape_cast %0 : vector<1x4x9x9x4xbf16> to vector<4x9x9x4xbf16>
    %cst = arith.constant 0.000000e+00 : bf16
    %2 = vector.broadcast %cst : bf16 to vector<4x9x9x4xbf16>
    %3 = arith.maximumf %1, %2 : vector<4x9x9x4xbf16>
    %c0_4 = arith.constant 0 : index
    %c0_5 = arith.constant 0 : index
    %c0_6 = arith.constant 0 : index
    %c0_7 = arith.constant 0 : index
    %4 = vector.load %arg9[%c0_4, %c0_5, %c0_6, %c0_7] : memref<4x9x9x4xbf16, #tpu.memory_space<vmem>>, vector<4x9x9x4xbf16>
    tpu.vector_store %arg9[%c0_4, %c0_5, %c0_6, %c0_7], %3 {strides = array<i32>} : memref<4x9x9x4xbf16, #tpu.memory_space<vmem>>, vector<4x9x9x4xbf16>,
    %cst_8 = arith.constant 0.000000e+00 : f32
    %5 = vector.broadcast %cst_8 : f32 to vector<64x16xf32>
    %c0_9 = arith.constant 0 : index
    %c0_10 = arith.constant 0 : index
    %c0_11 = arith.constant 0 : index
    %c0_12 = arith.constant 0 : index
    %6 = vector.load %arg9[%c0_9, %c0_10, %c0_11, %c0_12] : memref<4x9x9x4xbf16, #tpu.memory_space<vmem>>, vector<1x8x8x4xbf16>
    %7 = vector.shape_cast %6 : vector<1x8x8x4xbf16> to vector<8x8x4xbf16>
    %8 = vector.shape_cast %7 : vector<8x8x4xbf16> to vector<64x4xbf16>
    %c0_13 = arith.constant 0 : index
    %c0_14 = arith.constant 0 : index
    %c0_15 = arith.constant 0 : index
    %9 = vector.load %arg2[%c0_13, %c0_14, %c0_15] : memref<9x4x16xbf16, #tpu.memory_space<vmem>>, vector<1x4x16xbf16>
    %10 = vector.shape_cast %9 : vector<1x4x16xbf16> to vector<4x16xbf16>
    %cst_16 = arith.constant dense<0.000000e+00> : vector<64x16xf32>
    %11 = tpu.matmul %8, %10, %cst_16 {dimension_numbers = #tpu.dot_dimension_numbers<[1], [0], [0], [1], [0, 0, 1, 1], [], []>} : vector<64x4xbf16>, vector<4x16xbf16>, vector<64x16xf32> -> vector<64x16xf32>
    %12 = arith.addf %5, %11 : vector<64x16xf32>
    %c1 = arith.constant 1 : index
    %c0_17 = arith.constant 0 : index
    %c0_18 = arith.constant 0 : index
    %c0_19 = arith.constant 0 : index
    %13 = vector.load %arg9[%c1, %c0_17, %c0_18, %c0_19] : memref<4x9x9x4xbf16, #tpu.memory_space<vmem>>, vector<1x8x8x4xbf16>
    %14 = vector.shape_cast %13 : vector<1x8x8x4xbf16> to vector<8x8x4xbf16>
    %15 = vector.shape_cast %14 : vector<8x8x4xbf16> to vector<64x4xbf16>
    %c1_20 = arith.constant 1 : index
    %c0_21 = arith.constant 0 : index
    %c0_22 = arith.constant 0 : index
    %16 = vector.load %arg2[%c1_20, %c0_21, %c0_22] : memref<9x4x16xbf16, #tpu.memory_space<vmem>>, vector<1x4x16xbf16>
    %17 = vector.shape_cast %16 : vector<1x4x16xbf16> to vector<4x16xbf16>
    %cst_23 = arith.constant dense<0.000000e+00> : vector<64x16xf32>
    %18 = tpu.matmul %15, %17, %cst_23 {dimension_numbers = #tpu.dot_dimension_numbers<[1], [0], [0], [1], [0, 0, 1, 1], [], []>} : vector<64x4xbf16>, vector<4x16xbf16>, vector<64x16xf32> -> vector<64x16xf32>
    %19 = arith.addf %12, %18 : vector<64x16xf32>
    %c0_24 = arith.constant 0 : index
    %c0_25 = arith.constant 0 : index
    %c1_26 = arith.constant 1 : index
    %c0_27 = arith.constant 0 : index
    %20 = vector.load %arg9[%c0_24, %c0_25, %c1_26, %c0_27] : memref<4x9x9x4xbf16, #tpu.memory_space<vmem>>, vector<1x8x8x4xbf16>
    %21 = vector.shape_cast %20 : vector<1x8x8x4xbf16> to vector<8x8x4xbf16>
    %22 = vector.shape_cast %21 : vector<8x8x4xbf16> to vector<64x4xbf16>
    %c2 = arith.constant 2 : index
    %c0_28 = arith.constant 0 : index
    %c0_29 = arith.constant 0 : index
    %23 = vector.load %arg2[%c2, %c0_28, %c0_29] : memref<9x4x16xbf16, #tpu.memory_space<vmem>>, vector<1x4x16xbf16>
    %24 = vector.shape_cast %23 : vector<1x4x16xbf16> to vector<4x16xbf16>
    %cst_30 = arith.constant dense<0.000000e+00> : vector<64x16xf32>
    %25 = tpu.matmul %22, %24, %cst_30 {dimension_numbers = #tpu.dot_dimension_numbers<[1], [0], [0], [1], [0, 0, 1, 1], [], []>} : vector<64x4xbf16>, vector<4x16xbf16>, vector<64x16xf32> -> vector<64x16xf32>
    %26 = arith.addf %19, %25 : vector<64x16xf32>
    %c2_31 = arith.constant 2 : index
    %c0_32 = arith.constant 0 : index
    %c0_33 = arith.constant 0 : index
    %c0_34 = arith.constant 0 : index
    %27 = vector.load %arg9[%c2_31, %c0_32, %c0_33, %c0_34] : memref<4x9x9x4xbf16, #tpu.memory_space<vmem>>, vector<1x8x8x4xbf16>
    %28 = vector.shape_cast %27 : vector<1x8x8x4xbf16> to vector<8x8x4xbf16>
    %29 = vector.shape_cast %28 : vector<8x8x4xbf16> to vector<64x4xbf16>
    %c3 = arith.constant 3 : index
    %c0_35 = arith.constant 0 : index
    %c0_36 = arith.constant 0 : index
    %30 = vector.load %arg2[%c3, %c0_35, %c0_36] : memref<9x4x16xbf16, #tpu.memory_space<vmem>>, vector<1x4x16xbf16>
    %31 = vector.shape_cast %30 : vector<1x4x16xbf16> to vector<4x16xbf16>
    %cst_37 = arith.constant dense<0.000000e+00> : vector<64x16xf32>
    %32 = tpu.matmul %29, %31, %cst_37 {dimension_numbers = #tpu.dot_dimension_numbers<[1], [0], [0], [1], [0, 0, 1, 1], [], []>} : vector<64x4xbf16>, vector<4x16xbf16>, vector<64x16xf32> -> vector<64x16xf32>
    %33 = arith.addf %26, %32 : vector<64x16xf32>
    %c3_38 = arith.constant 3 : index
    %c0_39 = arith.constant 0 : index
    %c0_40 = arith.constant 0 : index
    %c0_41 = arith.constant 0 : index
    %34 = vector.load %arg9[%c3_38, %c0_39, %c0_40, %c0_41] : memref<4x9x9x4xbf16, #tpu.memory_space<vmem>>, vector<1x8x8x4xbf16>
    %35 = vector.shape_cast %34 : vector<1x8x8x4xbf16> to vector<8x8x4xbf16>
    %36 = vector.shape_cast %35 : vector<8x8x4xbf16> to vector<64x4xbf16>
    %c4 = arith.constant 4 : index
    %c0_42 = arith.constant 0 : index
    %c0_43 = arith.constant 0 : index
    %37 = vector.load %arg2[%c4, %c0_42, %c0_43] : memref<9x4x16xbf16, #tpu.memory_space<vmem>>, vector<1x4x16xbf16>
    %38 = vector.shape_cast %37 : vector<1x4x16xbf16> to vector<4x16xbf16>
    %cst_44 = arith.constant dense<0.000000e+00> : vector<64x16xf32>
    %39 = tpu.matmul %36, %38, %cst_44 {dimension_numbers = #tpu.dot_dimension_numbers<[1], [0], [0], [1], [0, 0, 1, 1], [], []>} : vector<64x4xbf16>, vector<4x16xbf16>, vector<64x16xf32> -> vector<64x16xf32>
    %40 = arith.addf %33, %39 : vector<64x16xf32>
    %c2_45 = arith.constant 2 : index
    %c0_46 = arith.constant 0 : index
    %c1_47 = arith.constant 1 : index
    %c0_48 = arith.constant 0 : index
    %41 = vector.load %arg9[%c2_45, %c0_46, %c1_47, %c0_48] : memref<4x9x9x4xbf16, #tpu.memory_space<vmem>>, vector<1x8x8x4xbf16>
    %42 = vector.shape_cast %41 : vector<1x8x8x4xbf16> to vector<8x8x4xbf16>
    %43 = vector.shape_cast %42 : vector<8x8x4xbf16> to vector<64x4xbf16>
    %c5 = arith.constant 5 : index
    %c0_49 = arith.constant 0 : index
    %c0_50 = arith.constant 0 : index
    %44 = vector.load %arg2[%c5, %c0_49, %c0_50] : memref<9x4x16xbf16, #tpu.memory_space<vmem>>, vector<1x4x16xbf16>
    %45 = vector.shape_cast %44 : vector<1x4x16xbf16> to vector<4x16xbf16>
    %cst_51 = arith.constant dense<0.000000e+00> : vector<64x16xf32>
    %46 = tpu.matmul %43, %45, %cst_51 {dimension_numbers = #tpu.dot_dimension_numbers<[1], [0], [0], [1], [0, 0, 1, 1], [], []>} : vector<64x4xbf16>, vector<4x16xbf16>, vector<64x16xf32> -> vector<64x16xf32>
    %47 = arith.addf %40, %46 : vector<64x16xf32>
    %c0_52 = arith.constant 0 : index
    %c1_53 = arith.constant 1 : index
    %c0_54 = arith.constant 0 : index
    %c0_55 = arith.constant 0 : index
    %48 = vector.load %arg9[%c0_52, %c1_53, %c0_54, %c0_55] : memref<4x9x9x4xbf16, #tpu.memory_space<vmem>>, vector<1x8x8x4xbf16>
    %49 = vector.shape_cast %48 : vector<1x8x8x4xbf16> to vector<8x8x4xbf16>
    %50 = vector.shape_cast %49 : vector<8x8x4xbf16> to vector<64x4xbf16>
    %c6 = arith.constant 6 : index
    %c0_56 = arith.constant 0 : index
    %c0_57 = arith.constant 0 : index
    %51 = vector.load %arg2[%c6, %c0_56, %c0_57] : memref<9x4x16xbf16, #tpu.memory_space<vmem>>, vector<1x4x16xbf16>
    %52 = vector.shape_cast %51 : vector<1x4x16xbf16> to vector<4x16xbf16>
    %cst_58 = arith.constant dense<0.000000e+00> : vector<64x16xf32>
    %53 = tpu.matmul %50, %52, %cst_58 {dimension_numbers = #tpu.dot_dimension_numbers<[1], [0], [0], [1], [0, 0, 1, 1], [], []>} : vector<64x4xbf16>, vector<4x16xbf16>, vector<64x16xf32> -> vector<64x16xf32>
    %54 = arith.addf %47, %53 : vector<64x16xf32>
    %c1_59 = arith.constant 1 : index
    %c1_60 = arith.constant 1 : index
    %c0_61 = arith.constant 0 : index
    %c0_62 = arith.constant 0 : index
    %55 = vector.load %arg9[%c1_59, %c1_60, %c0_61, %c0_62] : memref<4x9x9x4xbf16, #tpu.memory_space<vmem>>, vector<1x8x8x4xbf16>
    %56 = vector.shape_cast %55 : vector<1x8x8x4xbf16> to vector<8x8x4xbf16>
    %57 = vector.shape_cast %56 : vector<8x8x4xbf16> to vector<64x4xbf16>
    %c7 = arith.constant 7 : index
    %c0_63 = arith.constant 0 : index
    %c0_64 = arith.constant 0 : index
    %58 = vector.load %arg2[%c7, %c0_63, %c0_64] : memref<9x4x16xbf16, #tpu.memory_space<vmem>>, vector<1x4x16xbf16>
    %59 = vector.shape_cast %58 : vector<1x4x16xbf16> to vector<4x16xbf16>
    %cst_65 = arith.constant dense<0.000000e+00> : vector<64x16xf32>
    %60 = tpu.matmul %57, %59, %cst_65 {dimension_numbers = #tpu.dot_dimension_numbers<[1], [0], [0], [1], [0, 0, 1, 1], [], []>} : vector<64x4xbf16>, vector<4x16xbf16>, vector<64x16xf32> -> vector<64x16xf32>
    %61 = arith.addf %54, %60 : vector<64x16xf32>
    %c0_66 = arith.constant 0 : index
    %c1_67 = arith.constant 1 : index
    %c1_68 = arith.constant 1 : index
    %c0_69 = arith.constant 0 : index
    %62 = vector.load %arg9[%c0_66, %c1_67, %c1_68, %c0_69] : memref<4x9x9x4xbf16, #tpu.memory_space<vmem>>, vector<1x8x8x4xbf16>
    %63 = vector.shape_cast %62 : vector<1x8x8x4xbf16> to vector<8x8x4xbf16>
    %64 = vector.shape_cast %63 : vector<8x8x4xbf16> to vector<64x4xbf16>
    %c8 = arith.constant 8 : index
    %c0_70 = arith.constant 0 : index
    %c0_71 = arith.constant 0 : index
    %65 = vector.load %arg2[%c8, %c0_70, %c0_71] : memref<9x4x16xbf16, #tpu.memory_space<vmem>>, vector<1x4x16xbf16>
    %66 = vector.shape_cast %65 : vector<1x4x16xbf16> to vector<4x16xbf16>
    %cst_72 = arith.constant dense<0.000000e+00> : vector<64x16xf32>
    %67 = tpu.matmul %64, %66, %cst_72 {dimension_numbers = #tpu.dot_dimension_numbers<[1], [0], [0], [1], [0, 0, 1, 1], [], []>} : vector<64x4xbf16>, vector<4x16xbf16>, vector<64x16xf32> -> vector<64x16xf32>
    %68 = arith.addf %61, %67 : vector<64x16xf32>
    %c0_73 = arith.constant 0 : index
    %c0_74 = arith.constant 0 : index
    %69 = vector.load %arg3[%c0_73, %c0_74] : memref<1x16xf32, #tpu.memory_space<vmem>>, vector<1x16xf32>
    %70 = vector.broadcast %69 : vector<1x16xf32> to vector<64x16xf32>
    %71 = arith.mulf %68, %70 : vector<64x16xf32>
    %c0_75 = arith.constant 0 : index
    %c0_76 = arith.constant 0 : index
    %72 = vector.load %arg4[%c0_75, %c0_76] : memref<1x16xf32, #tpu.memory_space<vmem>>, vector<1x16xf32>
    %73 = vector.broadcast %72 : vector<1x16xf32> to vector<64x16xf32>
    %74 = arith.addf %71, %73 : vector<64x16xf32>
    %cst_77 = arith.constant 0.000000e+00 : f32
    %75 = vector.broadcast %cst_77 : f32 to vector<64x16xf32>
    %76 = arith.maximumf %74, %75 : vector<64x16xf32>
    %cst_78 = arith.constant 0.000000e+00 : bf16
    %77 = vector.broadcast %cst_78 : bf16 to vector<8x1x16xbf16>
    %78 = arith.truncf %76 : vector<64x16xf32> to vector<64x16xbf16>
    %79 = vector.shape_cast %78 : vector<64x16xbf16> to vector<8x8x16xbf16>
    %80 = tpu.concatenate %77, %79, %77 in 1 : vector<8x1x16xbf16>, vector<8x8x16xbf16>, vector<8x1x16xbf16> -> vector<8x10x16xbf16>
    %c1_79 = arith.constant 1 : index
    %c0_80 = arith.constant 0 : index
    %c0_81 = arith.constant 0 : index
    %81 = vector.load %arg10[%c1_79, %c0_80, %c0_81] : memref<10x10x16xbf16, #tpu.memory_space<vmem>>, vector<8x10x16xbf16>
    tpu.vector_store %arg10[%c1_79, %c0_80, %c0_81], %80 {strides = array<i32>} : memref<10x10x16xbf16, #tpu.memory_space<vmem>>, vector<8x10x16xbf16>,
    %cst_82 = arith.constant 0.000000e+00 : bf16
    %82 = vector.broadcast %cst_82 : bf16 to vector<1x10x16xbf16>
    %c0_83 = arith.constant 0 : index
    %c0_84 = arith.constant 0 : index
    %c0_85 = arith.constant 0 : index
    %83 = vector.load %arg10[%c0_83, %c0_84, %c0_85] : memref<10x10x16xbf16, #tpu.memory_space<vmem>>, vector<1x10x16xbf16>
    tpu.vector_store %arg10[%c0_83, %c0_84, %c0_85], %82 {strides = array<i32>} : memref<10x10x16xbf16, #tpu.memory_space<vmem>>, vector<1x10x16xbf16>,
    %c9 = arith.constant 9 : index
    %c0_86 = arith.constant 0 : index
    %c0_87 = arith.constant 0 : index
    %84 = vector.load %arg10[%c9, %c0_86, %c0_87] : memref<10x10x16xbf16, #tpu.memory_space<vmem>>, vector<1x10x16xbf16>
    tpu.vector_store %arg10[%c9, %c0_86, %c0_87], %82 {strides = array<i32>} : memref<10x10x16xbf16, #tpu.memory_space<vmem>>, vector<1x10x16xbf16>,
    %cst_88 = arith.constant 0.000000e+00 : f32
    %85 = vector.broadcast %cst_88 : f32 to vector<64x8xf32>
    %c0_89 = arith.constant 0 : index
    %c0_90 = arith.constant 0 : index
    %c0_91 = arith.constant 0 : index
    %86 = vector.load %arg10[%c0_89, %c0_90, %c0_91] : memref<10x10x16xbf16, #tpu.memory_space<vmem>>, vector<8x8x16xbf16>
    %87 = vector.shape_cast %86 : vector<8x8x16xbf16> to vector<64x16xbf16>
    %c0_92 = arith.constant 0 : index
    %c0_93 = arith.constant 0 : index
    %c0_94 = arith.constant 0 : index
    %88 = vector.load %arg5[%c0_92, %c0_93, %c0_94] : memref<9x16x8xbf16, #tpu.memory_space<vmem>>, vector<1x16x8xbf16>
    %89 = vector.shape_cast %88 : vector<1x16x8xbf16> to vector<16x8xbf16>
    %cst_95 = arith.constant dense<0.000000e+00> : vector<64x8xf32>
    %90 = tpu.matmul %87, %89, %cst_95 {dimension_numbers = #tpu.dot_dimension_numbers<[1], [0], [0], [1], [0, 0, 1, 1], [], []>} : vector<64x16xbf16>, vector<16x8xbf16>, vector<64x8xf32> -> vector<64x8xf32>
    %91 = arith.addf %85, %90 : vector<64x8xf32>
    %c0_96 = arith.constant 0 : index
    %c1_97 = arith.constant 1 : index
    %c0_98 = arith.constant 0 : index
    %92 = vector.load %arg10[%c0_96, %c1_97, %c0_98] : memref<10x10x16xbf16, #tpu.memory_space<vmem>>, vector<8x8x16xbf16>
    %93 = vector.shape_cast %92 : vector<8x8x16xbf16> to vector<64x16xbf16>
    %c1_99 = arith.constant 1 : index
    %c0_100 = arith.constant 0 : index
    %c0_101 = arith.constant 0 : index
    %94 = vector.load %arg5[%c1_99, %c0_100, %c0_101] : memref<9x16x8xbf16, #tpu.memory_space<vmem>>, vector<1x16x8xbf16>
    %95 = vector.shape_cast %94 : vector<1x16x8xbf16> to vector<16x8xbf16>
    %cst_102 = arith.constant dense<0.000000e+00> : vector<64x8xf32>
    %96 = tpu.matmul %93, %95, %cst_102 {dimension_numbers = #tpu.dot_dimension_numbers<[1], [0], [0], [1], [0, 0, 1, 1], [], []>} : vector<64x16xbf16>, vector<16x8xbf16>, vector<64x8xf32> -> vector<64x8xf32>
    %97 = arith.addf %91, %96 : vector<64x8xf32>
    %c0_103 = arith.constant 0 : index
    %c2_104 = arith.constant 2 : index
    %c0_105 = arith.constant 0 : index
    %98 = vector.load %arg10[%c0_103, %c2_104, %c0_105] : memref<10x10x16xbf16, #tpu.memory_space<vmem>>, vector<8x8x16xbf16>
    %99 = vector.shape_cast %98 : vector<8x8x16xbf16> to vector<64x16xbf16>
    %c2_106 = arith.constant 2 : index
    %c0_107 = arith.constant 0 : index
    %c0_108 = arith.constant 0 : index
    %100 = vector.load %arg5[%c2_106, %c0_107, %c0_108] : memref<9x16x8xbf16, #tpu.memory_space<vmem>>, vector<1x16x8xbf16>
    %101 = vector.shape_cast %100 : vector<1x16x8xbf16> to vector<16x8xbf16>
    %cst_109 = arith.constant dense<0.000000e+00> : vector<64x8xf32>
    %102 = tpu.matmul %99, %101, %cst_109 {dimension_numbers = #tpu.dot_dimension_numbers<[1], [0], [0], [1], [0, 0, 1, 1], [], []>} : vector<64x16xbf16>, vector<16x8xbf16>, vector<64x8xf32> -> vector<64x8xf32>
    %103 = arith.addf %97, %102 : vector<64x8xf32>
    %c1_110 = arith.constant 1 : index
    %c0_111 = arith.constant 0 : index
    %c0_112 = arith.constant 0 : index
    %104 = vector.load %arg10[%c1_110, %c0_111, %c0_112] : memref<10x10x16xbf16, #tpu.memory_space<vmem>>, vector<8x8x16xbf16>
    %105 = vector.shape_cast %104 : vector<8x8x16xbf16> to vector<64x16xbf16>
    %c3_113 = arith.constant 3 : index
    %c0_114 = arith.constant 0 : index
    %c0_115 = arith.constant 0 : index
    %106 = vector.load %arg5[%c3_113, %c0_114, %c0_115] : memref<9x16x8xbf16, #tpu.memory_space<vmem>>, vector<1x16x8xbf16>
    %107 = vector.shape_cast %106 : vector<1x16x8xbf16> to vector<16x8xbf16>
    %cst_116 = arith.constant dense<0.000000e+00> : vector<64x8xf32>
    %108 = tpu.matmul %105, %107, %cst_116 {dimension_numbers = #tpu.dot_dimension_numbers<[1], [0], [0], [1], [0, 0, 1, 1], [], []>} : vector<64x16xbf16>, vector<16x8xbf16>, vector<64x8xf32> -> vector<64x8xf32>
    %109 = arith.addf %103, %108 : vector<64x8xf32>
    %c1_117 = arith.constant 1 : index
    %c1_118 = arith.constant 1 : index
    %c0_119 = arith.constant 0 : index
    %110 = vector.load %arg10[%c1_117, %c1_118, %c0_119] : memref<10x10x16xbf16, #tpu.memory_space<vmem>>, vector<8x8x16xbf16>
    %111 = vector.shape_cast %110 : vector<8x8x16xbf16> to vector<64x16xbf16>
    %c4_120 = arith.constant 4 : index
    %c0_121 = arith.constant 0 : index
    %c0_122 = arith.constant 0 : index
    %112 = vector.load %arg5[%c4_120, %c0_121, %c0_122] : memref<9x16x8xbf16, #tpu.memory_space<vmem>>, vector<1x16x8xbf16>
    %113 = vector.shape_cast %112 : vector<1x16x8xbf16> to vector<16x8xbf16>
    %cst_123 = arith.constant dense<0.000000e+00> : vector<64x8xf32>
    %114 = tpu.matmul %111, %113, %cst_123 {dimension_numbers = #tpu.dot_dimension_numbers<[1], [0], [0], [1], [0, 0, 1, 1], [], []>} : vector<64x16xbf16>, vector<16x8xbf16>, vector<64x8xf32> -> vector<64x8xf32>
    %115 = arith.addf %109, %114 : vector<64x8xf32>
    %c1_124 = arith.constant 1 : index
    %c2_125 = arith.constant 2 : index
    %c0_126 = arith.constant 0 : index
    %116 = vector.load %arg10[%c1_124, %c2_125, %c0_126] : memref<10x10x16xbf16, #tpu.memory_space<vmem>>, vector<8x8x16xbf16>
    %117 = vector.shape_cast %116 : vector<8x8x16xbf16> to vector<64x16xbf16>
    %c5_127 = arith.constant 5 : index
    %c0_128 = arith.constant 0 : index
    %c0_129 = arith.constant 0 : index
    %118 = vector.load %arg5[%c5_127, %c0_128, %c0_129] : memref<9x16x8xbf16, #tpu.memory_space<vmem>>, vector<1x16x8xbf16>
    %119 = vector.shape_cast %118 : vector<1x16x8xbf16> to vector<16x8xbf16>
    %cst_130 = arith.constant dense<0.000000e+00> : vector<64x8xf32>
    %120 = tpu.matmul %117, %119, %cst_130 {dimension_numbers = #tpu.dot_dimension_numbers<[1], [0], [0], [1], [0, 0, 1, 1], [], []>} : vector<64x16xbf16>, vector<16x8xbf16>, vector<64x8xf32> -> vector<64x8xf32>
    %121 = arith.addf %115, %120 : vector<64x8xf32>
    %c2_131 = arith.constant 2 : index
    %c0_132 = arith.constant 0 : index
    %c0_133 = arith.constant 0 : index
    %122 = vector.load %arg10[%c2_131, %c0_132, %c0_133] : memref<10x10x16xbf16, #tpu.memory_space<vmem>>, vector<8x8x16xbf16>
    %123 = vector.shape_cast %122 : vector<8x8x16xbf16> to vector<64x16xbf16>
    %c6_134 = arith.constant 6 : index
    %c0_135 = arith.constant 0 : index
    %c0_136 = arith.constant 0 : index
    %124 = vector.load %arg5[%c6_134, %c0_135, %c0_136] : memref<9x16x8xbf16, #tpu.memory_space<vmem>>, vector<1x16x8xbf16>
    %125 = vector.shape_cast %124 : vector<1x16x8xbf16> to vector<16x8xbf16>
    %cst_137 = arith.constant dense<0.000000e+00> : vector<64x8xf32>
    %126 = tpu.matmul %123, %125, %cst_137 {dimension_numbers = #tpu.dot_dimension_numbers<[1], [0], [0], [1], [0, 0, 1, 1], [], []>} : vector<64x16xbf16>, vector<16x8xbf16>, vector<64x8xf32> -> vector<64x8xf32>
    %127 = arith.addf %121, %126 : vector<64x8xf32>
    %c2_138 = arith.constant 2 : index
    %c1_139 = arith.constant 1 : index
    %c0_140 = arith.constant 0 : index
    %128 = vector.load %arg10[%c2_138, %c1_139, %c0_140] : memref<10x10x16xbf16, #tpu.memory_space<vmem>>, vector<8x8x16xbf16>
    %129 = vector.shape_cast %128 : vector<8x8x16xbf16> to vector<64x16xbf16>
    %c7_141 = arith.constant 7 : index
    %c0_142 = arith.constant 0 : index
    %c0_143 = arith.constant 0 : index
    %130 = vector.load %arg5[%c7_141, %c0_142, %c0_143] : memref<9x16x8xbf16, #tpu.memory_space<vmem>>, vector<1x16x8xbf16>
    %131 = vector.shape_cast %130 : vector<1x16x8xbf16> to vector<16x8xbf16>
    %cst_144 = arith.constant dense<0.000000e+00> : vector<64x8xf32>
    %132 = tpu.matmul %129, %131, %cst_144 {dimension_numbers = #tpu.dot_dimension_numbers<[1], [0], [0], [1], [0, 0, 1, 1], [], []>} : vector<64x16xbf16>, vector<16x8xbf16>, vector<64x8xf32> -> vector<64x8xf32>
    %133 = arith.addf %127, %132 : vector<64x8xf32>
    %c2_145 = arith.constant 2 : index
    %c2_146 = arith.constant 2 : index
    %c0_147 = arith.constant 0 : index
    %134 = vector.load %arg10[%c2_145, %c2_146, %c0_147] : memref<10x10x16xbf16, #tpu.memory_space<vmem>>, vector<8x8x16xbf16>
    %135 = vector.shape_cast %134 : vector<8x8x16xbf16> to vector<64x16xbf16>
    %c8_148 = arith.constant 8 : index
    %c0_149 = arith.constant 0 : index
    %c0_150 = arith.constant 0 : index
    %136 = vector.load %arg5[%c8_148, %c0_149, %c0_150] : memref<9x16x8xbf16, #tpu.memory_space<vmem>>, vector<1x16x8xbf16>
    %137 = vector.shape_cast %136 : vector<1x16x8xbf16> to vector<16x8xbf16>
    %cst_151 = arith.constant dense<0.000000e+00> : vector<64x8xf32>
    %138 = tpu.matmul %135, %137, %cst_151 {dimension_numbers = #tpu.dot_dimension_numbers<[1], [0], [0], [1], [0, 0, 1, 1], [], []>} : vector<64x16xbf16>, vector<16x8xbf16>, vector<64x8xf32> -> vector<64x8xf32>
    %139 = arith.addf %133, %138 : vector<64x8xf32>
    %c3_152 = arith.constant 3 : index
    %c0_153 = arith.constant 0 : index
    %c0_154 = arith.constant 0 : index
    %c0_155 = arith.constant 0 : index
    %140 = vector.load %arg9[%c3_152, %c0_153, %c0_154, %c0_155] : memref<4x9x9x4xbf16, #tpu.memory_space<vmem>>, vector<1x8x8x4xbf16>
    %141 = vector.shape_cast %140 : vector<1x8x8x4xbf16> to vector<8x8x4xbf16>
    %142 = vector.shape_cast %141 : vector<8x8x4xbf16> to vector<64x4xbf16>
    %c0_156 = arith.constant 0 : index
    %c0_157 = arith.constant 0 : index
    %c1_158 = arith.constant 1 : index
    %c1_159 = arith.constant 1 : index
    %c0_160 = arith.constant 0 : index
    %143 = vector.load %arg1[%c0_156, %c0_157, %c1_158, %c1_159, %c0_160] : memref<1x4x9x9x4xbf16, #tpu.memory_space<vmem>>, vector<1x1x8x8x4xbf16>
    %144 = vector.shape_cast %143 : vector<1x1x8x8x4xbf16> to vector<8x8x4xbf16>
    %145 = vector.shape_cast %144 : vector<8x8x4xbf16> to vector<64x4xbf16>
    %146 = tpu.concatenate %142, %145 in 1 : vector<64x4xbf16>, vector<64x4xbf16> -> vector<64x8xbf16>
    %c0_161 = arith.constant 0 : index
    %c0_162 = arith.constant 0 : index
    %147 = vector.load %arg7[%c0_161, %c0_162] : memref<8x8xbf16, #tpu.memory_space<vmem>>, vector<8x8xbf16>
    %cst_163 = arith.constant dense<0.000000e+00> : vector<64x8xf32>
    %148 = tpu.matmul %146, %147, %cst_163 {dimension_numbers = #tpu.dot_dimension_numbers<[1], [0], [0], [1], [0, 0, 1, 1], [], []>} : vector<64x8xbf16>, vector<8x8xbf16>, vector<64x8xf32> -> vector<64x8xf32>
    %149 = arith.addf %139, %148 : vector<64x8xf32>
    %c0_164 = arith.constant 0 : index
    %c0_165 = arith.constant 0 : index
    %150 = vector.load %arg6[%c0_164, %c0_165] : memref<1x8xf32, #tpu.memory_space<vmem>>, vector<1x8xf32>
    %151 = vector.broadcast %150 : vector<1x8xf32> to vector<64x8xf32>
    %152 = arith.addf %149, %151 : vector<64x8xf32>
    %c0_166 = arith.constant 0 : index
    %c0_167 = arith.constant 0 : index
    %c0_168 = arith.constant 0 : index
    %153 = vector.load %arg8[%c0_166, %c0_167, %c0_168] : memref<1x64x8xf32, #tpu.memory_space<vmem>>, vector<1x64x8xf32>
    %154 = vector.shape_cast %153 : vector<1x64x8xf32> to vector<64x8xf32>
    %155 = vector.shape_cast %152 : vector<64x8xf32> to vector<1x64x8xf32>
    tpu.vector_store %arg8[%c0_166, %c0_167, %c0_168], %155 {strides = array<i32>} : memref<1x64x8xf32, #tpu.memory_space<vmem>>, vector<1x64x8xf32>,
    return
  }
  func.func @transform_0(%arg0: i32) -> (i32, i32, i32, i32, i32) {
    %c0_i32 = arith.constant 0 : i32
    %c0_i32_0 = arith.constant 0 : i32
    %c0_i32_1 = arith.constant 0 : i32
    %c0_i32_2 = arith.constant 0 : i32
    %c0_i32_3 = arith.constant 0 : i32
    return %arg0, %c0_i32, %c0_i32_0, %c0_i32_1, %c0_i32_2 : i32, i32, i32, i32, i32
  }
  func.func @transform_1(%arg0: i32) -> (i32, i32, i32) {
    %c0_i32 = arith.constant 0 : i32
    %c0_i32_0 = arith.constant 0 : i32
    %c0_i32_1 = arith.constant 0 : i32
    %c0_i32_2 = arith.constant 0 : i32
    return %c0_i32, %c0_i32_0, %c0_i32_1 : i32, i32, i32
  }
  func.func @transform_2(%arg0: i32) -> (i32, i32) {
    %c0_i32 = arith.constant 0 : i32
    %c0_i32_0 = arith.constant 0 : i32
    %c0_i32_1 = arith.constant 0 : i32
    return %c0_i32, %c0_i32_0 : i32, i32
  }
  func.func @transform_3(%arg0: i32) -> (i32, i32) {
    %c0_i32 = arith.constant 0 : i32
    %c0_i32_0 = arith.constant 0 : i32
    %c0_i32_1 = arith.constant 0 : i32
    return %c0_i32, %c0_i32_0 : i32, i32
  }
  func.func @transform_4(%arg0: i32) -> (i32, i32, i32) {
    %c0_i32 = arith.constant 0 : i32
    %c0_i32_0 = arith.constant 0 : i32
    %c0_i32_1 = arith.constant 0 : i32
    %c0_i32_2 = arith.constant 0 : i32
    return %c0_i32, %c0_i32_0, %c0_i32_1 : i32, i32, i32
  }
  func.func @transform_5(%arg0: i32) -> (i32, i32) {
    %c0_i32 = arith.constant 0 : i32
    %c0_i32_0 = arith.constant 0 : i32
    %c0_i32_1 = arith.constant 0 : i32
    return %c0_i32, %c0_i32_0 : i32, i32
  }
  func.func @transform_6(%arg0: i32) -> (i32, i32) {
    %c0_i32 = arith.constant 0 : i32
    %c0_i32_0 = arith.constant 0 : i32
    %c0_i32_1 = arith.constant 0 : i32
    return %c0_i32, %c0_i32_0 : i32, i32
  }
  func.func @transform_7(%arg0: i32) -> (i32, i32, i32) {
    %c0_i32 = arith.constant 0 : i32
    %c0_i32_0 = arith.constant 0 : i32
    %c0_i32_1 = arith.constant 0 : i32
    return %arg0, %c0_i32, %c0_i32_0 : i32, i32, i32
  }
}

module attributes {stable_mosaic.version = 11 : i64} {
  func.func @kernel(%arg0: i32, %arg1: memref<1x4x9x9x4xbf16, #tpu.memory_space<vmem>>, %arg2: memref<9x4x16xbf16, #tpu.memory_space<vmem>>, %arg3: memref<1x16xf32, #tpu.memory_space<vmem>>, %arg4: memref<1x16xf32, #tpu.memory_space<vmem>>, %arg5: memref<9x16x8xbf16, #tpu.memory_space<vmem>>, %arg6: memref<1x8xf32, #tpu.memory_space<vmem>>, %arg7: memref<8x8xbf16, #tpu.memory_space<vmem>>, %arg8: memref<1x64x8xf32, #tpu.memory_space<vmem>>, %arg9: memref<4x9x9x4xbf16, #tpu.memory_space<vmem>>, %arg10: memref<10x10x16xbf16, #tpu.memory_space<vmem>>) attributes {dimension_semantics = [#tpu.dimension_semantics<parallel>], iteration_bounds = array<i64: 2>, scalar_prefetch = 0 : i64, scratch_operands = 2 : i64, tpu.core_type = #tpu.core_type<tc>, window_params = [{transform_indices = @transform_0, window_bounds = array<i64: 1, 4, 9, 9, 4>}, {pipeline_mode = #tpu.pipeline_mode<synchronous>, transform_indices = @transform_1, window_bounds = array<i64: 9, 4, 16>}, {pipeline_mode = #tpu.pipeline_mode<synchronous>, transform_indices = @transform_2, window_bounds = array<i64: 1, 16>}, {pipeline_mode = #tpu.pipeline_mode<synchronous>, transform_indices = @transform_3, window_bounds = array<i64: 1, 16>}, {pipeline_mode = #tpu.pipeline_mode<synchronous>, transform_indices = @transform_4, window_bounds = array<i64: 9, 16, 8>}, {pipeline_mode = #tpu.pipeline_mode<synchronous>, transform_indices = @transform_5, window_bounds = array<i64: 1, 8>}, {pipeline_mode = #tpu.pipeline_mode<synchronous>, transform_indices = @transform_6, window_bounds = array<i64: 8, 8>}, {transform_indices = @transform_7, window_bounds = array<i64: 1, 64, 8>}]} {
    %c0 = arith.constant 0 : index
    %c0_0 = arith.constant 0 : index
    %c0_1 = arith.constant 0 : index
    %c0_2 = arith.constant 0 : index
    %c0_3 = arith.constant 0 : index
    %0 = vector.load %arg1[%c0, %c0_0, %c0_1, %c0_2, %c0_3] : memref<1x4x9x9x4xbf16, #tpu.memory_space<vmem>>, vector<1x4x9x9x4xbf16>
    %1 = vector.shape_cast %0 : vector<1x4x9x9x4xbf16> to vector<4x9x9x4xbf16>
    %cst = arith.constant 0.000000e+00 : bf16
    %2 = vector.broadcast %cst : bf16 to vector<4x9x9x4xbf16>
    %3 = arith.maximumf %1, %2 : vector<4x9x9x4xbf16>
    %c0_4 = arith.constant 0 : index
    %c0_5 = arith.constant 0 : index
    %c0_6 = arith.constant 0 : index
    %c0_7 = arith.constant 0 : index
    %4 = vector.load %arg9[%c0_4, %c0_5, %c0_6, %c0_7] : memref<4x9x9x4xbf16, #tpu.memory_space<vmem>>, vector<4x9x9x4xbf16>
    tpu.vector_store %arg9[%c0_4, %c0_5, %c0_6, %c0_7], %3 {strides = array<i32>} : memref<4x9x9x4xbf16, #tpu.memory_space<vmem>>, vector<4x9x9x4xbf16>,
    %cst_8 = arith.constant 0.000000e+00 : f32
    %5 = vector.broadcast %cst_8 : f32 to vector<64x16xf32>
    %c0_9 = arith.constant 0 : index
    %c0_10 = arith.constant 0 : index
    %c0_11 = arith.constant 0 : index
    %c0_12 = arith.constant 0 : index
    %6 = vector.load %arg9[%c0_9, %c0_10, %c0_11, %c0_12] : memref<4x9x9x4xbf16, #tpu.memory_space<vmem>>, vector<1x8x8x4xbf16>
    %7 = vector.shape_cast %6 : vector<1x8x8x4xbf16> to vector<8x8x4xbf16>
    %8 = vector.shape_cast %7 : vector<8x8x4xbf16> to vector<64x4xbf16>
    %c0_13 = arith.constant 0 : index
    %c0_14 = arith.constant 0 : index
    %c0_15 = arith.constant 0 : index
    %9 = vector.load %arg2[%c0_13, %c0_14, %c0_15] : memref<9x4x16xbf16, #tpu.memory_space<vmem>>, vector<1x4x16xbf16>
    %10 = vector.shape_cast %9 : vector<1x4x16xbf16> to vector<4x16xbf16>
    %cst_16 = arith.constant dense<0.000000e+00> : vector<64x16xf32>
    %11 = tpu.matmul %8, %10, %cst_16 {dimension_numbers = #tpu.dot_dimension_numbers<[1], [0], [0], [1], [0, 0, 1, 1], [], []>} : vector<64x4xbf16>, vector<4x16xbf16>, vector<64x16xf32> -> vector<64x16xf32>
    %12 = arith.addf %5, %11 : vector<64x16xf32>
    %c1 = arith.constant 1 : index
    %c0_17 = arith.constant 0 : index
    %c0_18 = arith.constant 0 : index
    %c0_19 = arith.constant 0 : index
    %13 = vector.load %arg9[%c1, %c0_17, %c0_18, %c0_19] : memref<4x9x9x4xbf16, #tpu.memory_space<vmem>>, vector<1x8x8x4xbf16>
    %14 = vector.shape_cast %13 : vector<1x8x8x4xbf16> to vector<8x8x4xbf16>
    %15 = vector.shape_cast %14 : vector<8x8x4xbf16> to vector<64x4xbf16>
    %c1_20 = arith.constant 1 : index
    %c0_21 = arith.constant 0 : index
    %c0_22 = arith.constant 0 : index
    %16 = vector.load %arg2[%c1_20, %c0_21, %c0_22] : memref<9x4x16xbf16, #tpu.memory_space<vmem>>, vector<1x4x16xbf16>
    %17 = vector.shape_cast %16 : vector<1x4x16xbf16> to vector<4x16xbf16>
    %cst_23 = arith.constant dense<0.000000e+00> : vector<64x16xf32>
    %18 = tpu.matmul %15, %17, %cst_23 {dimension_numbers = #tpu.dot_dimension_numbers<[1], [0], [0], [1], [0, 0, 1, 1], [], []>} : vector<64x4xbf16>, vector<4x16xbf16>, vector<64x16xf32> -> vector<64x16xf32>
    %19 = arith.addf %12, %18 : vector<64x16xf32>
    %c0_24 = arith.constant 0 : index
    %c0_25 = arith.constant 0 : index
    %c1_26 = arith.constant 1 : index
    %c0_27 = arith.constant 0 : index
    %20 = vector.load %arg9[%c0_24, %c0_25, %c1_26, %c0_27] : memref<4x9x9x4xbf16, #tpu.memory_space<vmem>>, vector<1x8x8x4xbf16>
    %21 = vector.shape_cast %20 : vector<1x8x8x4xbf16> to vector<8x8x4xbf16>
    %22 = vector.shape_cast %21 : vector<8x8x4xbf16> to vector<64x4xbf16>
    %c2 = arith.constant 2 : index
    %c0_28 = arith.constant 0 : index
    %c0_29 = arith.constant 0 : index
    %23 = vector.load %arg2[%c2, %c0_28, %c0_29] : memref<9x4x16xbf16, #tpu.memory_space<vmem>>, vector<1x4x16xbf16>
    %24 = vector.shape_cast %23 : vector<1x4x16xbf16> to vector<4x16xbf16>
    %cst_30 = arith.constant dense<0.000000e+00> : vector<64x16xf32>
    %25 = tpu.matmul %22, %24, %cst_30 {dimension_numbers = #tpu.dot_dimension_numbers<[1], [0], [0], [1], [0, 0, 1, 1], [], []>} : vector<64x4xbf16>, vector<4x16xbf16>, vector<64x16xf32> -> vector<64x16xf32>
    %26 = arith.addf %19, %25 : vector<64x16xf32>
    %c2_31 = arith.constant 2 : index
    %c0_32 = arith.constant 0 : index
    %c0_33 = arith.constant 0 : index
    %c0_34 = arith.constant 0 : index
    %27 = vector.load %arg9[%c2_31, %c0_32, %c0_33, %c0_34] : memref<4x9x9x4xbf16, #tpu.memory_space<vmem>>, vector<1x8x8x4xbf16>
    %28 = vector.shape_cast %27 : vector<1x8x8x4xbf16> to vector<8x8x4xbf16>
    %29 = vector.shape_cast %28 : vector<8x8x4xbf16> to vector<64x4xbf16>
    %c3 = arith.constant 3 : index
    %c0_35 = arith.constant 0 : index
    %c0_36 = arith.constant 0 : index
    %30 = vector.load %arg2[%c3, %c0_35, %c0_36] : memref<9x4x16xbf16, #tpu.memory_space<vmem>>, vector<1x4x16xbf16>
    %31 = vector.shape_cast %30 : vector<1x4x16xbf16> to vector<4x16xbf16>
    %cst_37 = arith.constant dense<0.000000e+00> : vector<64x16xf32>
    %32 = tpu.matmul %29, %31, %cst_37 {dimension_numbers = #tpu.dot_dimension_numbers<[1], [0], [0], [1], [0, 0, 1, 1], [], []>} : vector<64x4xbf16>, vector<4x16xbf16>, vector<64x16xf32> -> vector<64x16xf32>
    %33 = arith.addf %26, %32 : vector<64x16xf32>
    %c3_38 = arith.constant 3 : index
    %c0_39 = arith.constant 0 : index
    %c0_40 = arith.constant 0 : index
    %c0_41 = arith.constant 0 : index
    %34 = vector.load %arg9[%c3_38, %c0_39, %c0_40, %c0_41] : memref<4x9x9x4xbf16, #tpu.memory_space<vmem>>, vector<1x8x8x4xbf16>
    %35 = vector.shape_cast %34 : vector<1x8x8x4xbf16> to vector<8x8x4xbf16>
    %36 = vector.shape_cast %35 : vector<8x8x4xbf16> to vector<64x4xbf16>
    %c4 = arith.constant 4 : index
    %c0_42 = arith.constant 0 : index
    %c0_43 = arith.constant 0 : index
    %37 = vector.load %arg2[%c4, %c0_42, %c0_43] : memref<9x4x16xbf16, #tpu.memory_space<vmem>>, vector<1x4x16xbf16>
    %38 = vector.shape_cast %37 : vector<1x4x16xbf16> to vector<4x16xbf16>
    %cst_44 = arith.constant dense<0.000000e+00> : vector<64x16xf32>
    %39 = tpu.matmul %36, %38, %cst_44 {dimension_numbers = #tpu.dot_dimension_numbers<[1], [0], [0], [1], [0, 0, 1, 1], [], []>} : vector<64x4xbf16>, vector<4x16xbf16>, vector<64x16xf32> -> vector<64x16xf32>
    %40 = arith.addf %33, %39 : vector<64x16xf32>
    %c2_45 = arith.constant 2 : index
    %c0_46 = arith.constant 0 : index
    %c1_47 = arith.constant 1 : index
    %c0_48 = arith.constant 0 : index
    %41 = vector.load %arg9[%c2_45, %c0_46, %c1_47, %c0_48] : memref<4x9x9x4xbf16, #tpu.memory_space<vmem>>, vector<1x8x8x4xbf16>
    %42 = vector.shape_cast %41 : vector<1x8x8x4xbf16> to vector<8x8x4xbf16>
    %43 = vector.shape_cast %42 : vector<8x8x4xbf16> to vector<64x4xbf16>
    %c5 = arith.constant 5 : index
    %c0_49 = arith.constant 0 : index
    %c0_50 = arith.constant 0 : index
    %44 = vector.load %arg2[%c5, %c0_49, %c0_50] : memref<9x4x16xbf16, #tpu.memory_space<vmem>>, vector<1x4x16xbf16>
    %45 = vector.shape_cast %44 : vector<1x4x16xbf16> to vector<4x16xbf16>
    %cst_51 = arith.constant dense<0.000000e+00> : vector<64x16xf32>
    %46 = tpu.matmul %43, %45, %cst_51 {dimension_numbers = #tpu.dot_dimension_numbers<[1], [0], [0], [1], [0, 0, 1, 1], [], []>} : vector<64x4xbf16>, vector<4x16xbf16>, vector<64x16xf32> -> vector<64x16xf32>
    %47 = arith.addf %40, %46 : vector<64x16xf32>
    %c0_52 = arith.constant 0 : index
    %c1_53 = arith.constant 1 : index
    %c0_54 = arith.constant 0 : index
    %c0_55 = arith.constant 0 : index
    %48 = vector.load %arg9[%c0_52, %c1_53, %c0_54, %c0_55] : memref<4x9x9x4xbf16, #tpu.memory_space<vmem>>, vector<1x8x8x4xbf16>
    %49 = vector.shape_cast %48 : vector<1x8x8x4xbf16> to vector<8x8x4xbf16>
    %50 = vector.shape_cast %49 : vector<8x8x4xbf16> to vector<64x4xbf16>
    %c6 = arith.constant 6 : index
    %c0_56 = arith.constant 0 : index
    %c0_57 = arith.constant 0 : index
    %51 = vector.load %arg2[%c6, %c0_56, %c0_57] : memref<9x4x16xbf16, #tpu.memory_space<vmem>>, vector<1x4x16xbf16>
    %52 = vector.shape_cast %51 : vector<1x4x16xbf16> to vector<4x16xbf16>
    %cst_58 = arith.constant dense<0.000000e+00> : vector<64x16xf32>
    %53 = tpu.matmul %50, %52, %cst_58 {dimension_numbers = #tpu.dot_dimension_numbers<[1], [0], [0], [1], [0, 0, 1, 1], [], []>} : vector<64x4xbf16>, vector<4x16xbf16>, vector<64x16xf32> -> vector<64x16xf32>
    %54 = arith.addf %47, %53 : vector<64x16xf32>
    %c1_59 = arith.constant 1 : index
    %c1_60 = arith.constant 1 : index
    %c0_61 = arith.constant 0 : index
    %c0_62 = arith.constant 0 : index
    %55 = vector.load %arg9[%c1_59, %c1_60, %c0_61, %c0_62] : memref<4x9x9x4xbf16, #tpu.memory_space<vmem>>, vector<1x8x8x4xbf16>
    %56 = vector.shape_cast %55 : vector<1x8x8x4xbf16> to vector<8x8x4xbf16>
    %57 = vector.shape_cast %56 : vector<8x8x4xbf16> to vector<64x4xbf16>
    %c7 = arith.constant 7 : index
    %c0_63 = arith.constant 0 : index
    %c0_64 = arith.constant 0 : index
    %58 = vector.load %arg2[%c7, %c0_63, %c0_64] : memref<9x4x16xbf16, #tpu.memory_space<vmem>>, vector<1x4x16xbf16>
    %59 = vector.shape_cast %58 : vector<1x4x16xbf16> to vector<4x16xbf16>
    %cst_65 = arith.constant dense<0.000000e+00> : vector<64x16xf32>
    %60 = tpu.matmul %57, %59, %cst_65 {dimension_numbers = #tpu.dot_dimension_numbers<[1], [0], [0], [1], [0, 0, 1, 1], [], []>} : vector<64x4xbf16>, vector<4x16xbf16>, vector<64x16xf32> -> vector<64x16xf32>
    %61 = arith.addf %54, %60 : vector<64x16xf32>
    %c0_66 = arith.constant 0 : index
    %c1_67 = arith.constant 1 : index
    %c1_68 = arith.constant 1 : index
    %c0_69 = arith.constant 0 : index
    %62 = vector.load %arg9[%c0_66, %c1_67, %c1_68, %c0_69] : memref<4x9x9x4xbf16, #tpu.memory_space<vmem>>, vector<1x8x8x4xbf16>
    %63 = vector.shape_cast %62 : vector<1x8x8x4xbf16> to vector<8x8x4xbf16>
    %64 = vector.shape_cast %63 : vector<8x8x4xbf16> to vector<64x4xbf16>
    %c8 = arith.constant 8 : index
    %c0_70 = arith.constant 0 : index
    %c0_71 = arith.constant 0 : index
    %65 = vector.load %arg2[%c8, %c0_70, %c0_71] : memref<9x4x16xbf16, #tpu.memory_space<vmem>>, vector<1x4x16xbf16>
    %66 = vector.shape_cast %65 : vector<1x4x16xbf16> to vector<4x16xbf16>
    %cst_72 = arith.constant dense<0.000000e+00> : vector<64x16xf32>
    %67 = tpu.matmul %64, %66, %cst_72 {dimension_numbers = #tpu.dot_dimension_numbers<[1], [0], [0], [1], [0, 0, 1, 1], [], []>} : vector<64x4xbf16>, vector<4x16xbf16>, vector<64x16xf32> -> vector<64x16xf32>
    %68 = arith.addf %61, %67 : vector<64x16xf32>
    %c0_73 = arith.constant 0 : index
    %c0_74 = arith.constant 0 : index
    %69 = vector.load %arg3[%c0_73, %c0_74] : memref<1x16xf32, #tpu.memory_space<vmem>>, vector<1x16xf32>
    %70 = vector.broadcast %69 : vector<1x16xf32> to vector<64x16xf32>
    %71 = arith.mulf %68, %70 : vector<64x16xf32>
    %c0_75 = arith.constant 0 : index
    %c0_76 = arith.constant 0 : index
    %72 = vector.load %arg4[%c0_75, %c0_76] : memref<1x16xf32, #tpu.memory_space<vmem>>, vector<1x16xf32>
    %73 = vector.broadcast %72 : vector<1x16xf32> to vector<64x16xf32>
    %74 = arith.addf %71, %73 : vector<64x16xf32>
    %cst_77 = arith.constant 0.000000e+00 : f32
    %75 = vector.broadcast %cst_77 : f32 to vector<64x16xf32>
    %76 = arith.maximumf %74, %75 : vector<64x16xf32>
    %cst_78 = arith.constant 0.000000e+00 : bf16
    %77 = vector.broadcast %cst_78 : bf16 to vector<8x1x16xbf16>
    %78 = arith.truncf %76 : vector<64x16xf32> to vector<64x16xbf16>
    %79 = vector.shape_cast %78 : vector<64x16xbf16> to vector<8x8x16xbf16>
    %80 = tpu.concatenate %77, %79, %77 in 1 : vector<8x1x16xbf16>, vector<8x8x16xbf16>, vector<8x1x16xbf16> -> vector<8x10x16xbf16>
    %c1_79 = arith.constant 1 : index
    %c0_80 = arith.constant 0 : index
    %c0_81 = arith.constant 0 : index
    %81 = vector.load %arg10[%c1_79, %c0_80, %c0_81] : memref<10x10x16xbf16, #tpu.memory_space<vmem>>, vector<8x10x16xbf16>
    tpu.vector_store %arg10[%c1_79, %c0_80, %c0_81], %80 {strides = array<i32>} : memref<10x10x16xbf16, #tpu.memory_space<vmem>>, vector<8x10x16xbf16>,
    %cst_82 = arith.constant 0.000000e+00 : bf16
    %82 = vector.broadcast %cst_82 : bf16 to vector<1x10x16xbf16>
    %c0_83 = arith.constant 0 : index
    %c0_84 = arith.constant 0 : index
    %c0_85 = arith.constant 0 : index
    %83 = vector.load %arg10[%c0_83, %c0_84, %c0_85] : memref<10x10x16xbf16, #tpu.memory_space<vmem>>, vector<1x10x16xbf16>
    tpu.vector_store %arg10[%c0_83, %c0_84, %c0_85], %82 {strides = array<i32>} : memref<10x10x16xbf16, #tpu.memory_space<vmem>>, vector<1x10x16xbf16>,
    %c9 = arith.constant 9 : index
    %c0_86 = arith.constant 0 : index
    %c0_87 = arith.constant 0 : index
    %84 = vector.load %arg10[%c9, %c0_86, %c0_87] : memref<10x10x16xbf16, #tpu.memory_space<vmem>>, vector<1x10x16xbf16>
    tpu.vector_store %arg10[%c9, %c0_86, %c0_87], %82 {strides = array<i32>} : memref<10x10x16xbf16, #tpu.memory_space<vmem>>, vector<1x10x16xbf16>,
    %cst_88 = arith.constant 0.000000e+00 : f32
    %85 = vector.broadcast %cst_88 : f32 to vector<64x8xf32>
    %c0_89 = arith.constant 0 : index
    %c0_90 = arith.constant 0 : index
    %c0_91 = arith.constant 0 : index
    %86 = vector.load %arg10[%c0_89, %c0_90, %c0_91] : memref<10x10x16xbf16, #tpu.memory_space<vmem>>, vector<8x8x16xbf16>
    %87 = vector.shape_cast %86 : vector<8x8x16xbf16> to vector<64x16xbf16>
    %c0_92 = arith.constant 0 : index
    %c0_93 = arith.constant 0 : index
    %c0_94 = arith.constant 0 : index
    %88 = vector.load %arg5[%c0_92, %c0_93, %c0_94] : memref<9x16x8xbf16, #tpu.memory_space<vmem>>, vector<1x16x8xbf16>
    %89 = vector.shape_cast %88 : vector<1x16x8xbf16> to vector<16x8xbf16>
    %cst_95 = arith.constant dense<0.000000e+00> : vector<64x8xf32>
    %90 = tpu.matmul %87, %89, %cst_95 {dimension_numbers = #tpu.dot_dimension_numbers<[1], [0], [0], [1], [0, 0, 1, 1], [], []>} : vector<64x16xbf16>, vector<16x8xbf16>, vector<64x8xf32> -> vector<64x8xf32>
    %91 = arith.addf %85, %90 : vector<64x8xf32>
    %c0_96 = arith.constant 0 : index
    %c1_97 = arith.constant 1 : index
    %c0_98 = arith.constant 0 : index
    %92 = vector.load %arg10[%c0_96, %c1_97, %c0_98] : memref<10x10x16xbf16, #tpu.memory_space<vmem>>, vector<8x8x16xbf16>
    %93 = vector.shape_cast %92 : vector<8x8x16xbf16> to vector<64x16xbf16>
    %c1_99 = arith.constant 1 : index
    %c0_100 = arith.constant 0 : index
    %c0_101 = arith.constant 0 : index
    %94 = vector.load %arg5[%c1_99, %c0_100, %c0_101] : memref<9x16x8xbf16, #tpu.memory_space<vmem>>, vector<1x16x8xbf16>
    %95 = vector.shape_cast %94 : vector<1x16x8xbf16> to vector<16x8xbf16>
    %cst_102 = arith.constant dense<0.000000e+00> : vector<64x8xf32>
    %96 = tpu.matmul %93, %95, %cst_102 {dimension_numbers = #tpu.dot_dimension_numbers<[1], [0], [0], [1], [0, 0, 1, 1], [], []>} : vector<64x16xbf16>, vector<16x8xbf16>, vector<64x8xf32> -> vector<64x8xf32>
    %97 = arith.addf %91, %96 : vector<64x8xf32>
    %c0_103 = arith.constant 0 : index
    %c2_104 = arith.constant 2 : index
    %c0_105 = arith.constant 0 : index
    %98 = vector.load %arg10[%c0_103, %c2_104, %c0_105] : memref<10x10x16xbf16, #tpu.memory_space<vmem>>, vector<8x8x16xbf16>
    %99 = vector.shape_cast %98 : vector<8x8x16xbf16> to vector<64x16xbf16>
    %c2_106 = arith.constant 2 : index
    %c0_107 = arith.constant 0 : index
    %c0_108 = arith.constant 0 : index
    %100 = vector.load %arg5[%c2_106, %c0_107, %c0_108] : memref<9x16x8xbf16, #tpu.memory_space<vmem>>, vector<1x16x8xbf16>
    %101 = vector.shape_cast %100 : vector<1x16x8xbf16> to vector<16x8xbf16>
    %cst_109 = arith.constant dense<0.000000e+00> : vector<64x8xf32>
    %102 = tpu.matmul %99, %101, %cst_109 {dimension_numbers = #tpu.dot_dimension_numbers<[1], [0], [0], [1], [0, 0, 1, 1], [], []>} : vector<64x16xbf16>, vector<16x8xbf16>, vector<64x8xf32> -> vector<64x8xf32>
    %103 = arith.addf %97, %102 : vector<64x8xf32>
    %c1_110 = arith.constant 1 : index
    %c0_111 = arith.constant 0 : index
    %c0_112 = arith.constant 0 : index
    %104 = vector.load %arg10[%c1_110, %c0_111, %c0_112] : memref<10x10x16xbf16, #tpu.memory_space<vmem>>, vector<8x8x16xbf16>
    %105 = vector.shape_cast %104 : vector<8x8x16xbf16> to vector<64x16xbf16>
    %c3_113 = arith.constant 3 : index
    %c0_114 = arith.constant 0 : index
    %c0_115 = arith.constant 0 : index
    %106 = vector.load %arg5[%c3_113, %c0_114, %c0_115] : memref<9x16x8xbf16, #tpu.memory_space<vmem>>, vector<1x16x8xbf16>
    %107 = vector.shape_cast %106 : vector<1x16x8xbf16> to vector<16x8xbf16>
    %cst_116 = arith.constant dense<0.000000e+00> : vector<64x8xf32>
    %108 = tpu.matmul %105, %107, %cst_116 {dimension_numbers = #tpu.dot_dimension_numbers<[1], [0], [0], [1], [0, 0, 1, 1], [], []>} : vector<64x16xbf16>, vector<16x8xbf16>, vector<64x8xf32> -> vector<64x8xf32>
    %109 = arith.addf %103, %108 : vector<64x8xf32>
    %c1_117 = arith.constant 1 : index
    %c1_118 = arith.constant 1 : index
    %c0_119 = arith.constant 0 : index
    %110 = vector.load %arg10[%c1_117, %c1_118, %c0_119] : memref<10x10x16xbf16, #tpu.memory_space<vmem>>, vector<8x8x16xbf16>
    %111 = vector.shape_cast %110 : vector<8x8x16xbf16> to vector<64x16xbf16>
    %c4_120 = arith.constant 4 : index
    %c0_121 = arith.constant 0 : index
    %c0_122 = arith.constant 0 : index
    %112 = vector.load %arg5[%c4_120, %c0_121, %c0_122] : memref<9x16x8xbf16, #tpu.memory_space<vmem>>, vector<1x16x8xbf16>
    %113 = vector.shape_cast %112 : vector<1x16x8xbf16> to vector<16x8xbf16>
    %cst_123 = arith.constant dense<0.000000e+00> : vector<64x8xf32>
    %114 = tpu.matmul %111, %113, %cst_123 {dimension_numbers = #tpu.dot_dimension_numbers<[1], [0], [0], [1], [0, 0, 1, 1], [], []>} : vector<64x16xbf16>, vector<16x8xbf16>, vector<64x8xf32> -> vector<64x8xf32>
    %115 = arith.addf %109, %114 : vector<64x8xf32>
    %c1_124 = arith.constant 1 : index
    %c2_125 = arith.constant 2 : index
    %c0_126 = arith.constant 0 : index
    %116 = vector.load %arg10[%c1_124, %c2_125, %c0_126] : memref<10x10x16xbf16, #tpu.memory_space<vmem>>, vector<8x8x16xbf16>
    %117 = vector.shape_cast %116 : vector<8x8x16xbf16> to vector<64x16xbf16>
    %c5_127 = arith.constant 5 : index
    %c0_128 = arith.constant 0 : index
    %c0_129 = arith.constant 0 : index
    %118 = vector.load %arg5[%c5_127, %c0_128, %c0_129] : memref<9x16x8xbf16, #tpu.memory_space<vmem>>, vector<1x16x8xbf16>
    %119 = vector.shape_cast %118 : vector<1x16x8xbf16> to vector<16x8xbf16>
    %cst_130 = arith.constant dense<0.000000e+00> : vector<64x8xf32>
    %120 = tpu.matmul %117, %119, %cst_130 {dimension_numbers = #tpu.dot_dimension_numbers<[1], [0], [0], [1], [0, 0, 1, 1], [], []>} : vector<64x16xbf16>, vector<16x8xbf16>, vector<64x8xf32> -> vector<64x8xf32>
    %121 = arith.addf %115, %120 : vector<64x8xf32>
    %c2_131 = arith.constant 2 : index
    %c0_132 = arith.constant 0 : index
    %c0_133 = arith.constant 0 : index
    %122 = vector.load %arg10[%c2_131, %c0_132, %c0_133] : memref<10x10x16xbf16, #tpu.memory_space<vmem>>, vector<8x8x16xbf16>
    %123 = vector.shape_cast %122 : vector<8x8x16xbf16> to vector<64x16xbf16>
    %c6_134 = arith.constant 6 : index
    %c0_135 = arith.constant 0 : index
    %c0_136 = arith.constant 0 : index
    %124 = vector.load %arg5[%c6_134, %c0_135, %c0_136] : memref<9x16x8xbf16, #tpu.memory_space<vmem>>, vector<1x16x8xbf16>
    %125 = vector.shape_cast %124 : vector<1x16x8xbf16> to vector<16x8xbf16>
    %cst_137 = arith.constant dense<0.000000e+00> : vector<64x8xf32>
    %126 = tpu.matmul %123, %125, %cst_137 {dimension_numbers = #tpu.dot_dimension_numbers<[1], [0], [0], [1], [0, 0, 1, 1], [], []>} : vector<64x16xbf16>, vector<16x8xbf16>, vector<64x8xf32> -> vector<64x8xf32>
    %127 = arith.addf %121, %126 : vector<64x8xf32>
    %c2_138 = arith.constant 2 : index
    %c1_139 = arith.constant 1 : index
    %c0_140 = arith.constant 0 : index
    %128 = vector.load %arg10[%c2_138, %c1_139, %c0_140] : memref<10x10x16xbf16, #tpu.memory_space<vmem>>, vector<8x8x16xbf16>
    %129 = vector.shape_cast %128 : vector<8x8x16xbf16> to vector<64x16xbf16>
    %c7_141 = arith.constant 7 : index
    %c0_142 = arith.constant 0 : index
    %c0_143 = arith.constant 0 : index
    %130 = vector.load %arg5[%c7_141, %c0_142, %c0_143] : memref<9x16x8xbf16, #tpu.memory_space<vmem>>, vector<1x16x8xbf16>
    %131 = vector.shape_cast %130 : vector<1x16x8xbf16> to vector<16x8xbf16>
    %cst_144 = arith.constant dense<0.000000e+00> : vector<64x8xf32>
    %132 = tpu.matmul %129, %131, %cst_144 {dimension_numbers = #tpu.dot_dimension_numbers<[1], [0], [0], [1], [0, 0, 1, 1], [], []>} : vector<64x16xbf16>, vector<16x8xbf16>, vector<64x8xf32> -> vector<64x8xf32>
    %133 = arith.addf %127, %132 : vector<64x8xf32>
    %c2_145 = arith.constant 2 : index
    %c2_146 = arith.constant 2 : index
    %c0_147 = arith.constant 0 : index
    %134 = vector.load %arg10[%c2_145, %c2_146, %c0_147] : memref<10x10x16xbf16, #tpu.memory_space<vmem>>, vector<8x8x16xbf16>
    %135 = vector.shape_cast %134 : vector<8x8x16xbf16> to vector<64x16xbf16>
    %c8_148 = arith.constant 8 : index
    %c0_149 = arith.constant 0 : index
    %c0_150 = arith.constant 0 : index
    %136 = vector.load %arg5[%c8_148, %c0_149, %c0_150] : memref<9x16x8xbf16, #tpu.memory_space<vmem>>, vector<1x16x8xbf16>
    %137 = vector.shape_cast %136 : vector<1x16x8xbf16> to vector<16x8xbf16>
    %cst_151 = arith.constant dense<0.000000e+00> : vector<64x8xf32>
    %138 = tpu.matmul %135, %137, %cst_151 {dimension_numbers = #tpu.dot_dimension_numbers<[1], [0], [0], [1], [0, 0, 1, 1], [], []>} : vector<64x16xbf16>, vector<16x8xbf16>, vector<64x8xf32> -> vector<64x8xf32>
    %139 = arith.addf %133, %138 : vector<64x8xf32>
    %c3_152 = arith.constant 3 : index
    %c0_153 = arith.constant 0 : index
    %c0_154 = arith.constant 0 : index
    %c0_155 = arith.constant 0 : index
    %140 = vector.load %arg9[%c3_152, %c0_153, %c0_154, %c0_155] : memref<4x9x9x4xbf16, #tpu.memory_space<vmem>>, vector<1x8x8x4xbf16>
    %141 = vector.shape_cast %140 : vector<1x8x8x4xbf16> to vector<8x8x4xbf16>
    %142 = vector.shape_cast %141 : vector<8x8x4xbf16> to vector<64x4xbf16>
    %c0_156 = arith.constant 0 : index
    %c0_157 = arith.constant 0 : index
    %c1_158 = arith.constant 1 : index
    %c1_159 = arith.constant 1 : index
    %c0_160 = arith.constant 0 : index
    %143 = vector.load %arg1[%c0_156, %c0_157, %c1_158, %c1_159, %c0_160] : memref<1x4x9x9x4xbf16, #tpu.memory_space<vmem>>, vector<1x1x8x8x4xbf16>
    %144 = vector.shape_cast %143 : vector<1x1x8x8x4xbf16> to vector<8x8x4xbf16>
    %145 = vector.shape_cast %144 : vector<8x8x4xbf16> to vector<64x4xbf16>
    %146 = tpu.concatenate %142, %145 in 1 : vector<64x4xbf16>, vector<64x4xbf16> -> vector<64x8xbf16>
    %c0_161 = arith.constant 0 : index
    %c0_162 = arith.constant 0 : index
    %147 = vector.load %arg7[%c0_161, %c0_162] : memref<8x8xbf16, #tpu.memory_space<vmem>>, vector<8x8xbf16>
    %cst_163 = arith.constant dense<0.000000e+00> : vector<64x8xf32>
    %148 = tpu.matmul %146, %147, %cst_163 {dimension_numbers = #tpu.dot_dimension_numbers<[1], [0], [0], [1], [0, 0, 1, 1], [], []>} : vector<64x8xbf16>, vector<8x8xbf16>, vector<64x8xf32> -> vector<64x8xf32>
    %149 = arith.addf %139, %148 : vector<64x8xf32>
    %c0_164 = arith.constant 0 : index
    %c0_165 = arith.constant 0 : index
    %150 = vector.load %arg6[%c0_164, %c0_165] : memref<1x8xf32, #tpu.memory_space<vmem>>, vector<1x8xf32>
    %151 = vector.broadcast %150 : vector<1x8xf32> to vector<64x8xf32>
    %152 = arith.addf %149, %151 : vector<64x8xf32>
    %c0_166 = arith.constant 0 : index
    %c0_167 = arith.constant 0 : index
    %c0_168 = arith.constant 0 : index
    %153 = vector.load %arg8[%c0_166, %c0_167, %c0_168] : memref<1x64x8xf32, #tpu.memory_space<vmem>>, vector<1x64x8xf32>
    %154 = vector.shape_cast %153 : vector<1x64x8xf32> to vector<64x8xf32>
    %155 = vector.shape_cast %152 : vector<64x8xf32> to vector<1x64x8xf32>
    tpu.vector_store %arg8[%c0_166, %c0_167, %c0_168], %155 {strides = array<i32>} : memref<1x64x8xf32, #tpu.memory_space<vmem>>, vector<1x64x8xf32>,
    return
  }
  func.func @transform_0(%arg0: i32) -> (i32, i32, i32, i32, i32) {
    %c0_i32 = arith.constant 0 : i32
    %c0_i32_0 = arith.constant 0 : i32
    %c0_i32_1 = arith.constant 0 : i32
    %c0_i32_2 = arith.constant 0 : i32
    %c0_i32_3 = arith.constant 0 : i32
    return %arg0, %c0_i32, %c0_i32_0, %c0_i32_1, %c0_i32_2 : i32, i32, i32, i32, i32
  }
  func.func @transform_1(%arg0: i32) -> (i32, i32, i32) {
    %c0_i32 = arith.constant 0 : i32
    %c0_i32_0 = arith.constant 0 : i32
    %c0_i32_1 = arith.constant 0 : i32
    %c0_i32_2 = arith.constant 0 : i32
    return %c0_i32, %c0_i32_0, %c0_i32_1 : i32, i32, i32
  }
  func.func @transform_2(%arg0: i32) -> (i32, i32) {
    %c0_i32 = arith.constant 0 : i32
    %c0_i32_0 = arith.constant 0 : i32
    %c0_i32_1 = arith.constant 0 : i32
    return %c0_i32, %c0_i32_0 : i32, i32
  }
  func.func @transform_3(%arg0: i32) -> (i32, i32) {
    %c0_i32 = arith.constant 0 : i32
    %c0_i32_0 = arith.constant 0 : i32
    %c0_i32_1 = arith.constant 0 : i32
    return %c0_i32, %c0_i32_0 : i32, i32
  }
  func.func @transform_4(%arg0: i32) -> (i32, i32, i32) {
    %c0_i32 = arith.constant 0 : i32
    %c0_i32_0 = arith.constant 0 : i32
    %c0_i32_1 = arith.constant 0 : i32
    %c0_i32_2 = arith.constant 0 : i32
    return %c0_i32, %c0_i32_0, %c0_i32_1 : i32, i32, i32
  }
  func.func @transform_5(%arg0: i32) -> (i32, i32) {
    %c0_i32 = arith.constant 0 : i32
    %c0_i32_0 = arith.constant 0 : i32
    %c0_i32_1 = arith.constant 0 : i32
    return %c0_i32, %c0_i32_0 : i32, i32
  }
  func.func @transform_6(%arg0: i32) -> (i32, i32) {
    %c0_i32 = arith.constant 0 : i32
    %c0_i32_0 = arith.constant 0 : i32
    %c0_i32_1 = arith.constant 0 : i32
    return %c0_i32, %c0_i32_0 : i32, i32
  }
  func.func @transform_7(%arg0: i32) -> (i32, i32, i32) {
    %c0_i32 = arith.constant 0 : i32
    %c0_i32_0 = arith.constant 0 : i32
    %c0_i32_1 = arith.constant 0 : i32
    return %arg0, %c0_i32, %c0_i32_0 : i32, i32, i32
  }
}

</mosaic_0001>

<bundles_post_ra>
// kernel: basic_block_forward_nhwc.1
= control target key start
LH: loop header
LB: loop body
LE: loop exit
PB: predicated region body
PF: predicated region fallthrough
CT: control target
= control target key end

     0   :  { %s6607_s0 = inlined_call_operand.hbm [shape: bf16[2,4,9,9,4], index: 0, kind: input, shape index: {}]   ;;  %s6608_s1 = inlined_call_operand.hbm [shape: bf16[9,4,16], index: 1, kind: input, shape index: {}]   ;;  %s6609_s2 = inlined_call_operand.hbm [shape: f32[1,16], index: 2, kind: input, shape index: {}]   ;;  %s6610_s3 = inlined_call_operand.hbm [shape: f32[1,16], index: 3, kind: input, shape index: {}]   ;;  %s6611_s4 = inlined_call_operand.hbm [shape: bf16[9,16,8], index: 4, kind: input, shape index: {}]   ;;  %s6612_s5 = inlined_call_operand.hbm [shape: f32[1,8], index: 5, kind: input, shape index: {}]   ;;  %s6613_s6 = inlined_call_operand.hbm [shape: bf16[8,8], index: 6, kind: input, shape index: {}]   ;;  %s6614_s7 = inlined_call_operand.hbm [shape: f32[2,64,8], index: 7, kind: output, shape index: {}]  }
   0x1   :  { %6620 = sst [smem:[#allocation22_spill]] %s6608_s1 }
   0x2   :  { %12 = vsyncpa [#allocation5], 0 }
   0x3   :  { %14 = vsyncpa [#allocation5 + $0x1], 0 }
   0x4   :  { %15 = vsyncpa [#allocation8], 0 }
   0x5   :  { %16 = vsyncpa [#allocation11], 0 }
   0x6   :  { %17 = vsyncpa [#allocation14], 0 }
   0x7   :  { %18 = vsyncpa [#allocation6], 0 }
   0x8   :  { %20 = vsyncpa [#allocation6 + $0x1], 0  ;;  %s5462_s24 = smov 0   ;;  %s5464_s25 = smov 0  }
   0x9   :  { %s5466_s26 = smov 0   ;;  %s5468_s27 = smov 0  }
   0xa LB: > { %s5406_s28 = smov [#allocation7]   ;;  %s5483_s30 = sadd.s32 4294967295, %s5404_s27   ;;  %s5404_s27 = sphi %s5468_s27, %s6655_s27   ;;  %s5400_s26 = sphi %s5466_s26, %s6654_s26   ;;  %s5396_s25 = sphi %s5464_s25, %s6653_s25   ;;  %s5392_s24 = sphi %s5462_s24, %s6652_s24  }
   0xb   : > { %s221_s29 = sshll.u32 %s5406_s28, 4  ;;  %p4265_p0 = scmp.ge.s32.totalorder %s5404_s27, 1  ;;  %s5488_s29 = int_to_ptr.vmem [resolvable:$true] %s221_s29 }
   0xc   : > { %p6615_p1 = scmp.eq.s32.totalorder %s5483_s30, 0  ;;  %p209_p2 = scmp.lt.s32.totalorder %s5404_s27, 3 }
   0xd   : > { %s5407_s9 = smov [#allocation10]   ;;  %s5408_s12 = smov [#allocation13]  }
   0xe   : > { %p5490_p3 = pnand %p4265_p0, %p209_p2  ;;  %s246_s10 = sshll.u32 %s5407_s9, 4  ;;  %s5503_s10 = int_to_ptr.vmem [resolvable:$true] %s246_s10 }
   0xf   : > { %s270_s13 = sshll.u32 %s5408_s12, 4  ;;  %s6623_s1 = sld [smem:[#allocation22_spill]]  ;;  %s5505_s13 = int_to_ptr.vmem [resolvable:$true] %s270_s13 }
  0x10   : > { %s6621_s8 = scalar_select %p5490_p3, 1, 0 }
  0x11   : > { %p4992_p5 = pneg %p5490_p3 }
  0x13   : > { %p5499_p6 = pnand %p4992_p5, %p6615_p1 }
  0x15   : > { %s5128_s16 = scalar_lea.hbm %s6623_s1, 288  ;;  %p5515_p8 = pneg %p5499_p6 }
  0x16   : > { %p5129_p7 = scmp.ne.s32.totalorder %s6623_s1, %s5128_s16  ;;  %p5135_p11 = scmp.lt.u32.totalorder %s5128_s16, %s6623_s1 }
  0x18   : > { %p5131_p9 = pnand %p5515_p8, %p5129_p7 }
  0x1a   : > { %p5132_p10 = pneg %p5131_p9 }
  0x1c   : > { %p5137_p12 = pnand %p5135_p11, %p5132_p10 }
  0x1e   : > { %5140 = shalt.err (!%p5137_p12)
}
  0x1f   : > { %s5141_s22 = scalar_lea.vmem %s5488_s29, 288  ;;  %p5149_p5 = scmp.lt.s32.totalorder %s5488_s29, %s5488_s29 }
  0x20   : > { %p5142_p13 = scmp.ne.s32.totalorder %s5488_s29, %s5141_s22  ;;  %p5150_p4 = scmp.lt.s32.totalorder %s5141_s22, %s5141_s22 }
  0x22   : > { %p5144_p0 = pnand %p5142_p13, %p5515_p8  ;;  %p5151_p7 = por %p5150_p4, %p5149_p5 }
  0x24   : > { %p5145_p2 = pneg %p5144_p0 }
  0x26   : > { %p5152_p9 = pnand %p5151_p7, %p5145_p2 }
  0x28   : > { %5155 = shalt.err (!%p5152_p9)
}
  0x29   : > { %s5409_s23 = smov 32   ;;  %s5410_s28 = smov 2  }
  0x2a   : > { %4995 = dma.hbm_to_vmem [thread:$0]  (!%p5499_p6), %s6623_s1, 288, %s5488_s29, [#allocation8], %s5409_s23, %s5409_s23, %s5410_s28  }
  0x2b   : > { %s5156_s16 = scalar_lea.hbm %s6610_s3, 16 }
  0x2c   : > { %p5157_p4 = scmp.ne.s32.totalorder %s6610_s3, %s5156_s16  ;;  %p5163_p12 = scmp.lt.u32.totalorder %s5156_s16, %s6610_s3 }
  0x2e   : > { %p5159_p10 = pnand %p5157_p4, %p5515_p8 }
  0x30   : > { %p5160_p11 = pneg %p5159_p10 }
  0x32   : > { %p5165_p13 = pnand %p5163_p12, %p5160_p11 }
  0x34   : > { %5168 = shalt.err (!%p5165_p13)
}
  0x35   : > { %s5169_s29 = scalar_lea.vmem %s5503_s10, 16  ;;  %s5176_s22 = scalar_lea.vmem %s5503_s10, 32 }
  0x36   : > { %p5170_p0 = scmp.ne.s32.totalorder %s5503_s10, %s5169_s29  ;;  %p5177_p7 = scmp.lt.s32.totalorder %s5503_s10, %s5503_s10 }
  0x37   : > { %p5178_p9 = scmp.lt.s32.totalorder %s5176_s22, %s5169_s29 }
  0x38   : > { %p5172_p2 = pnand %p5170_p0, %p5515_p8 }
  0x39   : > { %p5179_p4 = por %p5178_p9, %p5177_p7 }
  0x3a   : > { %p5173_p5 = pneg %p5172_p2 }
  0x3c   : > { %p5180_p10 = pnand %p5179_p4, %p5173_p5 }
  0x3e   : > { %5183 = shalt.err (!%p5180_p10)
}
  0x3f   : > { %5001 = dma.hbm_to_vmem [thread:$0]  (!%p5499_p6), %s6610_s3, 16, %s5503_s10, [#allocation11]  }
  0x40   : > { %s5184_s14 = scalar_lea.hbm %s6612_s5, 16 }
  0x41   : > { %p5185_p11 = scmp.ne.s32.totalorder %s6612_s5, %s5184_s14  ;;  %p5191_p0 = scmp.lt.u32.totalorder %s5184_s14, %s6612_s5 }
  0x43   : > { %p5187_p12 = pnand %p5185_p11, %p5515_p8 }
  0x45   : > { %p5188_p13 = pneg %p5187_p12 }
  0x47   : > { %p5193_p2 = pnand %p5191_p0, %p5188_p13 }
  0x49   : > { %5196 = shalt.err (!%p5193_p2)
}
  0x4a   : > { %s5197_s10 = scalar_lea.vmem %s5505_s13, 16  ;;  %s5204_s20 = scalar_lea.vmem %s5505_s13, 32 }
  0x4b   : > { %p5198_p5 = scmp.ne.s32.totalorder %s5505_s13, %s5197_s10  ;;  %p5205_p4 = scmp.lt.s32.totalorder %s5505_s13, %s5505_s13 }
  0x4c   : > { %p5206_p10 = scmp.lt.s32.totalorder %s5204_s20, %s5197_s10 }
  0x4d   : > { %p5200_p7 = pnand %p5198_p5, %p5515_p8 }
  0x4e   : > { %p5207_p11 = por %p5206_p10, %p5205_p4 }
  0x4f   : > { %p5201_p9 = pneg %p5200_p7 }
  0x51   : > { %p5208_p12 = pnand %p5207_p11, %p5201_p9 }
  0x53   : > { %5211 = shalt.err (!%p5208_p12)
}
  0x54   : > { %5007 = dma.hbm_to_vmem [thread:$0]  (!%p5499_p6), %s6612_s5, 16, %s5505_s13, [#allocation14]  }
  0x55   : > { %s5411_s22 = smov [#allocation9]   ;;  %s5412_s28 = smov [#allocation12]  }
  0x56   : > { %s235_s23 = sshll.u32 %s5411_s22, 4  ;;  %s256_s9 = sshll.u32 %s5412_s28, 4  ;;  %s236_s23 = int_to_ptr.vmem [resolvable:$true] %s235_s23  ;;  %s257_s9 = int_to_ptr.vmem [resolvable:$true] %s256_s9 }
  0x57   : > { %s5212_s15 = scalar_lea.hbm %s6609_s2, 16 }
  0x58   : > { %p5213_p13 = scmp.ne.s32.totalorder %s6609_s2, %s5212_s15  ;;  %p5219_p5 = scmp.lt.u32.totalorder %s5212_s15, %s6609_s2 }
  0x5a   : > { %p5215_p0 = pnand %p5213_p13, %p5515_p8 }
  0x5c   : > { %p5216_p2 = pneg %p5215_p0 }
  0x5e   : > { %p5221_p7 = pnand %p5219_p5, %p5216_p2 }
  0x60   : > { %5224 = shalt.err (!%p5221_p7)
}
  0x61   : > { %s5225_s13 = scalar_lea.vmem %s236_s23, 16  ;;  %s5232_s20 = scalar_lea.vmem %s236_s23, 32 }
  0x62   : > { %p5226_p9 = scmp.ne.s32.totalorder %s236_s23, %s5225_s13  ;;  %p5233_p11 = scmp.lt.s32.totalorder %s236_s23, %s236_s23 }
  0x63   : > { %p5234_p12 = scmp.lt.s32.totalorder %s5232_s20, %s5225_s13 }
  0x64   : > { %p5228_p4 = pnand %p5226_p9, %p5515_p8 }
  0x65   : > { %p5235_p1 = por %p5234_p12, %p5233_p11 }
  0x66   : > { %p5229_p10 = pneg %p5228_p4 }
  0x68   : > { %p5236_p3 = pnand %p5235_p1, %p5229_p10 }
  0x6a   : > { %5239 = shalt.err (!%p5236_p3)
}
  0x6b   : > { %4998 = dma.hbm_to_vmem [thread:$0]  (!%p5499_p6), %s6609_s2, 16, %s236_s23, [#allocation8]  }
  0x6c   : > { %s5240_s12 = scalar_lea.hbm %s6611_s4, 1152 }
  0x6d   : > { %p5241_p13 = scmp.ne.s32.totalorder %s6611_s4, %s5240_s12  ;;  %p5247_p3 = scmp.lt.u32.totalorder %s5240_s12, %s6611_s4 }
  0x6f   : > { %p5243_p0 = pnand %p5241_p13, %p5515_p8 }
  0x71   : > { %p5244_p1 = pneg %p5243_p0 }
  0x73   : > { %p5249_p2 = pnand %p5247_p3, %p5244_p1 }
  0x75   : > { %5252 = shalt.err (!%p5249_p2)
}
  0x76   : > { %s5253_s18 = scalar_lea.vmem %s257_s9, 1152  ;;  %p5261_p4 = scmp.lt.s32.totalorder %s257_s9, %s257_s9 }
  0x77   : > { %p5254_p5 = scmp.ne.s32.totalorder %s257_s9, %s5253_s18  ;;  %p5262_p10 = scmp.lt.s32.totalorder %s5253_s18, %s5253_s18 }
  0x79   : > { %p5256_p7 = pnand %p5254_p5, %p5515_p8  ;;  %p5263_p11 = por %p5262_p10, %p5261_p4 }
  0x7b   : > { %p5257_p9 = pneg %p5256_p7 }
  0x7d   : > { %p5264_p12 = pnand %p5263_p11, %p5257_p9 }
  0x7f   : > { %5267 = shalt.err (!%p5264_p12)
}
  0x80   : > { %s6617_s23 = smov 64   ;;  %s6618_s10 = smov 4  }
  0x81   : > { %5004 = dma.hbm_to_vmem [thread:$0]  (!%p5499_p6), %s6611_s4, 1152, %s257_s9, [#allocation11], %s6617_s23, %s6617_s23, %s6618_s10  }
  0x82   : > { %s5415_s21 = smov [#allocation15]   ;;  %s5268_s12 = scalar_lea.hbm %s6613_s6, 64 }
  0x83   : > { %s281_s29 = sshll.u32 %s5415_s21, 4  ;;  %p5269_p13 = scmp.ne.s32.totalorder %s6613_s6, %s5268_s12  ;;  %s282_s29 = int_to_ptr.vmem [resolvable:$true] %s281_s29 }
  0x84   : > { %p5275_p3 = scmp.lt.u32.totalorder %s5268_s12, %s6613_s6 }
  0x85   : > { %p5271_p0 = pnand %p5269_p13, %p5515_p8 }
  0x87   : > { %p5272_p1 = pneg %p5271_p0 }
  0x89   : > { %p5277_p2 = pnand %p5275_p3, %p5272_p1 }
  0x8b   : > { %5280 = shalt.err (!%p5277_p2)
}
  0x8c   : > { %s5281_s9 = scalar_lea.vmem %s282_s29, 64  ;;  %p5289_p4 = scmp.lt.s32.totalorder %s282_s29, %s282_s29 }
  0x8d   : > { %p5282_p5 = scmp.ne.s32.totalorder %s282_s29, %s5281_s9  ;;  %p5290_p10 = scmp.lt.s32.totalorder %s5281_s9, %s5281_s9 }
  0x8f   : > { %p5284_p7 = pnand %p5282_p5, %p5515_p8  ;;  %p5291_p11 = por %p5290_p10, %p5289_p4 }
  0x91   : > { %p5285_p9 = pneg %p5284_p7 }
  0x93   : > { %p5292_p12 = pnand %p5291_p11, %p5285_p9 }
  0x95   : > { %5295 = shalt.err (!%p5292_p12)
}
  0x96   : > { %5010 = dma.hbm_to_vmem [thread:$0]  (!%p5499_p6), %s6613_s6, 64, %s282_s29, [#allocation14]  }
  0x97   : > { %s4264_s19 = sadd.s32 4294967294, %s5404_s27   ;;  %s5643_s11 = sadd.s32 1, %s5404_s27  }
  0x98   : > { %s30_s20 = ssub.s32 %s5404_s27, %s5643_s11  ;;  %s33_s21 = sadd.s32 1, %s5400_s26 }
  0x99   : > { %p31_p8 = scmp.eq.s32.totalorder %s30_s20, 0  ;;  %p40_p13 = scmp.ne.s32.totalorder %s5400_s26, %s5396_s25 }
  0x9a   : > { %p41_p0 = scmp.eq.s32.totalorder %s5404_s27, 0  ;;  %p46_p1 = scmp.ne.s32.totalorder %s5396_s25, %s5392_s24 }
  0x9b   : > { %s5654_s22 = scalar_select %p31_p8, %s5400_s26, %s33_s21  }
  0x9c   : > { %p42_p3 = por %p41_p0, %p40_p13  ;;  %p6625_p2 = scmp.eq.s32.totalorder %s5483_s30, 0 }
  0x9d   : > { %p196_p6 = scmp.eq.s32.totalorder %s5483_s30, 1  ;;  %p202_p7 = scmp.eq.s32.totalorder %s4264_s19, 1 }
  0x9e   : > { %p5658_p5 = por %p6625_p2, %p46_p1  ;;  %p5025_p9 = scmp.lt.s32.totalorder %s5404_s27, 2 }
  0x9f   : > { %s292_s29 = sand.u32 1, %s5400_s26   ;;  %p5665_p4 = por %p196_p6, %p40_p13 }
  0xa0   : > { %p5669_p10 = por %p202_p7, %p46_p1  ;;  %s4961_s15 = smul.u32 288, %s292_s29 }
  0xa1   : > { %s6627_s12 = scalar_select %p5665_p4, 1, 0 }
  0xa2   : > { %s6628_s14 = scalar_select %p5669_p10, 1, 0 }
  0xa3   : > { %s4962_s16 = smul.u32 4608, %s5404_s27  ;;  %p5674_p11 = pnand %p5025_p9, %p42_p3 }
  0xa4   : > { %s296_s19 = scalar_lea.vmem [#allocation4], %s4961_s15  ;;  %s5685_s21 = scalar_lea.sflag [#allocation5], %s292_s29 }
  0xa5   : > { %s5681_s13 = scalar_lea.hbm %s6607_s0, %s4962_s16  ;;  %s303_s20 = sshll.u32 %s296_s19, 4  ;;  %s5683_s20 = int_to_ptr.vmem [resolvable:$true] %s303_s20 }
  0xa6   : > { %s5296_s23 = scalar_lea.hbm %s5681_s13, 4608  ;;  %p5298_p8 = pneg %p5674_p11 }
  0xa7   : > { %p5297_p12 = scmp.ne.s32.totalorder %s5681_s13, %s5296_s23  ;;  %s5301_s18 = scalar_lea.hbm %s6607_s0, 9216 }
  0xa8   : > { %p5302_p1 = scmp.lt.u32.totalorder %s5681_s13, %s6607_s0  ;;  %p5303_p3 = scmp.lt.u32.totalorder %s5301_s18, %s5296_s23 }
  0xa9   : > { %p5299_p13 = pnand %p5298_p8, %p5297_p12  ;;  %p5305_p6 = scmp.lt.u32.totalorder %s5296_s23, %s5681_s13 }
  0xaa   : > { %p5304_p2 = por %p5303_p3, %p5302_p1 }
  0xab   : > { %p5300_p0 = pneg %p5299_p13 }
  0xac   : > { %p5306_p7 = por %p5305_p6, %p5304_p2 }
  0xae   : > { %p5307_p9 = pnand %p5306_p7, %p5300_p0 }
  0xb0   : > { %5310 = shalt.err (!%p5307_p9)
}
  0xb1   : > { %s5311_s29 = scalar_lea.vmem %s5683_s20, 4608  ;;  %s5416_s15 = smov [#allocation4]  }
  0xb2   : > { %p5312_p12 = scmp.ne.s32.totalorder %s5683_s20, %s5311_s29  ;;  %s5316_s19 = sshll.u32 %s5416_s15, 4  ;;  %s5317_s19 = int_to_ptr.vmem [resolvable:$false] %s5316_s19 }
  0xb3   : > { %s5318_s1 = scalar_lea.vmem %s5317_s19, 9216  ;;  %p5319_p4 = scmp.lt.s32.totalorder %s5683_s20, %s5317_s19 }
  0xb4   : > { %p5314_p13 = pnand %p5312_p12, %p5298_p8  ;;  %p5320_p1 = scmp.lt.s32.totalorder %s5318_s1, %s5311_s29 }
  0xb6   : > { %p5315_p10 = pneg %p5314_p13  ;;  %p5321_p3 = por %p5320_p1, %p5319_p4 }
  0xb8   : > { %p5322_p2 = pnand %p5321_p3, %p5315_p10 }
  0xba   : > { %5325 = shalt.err (!%p5322_p2)
}
  0xbb   : > { %s6630_s23 = smov 4   ;;  %s6631_s10 = smov 64  }
  0xbc   : > { %5014 = dma.hbm_to_vmem [thread:$0]  (!%p5674_p11), %s5681_s13, 4608, %s5683_s20, %s5685_s21, %s6631_s10, %s6631_s10, %s6630_s23  }
  0xbd   : > { %p6632_p8 = scmp.ne.s32.totalorder %s6621_s8, 0 }
  0xbe   : > { %s5719_s16 = sand.u32 (!%p6632_p8), 1, %s5396_s25  }
  0xbf   : > { %315 = sbr.rel (%p6632_p8) target bundleno = 1013 (0x3f5), region = 48  ;;  %s318_s18 = scalar_lea.sflag (!%p6632_p8), [#allocation5], %s5719_s16 }
  0xc0   : > { %s4963_s9 = smul.u32 (!%p6632_p8), 288, %s5719_s16 }
  0xc2   : > { %s5723_s29 = scalar_lea.vmem (!%p6632_p8), [#allocation4], %s4963_s9 }
  0xc6   : > { %5371 = dma.done.wait (%p5658_p5), %s318_s18, 4608  }
  0xc7   : > { %5373 = vsyncadd (%p5658_p5), %s318_s18, 4294962688  ;;  %p6633_p4 = scmp.eq.s32.totalorder %s5483_s30, 0 }
  0xc9   : > { %5375 = dma.done.wait (%p6633_p4), [#allocation8], 304   ;;  %p6634_p10 = pmov %p6633_p4 }
  0xca   : > { %p6635_p11 = pmov %p6633_p4 }
  0xcb   : > { %5377 = vsyncadd (%p6634_p10), [#allocation8], 4294966992 }
  0xcc   : > { %5379 = dma.done.wait (%p6635_p11), [#allocation11], 1168   ;;  %p6636_p0 = pmov %p6633_p4 }
  0xce   : > { %5381 = vsyncadd (%p6636_p0), [#allocation11], 4294966128  ;;  %p6637_p6 = pmov %p6636_p0 }
  0xcf   : > { %p6638_p7 = pmov %p6636_p0 }
  0xd0   : > { %5383 = dma.done.wait (%p6637_p6), [#allocation14], 80  }
  0xd1   : > { %5385 = vsyncadd (%p6638_p7), [#allocation14], 4294967216  ;;  %vm722_vm0 = vcmask 1041408   ;;  %v688_v0 = vld [vmem:[#allocation7 + $0x2] sm:$0x3]  ;;  %vm521_vm1 = vcmask 27648  }
  0xd2   : > { %4951 = vmatprep.subr.msk.bf16.mxu0 %vm722_vm0, %v688_v0  ;;  %v724_v1 = vsel %vm722_vm0, %v688_v0, 0  ;;  %v395_v2 = vld [vmem:[%s5723_s29 + $0x48] sm:$0xf]  ;;  %v397_v3 = vld [vmem:[%s5723_s29 + $0x50] sm:$0xf]  ;;  %v5417_v4 = vmov 0  }
  0xd3   : > { %4624 = vmatpush3.bf16.msra.mxu0 %v724_v1  ;;  %v467_v5 = vmax.bf16 %v5417_v4, %v395_v2  ;;  %v469_v6 = vmax.bf16 %v5417_v4, %v397_v3  ;;  %v677_v7 = vld [vmem:[#allocation7] sm:$0x3]  ;;  %v399_v8 = vld [vmem:[%s5723_s29 + $0x58] sm:$0xf]  ;;  %v403_v12 = vld [vmem:[%s5723_s29 + $0x68] sm:$0xf] }
  0xd4   : > { %v401_v9 = vld [vmem:[%s5723_s29 + $0x60] sm:$0xf]  ;;  %4952 = vmatprep.subr.msk.bf16.mxu0 %vm722_vm0, %v677_v7  ;;  %v471_v10 = vmax.bf16 %v5417_v4, %v399_v8  ;;  %v405_v13 = vld [vmem:[%s5723_s29 + $0x70] sm:$0xf]  ;;  %v475_v14 = vmax.bf16 %v5417_v4, %v403_v12  ;;  %v407_v16 = vld [vmem:[%s5723_s29 + $0x78] sm:$0xf] }
  0xd5   : > { %v473_v11 = vmax.bf16 %v5417_v4, %v401_v9  ;;  %561 = vst.msk [vmem:[#allocation2 + $0x48] sm:$0xf] %vm521_vm1, %v467_v5  ;;  %565 = vst.msk [vmem:[#allocation2 + $0x50] sm:$0xf] %vm521_vm1, %v469_v6  ;;  %v477_v15 = vmax.bf16 %v5417_v4, %v405_v13  ;;  %v409_v17 = vld [vmem:[%s5723_s29 + $0x80] sm:$0xf]  ;;  %v479_v19 = vmax.bf16 %v5417_v4, %v407_v16 }
  0xd6   : > { %v377_v18 = vld [vmem:[%s5723_s29] sm:$0xf]  ;;  %569 = vst.msk [vmem:[#allocation2 + $0x58] sm:$0xf] %vm521_vm1, %v471_v10  ;;  %v481_v20 = vmax.bf16 %v5417_v4, %v409_v17  ;;  %v379_v21 = vld [vmem:[%s5723_s29 + $0x8] sm:$0xf] }
  0xd7   : > { %573 = vst.msk [vmem:[#allocation2 + $0x60] sm:$0xf] %vm521_vm1, %v473_v11  ;;  %v449_v22 = vmax.bf16 %v5417_v4, %v377_v18  ;;  %v381_v23 = vld [vmem:[%s5723_s29 + $0x10] sm:$0xf]  ;;  %577 = vst.msk [vmem:[#allocation2 + $0x68] sm:$0xf] %vm521_vm1, %v475_v14  ;;  %v451_v24 = vmax.bf16 %v5417_v4, %v379_v21 }
  0xd8   : > { %581 = vst.msk [vmem:[#allocation2 + $0x70] sm:$0xf] %vm521_vm1, %v477_v15  ;;  %v1023_v25 = vld [vmem:[#allocation7 + $0x4] sm:$0x3]  ;;  %v383_v26 = vld [vmem:[%s5723_s29 + $0x18] sm:$0xf]  ;;  %v453_v27 = vmax.bf16 %v5417_v4, %v381_v23 }
  0xd9   : > { %v385_v28 = vld [vmem:[%s5723_s29 + $0x20] sm:$0xf]  ;;  %585 = vst.msk [vmem:[#allocation2 + $0x78] sm:$0xf] %vm521_vm1, %v479_v19  ;;  %589 = vst.msk [vmem:[#allocation2 + $0x80] sm:$0xf] %vm521_vm1, %v481_v20  ;;  %v455_v29 = vmax.bf16 %v5417_v4, %v383_v26 }
  0xda   : > { %522 = vst.msk [vmem:[#allocation2] sm:$0xf] %vm521_vm1, %v449_v22  ;;  %v387_v30 = vld [vmem:[%s5723_s29 + $0x28] sm:$0xf]  ;;  %v457_v31 = vmax.bf16 %v5417_v4, %v385_v28  ;;  %v389_v32 = vld [vmem:[%s5723_s29 + $0x30] sm:$0xf] }
  0xdb   : > { %v391_v33 = vld [vmem:[%s5723_s29 + $0x38] sm:$0xf]  ;;  %529 = vst.msk [vmem:[#allocation2 + $0x8] sm:$0xf] %vm521_vm1, %v451_v24  ;;  %533 = vst.msk [vmem:[#allocation2 + $0x10] sm:$0xf] %vm521_vm1, %v453_v27  ;;  %v459_v34 = vmax.bf16 %v5417_v4, %v387_v30  ;;  %v461_v35 = vmax.bf16 %v5417_v4, %v389_v32 }
  0xdc   : > { %v463_v36 = vmax.bf16 %v5417_v4, %v391_v33  ;;  %vm709_vm2 = vcmask 31744   ;;  %537 = vst.msk [vmem:[#allocation2 + $0x18] sm:$0xf] %vm521_vm1, %v455_v29  ;;  %541 = vst.msk [vmem:[#allocation2 + $0x20] sm:$0xf] %vm521_vm1, %v457_v31  ;;  %v824_v37 = vsel %vm722_vm0, %v677_v7, 0 }
  0xdd   : > { %v5791_v38 = vsel %vm722_vm0, %v1023_v25, 0  ;;  %545 = vst.msk [vmem:[#allocation2 + $0x28] sm:$0xf] %vm521_vm1, %v459_v34  ;;  %549 = vst.msk [vmem:[#allocation2 + $0x30] sm:$0xf] %vm521_vm1, %v461_v35  ;;  %vm523_vm3 = vcmask 24576  }
  0xde   : > { %553 = vst.msk [vmem:[#allocation2 + $0x38] sm:$0xf] %vm521_vm1, %v463_v36  ;;  %vm524_vm4 = vsmask.f32 256  ;;  %v5079_v39 = vld [vmem:[#allocation2 + $0x48] ss:$8 sps:$4 sm:$0xff]  }
  0xdf   : > { %v5080_v40 = vld [vmem:[#allocation2 + $0x58] ss:$8 sps:$4 sm:$0xff]   ;;  %4625 = vmatprep.mubr.msk.bf16.mxu0 %vm709_vm2, %v5079_v39  ;;  %v5081_v41 = vld [vmem:[#allocation2 + $0x68] ss:$8 sps:$4 sm:$0xff]   ;;  %vm5798_vm5 = vmand %vm523_vm3, %vm524_vm4  ;;  %vm907_vm6 = vsmask.f32 3328 }
  0xe0   : > { %4626 = vmatmul.mubr.msk.bf16.vlgmr.msra.gmra.mrb[0].mxu0 %vm709_vm2, %v5080_v40  ;;  %v378_v43 = vld [vmem:[%s5723_s29 + $0x4] sm:$0x1]  ;;  %v380_v44 = vld [vmem:[%s5723_s29 + $0xc] sm:$0x1]  ;;  %v398_v46 = vld [vmem:[%s5723_s29 + $0x54] sm:$0x1] }
  0xe1   : > { %4634 = vmatpush3.bf16.msra.mxu0 %v824_v37  ;;  %4629 = vmatprep.mubr.msk.bf16.mxu0 %vm709_vm2, %v5081_v41  ;;  %v396_v45 = vld [vmem:[%s5723_s29 + $0x4c] sm:$0x1]  ;;  %v400_v47 = vld [vmem:[%s5723_s29 + $0x5c] sm:$0x1]  ;;  %v402_v48 = vld [vmem:[%s5723_s29 + $0x64] sm:$0x1]  ;;  %v450_v57 = vmax.bf16 %v5417_v4, %v378_v43  ;;  %v452_v58 = vmax.bf16 %v5417_v4, %v380_v44  ;;  %v470_v63 = vmax.bf16 %v5417_v4, %v398_v46 }
  0xe2   : > { %4953 = vmatprep.subr.msk.bf16.mxu0 %vm722_vm0, %v1023_v25  ;;  %v404_v49 = vld [vmem:[%s5723_s29 + $0x6c] sm:$0x1]  ;;  %v406_v50 = vld [vmem:[%s5723_s29 + $0x74] sm:$0x1]  ;;  %v408_v51 = vld [vmem:[%s5723_s29 + $0x7c] sm:$0x1]  ;;  %v468_v62 = vmax.bf16 %v5417_v4, %v396_v45  ;;  %v472_v0 = vmax.bf16 %v5417_v4, %v400_v47  ;;  %v474_v1 = vmax.bf16 %v5417_v4, %v402_v48 }
  0xe3   : > { %v5082_v52 = vld [vmem:[#allocation2 + $0x78] ss:$8 sps:$4 sm:$0xff]   ;;  %v410_v54 = vld [vmem:[%s5723_s29 + $0x84] sm:$0x1]  ;;  %v412_v55 = vld [vmem:[%s5723_s29 + $0x8c] sm:$0x1]  ;;  %v476_v6 = vmax.bf16 %v5417_v4, %v404_v49  ;;  %v478_v7 = vmax.bf16 %v5417_v4, %v406_v50  ;;  %v480_v8 = vmax.bf16 %v5417_v4, %v408_v51 }
  0xe4   : > { %v5083_v53 = vld [vmem:[#allocation2] ss:$8 sps:$4 sm:$0xff]   ;;  %v430_v56 = vld [vmem:[%s5723_s29 + $0xd4] sm:$0x1]  ;;  %v432_v59 = vld [vmem:[%s5723_s29 + $0xdc] sm:$0x1]  ;;  %v482_v9 = vmax.bf16 %v5417_v4, %v410_v54  ;;  %v484_v13 = vmax.bf16 %v5417_v4, %v412_v55 }
  0xe5   : > { %v434_v60 = vld [vmem:[%s5723_s29 + $0xe4] sm:$0x1]  ;;  %v436_v61 = vld [vmem:[%s5723_s29 + $0xec] sm:$0x1]  ;;  %v438_v2 = vld [vmem:[%s5723_s29 + $0xf4] sm:$0x1]  ;;  %v502_v14 = vmax.bf16 %v5417_v4, %v430_v56  ;;  %v504_v15 = vmax.bf16 %v5417_v4, %v432_v59 }
  0xe6   : > { %v440_v3 = vld [vmem:[%s5723_s29 + $0xfc] sm:$0x1]  ;;  %v442_v5 = vld [vmem:[%s5723_s29 + $0x104] sm:$0x1]  ;;  %v444_v10 = vld [vmem:[%s5723_s29 + $0x10c] sm:$0x1]  ;;  %v506_v16 = vmax.bf16 %v5417_v4, %v434_v60  ;;  %v508_v17 = vmax.bf16 %v5417_v4, %v436_v61  ;;  %v5844_v18 = vmax.bf16 %v5417_v4, %v438_v2 }
  0xe7   : > { %v446_v11 = vld [vmem:[%s5723_s29 + $0x114] sm:$0x1]  ;;  %v448_v12 = vld [vmem:[%s5723_s29 + $0x11c] sm:$0x1]  ;;  %v5847_v19 = vmax.bf16 %v5417_v4, %v440_v3  ;;  %v5850_v20 = vmax.bf16 %v5417_v4, %v442_v5  ;;  %v5084_v24 = vld [vmem:[#allocation2 + $0x10] ss:$8 sps:$4 sm:$0xff]   ;;  %v5853_v25 = vmax.bf16 %v5417_v4, %v444_v10 }
  0xe8   : > { %4630 = vmatmul.mubr.msk.bf16.gmra.mrb[4].mxu0 %vm709_vm2, %v5082_v52  ;;  %v526_v21 = vld [vmem:[#allocation2 + $0x4] sm:$0x1]  ;;  %v530_v22 = vld [vmem:[#allocation2 + $0xc] sm:$0x1]  ;;  %v566_v29 = vld [vmem:[#allocation2 + $0x54] sm:$0x1]  ;;  %v518_v33 = vmax.bf16 %v5417_v4, %v446_v11  ;;  %v520_v41 = vmax.bf16 %v5417_v4, %v448_v12 }
  0xe9   : > { %4635 = vmatprep.mubr.msk.bf16.mxu0 %vm709_vm2, %v5083_v53  ;;  %v562_v23 = vld [vmem:[#allocation2 + $0x4c] sm:$0x1]  ;;  %v527_v26 = vsel %vm5798_vm5, %v450_v57, %v526_v21  ;;  %v531_v27 = vsel %vm5798_vm5, %v452_v58, %v530_v22  ;;  %v570_v30 = vld [vmem:[#allocation2 + $0x5c] sm:$0x1]  ;;  %v574_v31 = vld [vmem:[#allocation2 + $0x64] sm:$0x1]  ;;  %v567_v34 = vsel %vm5798_vm5, %v470_v63, %v566_v29 }
  0xea   : > { %v563_v28 = vsel %vm5798_vm5, %v468_v62, %v562_v23  ;;  %v5085_v32 = vld [vmem:[#allocation2 + $0x20] ss:$8 sps:$4 sm:$0xff]   ;;  %528 = vst [vmem:[#allocation2 + $0x4] sm:$0x1] %v527_v26  ;;  %532 = vst [vmem:[#allocation2 + $0xc] sm:$0x1] %v531_v27  ;;  %v571_v35 = vsel %vm5798_vm5, %v472_v0, %v570_v30  ;;  %v575_v36 = vsel %vm5798_vm5, %v474_v1, %v574_v31 }
  0xeb   : > { %564 = vst [vmem:[#allocation2 + $0x4c] sm:$0x1] %v563_v28  ;;  %v578_v37 = vld [vmem:[#allocation2 + $0x6c] sm:$0x1]  ;;  %v582_v39 = vld [vmem:[#allocation2 + $0x74] sm:$0x1] }
  0xec   : > { %v586_v40 = vld [vmem:[#allocation2 + $0x7c] sm:$0x1]  ;;  %vm908_vm7 = vsmask.f32 7440  ;;  %568 = vst [vmem:[#allocation2 + $0x54] sm:$0x1] %v567_v34  ;;  %v579_v43 = vsel %vm5798_vm5, %v476_v6, %v578_v37  ;;  %v583_v44 = vsel %vm5798_vm5, %v478_v7, %v582_v39 }
  0xed   : > { %572 = vst [vmem:[#allocation2 + $0x5c] sm:$0x1] %v571_v35  ;;  %576 = vst [vmem:[#allocation2 + $0x64] sm:$0x1] %v575_v36  ;;  %v587_v45 = vsel %vm5798_vm5, %v480_v8, %v586_v40  ;;  %v590_v46 = vld [vmem:[#allocation2 + $0x84] sm:$0x1] }
  0xee   : > { %v594_v47 = vld [vmem:[#allocation2 + $0x8c] sm:$0x1]  ;;  %v630_v48 = vld [vmem:[#allocation2 + $0xd4] sm:$0x1]  ;;  %580 = vst [vmem:[#allocation2 + $0x6c] sm:$0x1] %v579_v43  ;;  %v591_v49 = vsel %vm5798_vm5, %v482_v9, %v590_v46  ;;  %vm5915_vm8 = vmor %vm907_vm6, %vm908_vm7 }
  0xef   : > { %584 = vst [vmem:[#allocation2 + $0x74] sm:$0x1] %v583_v44  ;;  %588 = vst [vmem:[#allocation2 + $0x7c] sm:$0x1] %v587_v45  ;;  %v595_v50 = vsel %vm5798_vm5, %v484_v13, %v594_v47  ;;  %v631_v51 = vsel %vm5798_vm5, %v502_v14, %v630_v48  ;;  %v634_v52 = vld [vmem:[#allocation2 + $0xdc] sm:$0x1] }
  0xf0   : > { %v638_v53 = vld [vmem:[#allocation2 + $0xe4] sm:$0x1]  ;;  %v642_v54 = vld [vmem:[#allocation2 + $0xec] sm:$0x1]  ;;  %592 = vst [vmem:[#allocation2 + $0x84] sm:$0x1] %v591_v49  ;;  %v635_v55 = vsel %vm5798_vm5, %v504_v15, %v634_v52  ;;  %4636 = vmatmul.mubr.msk.bf16.vlgmr.msra.gmra.mrb[0].mxu0 %vm709_vm2, %v5084_v24 }
  0xf1   : > { %596 = vst [vmem:[#allocation2 + $0x8c] sm:$0x1] %v595_v50  ;;  %632 = vst [vmem:[#allocation2 + $0xd4] sm:$0x1] %v631_v51  ;;  %v639_v56 = vsel %vm5798_vm5, %v506_v16, %v638_v53  ;;  %v643_v57 = vsel %vm5798_vm5, %v508_v17, %v642_v54  ;;  %v646_v58 = vld [vmem:[#allocation2 + $0xf4] sm:$0x1]  ;;  %4644 = vmatpush3.bf16.msra.mxu0 %v5791_v38  ;;  %4639 = vmatprep.mubr.msk.bf16.mxu0 %vm709_vm2, %v5085_v32 }
  0xf2   : > { %v650_v59 = vld [vmem:[#allocation2 + $0xfc] sm:$0x1]  ;;  %v654_v60 = vld [vmem:[#allocation2 + $0x104] sm:$0x1]  ;;  %636 = vst [vmem:[#allocation2 + $0xdc] sm:$0x1] %v635_v55  ;;  %v647_v61 = vsel %vm5798_vm5, %v5844_v18, %v646_v58 }
  0xf3   : > { %640 = vst [vmem:[#allocation2 + $0xe4] sm:$0x1] %v639_v56  ;;  %644 = vst [vmem:[#allocation2 + $0xec] sm:$0x1] %v643_v57  ;;  %v651_v62 = vsel %vm5798_vm5, %v5847_v19, %v650_v59  ;;  %v655_v63 = vsel %vm5798_vm5, %v5850_v20, %v654_v60  ;;  %v658_v0 = vld [vmem:[#allocation2 + $0x10c] sm:$0x1] }
  0xf4   : > { %v662_v1 = vld [vmem:[#allocation2 + $0x114] sm:$0x1]  ;;  %v666_v2 = vld [vmem:[#allocation2 + $0x11c] sm:$0x1]  ;;  %648 = vst [vmem:[#allocation2 + $0xf4] sm:$0x1] %v647_v61  ;;  %v659_v3 = vsel %vm5798_vm5, %v5853_v25, %v658_v0 }
  0xf5   : > { %652 = vst [vmem:[#allocation2 + $0xfc] sm:$0x1] %v651_v62  ;;  %656 = vst [vmem:[#allocation2 + $0x104] sm:$0x1] %v655_v63  ;;  %v663_v5 = vsel %vm5798_vm5, %v518_v33, %v662_v1  ;;  %v667_v6 = vsel %vm5798_vm5, %v520_v41, %v666_v2  ;;  %v891_v7 = vld [vmem:[#allocation2] sm:$0xf] }
  0xf6   : > { %v893_v8 = vld [vmem:[#allocation2 + $0x8] sm:$0xf]  ;;  %v1134_v9 = vld [vmem:[#allocation7 + $0x6] sm:$0x3]  ;;  %660 = vst [vmem:[#allocation2 + $0x10c] sm:$0x1] %v659_v3 }
  0xf7   : > { %664 = vst [vmem:[#allocation2 + $0x114] sm:$0x1] %v663_v5  ;;  %668 = vst [vmem:[#allocation2 + $0x11c] sm:$0x1] %v667_v6  ;;  %v911_v10 = vshrl.u32 %v891_v7, 16  ;;  %v914_v11 = vshll.u32 %v891_v7, 16  ;;  %4954 = vmatprep.subr.msk.bf16.mxu0 %vm722_vm0, %v1134_v9 }
  0xf8   : > { %v925_v12 = vshrl.u32 %v893_v8, 16  ;;  %v928_v13 = vshll.u32 %v893_v8, 16  ;;  %v382_v14 = vld [vmem:[%s5723_s29 + $0x14] sm:$0x1]  ;;  %v5086_v15 = vld [vmem:[#allocation2 + $0x30] ss:$8 sps:$4 sm:$0xff]  }
  0xf9   : > { %v892_v16 = vld [vmem:[#allocation2 + $0x4] sm:$0x1]  ;;  %v894_v17 = vld [vmem:[#allocation2 + $0xc] sm:$0x1]  ;;  %v454_v19 = vmax.bf16 %v5417_v4, %v382_v14  ;;  %v913_v20 = vrot.slane %v911_v10, 4  ;;  %v916_v38 = vrot.slane %v914_v11, 5  ;;  %4640 = vmatmul.mubr.msk.bf16.gmra.mrb[4].mxu0 %vm709_vm2, %v5086_v15 }
  0xfa   : > { %v384_v18 = vld [vmem:[%s5723_s29 + $0x1c] sm:$0x1]  ;;  %v920_v21 = vshll.u32 %v892_v16, 16  ;;  %v927_v22 = vrot.slane %v925_v12, 4  ;;  %v534_v23 = vld [vmem:[#allocation2 + $0x14] sm:$0x1] }
  0xfb   : > { %v930_v24 = vrot.slane %v928_v13, 5  ;;  %v934_v25 = vshll.u32 %v894_v17, 16  ;;  %v456_v26 = vmax.bf16 %v5417_v4, %v384_v18  ;;  %v535_v27 = vsel %vm5798_vm5, %v454_v19, %v534_v23  ;;  %v538_v28 = vld [vmem:[#allocation2 + $0x1c] sm:$0x1]  ;;  %v895_v29 = vld [vmem:[#allocation2 + $0x10] sm:$0xf] }
  0xfc   : > { %v917_v30 = vor.u32 %v916_v38, %v913_v20  ;;  %v922_v31 = vrot.slane %v920_v21, 5  ;;  %536 = vst [vmem:[#allocation2 + $0x14] sm:$0x1] %v535_v27  ;;  %v897_v32 = vld [vmem:[#allocation2 + $0x18] sm:$0xf]  ;;  %v939_v33 = vshrl.u32 %v895_v29, 16 }
  0xfd   : > { %v942_v34 = vshll.u32 %v895_v29, 16  ;;  %v931_v36 = vor.u32 %v930_v24, %v927_v22  ;;  %v936_v37 = vrot.slane %v934_v25, 5  ;;  %v539_v39 = vsel %vm5798_vm5, %v456_v26, %v538_v28  ;;  %v386_v41 = vld [vmem:[%s5723_s29 + $0x24] sm:$0x1]  ;;  %v388_v43 = vld [vmem:[%s5723_s29 + $0x2c] sm:$0x1] }
  0xfe   : > { %v953_v40 = vshrl.u32 %v897_v32, 16  ;;  %v918_v44 = vrot.slane %v917_v30, 4  ;;  %540 = vst [vmem:[#allocation2 + $0x1c] sm:$0x1] %v539_v39  ;;  %v941_v45 = vrot.slane %v939_v33, 4  ;;  %v956_v47 = vshll.u32 %v897_v32, 16 }
  0xff   : > { %v944_v46 = vrot.slane %v942_v34, 5  ;;  %v542_v48 = vld [vmem:[#allocation2 + $0x24] sm:$0x1]  ;;  %v932_v49 = vrot.slane %v931_v36, 4  ;;  %v5925_v51 = vsel %vm722_vm0, %v1134_v9, 0  ;;  %v458_v52 = vmax.bf16 %v5417_v4, %v386_v41  ;;  %s5418_s8 = smov 4  }
 0x100   : > { %v955_v50 = vrot.slane %v953_v40, 4  ;;  %v546_v53 = vld [vmem:[#allocation2 + $0x2c] sm:$0x1]  ;;  %v923_v54 = vsel %vm5915_vm8, %v918_v44, %v922_v31  ;;  %v958_v56 = vrot.slane %v956_v47, 5  ;;  %v460_v57 = vmax.bf16 %v5417_v4, %v388_v43  ;;  %v899_v58 = vld [vmem:[#allocation2 + $0x20] sm:$0xf] }
 0x101   : > { %v945_v55 = vor.u32 %v944_v46, %v941_v45  ;;  %v901_v59 = vld [vmem:[#allocation2 + $0x28] sm:$0xf]  ;;  %v937_v60 = vsel %vm5915_vm8, %v932_v49, %v936_v37  ;;  %v543_v61 = vsel %vm5798_vm5, %v458_v52, %v542_v48  ;;  %v967_v62 = vshrl.u32 %v899_v58, 16  ;;  %v390_v0 = vld [vmem:[%s5723_s29 + $0x34] sm:$0x1]  ;;  %s4281_s28 = sshll.u32 %s5719_s16, 6 }
 0x102   : > { %v970_v63 = vshll.u32 %v899_v58, 16  ;;  %v392_v1 = vld [vmem:[%s5723_s29 + $0x3c] sm:$0x1]  ;;  %v4298_v2 = vcombine.low %v923_v54, %v937_v60  ;;  %v959_v5 = vor.u32 %v958_v56, %v955_v50  ;;  %544 = vst [vmem:[#allocation2 + $0x24] sm:$0x1] %v543_v61  ;;  %v547_v6 = vsel %vm5798_vm5, %v460_v57, %v546_v53  ;;  %s375_s17 = scalar_lea.vmem [#allocation16], %s4281_s28 }
 0x103   : > { %v946_v3 = vrot.slane %v945_v55, 4  ;;  %v550_v7 = vld [vmem:[#allocation2 + $0x34] sm:$0x1]  ;;  %v554_v8 = vld [vmem:[#allocation2 + $0x3c] sm:$0x1]  ;;  %v969_v10 = vrot.slane %v967_v62, 4  ;;  %v462_v16 = vmax.bf16 %v5417_v4, %v390_v0  ;;  %v464_v17 = vmax.bf16 %v5417_v4, %v392_v1 }
 0x104   : > { %v896_v9 = vld [vmem:[#allocation2 + $0x14] sm:$0x1]  ;;  %548 = vst [vmem:[#allocation2 + $0x2c] sm:$0x1] %v547_v6  ;;  %v972_v11 = vrot.slane %v970_v63, 5  ;;  %v981_v12 = vshrl.u32 %v901_v59, 16  ;;  %4645 = vmatprep.mubr.msk.bf16.mxu0 %vm709_vm2, %v4298_v2 }
 0x105   : > { %v984_v13 = vshll.u32 %v901_v59, 16  ;;  %v948_v14 = vshll.u32 %v896_v9, 16  ;;  %v960_v15 = vrot.slane %v959_v5, 4  ;;  %v903_v18 = vld [vmem:[#allocation2 + $0x30] sm:$0xf]  ;;  %v551_v26 = vsel %vm5798_vm5, %v462_v16, %v550_v7  ;;  %s4527_s13 = sshll.u32 %s5483_s30, 10 }
 0x106   : > { %v905_v19 = vld [vmem:[#allocation2 + $0x38] sm:$0xf]  ;;  %v898_v20 = vld [vmem:[#allocation2 + $0x1c] sm:$0x1]  ;;  %v973_v38 = vor.u32 %v972_v11, %v969_v10  ;;  %v983_v21 = vrot.slane %v981_v12, 4  ;;  %v995_v23 = vshrl.u32 %v903_v18, 16  ;;  %v555_v27 = vsel %vm5798_vm5, %v464_v17, %v554_v8  ;;  %s6558_s19 = scalar_lea.hbm %s6614_s7, %s4527_s13 }
 0x107   : > { %v986_v22 = vrot.slane %v984_v13, 5  ;;  %v950_v24 = vrot.slane %v948_v14, 5  ;;  %v962_v25 = vshll.u32 %v898_v20, 16  ;;  %v413_v28 = vld [vmem:[%s5723_s29 + $0x90] sm:$0xf]  ;;  %v998_v33 = vshll.u32 %v903_v18, 16 }
 0x108   : > { %v415_v29 = vld [vmem:[%s5723_s29 + $0x98] sm:$0xf]  ;;  %v974_v30 = vrot.slane %v973_v38, 4  ;;  %552 = vst [vmem:[#allocation2 + $0x34] sm:$0x1] %v551_v26  ;;  %v997_v32 = vrot.slane %v995_v23, 4  ;;  %v485_v45 = vmax.bf16 %v5417_v4, %v413_v28 }
 0x109   : > { %v987_v31 = vor.u32 %v986_v22, %v983_v21  ;;  %556 = vst [vmem:[#allocation2 + $0x3c] sm:$0x1] %v555_v27  ;;  %v951_v34 = vsel %vm5915_vm8, %v946_v3, %v950_v24  ;;  %v964_v36 = vrot.slane %v962_v25, 5  ;;  %v1009_v37 = vshrl.u32 %v905_v19, 16  ;;  %v417_v40 = vld [vmem:[%s5723_s29 + $0xa0] sm:$0xf] }
 0x10a   : > { %v1012_v39 = vshll.u32 %v905_v19, 16  ;;  %v900_v41 = vld [vmem:[#allocation2 + $0x24] sm:$0x1]  ;;  %v1000_v44 = vrot.slane %v998_v33, 5  ;;  %v487_v46 = vmax.bf16 %v5417_v4, %v415_v29  ;;  %v419_v47 = vld [vmem:[%s5723_s29 + $0xa8] sm:$0xf]  ;;  %v489_v58 = vmax.bf16 %v5417_v4, %v417_v40 }
 0x10b   : > { %v988_v43 = vrot.slane %v987_v31, 4  ;;  %v965_v48 = vsel %vm5915_vm8, %v960_v15, %v964_v36  ;;  %v902_v49 = vld [vmem:[#allocation2 + $0x2c] sm:$0x1]  ;;  %v976_v50 = vshll.u32 %v900_v41, 16  ;;  %v1011_v52 = vrot.slane %v1009_v37, 4  ;;  %s4134_s20 = sshll.u32 %s375_s17, 4  ;;  %s6560_s20 = int_to_ptr.vmem [resolvable:$true] %s4134_s20 }
 0x10c   : > { %v1014_v53 = vrot.slane %v1012_v39, 5  ;;  %v5956_v54 = vld [vmem:[#allocation7 + $0x8] sm:$0x3]  ;;  %v4299_v55 = vcombine.low %v951_v34, %v965_v48  ;;  %v990_v56 = vshll.u32 %v902_v49, 16  ;;  %v1001_v57 = vor.u32 %v1000_v44, %v997_v32  ;;  %597 = vst.msk [vmem:[#allocation2 + $0x90] sm:$0xf] %vm521_vm1, %v485_v45 }
 0x10d   : > { %601 = vst.msk [vmem:[#allocation2 + $0x98] sm:$0xf] %vm521_vm1, %v487_v46  ;;  %v421_v59 = vld [vmem:[%s5723_s29 + $0xb0] sm:$0xf]  ;;  %v423_v60 = vld [vmem:[%s5723_s29 + $0xb8] sm:$0xf]  ;;  %v491_v63 = vmax.bf16 %v5417_v4, %v419_v47 }
 0x10e   : > { %v978_v61 = vrot.slane %v976_v50, 5  ;;  %v1015_v62 = vor.u32 %v1014_v53, %v1011_v52  ;;  %v425_v0 = vld [vmem:[%s5723_s29 + $0xc0] sm:$0xf]  ;;  %v427_v1 = vld [vmem:[%s5723_s29 + $0xc8] sm:$0xf]  ;;  %4646 = vmatmul.mubr.msk.bf16.vlgmr.msra.gmra.mrb[0].mxu0 %vm709_vm2, %v4299_v55  ;;  %v992_v2 = vrot.slane %v990_v56, 5  ;;  %v493_v5 = vmax.bf16 %v5417_v4, %v421_v59 }
 0x10f   : > { %v1002_v3 = vrot.slane %v1001_v57, 4  ;;  %605 = vst.msk [vmem:[#allocation2 + $0xa0] sm:$0xf] %vm521_vm1, %v489_v58  ;;  %v495_v6 = vmax.bf16 %v5417_v4, %v423_v60  ;;  %v431_v7 = vld [vmem:[%s5723_s29 + $0xd8] sm:$0xf]  ;;  %4654 = vmatpush3.bf16.msra.mxu0 %v5925_v51  ;;  %v497_v13 = vmax.bf16 %v5417_v4, %v425_v0  ;;  %v499_v14 = vmax.bf16 %v5417_v4, %v427_v1  ;;  %s4121_s30 = scalar_lea.sflag [#allocation6], %s5719_s16 }
 0x110   : > { %v433_v8 = vld [vmem:[%s5723_s29 + $0xe0] sm:$0xf]  ;;  %v979_v9 = vsel %vm5915_vm8, %v974_v30, %v978_v61  ;;  %v904_v10 = vld [vmem:[#allocation2 + $0x34] sm:$0x1]  ;;  %v906_v11 = vld [vmem:[#allocation2 + $0x3c] sm:$0x1]  ;;  %v993_v15 = vsel %vm5915_vm8, %v988_v43, %v992_v2  ;;  %4955 = vmatprep.subr.msk.bf16.mxu0 %vm722_vm0, %v5956_v54  ;;  %v503_v51 = vmax.bf16 %v5417_v4, %v431_v7 }
 0x111   : > { %v1016_v12 = vrot.slane %v1015_v62, 4  ;;  %609 = vst.msk [vmem:[#allocation2 + $0xa8] sm:$0xf] %vm521_vm1, %v491_v63  ;;  %v1004_v16 = vshll.u32 %v904_v10, 16  ;;  %v1018_v17 = vshll.u32 %v906_v11, 16  ;;  %v4300_v19 = vcombine.low %v979_v9, %v993_v15  ;;  %s5326_s1 = scalar_lea.vmem %s6560_s20, 1024 }
 0x112   : > { %613 = vst.msk [vmem:[#allocation2 + $0xb0] sm:$0xf] %vm521_vm1, %v493_v5  ;;  %617 = vst.msk [vmem:[#allocation2 + $0xb8] sm:$0xf] %vm521_vm1, %v495_v6  ;;  %v435_v18 = vld [vmem:[%s5723_s29 + $0xe8] sm:$0xf]  ;;  %v505_v20 = vmax.bf16 %v5417_v4, %v433_v8  ;;  %p5327_p5 = scmp.ne.s32.totalorder %s6560_s20, %s5326_s1 }
 0x113   : > { %621 = vst.msk [vmem:[#allocation2 + $0xc0] sm:$0xf] %vm521_vm1, %v497_v13  ;;  %625 = vst.msk [vmem:[#allocation2 + $0xc8] sm:$0xf] %vm521_vm1, %v499_v14  ;;  %v437_v38 = vld [vmem:[%s5723_s29 + $0xf0] sm:$0xf]  ;;  %v507_v21 = vmax.bf16 %v5417_v4, %v435_v18  ;;  %4649 = vmatprep.mubr.msk.bf16.mxu0 %vm709_vm2, %v4300_v19 }
 0x114   : > { %v439_v22 = vld [vmem:[%s5723_s29 + $0xf8] sm:$0xf]  ;;  %v1006_v23 = vrot.slane %v1004_v16, 5  ;;  %v1020_v24 = vrot.slane %v1018_v17, 5  ;;  %633 = vst.msk [vmem:[#allocation2 + $0xd8] sm:$0xf] %vm521_vm1, %v503_v51  ;;  %v509_v25 = vmax.bf16 %v5417_v4, %v437_v38 }
 0x115   : > { %v441_v26 = vld [vmem:[%s5723_s29 + $0x100] sm:$0xf]  ;;  %v511_v27 = vmax.bf16 %v5417_v4, %v439_v22  ;;  %v443_v28 = vld [vmem:[%s5723_s29 + $0x108] sm:$0xf]  ;;  %637 = vst.msk [vmem:[#allocation2 + $0xe0] sm:$0xf] %vm521_vm1, %v505_v20 }
 0x116   : > { %v5087_v29 = vld [vmem:[#allocation2 + $0x90] ss:$8 sps:$4 sm:$0xff]   ;;  %641 = vst.msk [vmem:[#allocation2 + $0xe8] sm:$0xf] %vm521_vm1, %v507_v21  ;;  %v513_v30 = vmax.bf16 %v5417_v4, %v441_v26  ;;  %v515_v31 = vmax.bf16 %v5417_v4, %v443_v28  ;;  %v1007_v32 = vsel %vm5915_vm8, %v1002_v3, %v1006_v23  ;;  %v1021_v33 = vsel %vm5915_vm8, %v1016_v12, %v1020_v24  ;;  %v445_v34 = vld [vmem:[%s5723_s29 + $0x110] sm:$0xf] }
 0x117   : > { %645 = vst.msk [vmem:[#allocation2 + $0xf0] sm:$0xf] %vm521_vm1, %v509_v25  ;;  %649 = vst.msk [vmem:[#allocation2 + $0xf8] sm:$0xf] %vm521_vm1, %v511_v27  ;;  %v414_v36 = vld [vmem:[%s5723_s29 + $0x94] sm:$0x1]  ;;  %v4301_v39 = vcombine.low %v1007_v32, %v1021_v33  ;;  %v517_v40 = vmax.bf16 %v5417_v4, %v445_v34 }
 0x118   : > { %v416_v37 = vld [vmem:[%s5723_s29 + $0x9c] sm:$0x1]  ;;  %653 = vst.msk [vmem:[#allocation2 + $0x100] sm:$0xf] %vm521_vm1, %v513_v30  ;;  %657 = vst.msk [vmem:[#allocation2 + $0x108] sm:$0xf] %vm521_vm1, %v515_v31  ;;  %v486_v41 = vmax.bf16 %v5417_v4, %v414_v36 }
 0x119   : > { %v488_v43 = vmax.bf16 %v5417_v4, %v416_v37  ;;  %v598_v44 = vld [vmem:[#allocation2 + $0x94] sm:$0x1]  ;;  %v602_v45 = vld [vmem:[#allocation2 + $0x9c] sm:$0x1]  ;;  %v1362_v46 = vld [vmem:[#allocation2 + $0x90] sm:$0xf]  ;;  %4650 = vmatmul.mubr.msk.bf16.gmra.mrb[4].mxu0 %vm709_vm2, %v4301_v39 }
 0x11a   : > { %661 = vst.msk [vmem:[#allocation2 + $0x110] sm:$0xf] %vm521_vm1, %v517_v40  ;;  %v599_v47 = vsel %vm5798_vm5, %v486_v41, %v598_v44  ;;  %4655 = vmatprep.mubr.msk.bf16.mxu0 %vm709_vm2, %v5087_v29  ;;  %v1379_v49 = vshrl.u32 %v1362_v46, 16  ;;  %v1382_v50 = vshll.u32 %v1362_v46, 16  ;;  %v5088_v52 = vld [vmem:[#allocation2 + $0xa0] ss:$8 sps:$4 sm:$0xff]  }
 0x11b   : > { %v603_v48 = vsel %vm5798_vm5, %v488_v43, %v602_v45  ;;  %600 = vst [vmem:[#allocation2 + $0x94] sm:$0x1] %v599_v47  ;;  %v1364_v53 = vld [vmem:[#allocation2 + $0x98] sm:$0xf]  ;;  %v1287_v56 = vsel %vm722_vm0, %v5956_v54, 0  ;;  %vm2264_vm9 = vcmask 125952  }
 0x11c   : > { %604 = vst [vmem:[#allocation2 + $0x9c] sm:$0x1] %v603_v48  ;;  %v5089_v55 = vld [vmem:[#allocation2 + $0xb0] ss:$8 sps:$4 sm:$0xff]   ;;  %v1381_v58 = vrot.slane %v1379_v49, 4  ;;  %v1384_v59 = vrot.slane %v1382_v50, 5 }
 0x11d   : > { %v1491_v57 = vld [vmem:[#allocation7 + $0xa] sm:$0x3]  ;;  %v1393_v60 = vshrl.u32 %v1364_v53, 16  ;;  %v1396_v61 = vshll.u32 %v1364_v53, 16  ;;  %v418_v62 = vld [vmem:[%s5723_s29 + $0xa4] sm:$0x1] }
 0x11e   : > { %v490_v63 = vmax.bf16 %v5417_v4, %v418_v62  ;;  %v1385_v1 = vor.u32 %v1384_v59, %v1381_v58  ;;  %v420_v2 = vld [vmem:[%s5723_s29 + $0xac] sm:$0x1]  ;;  %v606_v3 = vld [vmem:[#allocation2 + $0xa4] sm:$0x1]  ;;  %v610_v7 = vld [vmem:[#allocation2 + $0xac] sm:$0x1] }
 0x11f   : > { %v492_v5 = vmax.bf16 %v5417_v4, %v420_v2  ;;  %v1366_v8 = vld [vmem:[#allocation2 + $0xa0] sm:$0xf]  ;;  %v1395_v10 = vrot.slane %v1393_v60, 4  ;;  %v1398_v11 = vrot.slane %v1396_v61, 5  ;;  %v1368_v12 = vld [vmem:[#allocation2 + $0xa8] sm:$0xf] }
 0x120   : > { %v607_v6 = vsel %vm5798_vm5, %v490_v63, %v606_v3  ;;  %v5090_v9 = vld [vmem:[#allocation2 + $0xc0] ss:$8 sps:$4 sm:$0xff]   ;;  %v6035_v14 = vsel %vm722_vm0, %v1491_v57, 0  ;;  %v422_v17 = vld [vmem:[%s5723_s29 + $0xb4] sm:$0x1]  ;;  %v6040_v51 = vrot.slane %v1385_v1, 4 }
 0x121   : > { %4656 = vmatmul.mubr.msk.bf16.vlgmr.msra.gmra.mrb[0].mxu0 %vm709_vm2, %v5088_v52  ;;  %608 = vst [vmem:[#allocation2 + $0xa4] sm:$0x1] %v607_v6  ;;  %v5091_v13 = vld [vmem:[#allocation2 + $0xd8] ss:$8 sps:$4 sm:$0xff]   ;;  %v611_v16 = vsel %vm5798_vm5, %v492_v5, %v610_v7  ;;  %v1407_v19 = vshrl.u32 %v1366_v8, 16  ;;  %v1410_v20 = vshll.u32 %v1366_v8, 16  ;;  %v494_v23 = vmax.bf16 %v5417_v4, %v422_v17 }
 0x122   : > { %4664 = vmatpush3.bf16.msra.mxu0 %v1287_v56  ;;  %4659 = vmatprep.mubr.msk.bf16.mxu0 %vm709_vm2, %v5089_v55  ;;  %v1363_v0 = vld [vmem:[#allocation2 + $0x94] sm:$0x1]  ;;  %612 = vst [vmem:[#allocation2 + $0xac] sm:$0x1] %v611_v16  ;;  %v424_v38 = vld [vmem:[%s5723_s29 + $0xbc] sm:$0x1]  ;;  %v1399_v26 = vor.u32 %v1398_v11, %v1395_v10 }
 0x123   : > { %4956 = vmatprep.subr.msk.bf16.mxu0 %vm722_vm0, %v1491_v57  ;;  %v1365_v54 = vld [vmem:[#allocation2 + $0x9c] sm:$0x1]  ;;  %v1388_v15 = vshll.u32 %v1363_v0, 16  ;;  %v1421_v21 = vshrl.u32 %v1368_v12, 16  ;;  %v1424_v22 = vshll.u32 %v1368_v12, 16  ;;  %v496_v27 = vmax.bf16 %v5417_v4, %v424_v38  ;;  %p6649_p9 = scmp.ne.s32.totalorder %s6627_s12, 0 }
 0x124   : > { %v1402_v18 = vshll.u32 %v1365_v54, 16  ;;  %v614_v24 = vld [vmem:[#allocation2 + $0xb4] sm:$0x1]  ;;  %v618_v25 = vld [vmem:[#allocation2 + $0xbc] sm:$0x1]  ;;  %v1409_v37 = vrot.slane %v1407_v19, 4 }
 0x125   : > { %v1370_v28 = vld [vmem:[#allocation2 + $0xb0] sm:$0xf]  ;;  %v1372_v29 = vld [vmem:[#allocation2 + $0xb8] sm:$0xf]  ;;  %v426_v30 = vld [vmem:[%s5723_s29 + $0xc4] sm:$0x1]  ;;  %v615_v32 = vsel %vm5798_vm5, %v494_v23, %v614_v24  ;;  %v619_v39 = vsel %vm5798_vm5, %v496_v27, %v618_v25  ;;  %p5328_p12 = pnand %p5327_p5, %p6649_p9 }
 0x126   : > { %v6047_v31 = vrot.slane %v1388_v15, 5  ;;  %v1435_v33 = vshrl.u32 %v1370_v28, 16  ;;  %v1438_v34 = vshll.u32 %v1370_v28, 16  ;;  %v428_v36 = vld [vmem:[%s5723_s29 + $0xcc] sm:$0x1]  ;;  %v1449_v40 = vshrl.u32 %v1372_v29, 16 }
 0x127   : > { %616 = vst [vmem:[#allocation2 + $0xb4] sm:$0x1] %v615_v32  ;;  %v1452_v41 = vshll.u32 %v1372_v29, 16  ;;  %v622_v43 = vld [vmem:[#allocation2 + $0xc4] sm:$0x1]  ;;  %v1412_v45 = vrot.slane %v1410_v20, 5  ;;  %v498_v48 = vmax.bf16 %v5417_v4, %v426_v30  ;;  %v500_v57 = vmax.bf16 %v5417_v4, %v428_v36  ;;  %p5329_p13 = pneg %p5328_p12 }
 0x128   : > { %v5092_v44 = vld [vmem:[#allocation2 + $0xe8] ss:$8 sps:$4 sm:$0xff]   ;;  %v1423_v46 = vrot.slane %v1421_v21, 4  ;;  %v1426_v47 = vrot.slane %v1424_v22, 5  ;;  %620 = vst [vmem:[#allocation2 + $0xbc] sm:$0x1] %v619_v39  ;;  %v1391_v15 = vsel %vm5915_vm8, %v6040_v51, %v6047_v31 }
 0x129   : > { %4660 = vmatmul.mubr.msk.bf16.gmra.mrb[4].mxu0 %vm709_vm2, %v5090_v9  ;;  %v626_v49 = vld [vmem:[#allocation2 + $0xcc] sm:$0x1]  ;;  %v5093_v50 = vld [vmem:[#allocation2 + $0xf8] ss:$8 sps:$4 sm:$0xff]   ;;  %v1404_v52 = vrot.slane %v1402_v18, 5  ;;  %v1437_v55 = vrot.slane %v1435_v33, 4  ;;  %v623_v61 = vsel %vm5798_vm5, %v498_v48, %v622_v43  ;;  %v1413_v2 = vor.u32 %v1412_v45, %v1409_v37 }
 0x12a   : > { %4665 = vmatprep.mubr.msk.bf16.mxu0 %vm709_vm2, %v5091_v13  ;;  %v1367_v53 = vld [vmem:[#allocation2 + $0xa4] sm:$0x1]  ;;  %v1440_v56 = vrot.slane %v1438_v34, 5  ;;  %v1369_v58 = vld [vmem:[#allocation2 + $0xac] sm:$0x1]  ;;  %v1451_v59 = vrot.slane %v1449_v40, 4  ;;  %v627_v63 = vsel %vm5798_vm5, %v500_v57, %v626_v49  ;;  %v1427_v54 = vor.u32 %v1426_v47, %v1423_v46 }
 0x12b   : > { %v1454_v60 = vrot.slane %v1452_v41, 5  ;;  %v1374_v62 = vld [vmem:[#allocation2 + $0xc0] sm:$0xf]  ;;  %624 = vst [vmem:[#allocation2 + $0xc4] sm:$0x1] %v623_v61  ;;  %v1400_v1 = vrot.slane %v1399_v26, 4 }
 0x12c   : > { %v1376_v0 = vld [vmem:[#allocation2 + $0xc8] sm:$0xf]  ;;  %v1416_v3 = vshll.u32 %v1367_v53, 16  ;;  %628 = vst [vmem:[#allocation2 + $0xcc] sm:$0x1] %v627_v63  ;;  %v1430_v6 = vshll.u32 %v1369_v58, 16  ;;  %v1441_v7 = vor.u32 %v1440_v56, %v1437_v55 }
 0x12d   : > { %v1602_v5 = vld [vmem:[#allocation7 + $0xc] sm:$0x3]  ;;  %v1463_v8 = vshrl.u32 %v1374_v62, 16  ;;  %v1466_v9 = vshll.u32 %v1374_v62, 16  ;;  %v1455_v11 = vor.u32 %v1454_v60, %v1451_v59  ;;  %v1477_v12 = vshrl.u32 %v1376_v0, 16  ;;  %s5419_s23 = smov [#allocation16]  }
 0x12e   : > { %v1371_v10 = vld [vmem:[#allocation2 + $0xb4] sm:$0x1]  ;;  %v1480_v13 = vshll.u32 %v1376_v0, 16  ;;  %v5094_v18 = vld [vmem:[#allocation2 + $0x108] ss:$8 sps:$4 sm:$0xff]   ;;  %v1405_v19 = vsel %vm5915_vm8, %v1400_v1, %v1404_v52  ;;  %v1414_v20 = vrot.slane %v1413_v2, 4 }
 0x12f   : > { %v1373_v16 = vld [vmem:[#allocation2 + $0xbc] sm:$0x1]  ;;  %v1444_v17 = vshll.u32 %v1371_v10, 16  ;;  %v1428_v38 = vrot.slane %v1427_v54, 4  ;;  %v1442_v22 = vrot.slane %v1441_v7, 4  ;;  %v1465_v23 = vrot.slane %v1463_v8, 4 }
 0x130   : > { %v1458_v21 = vshll.u32 %v1373_v16, 16  ;;  %v1468_v24 = vrot.slane %v1466_v9, 5  ;;  %v1432_v25 = vrot.slane %v1430_v6, 5  ;;  %v1456_v26 = vrot.slane %v1455_v11, 4  ;;  %v393_v28 = vld [vmem:[%s5723_s29 + $0x40] sm:$0xf] }
 0x131   : > { %4666 = vmatmul.mubr.msk.bf16.vlgmr.msra.gmra.mrb[0].mxu0 %vm709_vm2, %v5092_v44  ;;  %v1479_v27 = vrot.slane %v1477_v12, 4  ;;  %v1482_v51 = vrot.slane %v1480_v13, 5  ;;  %v4322_v29 = vcombine.low %v1391_v15, %v1405_v19  ;;  %v1446_v30 = vrot.slane %v1444_v17, 5  ;;  %v411_v46 = vld [vmem:[%s5723_s29 + $0x88] sm:$0xf]  ;;  %s5330_s10 = sshll.u32 %s5419_s23, 4  ;;  %s5331_s10 = int_to_ptr.vmem [resolvable:$false] %s5330_s10 }
 0x132   : > { %4674 = vmatpush3.bf16.msra.mxu0 %v6035_v14  ;;  %4669 = vmatprep.mubr.msk.bf16.mxu0 %vm709_vm2, %v5093_v50  ;;  %v1418_v14 = vrot.slane %v1416_v3, 5  ;;  %v1460_v31 = vrot.slane %v1458_v21, 5  ;;  %v1375_v32 = vld [vmem:[#allocation2 + $0xc4] sm:$0x1]  ;;  %v465_v33 = vmax.bf16 %v5417_v4, %v393_v28  ;;  %v1469_v37 = vor.u32 %v1468_v24, %v1465_v23  ;;  %v1721_v57 = vld [vmem:[#allocation7 + $0xe] sm:$0x3]  ;;  %p5333_p1 = scmp.lt.s32.totalorder %s6560_s20, %s5331_s10 }
 0x133   : > { %4957 = vmatprep.subr.msk.bf16.mxu0 %vm722_vm0, %v1602_v5  ;;  %v1377_v34 = vld [vmem:[#allocation2 + $0xcc] sm:$0x1]  ;;  %v1433_v39 = vsel %vm5915_vm8, %v1428_v38, %v1432_v25  ;;  %v1472_v40 = vshll.u32 %v1375_v32, 16  ;;  %v1483_v41 = vor.u32 %v1482_v51, %v1479_v27  ;;  %v1447_v44 = vsel %vm5915_vm8, %v1442_v22, %v1446_v30  ;;  %v5095_v61 = vld [vmem:[#allocation2 + $0x8] ss:$8 sps:$4 sm:$0xff]   ;;  %s5332_s9 = scalar_lea.vmem %s5331_s10, 2048 }
 0x134   : > { %557 = vst.msk [vmem:[#allocation2 + $0x40] sm:$0xf] %vm521_vm1, %v465_v33  ;;  %v1419_v36 = vsel %vm5915_vm8, %v1414_v20, %v1418_v14  ;;  %v1486_v43 = vshll.u32 %v1377_v34, 16  ;;  %v1461_v45 = vsel %vm5915_vm8, %v1456_v26, %v1460_v31  ;;  %v483_v47 = vmax.bf16 %v5417_v4, %v411_v46  ;;  %v394_v62 = vld [vmem:[%s5723_s29 + $0x44] sm:$0x1]  ;;  %p5334_p3 = scmp.lt.s32.totalorder %s5332_s9, %s5326_s1 }
 0x135   : > { %v4323_v48 = vcombine.low %v1419_v36, %v1433_v39  ;;  %v1470_v49 = vrot.slane %v1469_v37, 4  ;;  %v4324_v50 = vcombine.low %v1447_v44, %v1461_v45  ;;  %v1474_v52 = vrot.slane %v1472_v40, 5  ;;  %v558_v63 = vld [vmem:[#allocation2 + $0x44] sm:$0x1]  ;;  %v1830_v2 = vld [vmem:[#allocation2 + $0x8] sm:$0xf] }
 0x136   : > { %v1484_v53 = vrot.slane %v1483_v41, 4  ;;  %v1488_v55 = vrot.slane %v1486_v43, 5  ;;  %593 = vst.msk [vmem:[#allocation2 + $0x88] sm:$0xf] %vm521_vm1, %v483_v47  ;;  %v1636_v56 = vsel %vm722_vm0, %v1602_v5, 0  ;;  %v466_v0 = vmax.bf16 %v5417_v4, %v394_v62  ;;  %p5335_p2 = por %p5334_p3, %p5333_p1 }
 0x137   : > { %v1475_v58 = vsel %vm5915_vm8, %v1470_v49, %v1474_v52  ;;  %v1755_v1 = vsel %vm722_vm0, %v1721_v57, 0  ;;  %v5096_v54 = vld [vmem:[#allocation2 + $0x18] ss:$8 sps:$4 sm:$0xff]   ;;  %v5097_v5 = vld [vmem:[#allocation2 + $0x28] ss:$8 sps:$4 sm:$0xff]   ;;  %v1847_v8 = vshrl.u32 %v1830_v2, 16 }
 0x138   : > { %v1489_v59 = vsel %vm5915_vm8, %v1484_v53, %v1488_v55  ;;  %v559_v3 = vsel %vm5798_vm5, %v466_v0, %v558_v63  ;;  %v1959_v6 = vld [vmem:[#allocation7 + $0x10] sm:$0x3]  ;;  %v1832_v7 = vld [vmem:[#allocation2 + $0x10] sm:$0xf]  ;;  %v1850_v9 = vshll.u32 %v1830_v2, 16  ;;  %vm2266_vm10 = vcmask 122880   ;;  %p5336_p8 = pnand %p5335_p2, %p5329_p13 }
 0x139   : > { %4670 = vmatmul.mubr.msk.bf16.gmra.mrb[4].mxu0 %vm709_vm2, %v5094_v18  ;;  %v4325_v60 = vcombine.low %v1475_v58, %v1489_v59  ;;  %560 = vst [vmem:[#allocation2 + $0x44] sm:$0x1] %v559_v3  ;;  %v1861_v10 = vshrl.u32 %v1832_v7, 16  ;;  %v1864_v11 = vshll.u32 %v1832_v7, 16  ;;  %v1831_v12 = vld [vmem:[#allocation2 + $0xc] sm:$0x1] }
 0x13a   : > { %4675 = vmatprep.mubr.msk.bf16.mxu0 %vm709_vm2, %v4322_v29  ;;  %v1833_v42 = vld [vmem:[#allocation2 + $0x14] sm:$0x1]  ;;  %v1834_v15 = vld [vmem:[#allocation2 + $0x18] sm:$0xf]  ;;  %v1849_v17 = vrot.slane %v1847_v8, 4  ;;  %v1852_v18 = vrot.slane %v1850_v9, 5 }
 0x13b   : > { %v5098_v13 = vld [vmem:[#allocation2 + $0x38] ss:$8 sps:$4 sm:$0xff]   ;;  %v1863_v19 = vrot.slane %v1861_v10, 4  ;;  %v1866_v20 = vrot.slane %v1864_v11, 5  ;;  %v1856_v21 = vshll.u32 %v1831_v12, 16  ;;  %v1870_v22 = vshll.u32 %v1833_v42, 16 }
 0x13c   : > { %v5099_v16 = vld [vmem:[#allocation2 + $0x50] ss:$8 sps:$4 sm:$0xff]   ;;  %v1836_v38 = vld [vmem:[#allocation2 + $0x20] sm:$0xf]  ;;  %v1853_v14 = vor.u32 %v1852_v18, %v1849_v17  ;;  %v1875_v23 = vshrl.u32 %v1834_v15, 16  ;;  %v1878_v27 = vshll.u32 %v1834_v15, 16 }
 0x13d   : > { %v1838_v24 = vld [vmem:[#allocation2 + $0x28] sm:$0xf]  ;;  %v1840_v25 = vld [vmem:[#allocation2 + $0x30] sm:$0xf]  ;;  %v1867_v26 = vor.u32 %v1866_v20, %v1863_v19  ;;  %v1889_v51 = vshrl.u32 %v1836_v38, 16  ;;  %v1892_v28 = vshll.u32 %v1836_v38, 16 }
 0x13e   : > { %v5100_v29 = vld [vmem:[#allocation2 + $0x60] ss:$8 sps:$4 sm:$0xff]   ;;  %v1903_v30 = vshrl.u32 %v1838_v24, 16  ;;  %v1906_v31 = vshll.u32 %v1838_v24, 16  ;;  %v1917_v32 = vshrl.u32 %v1840_v25, 16  ;;  %v1920_v33 = vshll.u32 %v1840_v25, 16 }
 0x13f   : > { %v1854_v34 = vrot.slane %v1853_v14, 4  ;;  %v1858_v36 = vrot.slane %v1856_v21, 5  ;;  %v1872_v37 = vrot.slane %v1870_v22, 5  ;;  %v1835_v39 = vld [vmem:[#allocation2 + $0x1c] sm:$0x1]  ;;  %v1877_v40 = vrot.slane %v1875_v23, 4 }
 0x140   : > { %v1868_v41 = vrot.slane %v1867_v26, 4  ;;  %v1837_v43 = vld [vmem:[#allocation2 + $0x24] sm:$0x1]  ;;  %v1880_v44 = vrot.slane %v1878_v27, 5  ;;  %v1891_v45 = vrot.slane %v1889_v51, 4  ;;  %v1894_v46 = vrot.slane %v1892_v28, 5 }
 0x141   : > { %4676 = vmatmul.mubr.msk.bf16.vlgmr.msra.gmra.mrb[0].mxu0 %vm709_vm2, %v4323_v48  ;;  %v1985_v47 = vsel %vm722_vm0, %v1959_v6, 0  ;;  %v5101_v48 = vld [vmem:[#allocation2 + $0x70] ss:$8 sps:$4 sm:$0xff]   ;;  %v1908_v52 = vrot.slane %v1906_v31, 5  ;;  %v1919_v53 = vrot.slane %v1917_v32, 4  ;;  %v1922_v55 = vrot.slane %v1920_v33, 5 }
 0x142   : > { %4684 = vmatpush3.bf16.msra.mxu0 %v1636_v56  ;;  %4679 = vmatprep.mubr.msk.bf16.mxu0 %vm709_vm2, %v4324_v50  ;;  %v1842_v49 = vld [vmem:[#allocation2 + $0x38] sm:$0xf]  ;;  %v1905_v50 = vrot.slane %v1903_v30, 4  ;;  %v1844_v56 = vld [vmem:[#allocation2 + $0x40] sm:$0xf]  ;;  %v1898_v58 = vshll.u32 %v1837_v43, 16  ;;  %v1873_v62 = vsel %vm5915_vm8, %v1868_v41, %v1872_v37  ;;  %v1881_v63 = vor.u32 %v1880_v44, %v1877_v40 }
 0x143   : > { %4958 = vmatprep.subr.msk.bf16.mxu0 %vm722_vm0, %v1721_v57  ;;  %v1884_v57 = vshll.u32 %v1835_v39, 16  ;;  %v1839_v59 = vld [vmem:[#allocation2 + $0x2c] sm:$0x1]  ;;  %v1895_v0 = vor.u32 %v1894_v46, %v1891_v45  ;;  %v1934_v2 = vshll.u32 %v1842_v49, 16  ;;  %v1945_v3 = vshrl.u32 %v1844_v56, 16  ;;  %v5103_v41 = vld [vmem:[#allocation12 + $0x8] sm:$0xff]  }
 0x144   : > { %v1923_v7 = vor.u32 %v1922_v55, %v1919_v53  ;;  %v5102_v10 = vld [vmem:[#allocation2 + $0x80] ss:$8 sps:$4 sm:$0xff]   ;;  %v1882_v12 = vrot.slane %v1881_v63, 4  ;;  %v1900_v42 = vrot.slane %v1898_v58, 5  ;;  %v1843_v15 = vld [vmem:[#allocation2 + $0x3c] sm:$0x1]  ;;  %4813 = vmatprep.subr.bf16.mxu1 %v5103_v41 }
 0x145   : > { %v1886_v9 = vrot.slane %v1884_v57, 5  ;;  %v1936_v17 = vrot.slane %v1934_v2, 5  ;;  %v1947_v18 = vrot.slane %v1945_v3, 4  ;;  %v1845_v22 = vld [vmem:[#allocation2 + $0x44] sm:$0x1]  ;;  %v1940_v24 = vshll.u32 %v1843_v15, 16  ;;  %4814 = vmatpush3.bf16.msra.mxu1 %v5103_v41 }
 0x146   : > { %v1924_v21 = vrot.slane %v1923_v7, 4  ;;  %v1954_v51 = vshll.u32 %v1845_v22, 16  ;;  %2282 = vst.msk [vmem:[#allocation3] sm:$0xf] %vm2264_vm9, %v5417_v4  ;;  %2285 = vst.msk [vmem:[#allocation3 + $0x48] sm:$0xf] %vm2264_vm9, %v5417_v4 }
 0x147   : > { %v1887_v23 = vsel %vm5915_vm8, %v1882_v12, %v1886_v9  ;;  %v1942_v31 = vrot.slane %v1940_v24, 5  ;;  %2283 = vst.msk [vmem:[#allocation3 + $0x4] sm:$0x1] %vm2266_vm10, %v5417_v4  ;;  %2286 = vst.msk [vmem:[#allocation3 + $0x4c] sm:$0x1] %vm2266_vm10, %v5417_v4  ;;  %v6139_v43 = vld [vmem:[#allocation12] sm:$0xff]  }
 0x148   : > { %4723 = vmatprep.subr.bf16.mxu1 %v6139_v43  ;;  %v4485_v44 = vld [vmem:[%s5723_s29 + $0x8] sm:$0xf]  ;;  %v4486_v45 = vld [vmem:[%s5723_s29 + $0xc] sm:$0x1]  ;;  %v4487_v46 = vld [vmem:[%s5723_s29 + $0x10] sm:$0xf] }
 0x149   : > { %4680 = vmatmul.mubr.msk.bf16.gmra.mrb[4].mxu0 %vm709_vm2, %v4325_v60  ;;  %v1841_v60 = vld [vmem:[#allocation2 + $0x34] sm:$0x1]  ;;  %v3864_v4 = vshll.u32 %v4487_v46, 16  ;;  %v4490_v2 = vld [vmem:[%s5723_s29 + $0x1c] sm:$0x1]  ;;  %vm2186_vm11 = vcmask 1040384  }
 0x14a   : > { %4685 = vmatprep.mubr.msk.bf16.mxu0 %vm709_vm2, %v5095_v61  ;;  %v1859_v61 = vsel %vm5915_vm8, %v1854_v34, %v1858_v36  ;;  %v1926_v8 = vshll.u32 %v1841_v60, 16  ;;  %v1956_v36 = vrot.slane %v1954_v51, 5  ;;  %v3884_v9 = vshll.u32 %v4490_v2, 16  ;;  %v4493_v12 = vld [vmem:[%s5723_s29 + $0x28] sm:$0xf]  ;;  %vm6198_vm14 = vmand %vm2186_vm11, %vm524_vm4 }
 0x14b   : > { %v4346_v11 = vcombine.low %v1859_v61, %v1873_v62  ;;  %v3866_v58 = vrot.slane %v3864_v4, 5  ;;  %v3906_v24 = vshll.u32 %v4493_v12, 16  ;;  %vm2196_vm12 = vcmask 1044480  }
 0x14c   : > { %v1928_v14 = vrot.slane %v1926_v8, 5  ;;  %vm2197_vm13 = vsmask.f32 4352  ;;  %vm2643_vm1 = vcmask 1042432   ;;  %vm2644_vm3 = vcmask 1046532  }
 0x14d   : > { %vm6205_vm15 = vmand %vm2196_vm12, %vm2197_vm13  ;;  %vm4020_vm5 = vcmask 1043456   ;;  %vm4011_vm6 = vcmask 64512  }
 0x14e   : > { %vm6346_vm4 = vmor %vm2643_vm1, %vm2644_vm3 }
 0x151   : > { %4686 = vmatmul.mubr.msk.bf16.vlgmr.msra.gmra.mrb[0].mxu0 %vm709_vm2, %v5096_v54  ;;  %v1948_v54 = vshll.u32 %v1844_v56, 16 }
 0x152   : > { %4694 = vmatpush3.bf16.msra.mxu0 %v1755_v1  ;;  %4689 = vmatprep.mubr.msk.bf16.mxu0 %vm709_vm2, %v5097_v5  ;;  %v1931_v1 = vshrl.u32 %v1842_v49, 16  ;;  %v1909_v5 = vor.u32 %v1908_v52, %v1905_v50  ;;  %v3850_v49 = vshll.u32 %v4485_v44, 16  ;;  %v3856_v50 = vshll.u32 %v4486_v45, 16  ;;  %v4499_v45 = vld [vmem:[%s5723_s29 + $0x40] sm:$0xf] }
 0x153   : > { %4959 = vmatprep.subr.msk.bf16.mxu0 %vm722_vm0, %v1959_v6  ;;  %v1912_v6 = vshll.u32 %v1839_v59, 16  ;;  %v1950_v19 = vrot.slane %v1948_v54, 5  ;;  %v3861_v52 = vshrl.u32 %v4487_v46, 16  ;;  %v4491_v54 = vld [vmem:[%s5723_s29 + $0x20] sm:$0xf]  ;;  %vm2438_vm0 = vcmask 130048  }
 0x154   : > { %v1910_v20 = vrot.slane %v1909_v5, 4  ;;  %v3852_v56 = vrot.slane %v3850_v49, 5  ;;  %v3858_v60 = vrot.slane %v3856_v50, 5  ;;  %v4492_v5 = vld [vmem:[%s5723_s29 + $0x24] sm:$0x1] }
 0x155   : > { %v1914_v38 = vrot.slane %v1912_v6, 5  ;;  %v1951_v27 = vor.u32 %v1950_v19, %v1947_v18  ;;  %v3863_v57 = vrot.slane %v3861_v52, 4  ;;  %v3886_v18 = vrot.slane %v3884_v9, 5  ;;  %v4500_v49 = vld [vmem:[%s5723_s29 + $0x44] sm:$0x1] }
 0x157   : > { %v1915_v28 = vsel %vm5915_vm8, %v1910_v20, %v1914_v38  ;;  %v1952_v34 = vrot.slane %v1951_v27, 4  ;;  %v3867_v61 = vor.u32 %v3866_v58, %v3863_v57  ;;  %v4495_v38 = vld [vmem:[%s5723_s29 + $0x30] sm:$0xf] }
 0x158   : > { %v3917_v51 = vshrl.u32 %v4495_v38, 16 }
 0x159   : > { %4690 = vmatmul.mubr.msk.bf16.gmra.mrb[4].mxu0 %vm709_vm2, %v5098_v13  ;;  %v1896_v13 = vrot.slane %v1895_v0, 4  ;;  %v1957_v39 = vsel %vm5915_vm8, %v1952_v34, %v1956_v36  ;;  %v3868_v0 = vrot.slane %v3867_v61, 4 }
 0x15a   : > { %4695 = vmatprep.mubr.msk.bf16.mxu0 %vm709_vm2, %v5099_v16  ;;  %v1933_v16 = vrot.slane %v1931_v1, 4  ;;  %v4489_v1 = vld [vmem:[%s5723_s29 + $0x18] sm:$0xf]  ;;  %v3919_v34 = vrot.slane %v3917_v51, 4 }
 0x15b   : > { %v1901_v25 = vsel %vm5915_vm8, %v1896_v13, %v1900_v42  ;;  %v3875_v6 = vshrl.u32 %v4489_v1, 16  ;;  %v3878_v7 = vshll.u32 %v4489_v1, 16 }
 0x15c   : > { %v1937_v26 = vor.u32 %v1936_v17, %v1933_v16  ;;  %v4347_v30 = vcombine.low %v1887_v23, %v1901_v25  ;;  %v3898_v16 = vshll.u32 %v4492_v5, 16  ;;  %v4494_v17 = vld [vmem:[%s5723_s29 + $0x2c] sm:$0x1]  ;;  %v4496_v23 = vld [vmem:[%s5723_s29 + $0x34] sm:$0x1] }
 0x15d   : > { %v3877_v42 = vrot.slane %v3875_v6, 4  ;;  %v3880_v15 = vrot.slane %v3878_v7, 5  ;;  %v3912_v25 = vshll.u32 %v4494_v17, 16 }
 0x15e   : > { %v1938_v33 = vrot.slane %v1937_v26, 4  ;;  %v3900_v22 = vrot.slane %v3898_v16, 5 }
 0x160   : > { %v1943_v37 = vsel %vm5915_vm8, %v1938_v33, %v1942_v31  ;;  %v3926_v31 = vshll.u32 %v4496_v23, 16  ;;  %v3914_v33 = vrot.slane %v3912_v25, 5 }
 0x161   : > { %4696 = vmatmul.mubr.msk.bf16.vlgmr.msra.gmra.mrb[0].mxu0 %vm709_vm2, %v5100_v29  ;;  %v1929_v29 = vsel %vm5915_vm8, %v1924_v21, %v1928_v14  ;;  %v4349_v40 = vcombine.low %v1943_v37, %v1957_v39  ;;  %v3903_v21 = vshrl.u32 %v4493_v12, 16  ;;  %v3881_v14 = vor.u32 %v3880_v15, %v3877_v42  ;;  %v4497_v37 = vld [vmem:[%s5723_s29 + $0x38] sm:$0xf]  ;;  %v6180_v42 = vld [vmem:[#allocation3] sm:$0xf] }
 0x162   : > { %4704 = vmatpush3.bf16.msra.mxu0 %v1985_v47  ;;  %4699 = vmatprep.mubr.msk.bf16.mxu0 %vm709_vm2, %v5101_v48  ;;  %v4348_v32 = vcombine.low %v1915_v28, %v1929_v29  ;;  %v4488_v47 = vld [vmem:[%s5723_s29 + $0x14] sm:$0x1]  ;;  %v3847_v48 = vshrl.u32 %v4485_v44, 16  ;;  %v3920_v28 = vshll.u32 %v4495_v38, 16  ;;  %v4498_v44 = vld [vmem:[%s5723_s29 + $0x3c] sm:$0x1] }
 0x163   : > { %4713 = vmatprep.subr.bf16.mxu0 %v5103_v41  ;;  %v3870_v53 = vshll.u32 %v4488_v47, 16  ;;  %v3905_v27 = vrot.slane %v3903_v21, 4  ;;  %v3882_v29 = vrot.slane %v3881_v14, 4  ;;  %v3931_v46 = vshrl.u32 %v4497_v37, 16 }
 0x164   : > { %v3849_v55 = vrot.slane %v3847_v48, 4  ;;  %v3922_v36 = vrot.slane %v3920_v28, 5  ;;  %v3934_v50 = vshll.u32 %v4497_v37, 16  ;;  %v3940_v52 = vshll.u32 %v4498_v44, 16 }
 0x165   : > { %v3872_v62 = vrot.slane %v3870_v53, 5  ;;  %v3887_v39 = vsel %vm5915_vm8, %v3882_v29, %v3886_v18  ;;  %v2306_v21 = vshrl.u32 %v6180_v42, 16  ;;  %v2309_v23 = vshll.u32 %v6180_v42, 16  ;;  %v6188_v29 = vld [vmem:[#allocation3 + $0x4] sm:$0x1] }
 0x166   : > { %v3853_v59 = vor.u32 %v3852_v56, %v3849_v55  ;;  %v3923_v48 = vor.u32 %v3922_v36, %v3919_v34  ;;  %v3933_v55 = vrot.slane %v3931_v46, 4  ;;  %v3945_v56 = vshrl.u32 %v4499_v45, 16 }
 0x167   : > { %v3873_v8 = vsel %vm5915_vm8, %v3868_v0, %v3872_v62  ;;  %v3936_v58 = vrot.slane %v3934_v50, 5  ;;  %v3954_v62 = vshll.u32 %v4500_v49, 16  ;;  %v3942_v1 = vrot.slane %v3940_v52, 5 }
 0x168   : > { %v3854_v63 = vrot.slane %v3853_v59, 4  ;;  %v3924_v57 = vrot.slane %v3923_v48, 4  ;;  %v3948_v59 = vshll.u32 %v4499_v45, 16  ;;  %v3947_v61 = vrot.slane %v3945_v56, 4 }
 0x169   : > { %4700 = vmatmul.mubr.msk.bf16.gmra.mrb[4].mxu0 %vm709_vm2, %v5102_v10  ;;  %v3889_v10 = vshrl.u32 %v4491_v54, 16  ;;  %v3937_v0 = vor.u32 %v3936_v58, %v3933_v55  ;;  %v3956_v6 = vrot.slane %v3954_v62, 5  ;;  %v6192_v34 = vrot.slane %v2309_v23, 5 }
 0x16a   : > { %4705 = vmatprep.mubr.msk.bf16.mxu0 %vm709_vm2, %v4346_v11  ;;  %v3859_v3 = vsel %vm5915_vm8, %v3854_v63, %v3858_v60  ;;  %v3892_v11 = vshll.u32 %v4491_v54, 16  ;;  %v3950_v2 = vrot.slane %v3948_v59, 5  ;;  %v2315_v36 = vshll.u32 %v6188_v29, 16 }
 0x16b   : > { %v4505_v13 = vcombine.low %v3859_v3, %v3873_v8  ;;  %v3891_v19 = vrot.slane %v3889_v10, 4  ;;  %v3938_v54 = vrot.slane %v3937_v0, 4 }
 0x16c   : > { %v3894_v20 = vrot.slane %v3892_v11, 5  ;;  %v3951_v5 = vor.u32 %v3950_v2, %v3947_v61  ;;  %v4354_v11 = vld [vmem:[#allocation9] ss:$0 sm:$0xff] }
 0x16d   : > { %3990 = vrot.lane.b32.xlu0 %v4505_v13, %s5418_s8  ;;  %v3943_v7 = vsel %vm5915_vm8, %v3938_v54, %v3942_v1  ;;  %v6178_v13 = vld [vmem:[#allocation10] ss:$0 sm:$0xff] }
 0x16e   : > { %v3895_v26 = vor.u32 %v3894_v20, %v3891_v19  ;;  %v3952_v8 = vrot.slane %v3951_v5, 4 }
 0x170   : > { %v3957_v9 = vsel %vm5915_vm8, %v3952_v8, %v3956_v6 }
 0x171   : > { %4706 = vmatmul.mubr.msk.bf16.vlgmr.msra.gmra.mrb[0].mxu0 %vm709_vm2, %v4347_v30  ;;  %v3908_v30 = vrot.slane %v3906_v24, 5  ;;  %v4508_v10 = vcombine.low %v3943_v7, %v3957_v9 }
 0x172   : > { %4709 = vmatprep.mubr.msk.bf16.mxu0 %vm709_vm2, %v4348_v32  ;;  %4714 = vmatpush3.bf16.msra.mxu0 %v5103_v41  ;;  %v3896_v32 = vrot.slane %v3895_v26, 4  ;;  %v3928_v41 = vrot.slane %v3926_v31, 5 }
 0x174   : > { %v3901_v47 = vsel %vm5915_vm8, %v3896_v32, %v3900_v22  ;;  %v3929_v63 = vsel %vm5915_vm8, %v3924_v57, %v3928_v41 }
 0x175   : > { %v4506_v4 = vcombine.low %v3887_v39, %v3901_v47 }
 0x177   : > { %3992 = vrot.lane.b32.xlu0 %v4506_v4, %s5418_s8 }
 0x179   : > { %4710 = vmatmul.mubr.msk.bf16.gmra.mrb[4].mxu0 %vm709_vm2, %v4349_v40  ;;  %v3909_v40 = vor.u32 %v3908_v30, %v3905_v27  ;;  %v6190_v30 = vrot.slane %v2306_v21, 4 }
 0x17b   : > { %v3910_v53 = vrot.slane %v3909_v40, 4 }
 0x17d   : > { %v3915_v60 = vsel %vm5915_vm8, %v3910_v53, %v3914_v33 }
 0x17e   : > { %v4507_v3 = vcombine.low %v3915_v60, %v3929_v63 }
 0x180   : > { %3994 = vrot.lane.b32.xlu1 %v4507_v3, %s5418_s8 }
 0x184   : > { %3996 = vrot.lane.b32.xlu1 %v4508_v10, %s5418_s8 }
 0x244   : > { %v4707_v12 = vpop.f32.mrb[0].mxu0 }
 0x245   : > { %v2069_v15 = vmul.f32 %v4707_v12, %v4354_v11  ;;  %v2021_v16 = vpop.f32.mrb[1].mxu0 }
 0x246   : > { %v2067_v17 = vmul.f32 %v4354_v11, %v2021_v16  ;;  %v4708_v18 = vpop.f32.mrb[2].mxu0 }
 0x247   : > { %v2084_v19 = vadd.f32 %v6178_v13, %v2069_v15  ;;  %v2070_v20 = vmul.f32 %v4708_v18, %v4354_v11  ;;  %v2024_v38 = vpop.f32.mrb[3].mxu0 }
 0x248   : > { %v2082_v14 = vadd.f32 %v6178_v13, %v2067_v17  ;;  %v2068_v22 = vmul.f32 %v4354_v11, %v2024_v38 }
 0x249   : > { %v2092_v24 = vmax.f32 %v2084_v19, 0.0  ;;  %v2085_v25 = vadd.f32 %v6178_v13, %v2070_v20 }
 0x24a   : > { %v2090_v26 = vmax.f32 %v2082_v14, 0.0  ;;  %v2083_v27 = vadd.f32 %v6178_v13, %v2068_v22 }
 0x24b   : > { %v4521_v51 = vpack.c.bf16 %v2092_v24, %v2092_v24  ;;  %v2093_v28 = vmax.f32 %v2085_v25, 0.0 }
 0x24c   : > { %v4519_v31 = vpack.c.bf16 %v2090_v26, %v2090_v26  ;;  %v2091_v32 = vmax.f32 %v2083_v27, 0.0  ;;  %v4711_v33 = vpop.f32.mrb[4].mxu0 }
 0x24d   : > { %v2137_v37 = vshrl.u32 %v4521_v51, 16  ;;  %v2140_v39 = vshll.u32 %v4521_v51, 16  ;;  %v4522_v40 = vpack.c.bf16 %v2093_v28, %v2093_v28  ;;  %v2073_v41 = vmul.f32 %v4711_v33, %v4354_v11  ;;  %v2037_v44 = vpop.f32.mrb[5].mxu0 }
 0x24e   : > { %v2123_v45 = vshrl.u32 %v4519_v31, 16  ;;  %v2126_v46 = vshll.u32 %v4519_v31, 16  ;;  %v4520_v47 = vpack.c.bf16 %v2091_v32, %v2091_v32  ;;  %v2071_v48 = vmul.f32 %v4354_v11, %v2037_v44  ;;  %v4712_v49 = vpop.f32.mrb[6].mxu0 }
 0x24f   : > { %v2139_v50 = vrot.slane %v2137_v37, 7  ;;  %v2144_v52 = vshrl.u32 %v4522_v40, 16  ;;  %v2147_v4 = vshll.u32 %v4522_v40, 16  ;;  %v2088_v53 = vadd.f32 %v6178_v13, %v2073_v41  ;;  %v2040_v55 = vpop.f32.mrb[7].mxu0 }
 0x250   : > { %v2125_v57 = vrot.slane %v2123_v45, 7  ;;  %v2130_v58 = vshrl.u32 %v4520_v47, 16  ;;  %v2133_v59 = vshll.u32 %v4520_v47, 16  ;;  %v2086_v60 = vadd.f32 %v6178_v13, %v2071_v48 }
 0x251   : > { %v2142_v61 = vor.u32 %v2140_v39, %v2139_v50  ;;  %v2146_v63 = vrot.slane %v2144_v52, 7  ;;  %v2096_v0 = vmax.f32 %v2088_v53, 0.0  ;;  %v2074_v1 = vmul.f32 %v4712_v49, %v4354_v11 }
 0x252   : > { %v2128_v2 = vor.u32 %v2126_v46, %v2125_v57  ;;  %v2132_v3 = vrot.slane %v2130_v58, 7  ;;  %v2094_v54 = vmax.f32 %v2086_v60, 0.0  ;;  %v2072_v5 = vmul.f32 %v4354_v11, %v2040_v55 }
 0x253   : > { %v2190_v6 = vsel %vm6198_vm14, 0, %v2142_v61  ;;  %v2149_v7 = vor.u32 %v2147_v4, %v2146_v63  ;;  %v4525_v8 = vpack.c.bf16 %v2096_v0, %v2096_v0  ;;  %v2089_v9 = vadd.f32 %v6178_v13, %v2074_v1 }
 0x254   : > { %v2201_v10 = vsel %vm6205_vm15, %v2190_v6, 0  ;;  %v2188_v12 = vsel %vm6198_vm14, 0, %v2128_v2  ;;  %v2135_v15 = vor.u32 %v2133_v59, %v2132_v3  ;;  %v4523_v16 = vpack.c.bf16 %v2094_v54, %v2094_v54 }
 0x255   : > { %v4368_v17 = vcombine.low %v2201_v10, %v2201_v10  ;;  %v4369_v18 = vcombine.high %v2201_v10, %v2201_v10  ;;  %v2199_v11 = vsel %vm6205_vm15, %v2188_v12, 0  ;;  %v2191_v19 = vsel %vm6198_vm14, 0, %v2149_v7 }
 0x256   : > { %v4364_v20 = vcombine.low %v2199_v11, %v2199_v11  ;;  %v4365_v38 = vcombine.high %v2199_v11, %v2199_v11  ;;  %v2202_v21 = vsel %vm6205_vm15, %v2191_v19, 0  ;;  %v2189_v14 = vsel %vm6198_vm14, 0, %v2135_v15 }
 0x257   : > { %2270 = vst.msk [vmem:[#allocation3 + $0x18] sm:$0xf] %vm2264_vm9, %v4368_v17  ;;  %v4370_v22 = vcombine.low %v2202_v21, %v2202_v21  ;;  %v4371_v23 = vcombine.high %v2202_v21, %v2202_v21  ;;  %v2200_v24 = vsel %vm6205_vm15, %v2189_v14, 0  ;;  %v2165_v25 = vshrl.u32 %v4525_v8, 16 }
 0x258   : > { %2271 = vst.msk [vmem:[#allocation3 + $0x1c] sm:$0x1] %vm2266_vm10, %v4369_v18  ;;  %2267 = vst.msk [vmem:[#allocation3 + $0xc] sm:$0x1] %vm2266_vm10, %v4365_v38  ;;  %v4366_v26 = vcombine.low %v2200_v24, %v2200_v24  ;;  %v4367_v27 = vcombine.high %v2200_v24, %v2200_v24  ;;  %v2151_v51 = vshrl.u32 %v4523_v16, 16  ;;  %v2312_v28 = vor.u32 %v6192_v34, %v6190_v30 }
 0x259   : > { %2265 = vst.msk [vmem:[#allocation3 + $0x8] sm:$0xf] %vm2264_vm9, %v4364_v20  ;;  %2272 = vst.msk [vmem:[#allocation3 + $0x20] sm:$0xf] %vm2264_vm9, %v4370_v22  ;;  %v2167_v31 = vrot.slane %v2165_v25, 7  ;;  %v2168_v32 = vshll.u32 %v4525_v8, 16  ;;  %v2087_v37 = vadd.f32 %v6178_v13, %v2072_v5 }
 0x25a   : > { %2273 = vst.msk [vmem:[#allocation3 + $0x24] sm:$0x1] %vm2266_vm10, %v4371_v23  ;;  %v2097_v33 = vmax.f32 %v2089_v9, 0.0  ;;  %2269 = vst.msk [vmem:[#allocation3 + $0x14] sm:$0x1] %vm2266_vm10, %v4367_v27  ;;  %v2153_v39 = vrot.slane %v2151_v51, 7 }
 0x25b   : > { %2268 = vst.msk [vmem:[#allocation3 + $0x10] sm:$0xf] %vm2264_vm9, %v4366_v26  ;;  %v2154_v40 = vshll.u32 %v4523_v16, 16  ;;  %v2170_v41 = vor.u32 %v2168_v32, %v2167_v31  ;;  %v2095_v45 = vmax.f32 %v2087_v37, 0.0  ;;  %v6237_v30 = vrot.slane %v2312_v28, 4 }
 0x25c   : > { %v4526_v44 = vpack.c.bf16 %v2097_v33, %v2097_v33  ;;  %v6241_v34 = vrot.slane %v2315_v36, 5 }
 0x25d   : > { %v2156_v46 = vor.u32 %v2154_v40, %v2153_v39  ;;  %v2194_v47 = vsel %vm6198_vm14, 0, %v2170_v41  ;;  %v4524_v48 = vpack.c.bf16 %v2095_v45, %v2095_v45 }
 0x25e   : > { %v2172_v13 = vshrl.u32 %v4526_v44, 16  ;;  %v2205_v49 = vsel %vm6205_vm15, %v2194_v47, 0  ;;  %v2175_v52 = vshll.u32 %v4526_v44, 16  ;;  %v6253_v58 = vld [vmem:[#allocation3 + $0x18] sm:$0xf]  ;;  %v2318_v0 = vsel %vm5915_vm8, %v6237_v30, %v6241_v34 }
 0x25f   : > { %v2192_v50 = vsel %vm6198_vm14, 0, %v2156_v46  ;;  %v4376_v4 = vcombine.low %v2205_v49, %v2205_v49  ;;  %v4377_v53 = vcombine.high %v2205_v49, %v2205_v49  ;;  %v2158_v61 = vshrl.u32 %v4524_v48, 16  ;;  %v6255_v63 = vld [vmem:[#allocation3 + $0xc] sm:$0x1]  ;;  %v6279_v19 = vld [vmem:[#allocation3 + $0x1c] sm:$0x1] }
 0x260   : > { %v2203_v55 = vsel %vm6205_vm15, %v2192_v50, 0  ;;  %v2174_v57 = vrot.slane %v2172_v13, 7  ;;  %v6251_v36 = vld [vmem:[#allocation3 + $0x8] sm:$0xf]  ;;  %v2161_v2 = vshll.u32 %v4524_v48, 16  ;;  %v2348_v10 = vshrl.u32 %v6253_v58, 16 }
 0x261   : > { %v4372_v59 = vcombine.low %v2203_v55, %v2203_v55  ;;  %v4373_v60 = vcombine.high %v2203_v55, %v2203_v55  ;;  %2278 = vst.msk [vmem:[#allocation3 + $0x38] sm:$0xf] %vm2264_vm9, %v4376_v4  ;;  %v2320_v3 = vshrl.u32 %v6251_v36, 16  ;;  %v2323_v54 = vshll.u32 %v6251_v36, 16  ;;  %v6269_v7 = vld [vmem:[#allocation3 + $0x14] sm:$0x1] }
 0x262   : > { %2279 = vst.msk [vmem:[#allocation3 + $0x3c] sm:$0x1] %vm2266_vm10, %v4377_v53  ;;  %v2177_v1 = vor.u32 %v2175_v52, %v2174_v57  ;;  %v6265_v5 = vld [vmem:[#allocation3 + $0x10] sm:$0xf]  ;;  %v2160_v6 = vrot.slane %v2158_v61, 7  ;;  %v2329_v17 = vshll.u32 %v6255_v63, 16 }
 0x263   : > { %2274 = vst.msk [vmem:[#allocation3 + $0x28] sm:$0xf] %vm2264_vm9, %v4372_v59  ;;  %v2334_v8 = vshrl.u32 %v6265_v5, 16  ;;  %v2337_v9 = vshll.u32 %v6265_v5, 16  ;;  %v2322_v15 = vrot.slane %v2320_v3, 4  ;;  %v2325_v16 = vrot.slane %v2323_v54, 5 }
 0x264   : > { %2275 = vst.msk [vmem:[#allocation3 + $0x2c] sm:$0x1] %vm2266_vm10, %v4373_v60  ;;  %v2195_v12 = vsel %vm6198_vm14, 0, %v2177_v1  ;;  %v2163_v11 = vor.u32 %v2161_v2, %v2160_v6  ;;  %v2343_v23 = vshll.u32 %v6269_v7, 16  ;;  %v6282_v24 = vld [vmem:[#allocation3 + $0x20] sm:$0xf] }
 0x265   : > { %v2206_v18 = vsel %vm6205_vm15, %v2195_v12, 0  ;;  %v2336_v20 = vrot.slane %v2334_v8, 4  ;;  %v2339_v38 = vrot.slane %v2337_v9, 5  ;;  %v2326_v22 = vor.u32 %v2325_v16, %v2322_v15  ;;  %v6292_v41 = vld [vmem:[#allocation3 + $0x24] sm:$0x1] }
 0x266   : > { %v4378_v21 = vcombine.low %v2206_v18, %v2206_v18  ;;  %v4379_v14 = vcombine.high %v2206_v18, %v2206_v18  ;;  %v2193_v25 = vsel %vm6198_vm14, 0, %v2163_v11  ;;  %v2350_v27 = vrot.slane %v2348_v10, 4 }
 0x267   : > { %v2340_v26 = vor.u32 %v2339_v38, %v2336_v20  ;;  %v2351_v51 = vshll.u32 %v6253_v58, 16  ;;  %v2204_v28 = vsel %vm6205_vm15, %v2193_v25, 0  ;;  %v2327_v31 = vrot.slane %v2326_v22, 4 }
 0x268   : > { %2280 = vst.msk [vmem:[#allocation3 + $0x40] sm:$0xf] %vm2264_vm9, %v4378_v21  ;;  %v2331_v32 = vrot.slane %v2329_v17, 5  ;;  %v2357_v33 = vshll.u32 %v6279_v19, 16  ;;  %v4374_v37 = vcombine.low %v2204_v28, %v2204_v28  ;;  %v4375_v39 = vcombine.high %v2204_v28, %v2204_v28  ;;  %v6308_v53 = vld [vmem:[#allocation3 + $0x38] sm:$0xf] }
 0x269   : > { %2281 = vst.msk [vmem:[#allocation3 + $0x44] sm:$0x1] %vm2266_vm10, %v4379_v14  ;;  %v2341_v40 = vrot.slane %v2340_v26, 4  ;;  %v2353_v56 = vrot.slane %v2351_v51, 5  ;;  %v2345_v45 = vrot.slane %v2343_v23, 5  ;;  %v2362_v62 = vshrl.u32 %v6282_v24, 16 }
 0x26a   : > { %v2332_v44 = vsel %vm5915_vm8, %v2327_v31, %v2331_v32  ;;  %v6296_v46 = vld [vmem:[#allocation3 + $0x28] sm:$0xf]  ;;  %2276 = vst.msk [vmem:[#allocation3 + $0x30] sm:$0xf] %vm2264_vm9, %v4374_v37  ;;  %v2359_v13 = vrot.slane %v2357_v33, 5  ;;  %v2365_v48 = vshll.u32 %v6282_v24, 16 }
 0x26b   : > { %v6298_v30 = vld [vmem:[#allocation3 + $0x2c] sm:$0x1]  ;;  %2277 = vst.msk [vmem:[#allocation3 + $0x34] sm:$0x1] %vm2266_vm10, %v4375_v39  ;;  %v4380_v34 = vcombine.low %v2318_v0, %v2332_v44  ;;  %v2354_v47 = vor.u32 %v2353_v56, %v2350_v27  ;;  %v2346_v49 = vsel %vm5915_vm8, %v2341_v40, %v2345_v45  ;;  %v2364_v50 = vrot.slane %v2362_v62, 4  ;;  %v5106_v45 = vld [vmem:[#allocation12 + $0x10] sm:$0xff]  }
 0x26c   : > { %v2376_v52 = vshrl.u32 %v6296_v46, 16  ;;  %v2379_v4 = vshll.u32 %v6296_v46, 16  ;;  %v2367_v57 = vrot.slane %v2365_v48, 5  ;;  %v2371_v59 = vshll.u32 %v6292_v41, 16  ;;  %v6317_v15 = vld [vmem:[#allocation3 + $0x3c] sm:$0x1] }
 0x26d   : > { %4715 = vmatprep.mubr.msk.bf16.mxu0 %vm2438_vm0, %v4380_v34  ;;  %v2355_v55 = vrot.slane %v2354_v47, 4  ;;  %v2385_v60 = vshll.u32 %v6298_v30, 16  ;;  %v2404_v3 = vshrl.u32 %v6308_v53, 16  ;;  %v2407_v8 = vshll.u32 %v6308_v53, 16  ;;  %v2619_v34 = vld [vmem:[#allocation3] sm:$0xe] }
 0x26e   : > { %v2378_v61 = vrot.slane %v2376_v52, 4  ;;  %v2381_v0 = vrot.slane %v2379_v4, 5  ;;  %v2368_v2 = vor.u32 %v2367_v57, %v2364_v50  ;;  %v2373_v10 = vrot.slane %v2371_v59, 5  ;;  %v2620_v47 = vld [vmem:[#allocation3 + $0x8] sm:$0xe]  ;;  %v5110_v48 = vld [vmem:[#allocation12 + $0x18] sm:$0xff]  }
 0x26f   : > { %v2360_v1 = vsel %vm5915_vm8, %v2355_v55, %v2359_v13  ;;  %v2387_v12 = vrot.slane %v2385_v60, 5  ;;  %v2406_v16 = vrot.slane %v2404_v3, 4  ;;  %v2409_v20 = vrot.slane %v2407_v8, 5  ;;  %v2622_v4 = vld [vmem:[#allocation3 + $0x18] sm:$0xe] }
 0x270   : > { %v4381_v54 = vcombine.low %v2346_v49, %v2360_v1  ;;  %v2382_v6 = vor.u32 %v2381_v0, %v2378_v61  ;;  %v2369_v9 = vrot.slane %v2368_v2, 4  ;;  %v2413_v25 = vshll.u32 %v6317_v15, 16  ;;  %v2623_v59 = vld [vmem:[#allocation3 + $0x20] sm:$0xe]  ;;  %v5127_v52 = vld [vmem:[#allocation2 + $0x108] ss:$8 sps:$4 sm:$0xff]  }
 0x271   : > { %v2293_v18 = vld [vmem:[#allocation3 + $0x30] sm:$0xf]  ;;  %v2410_v23 = vor.u32 %v2409_v20, %v2406_v16  ;;  %v4389_v62 = vcombine.low %v6180_v42, %v6251_v36  ;;  %v4390_v13 = vcombine.low %v6265_v5, %v6253_v58  ;;  %v4391_v49 = vcombine.low %v6282_v24, %v6296_v46  ;;  %v2624_v46 = vld [vmem:[#allocation3 + $0x28] sm:$0xe] }
 0x272   : > { %4716 = vmatmul.mubr.msk.bf16.vlgmr.msra.gmra.mrb[8].mxu0 %vm2438_vm0, %v4381_v54  ;;  %v2383_v17 = vrot.slane %v2382_v6, 4  ;;  %v6320_v11 = vld [vmem:[#allocation3 + $0x34] sm:$0x1]  ;;  %v2390_v38 = vshrl.u32 %v2293_v18, 16  ;;  %v2393_v21 = vshll.u32 %v2293_v18, 16  ;;  %v2374_v14 = vsel %vm5915_vm8, %v2369_v9, %v2373_v10  ;;  %v5112_v10 = vld [vmem:[#allocation12 + $0x20] sm:$0xff]  }
 0x273   : > { %v2399_v28 = vshll.u32 %v6320_v11, 16  ;;  %v2411_v32 = vrot.slane %v2410_v23, 4  ;;  %v2415_v39 = vrot.slane %v2413_v25, 5  ;;  %v4398_v42 = vrot.slane %v2619_v34, 9  ;;  %v2621_v24 = vld [vmem:[#allocation3 + $0x10] sm:$0xe] }
 0x274   : > { %v2388_v22 = vsel %vm5915_vm8, %v2383_v17, %v2387_v12  ;;  %v2392_v27 = vrot.slane %v2390_v38, 4  ;;  %v2395_v51 = vrot.slane %v2393_v21, 5  ;;  %v2648_v36 = vrot.slane %v6188_v29, 5  ;;  %v2625_v54 = vld [vmem:[#allocation3 + $0x30] sm:$0xe] }
 0x275   : > { %v4382_v26 = vcombine.low %v2374_v14, %v2388_v22  ;;  %v2401_v37 = vrot.slane %v2399_v28, 5  ;;  %v2416_v56 = vsel %vm5915_vm8, %v2411_v32, %v2415_v39  ;;  %v2652_v50 = vrot.slane %v6255_v63, 5  ;;  %v2626_v9 = vld [vmem:[#allocation3 + $0x38] sm:$0xe]  ;;  %v2906_v38 = vld [vmem:[#allocation3 + $0x8] sm:$0xf] }
 0x276   : > { %v2396_v31 = vor.u32 %v2395_v51, %v2392_v27  ;;  %v2649_v58 = vsel %vm6346_vm4, %v4398_v42, %v2648_v36  ;;  %v4392_v29 = vcombine.low %v2293_v18, %v6308_v53  ;;  %v4400_v55 = vrot.slane %v2621_v24, 9  ;;  %v2908_v18 = vld [vmem:[#allocation3 + $0x10] sm:$0xf]  ;;  %v6381_v34 = vld [vmem:[#allocation3 + $0xc] sm:$0x1] }
 0x277   : > { %4719 = vmatprep.mubr.msk.bf16.mxu1 %vm2438_vm0, %v4382_v26  ;;  %v2656_v57 = vrot.slane %v6269_v7, 5  ;;  %v2668_v60 = vrot.slane %v6298_v30, 5  ;;  %v4403_v61 = vrot.slane %v2624_v46, 9  ;;  %v4401_v0 = vrot.slane %v2622_v4, 9  ;;  %v5111_v26 = vld [vmem:[#allocation3 + $0x8] ss:$8 sps:$4 sm:$0xff]  }
 0x278   : > { %v2397_v33 = vrot.slane %v2396_v31, 4  ;;  %v2660_v1 = vrot.slane %v6279_v19, 5  ;;  %v2664_v2 = vrot.slane %v6292_v41, 5  ;;  %v4402_v3 = vrot.slane %v2623_v59, 9  ;;  %v2916_v28 = vld [vmem:[#allocation3 + $0x30] sm:$0xf] }
 0x279   : > { %v2657_v53 = vsel %vm6346_vm4, %v4400_v55, %v2656_v57  ;;  %v2669_v7 = vsel %vm6346_vm4, %v4403_v61, %v2668_v60  ;;  %v4404_v12 = vrot.slane %v2625_v54, 9  ;;  %v2672_v41 = vrot.slane %v6320_v11, 5  ;;  %v6384_v36 = vld [vmem:[#allocation12 + $0x28] sm:$0xff]   ;;  %v2920_v55 = vld [vmem:[#allocation3 + $0x40] sm:$0xf] }
 0x27a   : > { %v2402_v40 = vsel %vm5915_vm8, %v2397_v33, %v2401_v37  ;;  %v2661_v30 = vsel %vm6346_vm4, %v4401_v0, %v2660_v1  ;;  %v2665_v8 = vsel %vm6346_vm4, %v4402_v3, %v2664_v2  ;;  %v4405_v16 = vrot.slane %v2626_v9, 9  ;;  %v2910_v33 = vld [vmem:[#allocation3 + $0x18] sm:$0xf]  ;;  %v6379_v37 = vld [vmem:[#allocation3 + $0x14] sm:$0x1] }
 0x27b   : > { %v4383_v44 = vcombine.low %v2402_v40, %v2416_v56  ;;  %v4407_v6 = vcombine.low %v2657_v53, %v2661_v30  ;;  %v4408_v19 = vcombine.low %v2665_v8, %v2669_v7  ;;  %v2676_v17 = vrot.slane %v6317_v15, 5  ;;  %v2912_v15 = vld [vmem:[#allocation3 + $0x20] sm:$0xf]  ;;  %v2914_v56 = vld [vmem:[#allocation3 + $0x28] sm:$0xf] }
 0x27c   : > { %v2673_v20 = vsel %vm6346_vm4, %v4404_v12, %v2672_v41  ;;  %v2937_v21 = vshrl.u32 %v2908_v18, 16  ;;  %v2940_v14 = vshll.u32 %v2908_v18, 16  ;;  %v2923_v23 = vshrl.u32 %v2906_v38, 16  ;;  %v6389_v57 = vld [vmem:[#allocation3 + $0x24] sm:$0x1] }
 0x27d   : > { %4720 = vmatmul.mubr.msk.bf16.vlgmr.msra.gmra.mrb[0].mxu1 %vm2438_vm0, %v4383_v44  ;;  %v2677_v22 = vsel %vm6346_vm4, %v4405_v16, %v2676_v17  ;;  %v2926_v25 = vshll.u32 %v2906_v38, 16  ;;  %v2965_v39 = vshrl.u32 %v2912_v15, 16  ;;  %v2968_v40 = vshll.u32 %v2912_v15, 16  ;;  %v2918_v3 = vld [vmem:[#allocation3 + $0x38] sm:$0xf] }
 0x27e   : > { %4724 = vmatpush3.bf16.msra.mxu1 %v6139_v43  ;;  %4725 = vmatprep.mubr.msk.bf16.mxu1 %vm2438_vm0, %v4389_v62  ;;  %v4399_v43 = vrot.slane %v2620_v47, 9  ;;  %v4409_v11 = vcombine.low %v2673_v20, %v2677_v22  ;;  %v2939_v27 = vrot.slane %v2937_v21, 4  ;;  %v2942_v51 = vrot.slane %v2940_v14, 5  ;;  %v6392_v53 = vld [vmem:[#allocation3 + $0x1c] sm:$0x1] }
 0x27f   : > { %4733 = vmatprep.subr.bf16.mxu1 %v5106_v45  ;;  %v2925_v31 = vrot.slane %v2923_v23, 4  ;;  %v2928_v32 = vrot.slane %v2926_v25, 5  ;;  %v2996_v62 = vshll.u32 %v2916_v28, 16  ;;  %v2951_v47 = vshrl.u32 %v2910_v33, 16  ;;  %v6394_v54 = vld [vmem:[#allocation3 + $0x34] sm:$0x1] }
 0x280   : > { %v2653_v5 = vsel %vm6346_vm4, %v4399_v43, %v2652_v50  ;;  %v2943_v44 = vor.u32 %v2942_v51, %v2939_v27  ;;  %v2946_v42 = vshll.u32 %v6379_v37, 16  ;;  %v2979_v43 = vshrl.u32 %v2914_v56, 16  ;;  %v6399_v41 = vld [vmem:[#allocation3 + $0x2c] sm:$0x1]  ;;  %v5115_v18 = vld [vmem:[#allocation3 + $0x38] ss:$8 sps:$4 sm:$0xff]  }
 0x281   : > { %v4406_v63 = vcombine.low %v2649_v58, %v2653_v5  ;;  %v2982_v50 = vshll.u32 %v2914_v56, 16  ;;  %v5114_v58 = vld [vmem:[#allocation3 + $0x28] ss:$8 sps:$4 sm:$0xff]   ;;  %v2967_v5 = vrot.slane %v2965_v39, 4  ;;  %v2970_v24 = vrot.slane %v2968_v40, 5 }
 0x282   : > { %v2932_v46 = vshll.u32 %v6381_v34, 16  ;;  %v2953_v59 = vrot.slane %v2951_v47, 4  ;;  %v2948_v0 = vrot.slane %v2946_v42, 5  ;;  %v2981_v1 = vrot.slane %v2979_v43, 4  ;;  %v6408_v39 = vld [vmem:[#allocation3 + $0x44] sm:$0x1] }
 0x283   : > { %v2984_v2 = vrot.slane %v2982_v50, 5  ;;  %v2971_v7 = vor.u32 %v2970_v24, %v2967_v5  ;;  %v3021_v30 = vshrl.u32 %v2920_v55, 16  ;;  %v2974_v12 = vshll.u32 %v6389_v57, 16  ;;  %v6414_v47 = vld [vmem:[#allocation3 + $0x3c] sm:$0x1] }
 0x284   : > { %v2934_v8 = vrot.slane %v2932_v46, 5  ;;  %v3007_v16 = vshrl.u32 %v2918_v3, 16  ;;  %v3010_v17 = vshll.u32 %v2918_v3, 16  ;;  %v2960_v38 = vshll.u32 %v6392_v53, 16  ;;  %v3141_v42 = vld [vmem:[#allocation3 + $0x10] sm:$0xe] }
 0x285   : > { %4726 = vmatmul.mubr.msk.bf16.vlgmr.msra.gmra.mrb[4].mxu1 %vm2438_vm0, %v4390_v13  ;;  %v2954_v13 = vshll.u32 %v2910_v33, 16  ;;  %v2985_v21 = vor.u32 %v2984_v2, %v2981_v1  ;;  %v3002_v14 = vshll.u32 %v6394_v54, 16  ;;  %v3023_v23 = vrot.slane %v3021_v30, 4  ;;  %v3143_v3 = vld [vmem:[#allocation3 + $0x20] sm:$0xe] }
 0x286   : > { %4734 = vmatpush3.bf16.msra.mxu1 %v5106_v45  ;;  %4729 = vmatprep.mubr.msk.bf16.mxu1 %vm2438_vm0, %v4391_v49  ;;  %v2993_v45 = vshrl.u32 %v2916_v28, 16  ;;  %v2929_v49 = vor.u32 %v2928_v32, %v2925_v31  ;;  %v2976_v15 = vrot.slane %v2974_v12, 5  ;;  %v3009_v28 = vrot.slane %v3007_v16, 4 }
 0x287   : > { %4743 = vmatprep.subr.bf16.mxu1 %v5110_v48  ;;  %v2956_v60 = vrot.slane %v2954_v13, 5  ;;  %v3012_v31 = vrot.slane %v3010_v17, 5  ;;  %v2986_v32 = vrot.slane %v2985_v21, 4  ;;  %v3004_v33 = vrot.slane %v3002_v14, 5  ;;  %v3147_v21 = vld [vmem:[#allocation3 + $0x40] sm:$0xe] }
 0x288   : > { %v2995_v4 = vrot.slane %v2993_v45, 4  ;;  %v2930_v61 = vrot.slane %v2929_v49, 4  ;;  %v2962_v40 = vrot.slane %v2960_v38, 5  ;;  %v3030_v49 = vshll.u32 %v6408_v39, 16 }
 0x289   : > { %v3016_v24 = vshll.u32 %v6414_v47, 16  ;;  %v3186_v12 = vrot.slane %v6394_v54, 5  ;;  %v3174_v17 = vrot.slane %v6392_v53, 5 }
 0x28a   : > { %v2935_v20 = vsel %vm5915_vm8, %v2930_v61, %v2934_v8  ;;  %v3166_v61 = vrot.slane %v6381_v34, 5  ;;  %v4436_v34 = vrot.slane %v3143_v3, 9 }
 0x28d   : > { %4730 = vmatmul.mubr.msk.bf16.gmra.mrb[0].mxu1 %vm2438_vm0, %v4392_v29  ;;  %v2944_v29 = vrot.slane %v2943_v44, 4 }
 0x28e   : > { %4735 = vmatprep.mubr.msk.bf16.mxu1 %vm2438_vm0, %v4406_v63  ;;  %v2998_v63 = vrot.slane %v2996_v62, 5 }
 0x28f   : > { %v2949_v9 = vsel %vm5915_vm8, %v2944_v29, %v2948_v0  ;;  %v3140_v29 = vld [vmem:[#allocation3 + $0x8] sm:$0xe]  ;;  %v3018_v0 = vrot.slane %v3016_v24, 5 }
 0x290   : > { %v4424_v22 = vcombine.low %v2935_v20, %v2949_v9  ;;  %v3178_v9 = vrot.slane %v6389_v57, 5  ;;  %v3182_v20 = vrot.slane %v6399_v41, 5 }
 0x292   : > { %v3179_v38 = vsel %vm6346_vm4, %v4436_v34, %v3178_v9  ;;  %v3437_v9 = vld [vmem:[#allocation3 + $0x40] sm:$0xf] }
 0x295   : > { %4736 = vmatmul.mubr.msk.bf16.vlgmr.msra.gmra.mrb[4].mxu1 %vm2438_vm0, %v4407_v6  ;;  %v3024_v6 = vshll.u32 %v2920_v55, 16 }
 0x296   : > { %4744 = vmatpush3.bf16.msra.mxu1 %v5110_v48  ;;  %4739 = vmatprep.mubr.msk.bf16.mxu1 %vm2438_vm0, %v4408_v19  ;;  %v5113_v48 = vld [vmem:[#allocation3 + $0x18] ss:$8 sps:$4 sm:$0xff]   ;;  %v2957_v19 = vor.u32 %v2956_v60, %v2953_v59  ;;  %v3032_v59 = vrot.slane %v3030_v49, 5  ;;  %v4433_v60 = vrot.slane %v3140_v29, 9 }
 0x297   : > { %4753 = vmatprep.subr.bf16.mxu1 %v5112_v10  ;;  %v3026_v25 = vrot.slane %v3024_v6, 5  ;;  %v3142_v6 = vld [vmem:[#allocation3 + $0x18] sm:$0xe] }
 0x298   : > { %v2958_v51 = vrot.slane %v2957_v19, 4  ;;  %v3167_v30 = vsel %vm6346_vm4, %v4433_v60, %v3166_v61  ;;  %v4435_v16 = vrot.slane %v3142_v6, 9  ;;  %v5120_v60 = vld [vmem:[#allocation3 + $0x20] ss:$8 sps:$4 sm:$0xff]  }
 0x299   : > { %v3027_v44 = vor.u32 %v3026_v25, %v3023_v23  ;;  %v5119_v23 = vld [vmem:[#allocation12 + $0x38] sm:$0xff]   ;;  %v4440_v25 = vrot.slane %v3147_v21, 9 }
 0x29a   : > { %v2963_v13 = vsel %vm5915_vm8, %v2958_v51, %v2962_v40  ;;  %v3175_v14 = vsel %vm6346_vm4, %v4435_v16, %v3174_v17  ;;  %v3425_v51 = vld [vmem:[#allocation3 + $0x10] sm:$0xf]  ;;  %v6472_v21 = vld [vmem:[#allocation3 + $0x24] sm:$0x1] }
 0x29b   : > { %v3028_v46 = vrot.slane %v3027_v44, 4  ;;  %v5118_v44 = vld [vmem:[#allocation3 + $0x10] ss:$8 sps:$4 sm:$0xff]  }
 0x29d   : > { %4740 = vmatmul.mubr.msk.bf16.gmra.mrb[0].mxu1 %vm2438_vm0, %v4409_v11  ;;  %v2972_v11 = vrot.slane %v2971_v7, 4  ;;  %v3033_v1 = vsel %vm5915_vm8, %v3028_v46, %v3032_v59  ;;  %v3439_v59 = vld [vmem:[#allocation3 + $0x48] sm:$0xf] }
 0x29e   : > { %4745 = vmatprep.mubr.msk.bf16.mxu1 %vm2438_vm0, %v5111_v26  ;;  %v2988_v26 = vshll.u32 %v6399_v41, 16  ;;  %v3194_v41 = vrot.slane %v6408_v39, 5  ;;  %v3543_v16 = vshll.u32 %v3439_v59, 16 }
 0x29f   : > { %v2977_v56 = vsel %vm5915_vm8, %v2972_v11, %v2976_v15  ;;  %v3146_v11 = vld [vmem:[#allocation3 + $0x38] sm:$0xe] }
 0x2a0   : > { %v2990_v45 = vrot.slane %v2988_v26, 5  ;;  %v4425_v43 = vcombine.low %v2963_v13, %v2977_v56  ;;  %v4439_v26 = vrot.slane %v3146_v11, 9  ;;  %v3195_v15 = vsel %vm6346_vm4, %v4440_v25, %v3194_v41  ;;  %v3433_v13 = vld [vmem:[#allocation3 + $0x30] sm:$0xf] }
 0x2a1   : > { %v3498_v46 = vshrl.u32 %v3433_v13, 16  ;;  %v3501_v29 = vshll.u32 %v3433_v13, 16  ;;  %v3529_v11 = vshll.u32 %v3437_v9, 16 }
 0x2a2   : > { %v2991_v50 = vsel %vm5915_vm8, %v2986_v32, %v2990_v45  ;;  %v3445_v32 = vshll.u32 %v3425_v51, 16 }
 0x2a3   : > { %v3503_v34 = vrot.slane %v3501_v29, 5 }
 0x2a5   : > { %4746 = vmatmul.mubr.msk.bf16.vlgmr.msra.gmra.mrb[4].mxu1 %vm2438_vm0, %v5113_v48  ;;  %v3013_v48 = vor.u32 %v3012_v31, %v3009_v28  ;;  %v3427_v28 = vld [vmem:[#allocation3 + $0x18] sm:$0xf]  ;;  %v3442_v31 = vshrl.u32 %v3425_v51, 16 }
 0x2a6   : > { %4754 = vmatpush3.bf16.msra.mxu1 %v5112_v10  ;;  %4749 = vmatprep.mubr.msk.bf16.mxu1 %vm2438_vm0, %v5114_v58  ;;  %v2999_v10 = vor.u32 %v2998_v63, %v2995_v4  ;;  %v5117_v58 = vld [vmem:[#allocation12 + $0x30] sm:$0xff]   ;;  %v4434_v4 = vrot.slane %v3141_v42, 9  ;;  %v3170_v63 = vrot.slane %v6379_v37, 5  ;;  %v3456_v40 = vshrl.u32 %v3427_v28, 16  ;;  %v3429_v42 = vld [vmem:[#allocation3 + $0x20] sm:$0xf] }
 0x2a7   : > { %4763 = vmatprep.subr.bf16.mxu1 %v6384_v36  ;;  %v3014_v55 = vrot.slane %v3013_v48, 4  ;;  %v3459_v56 = vshll.u32 %v3427_v28, 16  ;;  %v3444_v45 = vrot.slane %v3442_v31, 4  ;;  %v5122_v28 = vld [vmem:[#allocation3 + $0x40] ss:$8 sps:$4 sm:$0xff]  }
 0x2a8   : > { %v3000_v27 = vrot.slane %v2999_v10, 4  ;;  %v3171_v2 = vsel %vm6346_vm4, %v4434_v4, %v3170_v63  ;;  %v3144_v10 = vld [vmem:[#allocation3 + $0x28] sm:$0xe]  ;;  %v3458_v48 = vrot.slane %v3456_v40, 4  ;;  %v6461_v4 = vld [vmem:[#allocation3 + $0x1c] sm:$0x1] }
 0x2a9   : > { %v3019_v37 = vsel %vm5915_vm8, %v3014_v55, %v3018_v0  ;;  %v4441_v8 = vcombine.low %v3167_v30, %v3171_v2  ;;  %v3461_v49 = vrot.slane %v3459_v56, 5  ;;  %v3470_v63 = vshrl.u32 %v3429_v42, 16 }
 0x2aa   : > { %v3005_v62 = vsel %vm5915_vm8, %v3000_v27, %v3004_v33  ;;  %v4427_v7 = vcombine.low %v3019_v37, %v3033_v1  ;;  %v3190_v27 = vrot.slane %v6414_v47, 5  ;;  %v3431_v47 = vld [vmem:[#allocation3 + $0x28] sm:$0xf]  ;;  %v3473_v55 = vshll.u32 %v3429_v42, 16  ;;  %v5121_v37 = vld [vmem:[#allocation3 + $0x30] ss:$8 sps:$4 sm:$0xff]  }
 0x2ab   : > { %v4426_v5 = vcombine.low %v2991_v50, %v3005_v62  ;;  %v3447_v62 = vrot.slane %v3445_v32, 5  ;;  %v3484_v50 = vshrl.u32 %v3431_v47, 16  ;;  %v3462_v0 = vor.u32 %v3461_v49, %v3458_v48  ;;  %v6464_v1 = vld [vmem:[#allocation12 + $0x40] sm:$0xff]  }
 0x2ac   : > { %v3191_v33 = vsel %vm6346_vm4, %v4439_v26, %v3190_v27  ;;  %v3465_v6 = vshll.u32 %v6461_v4, 16  ;;  %v6479_v27 = vld [vmem:[#allocation3 + $0x3c] sm:$0x1]  ;;  %v3479_v32 = vshll.u32 %v6472_v21, 16  ;;  %v6488_v49 = vld [vmem:[#allocation3 + $0x4c] sm:$0x1] }
 0x2ad   : > { %4750 = vmatmul.mubr.msk.bf16.gmra.mrb[0].mxu1 %vm2438_vm0, %v5115_v18  ;;  %v4437_v18 = vrot.slane %v3144_v10, 9  ;;  %v4444_v39 = vcombine.low %v3191_v33, %v3195_v15  ;;  %v3448_v24 = vor.u32 %v3447_v62, %v3444_v45  ;;  %v3472_v10 = vrot.slane %v3470_v63, 4 }
 0x2ae   : > { %4755 = vmatprep.mubr.msk.bf16.mxu1 %vm2438_vm0, %v4424_v22  ;;  %v4442_v22 = vcombine.low %v3175_v14, %v3179_v38  ;;  %v3545_v15 = vrot.slane %v3543_v16, 5  ;;  %v3531_v45 = vrot.slane %v3529_v11, 5 }
 0x2af   : > { %v3183_v54 = vsel %vm6346_vm4, %v4437_v18, %v3182_v20  ;;  %v3449_v30 = vrot.slane %v3448_v24, 4  ;;  %v3463_v18 = vrot.slane %v3462_v0, 4  ;;  %v6470_v20 = vld [vmem:[#allocation3 + $0x2c] sm:$0x1]  ;;  %v3549_v24 = vshll.u32 %v6488_v49, 16 }
 0x2b0   : > { %v3493_v26 = vshll.u32 %v6470_v20, 16  ;;  %v3659_v0 = vld [vmem:[#allocation3 + $0x10] sm:$0xe]  ;;  %v3697_v11 = vrot.slane %v6470_v20, 5 }
 0x2b2   : > { %v3495_v48 = vrot.slane %v3493_v26, 5 }
 0x2b5   : > { %4756 = vmatmul.mubr.msk.bf16.vlgmr.msra.gmra.mrb[4].mxu1 %vm2438_vm0, %v4425_v43  ;;  %v6459_v43 = vld [vmem:[#allocation3 + $0x14] sm:$0x1] }
 0x2b6   : > { %4764 = vmatpush3.bf16.msra.mxu1 %v6384_v36  ;;  %4759 = vmatprep.mubr.msk.bf16.mxu1 %vm2438_vm0, %v4426_v5  ;;  %v3145_v36 = vld [vmem:[#allocation3 + $0x30] sm:$0xe]  ;;  %v3435_v5 = vld [vmem:[#allocation3 + $0x38] sm:$0xf]  ;;  %v3451_v61 = vshll.u32 %v6459_v43, 16 }
 0x2b7   : > { %4773 = vmatprep.subr.bf16.mxu1 %v5117_v58  ;;  %v4438_v19 = vrot.slane %v3145_v36, 9  ;;  %v3512_v2 = vshrl.u32 %v3435_v5, 16  ;;  %v3515_v3 = vshll.u32 %v3435_v5, 16  ;;  %v3486_v36 = vrot.slane %v3484_v50, 4 }
 0x2b8   : > { %v3453_v17 = vrot.slane %v3451_v61, 5 }
 0x2b9   : > { %v3187_v57 = vsel %vm6346_vm4, %v4438_v19, %v3186_v12  ;;  %v3475_v19 = vrot.slane %v3473_v55, 5  ;;  %v3540_v12 = vshrl.u32 %v3439_v59, 16  ;;  %v3514_v38 = vrot.slane %v3512_v2, 4 }
 0x2ba   : > { %v4443_v53 = vcombine.low %v3183_v54, %v3187_v57  ;;  %v3517_v57 = vrot.slane %v3515_v3, 5  ;;  %v3526_v54 = vshrl.u32 %v3437_v9, 16  ;;  %v3685_v9 = vrot.slane %v6459_v43, 5  ;;  %v3662_v43 = vld [vmem:[#allocation3 + $0x28] sm:$0xe] }
 0x2bb   : > { %v3476_v41 = vor.u32 %v3475_v19, %v3472_v10  ;;  %v3542_v51 = vrot.slane %v3540_v12, 4  ;;  %v3689_v12 = vrot.slane %v6461_v4, 5  ;;  %v4471_v4 = vrot.slane %v3662_v43, 9 }
 0x2bd   : > { %4760 = vmatmul.mubr.msk.bf16.gmra.mrb[0].mxu1 %vm2438_vm0, %v4427_v7  ;;  %v3477_v13 = vrot.slane %v3476_v41, 4  ;;  %v3546_v5 = vor.u32 %v3545_v15, %v3542_v51  ;;  %v3693_v41 = vrot.slane %v6472_v21, 5  ;;  %v3705_v51 = vrot.slane %v6479_v27, 5 }
 0x2be   : > { %4765 = vmatprep.mubr.msk.bf16.mxu1 %vm2438_vm0, %v4441_v8  ;;  %v3500_v8 = vrot.slane %v3498_v46, 4  ;;  %v3481_v46 = vrot.slane %v3479_v32, 5  ;;  %v3698_v15 = vsel %vm6346_vm4, %v4471_v4, %v3697_v11 }
 0x2c0   : > { %v3504_v25 = vor.u32 %v3503_v34, %v3500_v8  ;;  %v4010_v8 = vld [vmem:[#allocation15] sm:$0xf]  ;;  %v4468_v34 = vrot.slane %v3659_v0, 9 }
 0x2c2   : > { %v3505_v62 = vrot.slane %v3504_v25, 4 }
 0x2c5   : > { %4766 = vmatmul.mubr.msk.bf16.vlgmr.msra.gmra.mrb[4].mxu1 %vm2438_vm0, %v4442_v22  ;;  %v6474_v22 = vld [vmem:[#allocation3 + $0x34] sm:$0x1] }
 0x2c6   : > { %4774 = vmatpush3.bf16.msra.mxu1 %v5117_v58  ;;  %4769 = vmatprep.mubr.msk.bf16.mxu1 %vm2438_vm0, %v4443_v53  ;;  %v3487_v58 = vshll.u32 %v3431_v47, 16  ;;  %v3467_v53 = vrot.slane %v3465_v6, 5  ;;  %v3507_v33 = vshll.u32 %v6474_v22, 16  ;;  %v3521_v47 = vshll.u32 %v6479_v27, 16  ;;  %v3660_v6 = vld [vmem:[#allocation3 + $0x18] sm:$0xe] }
 0x2c7   : > { %4783 = vmatprep.subr.bf16.mxu1 %v5119_v23  ;;  %v4469_v19 = vrot.slane %v3660_v6, 9  ;;  %v3701_v35 = vrot.slane %v6474_v22, 5 }
 0x2c8   : > { %v3489_v7 = vrot.slane %v3487_v58, 5  ;;  %v3468_v31 = vsel %vm5915_vm8, %v3463_v18, %v3467_v53  ;;  %v3509_v42 = vrot.slane %v3507_v33, 5  ;;  %v6490_v58 = vld [vmem:[#allocation3 + $0x44] sm:$0x1]  ;;  %v3523_v59 = vrot.slane %v3521_v47, 5 }
 0x2c9   : > { %v3535_v61 = vshll.u32 %v6490_v58, 16  ;;  %v3686_v18 = vsel %vm6346_vm4, %v4468_v34, %v3685_v9  ;;  %v4022_v33 = vsel %vm4020_vm5, %v4010_v8, 0 }
 0x2ca   : > { %v3490_v14 = vor.u32 %v3489_v7, %v3486_v36  ;;  %v3510_v55 = vsel %vm5915_vm8, %v3505_v62, %v3509_v42  ;;  %v3551_v36 = vrot.slane %v3549_v24, 5 }
 0x2cb   : > { %v3537_v10 = vrot.slane %v3535_v61, 5 }
 0x2cc   : > { %v3491_v56 = vrot.slane %v3490_v14, 4  ;;  %v3661_v14 = vld [vmem:[#allocation3 + $0x20] sm:$0xe] }
 0x2cd   : > { %4770 = vmatmul.mubr.msk.bf16.gmra.mrb[0].mxu1 %vm2438_vm0, %v4444_v39  ;;  %v3518_v39 = vor.u32 %v3517_v57, %v3514_v38  ;;  %v3663_v38 = vld [vmem:[#allocation3 + $0x30] sm:$0xe]  ;;  %v3690_v57 = vsel %vm6346_vm4, %v4469_v19, %v3689_v12  ;;  %v4470_v25 = vrot.slane %v3661_v14, 9 }
 0x2ce   : > { %4775 = vmatprep.mubr.msk.bf16.mxu1 %vm2438_vm0, %v5118_v44  ;;  %v3528_v44 = vrot.slane %v3526_v54, 4  ;;  %v3496_v29 = vsel %vm5915_vm8, %v3491_v56, %v3495_v48  ;;  %v4476_v54 = vcombine.low %v3686_v18, %v3690_v57  ;;  %v4472_v53 = vrot.slane %v3663_v38, 9 }
 0x2cf   : > { %v3519_v50 = vrot.slane %v3518_v39, 4  ;;  %v3694_v32 = vsel %vm6346_vm4, %v4470_v25, %v3693_v41  ;;  %v3709_v56 = vrot.slane %v6490_v58, 5  ;;  %v5126_v58 = vld [vmem:[#allocation2 + $0xf8] ss:$8 sps:$4 sm:$0xff]  }
 0x2d0   : > { %v3532_v63 = vor.u32 %v3531_v45, %v3528_v44  ;;  %v3702_v20 = vsel %vm6346_vm4, %v4472_v53, %v3701_v35  ;;  %v4477_v22 = vcombine.low %v3694_v32, %v3698_v15  ;;  %v3713_v44 = vrot.slane %v6488_v49, 5  ;;  %v5124_v45 = vld [vmem:[#allocation2 + $0xd8] ss:$8 sps:$4 sm:$0xff]   ;;  %v5125_v49 = vld [vmem:[#allocation2 + $0xe8] ss:$8 sps:$4 sm:$0xff]  }
 0x2d1   : > { %v3524_v3 = vsel %vm5915_vm8, %v3519_v50, %v3523_v59 }
 0x2d2   : > { %v4461_v7 = vcombine.low %v3510_v55, %v3524_v3 }
 0x2d5   : > { %4776 = vmatmul.mubr.msk.bf16.vlgmr.msra.gmra.mrb[4].mxu1 %vm2438_vm0, %v5120_v60  ;;  %v3482_v60 = vsel %vm5915_vm8, %v3477_v13, %v3481_v46  ;;  %v3991_v13 = vpop.permute.xlu0 %3990 }
 0x2d6   : > { %4784 = vmatpush3.bf16.msra.mxu1 %v5119_v23  ;;  %4779 = vmatprep.mubr.msk.bf16.mxu1 %vm2438_vm0, %v5121_v37  ;;  %v3454_v23 = vsel %vm5915_vm8, %v3449_v30, %v3453_v17  ;;  %v4460_v2 = vcombine.low %v3482_v60, %v3496_v29  ;;  %v3547_v37 = vrot.slane %v3546_v5, 4  ;;  %v3533_v30 = vrot.slane %v3532_v63, 4  ;;  %v3995_v5 = vpop.permute.xlu1 %3994 }
 0x2d7   : > { %4793 = vmatprep.subr.bf16.mxu1 %v6464_v1  ;;  %v4459_v40 = vcombine.low %v3454_v23, %v3468_v31  ;;  %v3664_v23 = vld [vmem:[#allocation3 + $0x38] sm:$0xe]  ;;  %v3665_v31 = vld [vmem:[#allocation3 + $0x40] sm:$0xe]  ;;  %v4000_v42 = vsel %vm709_vm2, %v5124_v45, %v3991_v13  ;;  %v4006_v46 = vsel %vm709_vm2, %v5126_v58, %v3995_v5 }
 0x2d8   : > { %v3538_v16 = vsel %vm5915_vm8, %v3533_v30, %v3537_v10  ;;  %v3552_v17 = vsel %vm5915_vm8, %v3547_v37, %v3551_v36  ;;  %v4473_v26 = vrot.slane %v3664_v23, 9  ;;  %v4474_v27 = vrot.slane %v3665_v31, 9 }
 0x2d9   : > { %v3993_v50 = vpop.permute.xlu0 %3992 }
 0x2da   : > { %v3706_v21 = vsel %vm6346_vm4, %v4473_v26, %v3705_v51  ;;  %v3710_v62 = vsel %vm6346_vm4, %v4474_v27, %v3709_v56  ;;  %v4003_v24 = vsel %vm709_vm2, %v5125_v49, %v3993_v50  ;;  %v3997_v29 = vpop.permute.xlu1 %3996 }
 0x2db   : > { %v4009_v63 = vsel %vm709_vm2, %v5127_v52, %v3997_v29 }
 0x2dd   : > { %4780 = vmatmul.mubr.msk.bf16.gmra.mrb[0].mxu1 %vm2438_vm0, %v5122_v28  ;;  %v3666_v28 = vld [vmem:[#allocation3 + $0x48] sm:$0xe] }
 0x2de   : > { %4785 = vmatprep.mubr.msk.bf16.mxu1 %vm2438_vm0, %v4459_v40  ;;  %v4475_v39 = vrot.slane %v3666_v28, 9  ;;  %v4478_v40 = vcombine.low %v3702_v20, %v3706_v21 }
 0x2e0   : > { %v3714_v47 = vsel %vm6346_vm4, %v4475_v39, %v3713_v44 }
 0x2e1   : > { %v4479_v48 = vcombine.low %v3710_v62, %v3714_v47 }
 0x2e5   : > { %4786 = vmatmul.mubr.msk.bf16.vlgmr.msra.gmra.mrb[4].mxu1 %vm2438_vm0, %v4460_v2  ;;  %v4513_v2 = vld [vmem:[#allocation13] ss:$0 sm:$0xff] }
 0x2e6   : > { %4794 = vmatpush3.bf16.msra.mxu1 %v6464_v1  ;;  %4789 = vmatprep.mubr.msk.bf16.mxu1 %vm2438_vm0, %v4461_v7  ;;  %v4462_v1 = vcombine.low %v3538_v16, %v3552_v17 }
 0x2e7   : > { %4960 = vmatprep.subr.msk.bf16.mxu1 %vm4020_vm5, %v4010_v8 }
 0x2ed   : > { %4790 = vmatmul.mubr.msk.bf16.gmra.mrb[0].mxu1 %vm2438_vm0, %v4462_v1 }
 0x2ee   : > { %4795 = vmatprep.mubr.msk.bf16.mxu1 %vm2438_vm0, %v4476_v54 }
 0x2f5   : > { %4796 = vmatmul.mubr.msk.bf16.vlgmr.msra.gmra.mrb[4].mxu1 %vm2438_vm0, %v4477_v22 }
 0x2f6   : > { %4804 = vmatpush3.bf16.msra.mxu1 %v4022_v33  ;;  %4799 = vmatprep.mubr.msk.bf16.mxu1 %vm2438_vm0, %v4478_v40 }
 0x2fd   : > { %4800 = vmatmul.mubr.msk.bf16.gmra.mrb[0].mxu1 %vm2438_vm0, %v4479_v48 }
 0x2fe   : > { %4805 = vmatprep.mubr.msk.bf16.mxu1 %vm4011_vm6, %v4000_v42 }
 0x305   : > { %4806 = vmatmul.mubr.msk.bf16.vlgmr.msra.gmra.mrb[4].mxu1 %vm4011_vm6, %v4003_v24 }
 0x306   : > { %4809 = vmatprep.mubr.msk.bf16.mxu1 %vm4011_vm6, %v4006_v46 }
 0x30d   : > { %4810 = vmatmul.mubr.msk.bf16.gmra.mrb[0].mxu1 %vm4011_vm6, %v4009_v63 }
 0x345   : > { %v4717_v55 = vpop.f32.mrb[8].mxu0 }
 0x346   : > { %v2485_v59 = vpop.f32.mrb[9].mxu0 }
 0x347   : > { %v4718_v60 = vpop.f32.mrb[10].mxu0 }
 0x348   : > { %v2488_v61 = vpop.f32.mrb[11].mxu0 }
 0x3d8   : > { %v4807_v0 = vpop.f32.mrb[4].mxu1 }
 0x3d9   : > { %v4815_v3 = vadd.f32 %v4807_v0, %v4717_v55  ;;  %v4058_v37 = vpop.f32.mrb[5].mxu1 }
 0x3da   : > { %v4816_v36 = vadd.f32 %v4058_v37, %v2485_v59  ;;  %v4808_v7 = vpop.f32.mrb[6].mxu1 }
 0x3db   : > { %v4106_v30 = vadd.f32 %v4815_v3, %v4513_v2  ;;  %v4817_v6 = vadd.f32 %v4808_v7, %v4718_v60  ;;  %v4061_v8 = vpop.f32.mrb[7].mxu1 }
 0x3dc   : > { %v4104_v34 = vadd.f32 %v4816_v36, %v4513_v2  ;;  %v4818_v9 = vadd.f32 %v4061_v8, %v2488_v61 }
 0x3dd   : > { %4114 = vst.msk [vmem:[%s375_s17 + $0x10] sm:$0xff] %vm4011_vm6, %v4106_v30  ;;  %v4107_v10 = vadd.f32 %v4817_v6, %v4513_v2 }
 0x3de   : > { %4112 = vst.msk [vmem:[%s375_s17] sm:$0xff] %vm4011_vm6, %v4104_v34  ;;  %v4105_v19 = vadd.f32 %v4818_v9, %v4513_v2 }
 0x3df   : > { %4115 = vst.msk [vmem:[%s375_s17 + $0x18] sm:$0xff] %vm4011_vm6, %v4107_v10 }
 0x3e0   : > { %4113 = vst.msk [vmem:[%s375_s17 + $0x8] sm:$0xff] %vm4011_vm6, %v4105_v19  ;;  %v4811_v12 = vpop.f32.mrb[0].mxu1 }
 0x3e1   : > { %v4110_v16 = vadd.f32 %v4811_v12, %v4513_v2  ;;  %v4074_v17 = vpop.f32.mrb[1].mxu1 }
 0x3e2   : > { %v4108_v18 = vadd.f32 %v4513_v2, %v4074_v17  ;;  %v4812_v43 = vpop.f32.mrb[2].mxu1 }
 0x3e3   : > { %4118 = vst.msk [vmem:[%s375_s17 + $0x30] sm:$0xff] %vm4011_vm6, %v4110_v16  ;;  %v4111_v38 = vadd.f32 %v4812_v43, %v4513_v2  ;;  %v4077_v1 = vpop.f32.mrb[3].mxu1 }
 0x3e4   : > { %4116 = vst.msk [vmem:[%s375_s17 + $0x20] sm:$0xff] %vm4011_vm6, %v4108_v18  ;;  %v4109_v57 = vadd.f32 %v4513_v2, %v4077_v1 }
 0x3e5   : > { %4119 = vst.msk [vmem:[%s375_s17 + $0x38] sm:$0xff] %vm4011_vm6, %v4111_v38 }
 0x3e6   : > { %4117 = vst.msk [vmem:[%s375_s17 + $0x28] sm:$0xff] %vm4011_vm6, %v4109_v57 }
 0x3e7   : > { %5339 = shalt.err (!%p5336_p8)
}
 0x3e8   : > { %s5340_s18 = scalar_lea.hbm %s6558_s19, 1024  ;;  %s5344_s28 = scalar_lea.hbm %s6614_s7, 2048 }
 0x3e9   : > { %p5341_p4 = scmp.ne.s32.totalorder %s6558_s19, %s5340_s18  ;;  %p5345_p0 = scmp.lt.u32.totalorder %s6558_s19, %s6614_s7 }
 0x3ea   : > { %p5346_p6 = scmp.lt.u32.totalorder %s5344_s28, %s5340_s18  ;;  %p5348_p5 = scmp.lt.u32.totalorder %s5340_s18, %s6558_s19 }
 0x3eb   : > { %p5342_p10 = pnand %p5341_p4, %p6649_p9 }
 0x3ec   : > { %p5347_p7 = por %p5346_p6, %p5345_p0 }
 0x3ed   : > { %p5343_p11 = pneg %p5342_p10 }
 0x3ee   : > { %p5349_p12 = por %p5348_p5, %p5347_p7 }
 0x3f0   : > { %p5350_p13 = pnand %p5349_p12, %p5343_p11 }
 0x3f2   : > { %5353 = shalt.err (!%p5350_p13)
}
 0x3f3   : > { %s5420_s21 = smov 128   ;;  %s5421_s15 = smov 8  }
 0x3f4   : > { %4990 = dma.vmem_to_hbm [thread:$0]  (%p6649_p9), %s6560_s20, 1024, %s6558_s19, %s4121_s30, %s5420_s21, %s5420_s21, %s5421_s15  }
 0x3f5 PF: > { %s4149_s1 = sand.u32 1, %s5392_s24   ;;  %p6650_p1 = scmp.ne.s32.totalorder %s6628_s14, 0 }
 0x3f6   : > { %p6651_p3 = scmp.ge.s32.totalorder %s5404_s27, 2  ;;  %s4150_s23 = scalar_lea.sflag [#allocation6], %s4149_s1 }
 0x3f8   : > { %p5016_p2 = pnand %p6651_p3, %p6650_p1 }
 0x3fa   : > { %5387 = dma.done.wait (!%p5016_p2), %s4150_s23, 1024  }
 0x3fb   : > { %5389 = vsyncadd (!%p5016_p2), %s4150_s23, 4294966272  ;;  %p23_p8 = scmp.ge.s32.totalorder %s5643_s11, 4   ;;  %s6652_s24 = smov %s5396_s25 }
 0x3fc   : > { %s6653_s25 = smov %s5400_s26  ;;  %s6654_s26 = smov %s5654_s22 }
 0x3fd   : > { %s6655_s27 = smov %s5643_s11  ;;  %25 = sbr.rel (!%p23_p8) target bundleno = 10 (0xa), region = 142 }
 0x404   :  { %4155 = vsyncpa [#allocation5], 1 }
 0x405   :  { %4157 = vsyncpa [#allocation5 + $0x1], 1 }
 0x406   :  { %4158 = vsyncpa [#allocation8], 1 }
 0x407   :  { %4159 = vsyncpa [#allocation11], 1 }
 0x408   :  { %4160 = vsyncpa [#allocation14], 1 }
 0x409   :  { %4161 = vsyncpa [#allocation6], 1 }
 0x40a   :  { %4163 = vsyncpa [#allocation6 + $0x1], 1 }

// kernel: basic_block_forward_nhwc.1
= control target key start
LH: loop header
LB: loop body
LE: loop exit
PB: predicated region body
PF: predicated region fallthrough
CT: control target
= control target key end

     0   :  { %s6607_s0 = inlined_call_operand.hbm [shape: bf16[2,4,9,9,4], index: 0, kind: input, shape index: {}]   ;;  %s6608_s1 = inlined_call_operand.hbm [shape: bf16[9,4,16], index: 1, kind: input, shape index: {}]   ;;  %s6609_s2 = inlined_call_operand.hbm [shape: f32[1,16], index: 2, kind: input, shape index: {}]   ;;  %s6610_s3 = inlined_call_operand.hbm [shape: f32[1,16], index: 3, kind: input, shape index: {}]   ;;  %s6611_s4 = inlined_call_operand.hbm [shape: bf16[9,16,8], index: 4, kind: input, shape index: {}]   ;;  %s6612_s5 = inlined_call_operand.hbm [shape: f32[1,8], index: 5, kind: input, shape index: {}]   ;;  %s6613_s6 = inlined_call_operand.hbm [shape: bf16[8,8], index: 6, kind: input, shape index: {}]   ;;  %s6614_s7 = inlined_call_operand.hbm [shape: f32[2,64,8], index: 7, kind: output, shape index: {}]  }
   0x1   :  { %6620 = sst [smem:[#allocation22_spill]] %s6608_s1 }
   0x2   :  { %12 = vsyncpa [#allocation5], 0 }
   0x3   :  { %14 = vsyncpa [#allocation5 + $0x1], 0 }
   0x4   :  { %15 = vsyncpa [#allocation8], 0 }
   0x5   :  { %16 = vsyncpa [#allocation11], 0 }
   0x6   :  { %17 = vsyncpa [#allocation14], 0 }
   0x7   :  { %18 = vsyncpa [#allocation6], 0 }
   0x8   :  { %20 = vsyncpa [#allocation6 + $0x1], 0  ;;  %s5462_s24 = smov 0   ;;  %s5464_s25 = smov 0  }
   0x9   :  { %s5466_s26 = smov 0   ;;  %s5468_s27 = smov 0  }
   0xa LB: > { %s5406_s28 = smov [#allocation7]   ;;  %s5483_s30 = sadd.s32 4294967295, %s5404_s27   ;;  %s5404_s27 = sphi %s5468_s27, %s6655_s27   ;;  %s5400_s26 = sphi %s5466_s26, %s6654_s26   ;;  %s5396_s25 = sphi %s5464_s25, %s6653_s25   ;;  %s5392_s24 = sphi %s5462_s24, %s6652_s24  }
   0xb   : > { %s221_s29 = sshll.u32 %s5406_s28, 4  ;;  %p4265_p0 = scmp.ge.s32.totalorder %s5404_s27, 1  ;;  %s5488_s29 = int_to_ptr.vmem [resolvable:$true] %s221_s29 }
   0xc   : > { %p6615_p1 = scmp.eq.s32.totalorder %s5483_s30, 0  ;;  %p209_p2 = scmp.lt.s32.totalorder %s5404_s27, 3 }
   0xd   : > { %s5407_s9 = smov [#allocation10]   ;;  %s5408_s12 = smov [#allocation13]  }
   0xe   : > { %p5490_p3 = pnand %p4265_p0, %p209_p2  ;;  %s246_s10 = sshll.u32 %s5407_s9, 4  ;;  %s5503_s10 = int_to_ptr.vmem [resolvable:$true] %s246_s10 }
   0xf   : > { %s270_s13 = sshll.u32 %s5408_s12, 4  ;;  %s6623_s1 = sld [smem:[#allocation22_spill]]  ;;  %s5505_s13 = int_to_ptr.vmem [resolvable:$true] %s270_s13 }
  0x10   : > { %s6621_s8 = scalar_select %p5490_p3, 1, 0 }
  0x11   : > { %p4992_p5 = pneg %p5490_p3 }
  0x13   : > { %p5499_p6 = pnand %p4992_p5, %p6615_p1 }
  0x15   : > { %s5128_s16 = scalar_lea.hbm %s6623_s1, 288  ;;  %p5515_p8 = pneg %p5499_p6 }
  0x16   : > { %p5129_p7 = scmp.ne.s32.totalorder %s6623_s1, %s5128_s16  ;;  %p5135_p11 = scmp.lt.u32.totalorder %s5128_s16, %s6623_s1 }
  0x18   : > { %p5131_p9 = pnand %p5515_p8, %p5129_p7 }
  0x1a   : > { %p5132_p10 = pneg %p5131_p9 }
  0x1c   : > { %p5137_p12 = pnand %p5135_p11, %p5132_p10 }
  0x1e   : > { %5140 = shalt.err (!%p5137_p12)
}
  0x1f   : > { %s5141_s22 = scalar_lea.vmem %s5488_s29, 288  ;;  %p5149_p5 = scmp.lt.s32.totalorder %s5488_s29, %s5488_s29 }
  0x20   : > { %p5142_p13 = scmp.ne.s32.totalorder %s5488_s29, %s5141_s22  ;;  %p5150_p4 = scmp.lt.s32.totalorder %s5141_s22, %s5141_s22 }
  0x22   : > { %p5144_p0 = pnand %p5142_p13, %p5515_p8  ;;  %p5151_p7 = por %p5150_p4, %p5149_p5 }
  0x24   : > { %p5145_p2 = pneg %p5144_p0 }
  0x26   : > { %p5152_p9 = pnand %p5151_p7, %p5145_p2 }
  0x28   : > { %5155 = shalt.err (!%p5152_p9)
}
  0x29   : > { %s5409_s23 = smov 32   ;;  %s5410_s28 = smov 2  }
  0x2a   : > { %4995 = dma.hbm_to_vmem [thread:$0]  (!%p5499_p6), %s6623_s1, 288, %s5488_s29, [#allocation8], %s5409_s23, %s5409_s23, %s5410_s28  }
  0x2b   : > { %s5156_s16 = scalar_lea.hbm %s6610_s3, 16 }
  0x2c   : > { %p5157_p4 = scmp.ne.s32.totalorder %s6610_s3, %s5156_s16  ;;  %p5163_p12 = scmp.lt.u32.totalorder %s5156_s16, %s6610_s3 }
  0x2e   : > { %p5159_p10 = pnand %p5157_p4, %p5515_p8 }
  0x30   : > { %p5160_p11 = pneg %p5159_p10 }
  0x32   : > { %p5165_p13 = pnand %p5163_p12, %p5160_p11 }
  0x34   : > { %5168 = shalt.err (!%p5165_p13)
}
  0x35   : > { %s5169_s29 = scalar_lea.vmem %s5503_s10, 16  ;;  %s5176_s22 = scalar_lea.vmem %s5503_s10, 32 }
  0x36   : > { %p5170_p0 = scmp.ne.s32.totalorder %s5503_s10, %s5169_s29  ;;  %p5177_p7 = scmp.lt.s32.totalorder %s5503_s10, %s5503_s10 }
  0x37   : > { %p5178_p9 = scmp.lt.s32.totalorder %s5176_s22, %s5169_s29 }
  0x38   : > { %p5172_p2 = pnand %p5170_p0, %p5515_p8 }
  0x39   : > { %p5179_p4 = por %p5178_p9, %p5177_p7 }
  0x3a   : > { %p5173_p5 = pneg %p5172_p2 }
  0x3c   : > { %p5180_p10 = pnand %p5179_p4, %p5173_p5 }
  0x3e   : > { %5183 = shalt.err (!%p5180_p10)
}
  0x3f   : > { %5001 = dma.hbm_to_vmem [thread:$0]  (!%p5499_p6), %s6610_s3, 16, %s5503_s10, [#allocation11]  }
  0x40   : > { %s5184_s14 = scalar_lea.hbm %s6612_s5, 16 }
  0x41   : > { %p5185_p11 = scmp.ne.s32.totalorder %s6612_s5, %s5184_s14  ;;  %p5191_p0 = scmp.lt.u32.totalorder %s5184_s14, %s6612_s5 }
  0x43   : > { %p5187_p12 = pnand %p5185_p11, %p5515_p8 }
  0x45   : > { %p5188_p13 = pneg %p5187_p12 }
  0x47   : > { %p5193_p2 = pnand %p5191_p0, %p5188_p13 }
  0x49   : > { %5196 = shalt.err (!%p5193_p2)
}
  0x4a   : > { %s5197_s10 = scalar_lea.vmem %s5505_s13, 16  ;;  %s5204_s20 = scalar_lea.vmem %s5505_s13, 32 }
  0x4b   : > { %p5198_p5 = scmp.ne.s32.totalorder %s5505_s13, %s5197_s10  ;;  %p5205_p4 = scmp.lt.s32.totalorder %s5505_s13, %s5505_s13 }
  0x4c   : > { %p5206_p10 = scmp.lt.s32.totalorder %s5204_s20, %s5197_s10 }
  0x4d   : > { %p5200_p7 = pnand %p5198_p5, %p5515_p8 }
  0x4e   : > { %p5207_p11 = por %p5206_p10, %p5205_p4 }
  0x4f   : > { %p5201_p9 = pneg %p5200_p7 }
  0x51   : > { %p5208_p12 = pnand %p5207_p11, %p5201_p9 }
  0x53   : > { %5211 = shalt.err (!%p5208_p12)
}
  0x54   : > { %5007 = dma.hbm_to_vmem [thread:$0]  (!%p5499_p6), %s6612_s5, 16, %s5505_s13, [#allocation14]  }
  0x55   : > { %s5411_s22 = smov [#allocation9]   ;;  %s5412_s28 = smov [#allocation12]  }
  0x56   : > { %s235_s23 = sshll.u32 %s5411_s22, 4  ;;  %s256_s9 = sshll.u32 %s5412_s28, 4  ;;  %s236_s23 = int_to_ptr.vmem [resolvable:$true] %s235_s23  ;;  %s257_s9 = int_to_ptr.vmem [resolvable:$true] %s256_s9 }
  0x57   : > { %s5212_s15 = scalar_lea.hbm %s6609_s2, 16 }
  0x58   : > { %p5213_p13 = scmp.ne.s32.totalorder %s6609_s2, %s5212_s15  ;;  %p5219_p5 = scmp.lt.u32.totalorder %s5212_s15, %s6609_s2 }
  0x5a   : > { %p5215_p0 = pnand %p5213_p13, %p5515_p8 }
  0x5c   : > { %p5216_p2 = pneg %p5215_p0 }
  0x5e   : > { %p5221_p7 = pnand %p5219_p5, %p5216_p2 }
  0x60   : > { %5224 = shalt.err (!%p5221_p7)
}
  0x61   : > { %s5225_s13 = scalar_lea.vmem %s236_s23, 16  ;;  %s5232_s20 = scalar_lea.vmem %s236_s23, 32 }
  0x62   : > { %p5226_p9 = scmp.ne.s32.totalorder %s236_s23, %s5225_s13  ;;  %p5233_p11 = scmp.lt.s32.totalorder %s236_s23, %s236_s23 }
  0x63   : > { %p5234_p12 = scmp.lt.s32.totalorder %s5232_s20, %s5225_s13 }
  0x64   : > { %p5228_p4 = pnand %p5226_p9, %p5515_p8 }
  0x65   : > { %p5235_p1 = por %p5234_p12, %p5233_p11 }
  0x66   : > { %p5229_p10 = pneg %p5228_p4 }
  0x68   : > { %p5236_p3 = pnand %p5235_p1, %p5229_p10 }
  0x6a   : > { %5239 = shalt.err (!%p5236_p3)
}
  0x6b   : > { %4998 = dma.hbm_to_vmem [thread:$0]  (!%p5499_p6), %s6609_s2, 16, %s236_s23, [#allocation8]  }
  0x6c   : > { %s5240_s12 = scalar_lea.hbm %s6611_s4, 1152 }
  0x6d   : > { %p5241_p13 = scmp.ne.s32.totalorder %s6611_s4, %s5240_s12  ;;  %p5247_p3 = scmp.lt.u32.totalorder %s5240_s12, %s6611_s4 }
  0x6f   : > { %p5243_p0 = pnand %p5241_p13, %p5515_p8 }
  0x71   : > { %p5244_p1 = pneg %p5243_p0 }
  0x73   : > { %p5249_p2 = pnand %p5247_p3, %p5244_p1 }
  0x75   : > { %5252 = shalt.err (!%p5249_p2)
}
  0x76   : > { %s5253_s18 = scalar_lea.vmem %s257_s9, 1152  ;;  %p5261_p4 = scmp.lt.s32.totalorder %s257_s9, %s257_s9 }
  0x77   : > { %p5254_p5 = scmp.ne.s32.totalorder %s257_s9, %s5253_s18  ;;  %p5262_p10 = scmp.lt.s32.totalorder %s5253_s18, %s5253_s18 }
  0x79   : > { %p5256_p7 = pnand %p5254_p5, %p5515_p8  ;;  %p5263_p11 = por %p5262_p10, %p5261_p4 }
  0x7b   : > { %p5257_p9 = pneg %p5256_p7 }
  0x7d   : > { %p5264_p12 = pnand %p5263_p11, %p5257_p9 }
  0x7f   : > { %5267 = shalt.err (!%p5264_p12)
}
  0x80   : > { %s6617_s23 = smov 64   ;;  %s6618_s10 = smov 4  }
  0x81   : > { %5004 = dma.hbm_to_vmem [thread:$0]  (!%p5499_p6), %s6611_s4, 1152, %s257_s9, [#allocation11], %s6617_s23, %s6617_s23, %s6618_s10  }
  0x82   : > { %s5415_s21 = smov [#allocation15]   ;;  %s5268_s12 = scalar_lea.hbm %s6613_s6, 64 }
  0x83   : > { %s281_s29 = sshll.u32 %s5415_s21, 4  ;;  %p5269_p13 = scmp.ne.s32.totalorder %s6613_s6, %s5268_s12  ;;  %s282_s29 = int_to_ptr.vmem [resolvable:$true] %s281_s29 }
  0x84   : > { %p5275_p3 = scmp.lt.u32.totalorder %s5268_s12, %s6613_s6 }
  0x85   : > { %p5271_p0 = pnand %p5269_p13, %p5515_p8 }
  0x87   : > { %p5272_p1 = pneg %p5271_p0 }
  0x89   : > { %p5277_p2 = pnand %p5275_p3, %p5272_p1 }
  0x8b   : > { %5280 = shalt.err (!%p5277_p2)
}
  0x8c   : > { %s5281_s9 = scalar_lea.vmem %s282_s29, 64  ;;  %p5289_p4 = scmp.lt.s32.totalorder %s282_s29, %s282_s29 }
  0x8d   : > { %p5282_p5 = scmp.ne.s32.totalorder %s282_s29, %s5281_s9  ;;  %p5290_p10 = scmp.lt.s32.totalorder %s5281_s9, %s5281_s9 }
  0x8f   : > { %p5284_p7 = pnand %p5282_p5, %p5515_p8  ;;  %p5291_p11 = por %p5290_p10, %p5289_p4 }
  0x91   : > { %p5285_p9 = pneg %p5284_p7 }
  0x93   : > { %p5292_p12 = pnand %p5291_p11, %p5285_p9 }
  0x95   : > { %5295 = shalt.err (!%p5292_p12)
}
  0x96   : > { %5010 = dma.hbm_to_vmem [thread:$0]  (!%p5499_p6), %s6613_s6, 64, %s282_s29, [#allocation14]  }
  0x97   : > { %s4264_s19 = sadd.s32 4294967294, %s5404_s27   ;;  %s5643_s11 = sadd.s32 1, %s5404_s27  }
  0x98   : > { %s30_s20 = ssub.s32 %s5404_s27, %s5643_s11  ;;  %s33_s21 = sadd.s32 1, %s5400_s26 }
  0x99   : > { %p31_p8 = scmp.eq.s32.totalorder %s30_s20, 0  ;;  %p40_p13 = scmp.ne.s32.totalorder %s5400_s26, %s5396_s25 }
  0x9a   : > { %p41_p0 = scmp.eq.s32.totalorder %s5404_s27, 0  ;;  %p46_p1 = scmp.ne.s32.totalorder %s5396_s25, %s5392_s24 }
  0x9b   : > { %s5654_s22 = scalar_select %p31_p8, %s5400_s26, %s33_s21  }
  0x9c   : > { %p42_p3 = por %p41_p0, %p40_p13  ;;  %p6625_p2 = scmp.eq.s32.totalorder %s5483_s30, 0 }
  0x9d   : > { %p196_p6 = scmp.eq.s32.totalorder %s5483_s30, 1  ;;  %p202_p7 = scmp.eq.s32.totalorder %s4264_s19, 1 }
  0x9e   : > { %p5658_p5 = por %p6625_p2, %p46_p1  ;;  %p5025_p9 = scmp.lt.s32.totalorder %s5404_s27, 2 }
  0x9f   : > { %s292_s29 = sand.u32 1, %s5400_s26   ;;  %p5665_p4 = por %p196_p6, %p40_p13 }
  0xa0   : > { %p5669_p10 = por %p202_p7, %p46_p1  ;;  %s4961_s15 = smul.u32 288, %s292_s29 }
  0xa1   : > { %s6627_s12 = scalar_select %p5665_p4, 1, 0 }
  0xa2   : > { %s6628_s14 = scalar_select %p5669_p10, 1, 0 }
  0xa3   : > { %s4962_s16 = smul.u32 4608, %s5404_s27  ;;  %p5674_p11 = pnand %p5025_p9, %p42_p3 }
  0xa4   : > { %s296_s19 = scalar_lea.vmem [#allocation4], %s4961_s15  ;;  %s5685_s21 = scalar_lea.sflag [#allocation5], %s292_s29 }
  0xa5   : > { %s5681_s13 = scalar_lea.hbm %s6607_s0, %s4962_s16  ;;  %s303_s20 = sshll.u32 %s296_s19, 4  ;;  %s5683_s20 = int_to_ptr.vmem [resolvable:$true] %s303_s20 }
  0xa6   : > { %s5296_s23 = scalar_lea.hbm %s5681_s13, 4608  ;;  %p5298_p8 = pneg %p5674_p11 }
  0xa7   : > { %p5297_p12 = scmp.ne.s32.totalorder %s5681_s13, %s5296_s23  ;;  %s5301_s18 = scalar_lea.hbm %s6607_s0, 9216 }
  0xa8   : > { %p5302_p1 = scmp.lt.u32.totalorder %s5681_s13, %s6607_s0  ;;  %p5303_p3 = scmp.lt.u32.totalorder %s5301_s18, %s5296_s23 }
  0xa9   : > { %p5299_p13 = pnand %p5298_p8, %p5297_p12  ;;  %p5305_p6 = scmp.lt.u32.totalorder %s5296_s23, %s5681_s13 }
  0xaa   : > { %p5304_p2 = por %p5303_p3, %p5302_p1 }
  0xab   : > { %p5300_p0 = pneg %p5299_p13 }
  0xac   : > { %p5306_p7 = por %p5305_p6, %p5304_p2 }
  0xae   : > { %p5307_p9 = pnand %p5306_p7, %p5300_p0 }
  0xb0   : > { %5310 = shalt.err (!%p5307_p9)
}
  0xb1   : > { %s5311_s29 = scalar_lea.vmem %s5683_s20, 4608  ;;  %s5416_s15 = smov [#allocation4]  }
  0xb2   : > { %p5312_p12 = scmp.ne.s32.totalorder %s5683_s20, %s5311_s29  ;;  %s5316_s19 = sshll.u32 %s5416_s15, 4  ;;  %s5317_s19 = int_to_ptr.vmem [resolvable:$false] %s5316_s19 }
  0xb3   : > { %s5318_s1 = scalar_lea.vmem %s5317_s19, 9216  ;;  %p5319_p4 = scmp.lt.s32.totalorder %s5683_s20, %s5317_s19 }
  0xb4   : > { %p5314_p13 = pnand %p5312_p12, %p5298_p8  ;;  %p5320_p1 = scmp.lt.s32.totalorder %s5318_s1, %s5311_s29 }
  0xb6   : > { %p5315_p10 = pneg %p5314_p13  ;;  %p5321_p3 = por %p5320_p1, %p5319_p4 }
  0xb8   : > { %p5322_p2 = pnand %p5321_p3, %p5315_p10 }
  0xba   : > { %5325 = shalt.err (!%p5322_p2)
}
  0xbb   : > { %s6630_s23 = smov 4   ;;  %s6631_s10 = smov 64  }
  0xbc   : > { %5014 = dma.hbm_to_vmem [thread:$0]  (!%p5674_p11), %s5681_s13, 4608, %s5683_s20, %s5685_s21, %s6631_s10, %s6631_s10, %s6630_s23  }
  0xbd   : > { %p6632_p8 = scmp.ne.s32.totalorder %s6621_s8, 0 }
  0xbe   : > { %s5719_s16 = sand.u32 (!%p6632_p8), 1, %s5396_s25  }
  0xbf   : > { %315 = sbr.rel (%p6632_p8) target bundleno = 1013 (0x3f5), region = 48  ;;  %s318_s18 = scalar_lea.sflag (!%p6632_p8), [#allocation5], %s5719_s16 }
  0xc0   : > { %s4963_s9 = smul.u32 (!%p6632_p8), 288, %s5719_s16 }
  0xc2   : > { %s5723_s29 = scalar_lea.vmem (!%p6632_p8), [#allocation4], %s4963_s9 }
  0xc6   : > { %5371 = dma.done.wait (%p5658_p5), %s318_s18, 4608  }
  0xc7   : > { %5373 = vsyncadd (%p5658_p5), %s318_s18, 4294962688  ;;  %p6633_p4 = scmp.eq.s32.totalorder %s5483_s30, 0 }
  0xc9   : > { %5375 = dma.done.wait (%p6633_p4), [#allocation8], 304   ;;  %p6634_p10 = pmov %p6633_p4 }
  0xca   : > { %p6635_p11 = pmov %p6633_p4 }
  0xcb   : > { %5377 = vsyncadd (%p6634_p10), [#allocation8], 4294966992 }
  0xcc   : > { %5379 = dma.done.wait (%p6635_p11), [#allocation11], 1168   ;;  %p6636_p0 = pmov %p6633_p4 }
  0xce   : > { %5381 = vsyncadd (%p6636_p0), [#allocation11], 4294966128  ;;  %p6637_p6 = pmov %p6636_p0 }
  0xcf   : > { %p6638_p7 = pmov %p6636_p0 }
  0xd0   : > { %5383 = dma.done.wait (%p6637_p6), [#allocation14], 80  }
  0xd1   : > { %5385 = vsyncadd (%p6638_p7), [#allocation14], 4294967216  ;;  %vm722_vm0 = vcmask 1041408   ;;  %v688_v0 = vld [vmem:[#allocation7 + $0x2] sm:$0x3]  ;;  %vm521_vm1 = vcmask 27648  }
  0xd2   : > { %4951 = vmatprep.subr.msk.bf16.mxu0 %vm722_vm0, %v688_v0  ;;  %v724_v1 = vsel %vm722_vm0, %v688_v0, 0  ;;  %v395_v2 = vld [vmem:[%s5723_s29 + $0x48] sm:$0xf]  ;;  %v397_v3 = vld [vmem:[%s5723_s29 + $0x50] sm:$0xf]  ;;  %v5417_v4 = vmov 0  }
  0xd3   : > { %4624 = vmatpush3.bf16.msra.mxu0 %v724_v1  ;;  %v467_v5 = vmax.bf16 %v5417_v4, %v395_v2  ;;  %v469_v6 = vmax.bf16 %v5417_v4, %v397_v3  ;;  %v677_v7 = vld [vmem:[#allocation7] sm:$0x3]  ;;  %v399_v8 = vld [vmem:[%s5723_s29 + $0x58] sm:$0xf]  ;;  %v403_v12 = vld [vmem:[%s5723_s29 + $0x68] sm:$0xf] }
  0xd4   : > { %v401_v9 = vld [vmem:[%s5723_s29 + $0x60] sm:$0xf]  ;;  %4952 = vmatprep.subr.msk.bf16.mxu0 %vm722_vm0, %v677_v7  ;;  %v471_v10 = vmax.bf16 %v5417_v4, %v399_v8  ;;  %v405_v13 = vld [vmem:[%s5723_s29 + $0x70] sm:$0xf]  ;;  %v475_v14 = vmax.bf16 %v5417_v4, %v403_v12  ;;  %v407_v16 = vld [vmem:[%s5723_s29 + $0x78] sm:$0xf] }
  0xd5   : > { %v473_v11 = vmax.bf16 %v5417_v4, %v401_v9  ;;  %561 = vst.msk [vmem:[#allocation2 + $0x48] sm:$0xf] %vm521_vm1, %v467_v5  ;;  %565 = vst.msk [vmem:[#allocation2 + $0x50] sm:$0xf] %vm521_vm1, %v469_v6  ;;  %v477_v15 = vmax.bf16 %v5417_v4, %v405_v13  ;;  %v409_v17 = vld [vmem:[%s5723_s29 + $0x80] sm:$0xf]  ;;  %v479_v19 = vmax.bf16 %v5417_v4, %v407_v16 }
  0xd6   : > { %v377_v18 = vld [vmem:[%s5723_s29] sm:$0xf]  ;;  %569 = vst.msk [vmem:[#allocation2 + $0x58] sm:$0xf] %vm521_vm1, %v471_v10  ;;  %v481_v20 = vmax.bf16 %v5417_v4, %v409_v17  ;;  %v379_v21 = vld [vmem:[%s5723_s29 + $0x8] sm:$0xf] }
  0xd7   : > { %573 = vst.msk [vmem:[#allocation2 + $0x60] sm:$0xf] %vm521_vm1, %v473_v11  ;;  %v449_v22 = vmax.bf16 %v5417_v4, %v377_v18  ;;  %v381_v23 = vld [vmem:[%s5723_s29 + $0x10] sm:$0xf]  ;;  %577 = vst.msk [vmem:[#allocation2 + $0x68] sm:$0xf] %vm521_vm1, %v475_v14  ;;  %v451_v24 = vmax.bf16 %v5417_v4, %v379_v21 }
  0xd8   : > { %581 = vst.msk [vmem:[#allocation2 + $0x70] sm:$0xf] %vm521_vm1, %v477_v15  ;;  %v1023_v25 = vld [vmem:[#allocation7 + $0x4] sm:$0x3]  ;;  %v383_v26 = vld [vmem:[%s5723_s29 + $0x18] sm:$0xf]  ;;  %v453_v27 = vmax.bf16 %v5417_v4, %v381_v23 }
  0xd9   : > { %v385_v28 = vld [vmem:[%s5723_s29 + $0x20] sm:$0xf]  ;;  %585 = vst.msk [vmem:[#allocation2 + $0x78] sm:$0xf] %vm521_vm1, %v479_v19  ;;  %589 = vst.msk [vmem:[#allocation2 + $0x80] sm:$0xf] %vm521_vm1, %v481_v20  ;;  %v455_v29 = vmax.bf16 %v5417_v4, %v383_v26 }
  0xda   : > { %522 = vst.msk [vmem:[#allocation2] sm:$0xf] %vm521_vm1, %v449_v22  ;;  %v387_v30 = vld [vmem:[%s5723_s29 + $0x28] sm:$0xf]  ;;  %v457_v31 = vmax.bf16 %v5417_v4, %v385_v28  ;;  %v389_v32 = vld [vmem:[%s5723_s29 + $0x30] sm:$0xf] }
  0xdb   : > { %v391_v33 = vld [vmem:[%s5723_s29 + $0x38] sm:$0xf]  ;;  %529 = vst.msk [vmem:[#allocation2 + $0x8] sm:$0xf] %vm521_vm1, %v451_v24  ;;  %533 = vst.msk [vmem:[#allocation2 + $0x10] sm:$0xf] %vm521_vm1, %v453_v27  ;;  %v459_v34 = vmax.bf16 %v5417_v4, %v387_v30  ;;  %v461_v35 = vmax.bf16 %v5417_v4, %v389_v32 }
  0xdc   : > { %v463_v36 = vmax.bf16 %v5417_v4, %v391_v33  ;;  %vm709_vm2 = vcmask 31744   ;;  %537 = vst.msk [vmem:[#allocation2 + $0x18] sm:$0xf] %vm521_vm1, %v455_v29  ;;  %541 = vst.msk [vmem:[#allocation2 + $0x20] sm:$0xf] %vm521_vm1, %v457_v31  ;;  %v824_v37 = vsel %vm722_vm0, %v677_v7, 0 }
  0xdd   : > { %v5791_v38 = vsel %vm722_vm0, %v1023_v25, 0  ;;  %545 = vst.msk [vmem:[#allocation2 + $0x28] sm:$0xf] %vm521_vm1, %v459_v34  ;;  %549 = vst.msk [vmem:[#allocation2 + $0x30] sm:$0xf] %vm521_vm1, %v461_v35  ;;  %vm523_vm3 = vcmask 24576  }
  0xde   : > { %553 = vst.msk [vmem:[#allocation2 + $0x38] sm:$0xf] %vm521_vm1, %v463_v36  ;;  %vm524_vm4 = vsmask.f32 256  ;;  %v5079_v39 = vld [vmem:[#allocation2 + $0x48] ss:$8 sps:$4 sm:$0xff]  }
  0xdf   : > { %v5080_v40 = vld [vmem:[#allocation2 + $0x58] ss:$8 sps:$4 sm:$0xff]   ;;  %4625 = vmatprep.mubr.msk.bf16.mxu0 %vm709_vm2, %v5079_v39  ;;  %v5081_v41 = vld [vmem:[#allocation2 + $0x68] ss:$8 sps:$4 sm:$0xff]   ;;  %vm5798_vm5 = vmand %vm523_vm3, %vm524_vm4  ;;  %vm907_vm6 = vsmask.f32 3328 }
  0xe0   : > { %4626 = vmatmul.mubr.msk.bf16.vlgmr.msra.gmra.mrb[0].mxu0 %vm709_vm2, %v5080_v40  ;;  %v378_v43 = vld [vmem:[%s5723_s29 + $0x4] sm:$0x1]  ;;  %v380_v44 = vld [vmem:[%s5723_s29 + $0xc] sm:$0x1]  ;;  %v398_v46 = vld [vmem:[%s5723_s29 + $0x54] sm:$0x1] }
  0xe1   : > { %4634 = vmatpush3.bf16.msra.mxu0 %v824_v37  ;;  %4629 = vmatprep.mubr.msk.bf16.mxu0 %vm709_vm2, %v5081_v41  ;;  %v396_v45 = vld [vmem:[%s5723_s29 + $0x4c] sm:$0x1]  ;;  %v400_v47 = vld [vmem:[%s5723_s29 + $0x5c] sm:$0x1]  ;;  %v402_v48 = vld [vmem:[%s5723_s29 + $0x64] sm:$0x1]  ;;  %v450_v57 = vmax.bf16 %v5417_v4, %v378_v43  ;;  %v452_v58 = vmax.bf16 %v5417_v4, %v380_v44  ;;  %v470_v63 = vmax.bf16 %v5417_v4, %v398_v46 }
  0xe2   : > { %4953 = vmatprep.subr.msk.bf16.mxu0 %vm722_vm0, %v1023_v25  ;;  %v404_v49 = vld [vmem:[%s5723_s29 + $0x6c] sm:$0x1]  ;;  %v406_v50 = vld [vmem:[%s5723_s29 + $0x74] sm:$0x1]  ;;  %v408_v51 = vld [vmem:[%s5723_s29 + $0x7c] sm:$0x1]  ;;  %v468_v62 = vmax.bf16 %v5417_v4, %v396_v45  ;;  %v472_v0 = vmax.bf16 %v5417_v4, %v400_v47  ;;  %v474_v1 = vmax.bf16 %v5417_v4, %v402_v48 }
  0xe3   : > { %v5082_v52 = vld [vmem:[#allocation2 + $0x78] ss:$8 sps:$4 sm:$0xff]   ;;  %v410_v54 = vld [vmem:[%s5723_s29 + $0x84] sm:$0x1]  ;;  %v412_v55 = vld [vmem:[%s5723_s29 + $0x8c] sm:$0x1]  ;;  %v476_v6 = vmax.bf16 %v5417_v4, %v404_v49  ;;  %v478_v7 = vmax.bf16 %v5417_v4, %v406_v50  ;;  %v480_v8 = vmax.bf16 %v5417_v4, %v408_v51 }
  0xe4   : > { %v5083_v53 = vld [vmem:[#allocation2] ss:$8 sps:$4 sm:$0xff]   ;;  %v430_v56 = vld [vmem:[%s5723_s29 + $0xd4] sm:$0x1]  ;;  %v432_v59 = vld [vmem:[%s5723_s29 + $0xdc] sm:$0x1]  ;;  %v482_v9 = vmax.bf16 %v5417_v4, %v410_v54  ;;  %v484_v13 = vmax.bf16 %v5417_v4, %v412_v55 }
  0xe5   : > { %v434_v60 = vld [vmem:[%s5723_s29 + $0xe4] sm:$0x1]  ;;  %v436_v61 = vld [vmem:[%s5723_s29 + $0xec] sm:$0x1]  ;;  %v438_v2 = vld [vmem:[%s5723_s29 + $0xf4] sm:$0x1]  ;;  %v502_v14 = vmax.bf16 %v5417_v4, %v430_v56  ;;  %v504_v15 = vmax.bf16 %v5417_v4, %v432_v59 }
  0xe6   : > { %v440_v3 = vld [vmem:[%s5723_s29 + $0xfc] sm:$0x1]  ;;  %v442_v5 = vld [vmem:[%s5723_s29 + $0x104] sm:$0x1]  ;;  %v444_v10 = vld [vmem:[%s5723_s29 + $0x10c] sm:$0x1]  ;;  %v506_v16 = vmax.bf16 %v5417_v4, %v434_v60  ;;  %v508_v17 = vmax.bf16 %v5417_v4, %v436_v61  ;;  %v5844_v18 = vmax.bf16 %v5417_v4, %v438_v2 }
  0xe7   : > { %v446_v11 = vld [vmem:[%s5723_s29 + $0x114] sm:$0x1]  ;;  %v448_v12 = vld [vmem:[%s5723_s29 + $0x11c] sm:$0x1]  ;;  %v5847_v19 = vmax.bf16 %v5417_v4, %v440_v3  ;;  %v5850_v20 = vmax.bf16 %v5417_v4, %v442_v5  ;;  %v5084_v24 = vld [vmem:[#allocation2 + $0x10] ss:$8 sps:$4 sm:$0xff]   ;;  %v5853_v25 = vmax.bf16 %v5417_v4, %v444_v10 }
  0xe8   : > { %4630 = vmatmul.mubr.msk.bf16.gmra.mrb[4].mxu0 %vm709_vm2, %v5082_v52  ;;  %v526_v21 = vld [vmem:[#allocation2 + $0x4] sm:$0x1]  ;;  %v530_v22 = vld [vmem:[#allocation2 + $0xc] sm:$0x1]  ;;  %v566_v29 = vld [vmem:[#allocation2 + $0x54] sm:$0x1]  ;;  %v518_v33 = vmax.bf16 %v5417_v4, %v446_v11  ;;  %v520_v41 = vmax.bf16 %v5417_v4, %v448_v12 }
  0xe9   : > { %4635 = vmatprep.mubr.msk.bf16.mxu0 %vm709_vm2, %v5083_v53  ;;  %v562_v23 = vld [vmem:[#allocation2 + $0x4c] sm:$0x1]  ;;  %v527_v26 = vsel %vm5798_vm5, %v450_v57, %v526_v21  ;;  %v531_v27 = vsel %vm5798_vm5, %v452_v58, %v530_v22  ;;  %v570_v30 = vld [vmem:[#allocation2 + $0x5c] sm:$0x1]  ;;  %v574_v31 = vld [vmem:[#allocation2 + $0x64] sm:$0x1]  ;;  %v567_v34 = vsel %vm5798_vm5, %v470_v63, %v566_v29 }
  0xea   : > { %v563_v28 = vsel %vm5798_vm5, %v468_v62, %v562_v23  ;;  %v5085_v32 = vld [vmem:[#allocation2 + $0x20] ss:$8 sps:$4 sm:$0xff]   ;;  %528 = vst [vmem:[#allocation2 + $0x4] sm:$0x1] %v527_v26  ;;  %532 = vst [vmem:[#allocation2 + $0xc] sm:$0x1] %v531_v27  ;;  %v571_v35 = vsel %vm5798_vm5, %v472_v0, %v570_v30  ;;  %v575_v36 = vsel %vm5798_vm5, %v474_v1, %v574_v31 }
  0xeb   : > { %564 = vst [vmem:[#allocation2 + $0x4c] sm:$0x1] %v563_v28  ;;  %v578_v37 = vld [vmem:[#allocation2 + $0x6c] sm:$0x1]  ;;  %v582_v39 = vld [vmem:[#allocation2 + $0x74] sm:$0x1] }
  0xec   : > { %v586_v40 = vld [vmem:[#allocation2 + $0x7c] sm:$0x1]  ;;  %vm908_vm7 = vsmask.f32 7440  ;;  %568 = vst [vmem:[#allocation2 + $0x54] sm:$0x1] %v567_v34  ;;  %v579_v43 = vsel %vm5798_vm5, %v476_v6, %v578_v37  ;;  %v583_v44 = vsel %vm5798_vm5, %v478_v7, %v582_v39 }
  0xed   : > { %572 = vst [vmem:[#allocation2 + $0x5c] sm:$0x1] %v571_v35  ;;  %576 = vst [vmem:[#allocation2 + $0x64] sm:$0x1] %v575_v36  ;;  %v587_v45 = vsel %vm5798_vm5, %v480_v8, %v586_v40  ;;  %v590_v46 = vld [vmem:[#allocation2 + $0x84] sm:$0x1] }
  0xee   : > { %v594_v47 = vld [vmem:[#allocation2 + $0x8c] sm:$0x1]  ;;  %v630_v48 = vld [vmem:[#allocation2 + $0xd4] sm:$0x1]  ;;  %580 = vst [vmem:[#allocation2 + $0x6c] sm:$0x1] %v579_v43  ;;  %v591_v49 = vsel %vm5798_vm5, %v482_v9, %v590_v46  ;;  %vm5915_vm8 = vmor %vm907_vm6, %vm908_vm7 }
  0xef   : > { %584 = vst [vmem:[#allocation2 + $0x74] sm:$0x1] %v583_v44  ;;  %588 = vst [vmem:[#allocation2 + $0x7c] sm:$0x1] %v587_v45  ;;  %v595_v50 = vsel %vm5798_vm5, %v484_v13, %v594_v47  ;;  %v631_v51 = vsel %vm5798_vm5, %v502_v14, %v630_v48  ;;  %v634_v52 = vld [vmem:[#allocation2 + $0xdc] sm:$0x1] }
  0xf0   : > { %v638_v53 = vld [vmem:[#allocation2 + $0xe4] sm:$0x1]  ;;  %v642_v54 = vld [vmem:[#allocation2 + $0xec] sm:$0x1]  ;;  %592 = vst [vmem:[#allocation2 + $0x84] sm:$0x1] %v591_v49  ;;  %v635_v55 = vsel %vm5798_vm5, %v504_v15, %v634_v52  ;;  %4636 = vmatmul.mubr.msk.bf16.vlgmr.msra.gmra.mrb[0].mxu0 %vm709_vm2, %v5084_v24 }
  0xf1   : > { %596 = vst [vmem:[#allocation2 + $0x8c] sm:$0x1] %v595_v50  ;;  %632 = vst [vmem:[#allocation2 + $0xd4] sm:$0x1] %v631_v51  ;;  %v639_v56 = vsel %vm5798_vm5, %v506_v16, %v638_v53  ;;  %v643_v57 = vsel %vm5798_vm5, %v508_v17, %v642_v54  ;;  %v646_v58 = vld [vmem:[#allocation2 + $0xf4] sm:$0x1]  ;;  %4644 = vmatpush3.bf16.msra.mxu0 %v5791_v38  ;;  %4639 = vmatprep.mubr.msk.bf16.mxu0 %vm709_vm2, %v5085_v32 }
  0xf2   : > { %v650_v59 = vld [vmem:[#allocation2 + $0xfc] sm:$0x1]  ;;  %v654_v60 = vld [vmem:[#allocation2 + $0x104] sm:$0x1]  ;;  %636 = vst [vmem:[#allocation2 + $0xdc] sm:$0x1] %v635_v55  ;;  %v647_v61 = vsel %vm5798_vm5, %v5844_v18, %v646_v58 }
  0xf3   : > { %640 = vst [vmem:[#allocation2 + $0xe4] sm:$0x1] %v639_v56  ;;  %644 = vst [vmem:[#allocation2 + $0xec] sm:$0x1] %v643_v57  ;;  %v651_v62 = vsel %vm5798_vm5, %v5847_v19, %v650_v59  ;;  %v655_v63 = vsel %vm5798_vm5, %v5850_v20, %v654_v60  ;;  %v658_v0 = vld [vmem:[#allocation2 + $0x10c] sm:$0x1] }
  0xf4   : > { %v662_v1 = vld [vmem:[#allocation2 + $0x114] sm:$0x1]  ;;  %v666_v2 = vld [vmem:[#allocation2 + $0x11c] sm:$0x1]  ;;  %648 = vst [vmem:[#allocation2 + $0xf4] sm:$0x1] %v647_v61  ;;  %v659_v3 = vsel %vm5798_vm5, %v5853_v25, %v658_v0 }
  0xf5   : > { %652 = vst [vmem:[#allocation2 + $0xfc] sm:$0x1] %v651_v62  ;;  %656 = vst [vmem:[#allocation2 + $0x104] sm:$0x1] %v655_v63  ;;  %v663_v5 = vsel %vm5798_vm5, %v518_v33, %v662_v1  ;;  %v667_v6 = vsel %vm5798_vm5, %v520_v41, %v666_v2  ;;  %v891_v7 = vld [vmem:[#allocation2] sm:$0xf] }
  0xf6   : > { %v893_v8 = vld [vmem:[#allocation2 + $0x8] sm:$0xf]  ;;  %v1134_v9 = vld [vmem:[#allocation7 + $0x6] sm:$0x3]  ;;  %660 = vst [vmem:[#allocation2 + $0x10c] sm:$0x1] %v659_v3 }
  0xf7   : > { %664 = vst [vmem:[#allocation2 + $0x114] sm:$0x1] %v663_v5  ;;  %668 = vst [vmem:[#allocation2 + $0x11c] sm:$0x1] %v667_v6  ;;  %v911_v10 = vshrl.u32 %v891_v7, 16  ;;  %v914_v11 = vshll.u32 %v891_v7, 16  ;;  %4954 = vmatprep.subr.msk.bf16.mxu0 %vm722_vm0, %v1134_v9 }
  0xf8   : > { %v925_v12 = vshrl.u32 %v893_v8, 16  ;;  %v928_v13 = vshll.u32 %v893_v8, 16  ;;  %v382_v14 = vld [vmem:[%s5723_s29 + $0x14] sm:$0x1]  ;;  %v5086_v15 = vld [vmem:[#allocation2 + $0x30] ss:$8 sps:$4 sm:$0xff]  }
  0xf9   : > { %v892_v16 = vld [vmem:[#allocation2 + $0x4] sm:$0x1]  ;;  %v894_v17 = vld [vmem:[#allocation2 + $0xc] sm:$0x1]  ;;  %v454_v19 = vmax.bf16 %v5417_v4, %v382_v14  ;;  %v913_v20 = vrot.slane %v911_v10, 4  ;;  %v916_v38 = vrot.slane %v914_v11, 5  ;;  %4640 = vmatmul.mubr.msk.bf16.gmra.mrb[4].mxu0 %vm709_vm2, %v5086_v15 }
  0xfa   : > { %v384_v18 = vld [vmem:[%s5723_s29 + $0x1c] sm:$0x1]  ;;  %v920_v21 = vshll.u32 %v892_v16, 16  ;;  %v927_v22 = vrot.slane %v925_v12, 4  ;;  %v534_v23 = vld [vmem:[#allocation2 + $0x14] sm:$0x1] }
  0xfb   : > { %v930_v24 = vrot.slane %v928_v13, 5  ;;  %v934_v25 = vshll.u32 %v894_v17, 16  ;;  %v456_v26 = vmax.bf16 %v5417_v4, %v384_v18  ;;  %v535_v27 = vsel %vm5798_vm5, %v454_v19, %v534_v23  ;;  %v538_v28 = vld [vmem:[#allocation2 + $0x1c] sm:$0x1]  ;;  %v895_v29 = vld [vmem:[#allocation2 + $0x10] sm:$0xf] }
  0xfc   : > { %v917_v30 = vor.u32 %v916_v38, %v913_v20  ;;  %v922_v31 = vrot.slane %v920_v21, 5  ;;  %536 = vst [vmem:[#allocation2 + $0x14] sm:$0x1] %v535_v27  ;;  %v897_v32 = vld [vmem:[#allocation2 + $0x18] sm:$0xf]  ;;  %v939_v33 = vshrl.u32 %v895_v29, 16 }
  0xfd   : > { %v942_v34 = vshll.u32 %v895_v29, 16  ;;  %v931_v36 = vor.u32 %v930_v24, %v927_v22  ;;  %v936_v37 = vrot.slane %v934_v25, 5  ;;  %v539_v39 = vsel %vm5798_vm5, %v456_v26, %v538_v28  ;;  %v386_v41 = vld [vmem:[%s5723_s29 + $0x24] sm:$0x1]  ;;  %v388_v43 = vld [vmem:[%s5723_s29 + $0x2c] sm:$0x1] }
  0xfe   : > { %v953_v40 = vshrl.u32 %v897_v32, 16  ;;  %v918_v44 = vrot.slane %v917_v30, 4  ;;  %540 = vst [vmem:[#allocation2 + $0x1c] sm:$0x1] %v539_v39  ;;  %v941_v45 = vrot.slane %v939_v33, 4  ;;  %v956_v47 = vshll.u32 %v897_v32, 16 }
  0xff   : > { %v944_v46 = vrot.slane %v942_v34, 5  ;;  %v542_v48 = vld [vmem:[#allocation2 + $0x24] sm:$0x1]  ;;  %v932_v49 = vrot.slane %v931_v36, 4  ;;  %v5925_v51 = vsel %vm722_vm0, %v1134_v9, 0  ;;  %v458_v52 = vmax.bf16 %v5417_v4, %v386_v41  ;;  %s5418_s8 = smov 4  }
 0x100   : > { %v955_v50 = vrot.slane %v953_v40, 4  ;;  %v546_v53 = vld [vmem:[#allocation2 + $0x2c] sm:$0x1]  ;;  %v923_v54 = vsel %vm5915_vm8, %v918_v44, %v922_v31  ;;  %v958_v56 = vrot.slane %v956_v47, 5  ;;  %v460_v57 = vmax.bf16 %v5417_v4, %v388_v43  ;;  %v899_v58 = vld [vmem:[#allocation2 + $0x20] sm:$0xf] }
 0x101   : > { %v945_v55 = vor.u32 %v944_v46, %v941_v45  ;;  %v901_v59 = vld [vmem:[#allocation2 + $0x28] sm:$0xf]  ;;  %v937_v60 = vsel %vm5915_vm8, %v932_v49, %v936_v37  ;;  %v543_v61 = vsel %vm5798_vm5, %v458_v52, %v542_v48  ;;  %v967_v62 = vshrl.u32 %v899_v58, 16  ;;  %v390_v0 = vld [vmem:[%s5723_s29 + $0x34] sm:$0x1]  ;;  %s4281_s28 = sshll.u32 %s5719_s16, 6 }
 0x102   : > { %v970_v63 = vshll.u32 %v899_v58, 16  ;;  %v392_v1 = vld [vmem:[%s5723_s29 + $0x3c] sm:$0x1]  ;;  %v4298_v2 = vcombine.low %v923_v54, %v937_v60  ;;  %v959_v5 = vor.u32 %v958_v56, %v955_v50  ;;  %544 = vst [vmem:[#allocation2 + $0x24] sm:$0x1] %v543_v61  ;;  %v547_v6 = vsel %vm5798_vm5, %v460_v57, %v546_v53  ;;  %s375_s17 = scalar_lea.vmem [#allocation16], %s4281_s28 }
 0x103   : > { %v946_v3 = vrot.slane %v945_v55, 4  ;;  %v550_v7 = vld [vmem:[#allocation2 + $0x34] sm:$0x1]  ;;  %v554_v8 = vld [vmem:[#allocation2 + $0x3c] sm:$0x1]  ;;  %v969_v10 = vrot.slane %v967_v62, 4  ;;  %v462_v16 = vmax.bf16 %v5417_v4, %v390_v0  ;;  %v464_v17 = vmax.bf16 %v5417_v4, %v392_v1 }
 0x104   : > { %v896_v9 = vld [vmem:[#allocation2 + $0x14] sm:$0x1]  ;;  %548 = vst [vmem:[#allocation2 + $0x2c] sm:$0x1] %v547_v6  ;;  %v972_v11 = vrot.slane %v970_v63, 5  ;;  %v981_v12 = vshrl.u32 %v901_v59, 16  ;;  %4645 = vmatprep.mubr.msk.bf16.mxu0 %vm709_vm2, %v4298_v2 }
 0x105   : > { %v984_v13 = vshll.u32 %v901_v59, 16  ;;  %v948_v14 = vshll.u32 %v896_v9, 16  ;;  %v960_v15 = vrot.slane %v959_v5, 4  ;;  %v903_v18 = vld [vmem:[#allocation2 + $0x30] sm:$0xf]  ;;  %v551_v26 = vsel %vm5798_vm5, %v462_v16, %v550_v7  ;;  %s4527_s13 = sshll.u32 %s5483_s30, 10 }
 0x106   : > { %v905_v19 = vld [vmem:[#allocation2 + $0x38] sm:$0xf]  ;;  %v898_v20 = vld [vmem:[#allocation2 + $0x1c] sm:$0x1]  ;;  %v973_v38 = vor.u32 %v972_v11, %v969_v10  ;;  %v983_v21 = vrot.slane %v981_v12, 4  ;;  %v995_v23 = vshrl.u32 %v903_v18, 16  ;;  %v555_v27 = vsel %vm5798_vm5, %v464_v17, %v554_v8  ;;  %s6558_s19 = scalar_lea.hbm %s6614_s7, %s4527_s13 }
 0x107   : > { %v986_v22 = vrot.slane %v984_v13, 5  ;;  %v950_v24 = vrot.slane %v948_v14, 5  ;;  %v962_v25 = vshll.u32 %v898_v20, 16  ;;  %v413_v28 = vld [vmem:[%s5723_s29 + $0x90] sm:$0xf]  ;;  %v998_v33 = vshll.u32 %v903_v18, 16 }
 0x108   : > { %v415_v29 = vld [vmem:[%s5723_s29 + $0x98] sm:$0xf]  ;;  %v974_v30 = vrot.slane %v973_v38, 4  ;;  %552 = vst [vmem:[#allocation2 + $0x34] sm:$0x1] %v551_v26  ;;  %v997_v32 = vrot.slane %v995_v23, 4  ;;  %v485_v45 = vmax.bf16 %v5417_v4, %v413_v28 }
 0x109   : > { %v987_v31 = vor.u32 %v986_v22, %v983_v21  ;;  %556 = vst [vmem:[#allocation2 + $0x3c] sm:$0x1] %v555_v27  ;;  %v951_v34 = vsel %vm5915_vm8, %v946_v3, %v950_v24  ;;  %v964_v36 = vrot.slane %v962_v25, 5  ;;  %v1009_v37 = vshrl.u32 %v905_v19, 16  ;;  %v417_v40 = vld [vmem:[%s5723_s29 + $0xa0] sm:$0xf] }
 0x10a   : > { %v1012_v39 = vshll.u32 %v905_v19, 16  ;;  %v900_v41 = vld [vmem:[#allocation2 + $0x24] sm:$0x1]  ;;  %v1000_v44 = vrot.slane %v998_v33, 5  ;;  %v487_v46 = vmax.bf16 %v5417_v4, %v415_v29  ;;  %v419_v47 = vld [vmem:[%s5723_s29 + $0xa8] sm:$0xf]  ;;  %v489_v58 = vmax.bf16 %v5417_v4, %v417_v40 }
 0x10b   : > { %v988_v43 = vrot.slane %v987_v31, 4  ;;  %v965_v48 = vsel %vm5915_vm8, %v960_v15, %v964_v36  ;;  %v902_v49 = vld [vmem:[#allocation2 + $0x2c] sm:$0x1]  ;;  %v976_v50 = vshll.u32 %v900_v41, 16  ;;  %v1011_v52 = vrot.slane %v1009_v37, 4  ;;  %s4134_s20 = sshll.u32 %s375_s17, 4  ;;  %s6560_s20 = int_to_ptr.vmem [resolvable:$true] %s4134_s20 }
 0x10c   : > { %v1014_v53 = vrot.slane %v1012_v39, 5  ;;  %v5956_v54 = vld [vmem:[#allocation7 + $0x8] sm:$0x3]  ;;  %v4299_v55 = vcombine.low %v951_v34, %v965_v48  ;;  %v990_v56 = vshll.u32 %v902_v49, 16  ;;  %v1001_v57 = vor.u32 %v1000_v44, %v997_v32  ;;  %597 = vst.msk [vmem:[#allocation2 + $0x90] sm:$0xf] %vm521_vm1, %v485_v45 }
 0x10d   : > { %601 = vst.msk [vmem:[#allocation2 + $0x98] sm:$0xf] %vm521_vm1, %v487_v46  ;;  %v421_v59 = vld [vmem:[%s5723_s29 + $0xb0] sm:$0xf]  ;;  %v423_v60 = vld [vmem:[%s5723_s29 + $0xb8] sm:$0xf]  ;;  %v491_v63 = vmax.bf16 %v5417_v4, %v419_v47 }
 0x10e   : > { %v978_v61 = vrot.slane %v976_v50, 5  ;;  %v1015_v62 = vor.u32 %v1014_v53, %v1011_v52  ;;  %v425_v0 = vld [vmem:[%s5723_s29 + $0xc0] sm:$0xf]  ;;  %v427_v1 = vld [vmem:[%s5723_s29 + $0xc8] sm:$0xf]  ;;  %4646 = vmatmul.mubr.msk.bf16.vlgmr.msra.gmra.mrb[0].mxu0 %vm709_vm2, %v4299_v55  ;;  %v992_v2 = vrot.slane %v990_v56, 5  ;;  %v493_v5 = vmax.bf16 %v5417_v4, %v421_v59 }
 0x10f   : > { %v1002_v3 = vrot.slane %v1001_v57, 4  ;;  %605 = vst.msk [vmem:[#allocation2 + $0xa0] sm:$0xf] %vm521_vm1, %v489_v58  ;;  %v495_v6 = vmax.bf16 %v5417_v4, %v423_v60  ;;  %v431_v7 = vld [vmem:[%s5723_s29 + $0xd8] sm:$0xf]  ;;  %4654 = vmatpush3.bf16.msra.mxu0 %v5925_v51  ;;  %v497_v13 = vmax.bf16 %v5417_v4, %v425_v0  ;;  %v499_v14 = vmax.bf16 %v5417_v4, %v427_v1  ;;  %s4121_s30 = scalar_lea.sflag [#allocation6], %s5719_s16 }
 0x110   : > { %v433_v8 = vld [vmem:[%s5723_s29 + $0xe0] sm:$0xf]  ;;  %v979_v9 = vsel %vm5915_vm8, %v974_v30, %v978_v61  ;;  %v904_v10 = vld [vmem:[#allocation2 + $0x34] sm:$0x1]  ;;  %v906_v11 = vld [vmem:[#allocation2 + $0x3c] sm:$0x1]  ;;  %v993_v15 = vsel %vm5915_vm8, %v988_v43, %v992_v2  ;;  %4955 = vmatprep.subr.msk.bf16.mxu0 %vm722_vm0, %v5956_v54  ;;  %v503_v51 = vmax.bf16 %v5417_v4, %v431_v7 }
 0x111   : > { %v1016_v12 = vrot.slane %v1015_v62, 4  ;;  %609 = vst.msk [vmem:[#allocation2 + $0xa8] sm:$0xf] %vm521_vm1, %v491_v63  ;;  %v1004_v16 = vshll.u32 %v904_v10, 16  ;;  %v1018_v17 = vshll.u32 %v906_v11, 16  ;;  %v4300_v19 = vcombine.low %v979_v9, %v993_v15  ;;  %s5326_s1 = scalar_lea.vmem %s6560_s20, 1024 }
 0x112   : > { %613 = vst.msk [vmem:[#allocation2 + $0xb0] sm:$0xf] %vm521_vm1, %v493_v5  ;;  %617 = vst.msk [vmem:[#allocation2 + $0xb8] sm:$0xf] %vm521_vm1, %v495_v6  ;;  %v435_v18 = vld [vmem:[%s5723_s29 + $0xe8] sm:$0xf]  ;;  %v505_v20 = vmax.bf16 %v5417_v4, %v433_v8  ;;  %p5327_p5 = scmp.ne.s32.totalorder %s6560_s20, %s5326_s1 }
 0x113   : > { %621 = vst.msk [vmem:[#allocation2 + $0xc0] sm:$0xf] %vm521_vm1, %v497_v13  ;;  %625 = vst.msk [vmem:[#allocation2 + $0xc8] sm:$0xf] %vm521_vm1, %v499_v14  ;;  %v437_v38 = vld [vmem:[%s5723_s29 + $0xf0] sm:$0xf]  ;;  %v507_v21 = vmax.bf16 %v5417_v4, %v435_v18  ;;  %4649 = vmatprep.mubr.msk.bf16.mxu0 %vm709_vm2, %v4300_v19 }
 0x114   : > { %v439_v22 = vld [vmem:[%s5723_s29 + $0xf8] sm:$0xf]  ;;  %v1006_v23 = vrot.slane %v1004_v16, 5  ;;  %v1020_v24 = vrot.slane %v1018_v17, 5  ;;  %633 = vst.msk [vmem:[#allocation2 + $0xd8] sm:$0xf] %vm521_vm1, %v503_v51  ;;  %v509_v25 = vmax.bf16 %v5417_v4, %v437_v38 }
 0x115   : > { %v441_v26 = vld [vmem:[%s5723_s29 + $0x100] sm:$0xf]  ;;  %v511_v27 = vmax.bf16 %v5417_v4, %v439_v22  ;;  %v443_v28 = vld [vmem:[%s5723_s29 + $0x108] sm:$0xf]  ;;  %637 = vst.msk [vmem:[#allocation2 + $0xe0] sm:$0xf] %vm521_vm1, %v505_v20 }
 0x116   : > { %v5087_v29 = vld [vmem:[#allocation2 + $0x90] ss:$8 sps:$4 sm:$0xff]   ;;  %641 = vst.msk [vmem:[#allocation2 + $0xe8] sm:$0xf] %vm521_vm1, %v507_v21  ;;  %v513_v30 = vmax.bf16 %v5417_v4, %v441_v26  ;;  %v515_v31 = vmax.bf16 %v5417_v4, %v443_v28  ;;  %v1007_v32 = vsel %vm5915_vm8, %v1002_v3, %v1006_v23  ;;  %v1021_v33 = vsel %vm5915_vm8, %v1016_v12, %v1020_v24  ;;  %v445_v34 = vld [vmem:[%s5723_s29 + $0x110] sm:$0xf] }
 0x117   : > { %645 = vst.msk [vmem:[#allocation2 + $0xf0] sm:$0xf] %vm521_vm1, %v509_v25  ;;  %649 = vst.msk [vmem:[#allocation2 + $0xf8] sm:$0xf] %vm521_vm1, %v511_v27  ;;  %v414_v36 = vld [vmem:[%s5723_s29 + $0x94] sm:$0x1]  ;;  %v4301_v39 = vcombine.low %v1007_v32, %v1021_v33  ;;  %v517_v40 = vmax.bf16 %v5417_v4, %v445_v34 }
 0x118   : > { %v416_v37 = vld [vmem:[%s5723_s29 + $0x9c] sm:$0x1]  ;;  %653 = vst.msk [vmem:[#allocation2 + $0x100] sm:$0xf] %vm521_vm1, %v513_v30  ;;  %657 = vst.msk [vmem:[#allocation2 + $0x108] sm:$0xf] %vm521_vm1, %v515_v31  ;;  %v486_v41 = vmax.bf16 %v5417_v4, %v414_v36 }
 0x119   : > { %v488_v43 = vmax.bf16 %v5417_v4, %v416_v37  ;;  %v598_v44 = vld [vmem:[#allocation2 + $0x94] sm:$0x1]  ;;  %v602_v45 = vld [vmem:[#allocation2 + $0x9c] sm:$0x1]  ;;  %v1362_v46 = vld [vmem:[#allocation2 + $0x90] sm:$0xf]  ;;  %4650 = vmatmul.mubr.msk.bf16.gmra.mrb[4].mxu0 %vm709_vm2, %v4301_v39 }
 0x11a   : > { %661 = vst.msk [vmem:[#allocation2 + $0x110] sm:$0xf] %vm521_vm1, %v517_v40  ;;  %v599_v47 = vsel %vm5798_vm5, %v486_v41, %v598_v44  ;;  %4655 = vmatprep.mubr.msk.bf16.mxu0 %vm709_vm2, %v5087_v29  ;;  %v1379_v49 = vshrl.u32 %v1362_v46, 16  ;;  %v1382_v50 = vshll.u32 %v1362_v46, 16  ;;  %v5088_v52 = vld [vmem:[#allocation2 + $0xa0] ss:$8 sps:$4 sm:$0xff]  }
 0x11b   : > { %v603_v48 = vsel %vm5798_vm5, %v488_v43, %v602_v45  ;;  %600 = vst [vmem:[#allocation2 + $0x94] sm:$0x1] %v599_v47  ;;  %v1364_v53 = vld [vmem:[#allocation2 + $0x98] sm:$0xf]  ;;  %v1287_v56 = vsel %vm722_vm0, %v5956_v54, 0  ;;  %vm2264_vm9 = vcmask 125952  }
 0x11c   : > { %604 = vst [vmem:[#allocation2 + $0x9c] sm:$0x1] %v603_v48  ;;  %v5089_v55 = vld [vmem:[#allocation2 + $0xb0] ss:$8 sps:$4 sm:$0xff]   ;;  %v1381_v58 = vrot.slane %v1379_v49, 4  ;;  %v1384_v59 = vrot.slane %v1382_v50, 5 }
 0x11d   : > { %v1491_v57 = vld [vmem:[#allocation7 + $0xa] sm:$0x3]  ;;  %v1393_v60 = vshrl.u32 %v1364_v53, 16  ;;  %v1396_v61 = vshll.u32 %v1364_v53, 16  ;;  %v418_v62 = vld [vmem:[%s5723_s29 + $0xa4] sm:$0x1] }
 0x11e   : > { %v490_v63 = vmax.bf16 %v5417_v4, %v418_v62  ;;  %v1385_v1 = vor.u32 %v1384_v59, %v1381_v58  ;;  %v420_v2 = vld [vmem:[%s5723_s29 + $0xac] sm:$0x1]  ;;  %v606_v3 = vld [vmem:[#allocation2 + $0xa4] sm:$0x1]  ;;  %v610_v7 = vld [vmem:[#allocation2 + $0xac] sm:$0x1] }
 0x11f   : > { %v492_v5 = vmax.bf16 %v5417_v4, %v420_v2  ;;  %v1366_v8 = vld [vmem:[#allocation2 + $0xa0] sm:$0xf]  ;;  %v1395_v10 = vrot.slane %v1393_v60, 4  ;;  %v1398_v11 = vrot.slane %v1396_v61, 5  ;;  %v1368_v12 = vld [vmem:[#allocation2 + $0xa8] sm:$0xf] }
 0x120   : > { %v607_v6 = vsel %vm5798_vm5, %v490_v63, %v606_v3  ;;  %v5090_v9 = vld [vmem:[#allocation2 + $0xc0] ss:$8 sps:$4 sm:$0xff]   ;;  %v6035_v14 = vsel %vm722_vm0, %v1491_v57, 0  ;;  %v422_v17 = vld [vmem:[%s5723_s29 + $0xb4] sm:$0x1]  ;;  %v6040_v51 = vrot.slane %v1385_v1, 4 }
 0x121   : > { %4656 = vmatmul.mubr.msk.bf16.vlgmr.msra.gmra.mrb[0].mxu0 %vm709_vm2, %v5088_v52  ;;  %608 = vst [vmem:[#allocation2 + $0xa4] sm:$0x1] %v607_v6  ;;  %v5091_v13 = vld [vmem:[#allocation2 + $0xd8] ss:$8 sps:$4 sm:$0xff]   ;;  %v611_v16 = vsel %vm5798_vm5, %v492_v5, %v610_v7  ;;  %v1407_v19 = vshrl.u32 %v1366_v8, 16  ;;  %v1410_v20 = vshll.u32 %v1366_v8, 16  ;;  %v494_v23 = vmax.bf16 %v5417_v4, %v422_v17 }
 0x122   : > { %4664 = vmatpush3.bf16.msra.mxu0 %v1287_v56  ;;  %4659 = vmatprep.mubr.msk.bf16.mxu0 %vm709_vm2, %v5089_v55  ;;  %v1363_v0 = vld [vmem:[#allocation2 + $0x94] sm:$0x1]  ;;  %612 = vst [vmem:[#allocation2 + $0xac] sm:$0x1] %v611_v16  ;;  %v424_v38 = vld [vmem:[%s5723_s29 + $0xbc] sm:$0x1]  ;;  %v1399_v26 = vor.u32 %v1398_v11, %v1395_v10 }
 0x123   : > { %4956 = vmatprep.subr.msk.bf16.mxu0 %vm722_vm0, %v1491_v57  ;;  %v1365_v54 = vld [vmem:[#allocation2 + $0x9c] sm:$0x1]  ;;  %v1388_v15 = vshll.u32 %v1363_v0, 16  ;;  %v1421_v21 = vshrl.u32 %v1368_v12, 16  ;;  %v1424_v22 = vshll.u32 %v1368_v12, 16  ;;  %v496_v27 = vmax.bf16 %v5417_v4, %v424_v38  ;;  %p6649_p9 = scmp.ne.s32.totalorder %s6627_s12, 0 }
 0x124   : > { %v1402_v18 = vshll.u32 %v1365_v54, 16  ;;  %v614_v24 = vld [vmem:[#allocation2 + $0xb4] sm:$0x1]  ;;  %v618_v25 = vld [vmem:[#allocation2 + $0xbc] sm:$0x1]  ;;  %v1409_v37 = vrot.slane %v1407_v19, 4 }
 0x125   : > { %v1370_v28 = vld [vmem:[#allocation2 + $0xb0] sm:$0xf]  ;;  %v1372_v29 = vld [vmem:[#allocation2 + $0xb8] sm:$0xf]  ;;  %v426_v30 = vld [vmem:[%s5723_s29 + $0xc4] sm:$0x1]  ;;  %v615_v32 = vsel %vm5798_vm5, %v494_v23, %v614_v24  ;;  %v619_v39 = vsel %vm5798_vm5, %v496_v27, %v618_v25  ;;  %p5328_p12 = pnand %p5327_p5, %p6649_p9 }
 0x126   : > { %v6047_v31 = vrot.slane %v1388_v15, 5  ;;  %v1435_v33 = vshrl.u32 %v1370_v28, 16  ;;  %v1438_v34 = vshll.u32 %v1370_v28, 16  ;;  %v428_v36 = vld [vmem:[%s5723_s29 + $0xcc] sm:$0x1]  ;;  %v1449_v40 = vshrl.u32 %v1372_v29, 16 }
 0x127   : > { %616 = vst [vmem:[#allocation2 + $0xb4] sm:$0x1] %v615_v32  ;;  %v1452_v41 = vshll.u32 %v1372_v29, 16  ;;  %v622_v43 = vld [vmem:[#allocation2 + $0xc4] sm:$0x1]  ;;  %v1412_v45 = vrot.slane %v1410_v20, 5  ;;  %v498_v48 = vmax.bf16 %v5417_v4, %v426_v30  ;;  %v500_v57 = vmax.bf16 %v5417_v4, %v428_v36  ;;  %p5329_p13 = pneg %p5328_p12 }
 0x128   : > { %v5092_v44 = vld [vmem:[#allocation2 + $0xe8] ss:$8 sps:$4 sm:$0xff]   ;;  %v1423_v46 = vrot.slane %v1421_v21, 4  ;;  %v1426_v47 = vrot.slane %v1424_v22, 5  ;;  %620 = vst [vmem:[#allocation2 + $0xbc] sm:$0x1] %v619_v39  ;;  %v1391_v15 = vsel %vm5915_vm8, %v6040_v51, %v6047_v31 }
 0x129   : > { %4660 = vmatmul.mubr.msk.bf16.gmra.mrb[4].mxu0 %vm709_vm2, %v5090_v9  ;;  %v626_v49 = vld [vmem:[#allocation2 + $0xcc] sm:$0x1]  ;;  %v5093_v50 = vld [vmem:[#allocation2 + $0xf8] ss:$8 sps:$4 sm:$0xff]   ;;  %v1404_v52 = vrot.slane %v1402_v18, 5  ;;  %v1437_v55 = vrot.slane %v1435_v33, 4  ;;  %v623_v61 = vsel %vm5798_vm5, %v498_v48, %v622_v43  ;;  %v1413_v2 = vor.u32 %v1412_v45, %v1409_v37 }
 0x12a   : > { %4665 = vmatprep.mubr.msk.bf16.mxu0 %vm709_vm2, %v5091_v13  ;;  %v1367_v53 = vld [vmem:[#allocation2 + $0xa4] sm:$0x1]  ;;  %v1440_v56 = vrot.slane %v1438_v34, 5  ;;  %v1369_v58 = vld [vmem:[#allocation2 + $0xac] sm:$0x1]  ;;  %v1451_v59 = vrot.slane %v1449_v40, 4  ;;  %v627_v63 = vsel %vm5798_vm5, %v500_v57, %v626_v49  ;;  %v1427_v54 = vor.u32 %v1426_v47, %v1423_v46 }
 0x12b   : > { %v1454_v60 = vrot.slane %v1452_v41, 5  ;;  %v1374_v62 = vld [vmem:[#allocation2 + $0xc0] sm:$0xf]  ;;  %624 = vst [vmem:[#allocation2 + $0xc4] sm:$0x1] %v623_v61  ;;  %v1400_v1 = vrot.slane %v1399_v26, 4 }
 0x12c   : > { %v1376_v0 = vld [vmem:[#allocation2 + $0xc8] sm:$0xf]  ;;  %v1416_v3 = vshll.u32 %v1367_v53, 16  ;;  %628 = vst [vmem:[#allocation2 + $0xcc] sm:$0x1] %v627_v63  ;;  %v1430_v6 = vshll.u32 %v1369_v58, 16  ;;  %v1441_v7 = vor.u32 %v1440_v56, %v1437_v55 }
 0x12d   : > { %v1602_v5 = vld [vmem:[#allocation7 + $0xc] sm:$0x3]  ;;  %v1463_v8 = vshrl.u32 %v1374_v62, 16  ;;  %v1466_v9 = vshll.u32 %v1374_v62, 16  ;;  %v1455_v11 = vor.u32 %v1454_v60, %v1451_v59  ;;  %v1477_v12 = vshrl.u32 %v1376_v0, 16  ;;  %s5419_s23 = smov [#allocation16]  }
 0x12e   : > { %v1371_v10 = vld [vmem:[#allocation2 + $0xb4] sm:$0x1]  ;;  %v1480_v13 = vshll.u32 %v1376_v0, 16  ;;  %v5094_v18 = vld [vmem:[#allocation2 + $0x108] ss:$8 sps:$4 sm:$0xff]   ;;  %v1405_v19 = vsel %vm5915_vm8, %v1400_v1, %v1404_v52  ;;  %v1414_v20 = vrot.slane %v1413_v2, 4 }
 0x12f   : > { %v1373_v16 = vld [vmem:[#allocation2 + $0xbc] sm:$0x1]  ;;  %v1444_v17 = vshll.u32 %v1371_v10, 16  ;;  %v1428_v38 = vrot.slane %v1427_v54, 4  ;;  %v1442_v22 = vrot.slane %v1441_v7, 4  ;;  %v1465_v23 = vrot.slane %v1463_v8, 4 }
 0x130   : > { %v1458_v21 = vshll.u32 %v1373_v16, 16  ;;  %v1468_v24 = vrot.slane %v1466_v9, 5  ;;  %v1432_v25 = vrot.slane %v1430_v6, 5  ;;  %v1456_v26 = vrot.slane %v1455_v11, 4  ;;  %v393_v28 = vld [vmem:[%s5723_s29 + $0x40] sm:$0xf] }
 0x131   : > { %4666 = vmatmul.mubr.msk.bf16.vlgmr.msra.gmra.mrb[0].mxu0 %vm709_vm2, %v5092_v44  ;;  %v1479_v27 = vrot.slane %v1477_v12, 4  ;;  %v1482_v51 = vrot.slane %v1480_v13, 5  ;;  %v4322_v29 = vcombine.low %v1391_v15, %v1405_v19  ;;  %v1446_v30 = vrot.slane %v1444_v17, 5  ;;  %v411_v46 = vld [vmem:[%s5723_s29 + $0x88] sm:$0xf]  ;;  %s5330_s10 = sshll.u32 %s5419_s23, 4  ;;  %s5331_s10 = int_to_ptr.vmem [resolvable:$false] %s5330_s10 }
 0x132   : > { %4674 = vmatpush3.bf16.msra.mxu0 %v6035_v14  ;;  %4669 = vmatprep.mubr.msk.bf16.mxu0 %vm709_vm2, %v5093_v50  ;;  %v1418_v14 = vrot.slane %v1416_v3, 5  ;;  %v1460_v31 = vrot.slane %v1458_v21, 5  ;;  %v1375_v32 = vld [vmem:[#allocation2 + $0xc4] sm:$0x1]  ;;  %v465_v33 = vmax.bf16 %v5417_v4, %v393_v28  ;;  %v1469_v37 = vor.u32 %v1468_v24, %v1465_v23  ;;  %v1721_v57 = vld [vmem:[#allocation7 + $0xe] sm:$0x3]  ;;  %p5333_p1 = scmp.lt.s32.totalorder %s6560_s20, %s5331_s10 }
 0x133   : > { %4957 = vmatprep.subr.msk.bf16.mxu0 %vm722_vm0, %v1602_v5  ;;  %v1377_v34 = vld [vmem:[#allocation2 + $0xcc] sm:$0x1]  ;;  %v1433_v39 = vsel %vm5915_vm8, %v1428_v38, %v1432_v25  ;;  %v1472_v40 = vshll.u32 %v1375_v32, 16  ;;  %v1483_v41 = vor.u32 %v1482_v51, %v1479_v27  ;;  %v1447_v44 = vsel %vm5915_vm8, %v1442_v22, %v1446_v30  ;;  %v5095_v61 = vld [vmem:[#allocation2 + $0x8] ss:$8 sps:$4 sm:$0xff]   ;;  %s5332_s9 = scalar_lea.vmem %s5331_s10, 2048 }
 0x134   : > { %557 = vst.msk [vmem:[#allocation2 + $0x40] sm:$0xf] %vm521_vm1, %v465_v33  ;;  %v1419_v36 = vsel %vm5915_vm8, %v1414_v20, %v1418_v14  ;;  %v1486_v43 = vshll.u32 %v1377_v34, 16  ;;  %v1461_v45 = vsel %vm5915_vm8, %v1456_v26, %v1460_v31  ;;  %v483_v47 = vmax.bf16 %v5417_v4, %v411_v46  ;;  %v394_v62 = vld [vmem:[%s5723_s29 + $0x44] sm:$0x1]  ;;  %p5334_p3 = scmp.lt.s32.totalorder %s5332_s9, %s5326_s1 }
 0x135   : > { %v4323_v48 = vcombine.low %v1419_v36, %v1433_v39  ;;  %v1470_v49 = vrot.slane %v1469_v37, 4  ;;  %v4324_v50 = vcombine.low %v1447_v44, %v1461_v45  ;;  %v1474_v52 = vrot.slane %v1472_v40, 5  ;;  %v558_v63 = vld [vmem:[#allocation2 + $0x44] sm:$0x1]  ;;  %v1830_v2 = vld [vmem:[#allocation2 + $0x8] sm:$0xf] }
 0x136   : > { %v1484_v53 = vrot.slane %v1483_v41, 4  ;;  %v1488_v55 = vrot.slane %v1486_v43, 5  ;;  %593 = vst.msk [vmem:[#allocation2 + $0x88] sm:$0xf] %vm521_vm1, %v483_v47  ;;  %v1636_v56 = vsel %vm722_vm0, %v1602_v5, 0  ;;  %v466_v0 = vmax.bf16 %v5417_v4, %v394_v62  ;;  %p5335_p2 = por %p5334_p3, %p5333_p1 }
 0x137   : > { %v1475_v58 = vsel %vm5915_vm8, %v1470_v49, %v1474_v52  ;;  %v1755_v1 = vsel %vm722_vm0, %v1721_v57, 0  ;;  %v5096_v54 = vld [vmem:[#allocation2 + $0x18] ss:$8 sps:$4 sm:$0xff]   ;;  %v5097_v5 = vld [vmem:[#allocation2 + $0x28] ss:$8 sps:$4 sm:$0xff]   ;;  %v1847_v8 = vshrl.u32 %v1830_v2, 16 }
 0x138   : > { %v1489_v59 = vsel %vm5915_vm8, %v1484_v53, %v1488_v55  ;;  %v559_v3 = vsel %vm5798_vm5, %v466_v0, %v558_v63  ;;  %v1959_v6 = vld [vmem:[#allocation7 + $0x10] sm:$0x3]  ;;  %v1832_v7 = vld [vmem:[#allocation2 + $0x10] sm:$0xf]  ;;  %v1850_v9 = vshll.u32 %v1830_v2, 16  ;;  %vm2266_vm10 = vcmask 122880   ;;  %p5336_p8 = pnand %p5335_p2, %p5329_p13 }
 0x139   : > { %4670 = vmatmul.mubr.msk.bf16.gmra.mrb[4].mxu0 %vm709_vm2, %v5094_v18  ;;  %v4325_v60 = vcombine.low %v1475_v58, %v1489_v59  ;;  %560 = vst [vmem:[#allocation2 + $0x44] sm:$0x1] %v559_v3  ;;  %v1861_v10 = vshrl.u32 %v1832_v7, 16  ;;  %v1864_v11 = vshll.u32 %v1832_v7, 16  ;;  %v1831_v12 = vld [vmem:[#allocation2 + $0xc] sm:$0x1] }
 0x13a   : > { %4675 = vmatprep.mubr.msk.bf16.mxu0 %vm709_vm2, %v4322_v29  ;;  %v1833_v42 = vld [vmem:[#allocation2 + $0x14] sm:$0x1]  ;;  %v1834_v15 = vld [vmem:[#allocation2 + $0x18] sm:$0xf]  ;;  %v1849_v17 = vrot.slane %v1847_v8, 4  ;;  %v1852_v18 = vrot.slane %v1850_v9, 5 }
 0x13b   : > { %v5098_v13 = vld [vmem:[#allocation2 + $0x38] ss:$8 sps:$4 sm:$0xff]   ;;  %v1863_v19 = vrot.slane %v1861_v10, 4  ;;  %v1866_v20 = vrot.slane %v1864_v11, 5  ;;  %v1856_v21 = vshll.u32 %v1831_v12, 16  ;;  %v1870_v22 = vshll.u32 %v1833_v42, 16 }
 0x13c   : > { %v5099_v16 = vld [vmem:[#allocation2 + $0x50] ss:$8 sps:$4 sm:$0xff]   ;;  %v1836_v38 = vld [vmem:[#allocation2 + $0x20] sm:$0xf]  ;;  %v1853_v14 = vor.u32 %v1852_v18, %v1849_v17  ;;  %v1875_v23 = vshrl.u32 %v1834_v15, 16  ;;  %v1878_v27 = vshll.u32 %v1834_v15, 16 }
 0x13d   : > { %v1838_v24 = vld [vmem:[#allocation2 + $0x28] sm:$0xf]  ;;  %v1840_v25 = vld [vmem:[#allocation2 + $0x30] sm:$0xf]  ;;  %v1867_v26 = vor.u32 %v1866_v20, %v1863_v19  ;;  %v1889_v51 = vshrl.u32 %v1836_v38, 16  ;;  %v1892_v28 = vshll.u32 %v1836_v38, 16 }
 0x13e   : > { %v5100_v29 = vld [vmem:[#allocation2 + $0x60] ss:$8 sps:$4 sm:$0xff]   ;;  %v1903_v30 = vshrl.u32 %v1838_v24, 16  ;;  %v1906_v31 = vshll.u32 %v1838_v24, 16  ;;  %v1917_v32 = vshrl.u32 %v1840_v25, 16  ;;  %v1920_v33 = vshll.u32 %v1840_v25, 16 }
 0x13f   : > { %v1854_v34 = vrot.slane %v1853_v14, 4  ;;  %v1858_v36 = vrot.slane %v1856_v21, 5  ;;  %v1872_v37 = vrot.slane %v1870_v22, 5  ;;  %v1835_v39 = vld [vmem:[#allocation2 + $0x1c] sm:$0x1]  ;;  %v1877_v40 = vrot.slane %v1875_v23, 4 }
 0x140   : > { %v1868_v41 = vrot.slane %v1867_v26, 4  ;;  %v1837_v43 = vld [vmem:[#allocation2 + $0x24] sm:$0x1]  ;;  %v1880_v44 = vrot.slane %v1878_v27, 5  ;;  %v1891_v45 = vrot.slane %v1889_v51, 4  ;;  %v1894_v46 = vrot.slane %v1892_v28, 5 }
 0x141   : > { %4676 = vmatmul.mubr.msk.bf16.vlgmr.msra.gmra.mrb[0].mxu0 %vm709_vm2, %v4323_v48  ;;  %v1985_v47 = vsel %vm722_vm0, %v1959_v6, 0  ;;  %v5101_v48 = vld [vmem:[#allocation2 + $0x70] ss:$8 sps:$4 sm:$0xff]   ;;  %v1908_v52 = vrot.slane %v1906_v31, 5  ;;  %v1919_v53 = vrot.slane %v1917_v32, 4  ;;  %v1922_v55 = vrot.slane %v1920_v33, 5 }
 0x142   : > { %4684 = vmatpush3.bf16.msra.mxu0 %v1636_v56  ;;  %4679 = vmatprep.mubr.msk.bf16.mxu0 %vm709_vm2, %v4324_v50  ;;  %v1842_v49 = vld [vmem:[#allocation2 + $0x38] sm:$0xf]  ;;  %v1905_v50 = vrot.slane %v1903_v30, 4  ;;  %v1844_v56 = vld [vmem:[#allocation2 + $0x40] sm:$0xf]  ;;  %v1898_v58 = vshll.u32 %v1837_v43, 16  ;;  %v1873_v62 = vsel %vm5915_vm8, %v1868_v41, %v1872_v37  ;;  %v1881_v63 = vor.u32 %v1880_v44, %v1877_v40 }
 0x143   : > { %4958 = vmatprep.subr.msk.bf16.mxu0 %vm722_vm0, %v1721_v57  ;;  %v1884_v57 = vshll.u32 %v1835_v39, 16  ;;  %v1839_v59 = vld [vmem:[#allocation2 + $0x2c] sm:$0x1]  ;;  %v1895_v0 = vor.u32 %v1894_v46, %v1891_v45  ;;  %v1934_v2 = vshll.u32 %v1842_v49, 16  ;;  %v1945_v3 = vshrl.u32 %v1844_v56, 16  ;;  %v5103_v41 = vld [vmem:[#allocation12 + $0x8] sm:$0xff]  }
 0x144   : > { %v1923_v7 = vor.u32 %v1922_v55, %v1919_v53  ;;  %v5102_v10 = vld [vmem:[#allocation2 + $0x80] ss:$8 sps:$4 sm:$0xff]   ;;  %v1882_v12 = vrot.slane %v1881_v63, 4  ;;  %v1900_v42 = vrot.slane %v1898_v58, 5  ;;  %v1843_v15 = vld [vmem:[#allocation2 + $0x3c] sm:$0x1]  ;;  %4813 = vmatprep.subr.bf16.mxu1 %v5103_v41 }
 0x145   : > { %v1886_v9 = vrot.slane %v1884_v57, 5  ;;  %v1936_v17 = vrot.slane %v1934_v2, 5  ;;  %v1947_v18 = vrot.slane %v1945_v3, 4  ;;  %v1845_v22 = vld [vmem:[#allocation2 + $0x44] sm:$0x1]  ;;  %v1940_v24 = vshll.u32 %v1843_v15, 16  ;;  %4814 = vmatpush3.bf16.msra.mxu1 %v5103_v41 }
 0x146   : > { %v1924_v21 = vrot.slane %v1923_v7, 4  ;;  %v1954_v51 = vshll.u32 %v1845_v22, 16  ;;  %2282 = vst.msk [vmem:[#allocation3] sm:$0xf] %vm2264_vm9, %v5417_v4  ;;  %2285 = vst.msk [vmem:[#allocation3 + $0x48] sm:$0xf] %vm2264_vm9, %v5417_v4 }
 0x147   : > { %v1887_v23 = vsel %vm5915_vm8, %v1882_v12, %v1886_v9  ;;  %v1942_v31 = vrot.slane %v1940_v24, 5  ;;  %2283 = vst.msk [vmem:[#allocation3 + $0x4] sm:$0x1] %vm2266_vm10, %v5417_v4  ;;  %2286 = vst.msk [vmem:[#allocation3 + $0x4c] sm:$0x1] %vm2266_vm10, %v5417_v4  ;;  %v6139_v43 = vld [vmem:[#allocation12] sm:$0xff]  }
 0x148   : > { %4723 = vmatprep.subr.bf16.mxu1 %v6139_v43  ;;  %v4485_v44 = vld [vmem:[%s5723_s29 + $0x8] sm:$0xf]  ;;  %v4486_v45 = vld [vmem:[%s5723_s29 + $0xc] sm:$0x1]  ;;  %v4487_v46 = vld [vmem:[%s5723_s29 + $0x10] sm:$0xf] }
 0x149   : > { %4680 = vmatmul.mubr.msk.bf16.gmra.mrb[4].mxu0 %vm709_vm2, %v4325_v60  ;;  %v1841_v60 = vld [vmem:[#allocation2 + $0x34] sm:$0x1]  ;;  %v3864_v4 = vshll.u32 %v4487_v46, 16  ;;  %v4490_v2 = vld [vmem:[%s5723_s29 + $0x1c] sm:$0x1]  ;;  %vm2186_vm11 = vcmask 1040384  }
 0x14a   : > { %4685 = vmatprep.mubr.msk.bf16.mxu0 %vm709_vm2, %v5095_v61  ;;  %v1859_v61 = vsel %vm5915_vm8, %v1854_v34, %v1858_v36  ;;  %v1926_v8 = vshll.u32 %v1841_v60, 16  ;;  %v1956_v36 = vrot.slane %v1954_v51, 5  ;;  %v3884_v9 = vshll.u32 %v4490_v2, 16  ;;  %v4493_v12 = vld [vmem:[%s5723_s29 + $0x28] sm:$0xf]  ;;  %vm6198_vm14 = vmand %vm2186_vm11, %vm524_vm4 }
 0x14b   : > { %v4346_v11 = vcombine.low %v1859_v61, %v1873_v62  ;;  %v3866_v58 = vrot.slane %v3864_v4, 5  ;;  %v3906_v24 = vshll.u32 %v4493_v12, 16  ;;  %vm2196_vm12 = vcmask 1044480  }
 0x14c   : > { %v1928_v14 = vrot.slane %v1926_v8, 5  ;;  %vm2197_vm13 = vsmask.f32 4352  ;;  %vm2643_vm1 = vcmask 1042432   ;;  %vm2644_vm3 = vcmask 1046532  }
 0x14d   : > { %vm6205_vm15 = vmand %vm2196_vm12, %vm2197_vm13  ;;  %vm4020_vm5 = vcmask 1043456   ;;  %vm4011_vm6 = vcmask 64512  }
 0x14e   : > { %vm6346_vm4 = vmor %vm2643_vm1, %vm2644_vm3 }
 0x151   : > { %4686 = vmatmul.mubr.msk.bf16.vlgmr.msra.gmra.mrb[0].mxu0 %vm709_vm2, %v5096_v54  ;;  %v1948_v54 = vshll.u32 %v1844_v56, 16 }
 0x152   : > { %4694 = vmatpush3.bf16.msra.mxu0 %v1755_v1  ;;  %4689 = vmatprep.mubr.msk.bf16.mxu0 %vm709_vm2, %v5097_v5  ;;  %v1931_v1 = vshrl.u32 %v1842_v49, 16  ;;  %v1909_v5 = vor.u32 %v1908_v52, %v1905_v50  ;;  %v3850_v49 = vshll.u32 %v4485_v44, 16  ;;  %v3856_v50 = vshll.u32 %v4486_v45, 16  ;;  %v4499_v45 = vld [vmem:[%s5723_s29 + $0x40] sm:$0xf] }
 0x153   : > { %4959 = vmatprep.subr.msk.bf16.mxu0 %vm722_vm0, %v1959_v6  ;;  %v1912_v6 = vshll.u32 %v1839_v59, 16  ;;  %v1950_v19 = vrot.slane %v1948_v54, 5  ;;  %v3861_v52 = vshrl.u32 %v4487_v46, 16  ;;  %v4491_v54 = vld [vmem:[%s5723_s29 + $0x20] sm:$0xf]  ;;  %vm2438_vm0 = vcmask 130048  }
 0x154   : > { %v1910_v20 = vrot.slane %v1909_v5, 4  ;;  %v3852_v56 = vrot.slane %v3850_v49, 5  ;;  %v3858_v60 = vrot.slane %v3856_v50, 5  ;;  %v4492_v5 = vld [vmem:[%s5723_s29 + $0x24] sm:$0x1] }
 0x155   : > { %v1914_v38 = vrot.slane %v1912_v6, 5  ;;  %v1951_v27 = vor.u32 %v1950_v19, %v1947_v18  ;;  %v3863_v57 = vrot.slane %v3861_v52, 4  ;;  %v3886_v18 = vrot.slane %v3884_v9, 5  ;;  %v4500_v49 = vld [vmem:[%s5723_s29 + $0x44] sm:$0x1] }
 0x157   : > { %v1915_v28 = vsel %vm5915_vm8, %v1910_v20, %v1914_v38  ;;  %v1952_v34 = vrot.slane %v1951_v27, 4  ;;  %v3867_v61 = vor.u32 %v3866_v58, %v3863_v57  ;;  %v4495_v38 = vld [vmem:[%s5723_s29 + $0x30] sm:$0xf] }
 0x158   : > { %v3917_v51 = vshrl.u32 %v4495_v38, 16 }
 0x159   : > { %4690 = vmatmul.mubr.msk.bf16.gmra.mrb[4].mxu0 %vm709_vm2, %v5098_v13  ;;  %v1896_v13 = vrot.slane %v1895_v0, 4  ;;  %v1957_v39 = vsel %vm5915_vm8, %v1952_v34, %v1956_v36  ;;  %v3868_v0 = vrot.slane %v3867_v61, 4 }
 0x15a   : > { %4695 = vmatprep.mubr.msk.bf16.mxu0 %vm709_vm2, %v5099_v16  ;;  %v1933_v16 = vrot.slane %v1931_v1, 4  ;;  %v4489_v1 = vld [vmem:[%s5723_s29 + $0x18] sm:$0xf]  ;;  %v3919_v34 = vrot.slane %v3917_v51, 4 }
 0x15b   : > { %v1901_v25 = vsel %vm5915_vm8, %v1896_v13, %v1900_v42  ;;  %v3875_v6 = vshrl.u32 %v4489_v1, 16  ;;  %v3878_v7 = vshll.u32 %v4489_v1, 16 }
 0x15c   : > { %v1937_v26 = vor.u32 %v1936_v17, %v1933_v16  ;;  %v4347_v30 = vcombine.low %v1887_v23, %v1901_v25  ;;  %v3898_v16 = vshll.u32 %v4492_v5, 16  ;;  %v4494_v17 = vld [vmem:[%s5723_s29 + $0x2c] sm:$0x1]  ;;  %v4496_v23 = vld [vmem:[%s5723_s29 + $0x34] sm:$0x1] }
 0x15d   : > { %v3877_v42 = vrot.slane %v3875_v6, 4  ;;  %v3880_v15 = vrot.slane %v3878_v7, 5  ;;  %v3912_v25 = vshll.u32 %v4494_v17, 16 }
 0x15e   : > { %v1938_v33 = vrot.slane %v1937_v26, 4  ;;  %v3900_v22 = vrot.slane %v3898_v16, 5 }
 0x160   : > { %v1943_v37 = vsel %vm5915_vm8, %v1938_v33, %v1942_v31  ;;  %v3926_v31 = vshll.u32 %v4496_v23, 16  ;;  %v3914_v33 = vrot.slane %v3912_v25, 5 }
 0x161   : > { %4696 = vmatmul.mubr.msk.bf16.vlgmr.msra.gmra.mrb[0].mxu0 %vm709_vm2, %v5100_v29  ;;  %v1929_v29 = vsel %vm5915_vm8, %v1924_v21, %v1928_v14  ;;  %v4349_v40 = vcombine.low %v1943_v37, %v1957_v39  ;;  %v3903_v21 = vshrl.u32 %v4493_v12, 16  ;;  %v3881_v14 = vor.u32 %v3880_v15, %v3877_v42  ;;  %v4497_v37 = vld [vmem:[%s5723_s29 + $0x38] sm:$0xf]  ;;  %v6180_v42 = vld [vmem:[#allocation3] sm:$0xf] }
 0x162   : > { %4704 = vmatpush3.bf16.msra.mxu0 %v1985_v47  ;;  %4699 = vmatprep.mubr.msk.bf16.mxu0 %vm709_vm2, %v5101_v48  ;;  %v4348_v32 = vcombine.low %v1915_v28, %v1929_v29  ;;  %v4488_v47 = vld [vmem:[%s5723_s29 + $0x14] sm:$0x1]  ;;  %v3847_v48 = vshrl.u32 %v4485_v44, 16  ;;  %v3920_v28 = vshll.u32 %v4495_v38, 16  ;;  %v4498_v44 = vld [vmem:[%s5723_s29 + $0x3c] sm:$0x1] }
 0x163   : > { %4713 = vmatprep.subr.bf16.mxu0 %v5103_v41  ;;  %v3870_v53 = vshll.u32 %v4488_v47, 16  ;;  %v3905_v27 = vrot.slane %v3903_v21, 4  ;;  %v3882_v29 = vrot.slane %v3881_v14, 4  ;;  %v3931_v46 = vshrl.u32 %v4497_v37, 16 }
 0x164   : > { %v3849_v55 = vrot.slane %v3847_v48, 4  ;;  %v3922_v36 = vrot.slane %v3920_v28, 5  ;;  %v3934_v50 = vshll.u32 %v4497_v37, 16  ;;  %v3940_v52 = vshll.u32 %v4498_v44, 16 }
 0x165   : > { %v3872_v62 = vrot.slane %v3870_v53, 5  ;;  %v3887_v39 = vsel %vm5915_vm8, %v3882_v29, %v3886_v18  ;;  %v2306_v21 = vshrl.u32 %v6180_v42, 16  ;;  %v2309_v23 = vshll.u32 %v6180_v42, 16  ;;  %v6188_v29 = vld [vmem:[#allocation3 + $0x4] sm:$0x1] }
 0x166   : > { %v3853_v59 = vor.u32 %v3852_v56, %v3849_v55  ;;  %v3923_v48 = vor.u32 %v3922_v36, %v3919_v34  ;;  %v3933_v55 = vrot.slane %v3931_v46, 4  ;;  %v3945_v56 = vshrl.u32 %v4499_v45, 16 }
 0x167   : > { %v3873_v8 = vsel %vm5915_vm8, %v3868_v0, %v3872_v62  ;;  %v3936_v58 = vrot.slane %v3934_v50, 5  ;;  %v3954_v62 = vshll.u32 %v4500_v49, 16  ;;  %v3942_v1 = vrot.slane %v3940_v52, 5 }
 0x168   : > { %v3854_v63 = vrot.slane %v3853_v59, 4  ;;  %v3924_v57 = vrot.slane %v3923_v48, 4  ;;  %v3948_v59 = vshll.u32 %v4499_v45, 16  ;;  %v3947_v61 = vrot.slane %v3945_v56, 4 }
 0x169   : > { %4700 = vmatmul.mubr.msk.bf16.gmra.mrb[4].mxu0 %vm709_vm2, %v5102_v10  ;;  %v3889_v10 = vshrl.u32 %v4491_v54, 16  ;;  %v3937_v0 = vor.u32 %v3936_v58, %v3933_v55  ;;  %v3956_v6 = vrot.slane %v3954_v62, 5  ;;  %v6192_v34 = vrot.slane %v2309_v23, 5 }
 0x16a   : > { %4705 = vmatprep.mubr.msk.bf16.mxu0 %vm709_vm2, %v4346_v11  ;;  %v3859_v3 = vsel %vm5915_vm8, %v3854_v63, %v3858_v60  ;;  %v3892_v11 = vshll.u32 %v4491_v54, 16  ;;  %v3950_v2 = vrot.slane %v3948_v59, 5  ;;  %v2315_v36 = vshll.u32 %v6188_v29, 16 }
 0x16b   : > { %v4505_v13 = vcombine.low %v3859_v3, %v3873_v8  ;;  %v3891_v19 = vrot.slane %v3889_v10, 4  ;;  %v3938_v54 = vrot.slane %v3937_v0, 4 }
 0x16c   : > { %v3894_v20 = vrot.slane %v3892_v11, 5  ;;  %v3951_v5 = vor.u32 %v3950_v2, %v3947_v61  ;;  %v4354_v11 = vld [vmem:[#allocation9] ss:$0 sm:$0xff] }
 0x16d   : > { %3990 = vrot.lane.b32.xlu0 %v4505_v13, %s5418_s8  ;;  %v3943_v7 = vsel %vm5915_vm8, %v3938_v54, %v3942_v1  ;;  %v6178_v13 = vld [vmem:[#allocation10] ss:$0 sm:$0xff] }
 0x16e   : > { %v3895_v26 = vor.u32 %v3894_v20, %v3891_v19  ;;  %v3952_v8 = vrot.slane %v3951_v5, 4 }
 0x170   : > { %v3957_v9 = vsel %vm5915_vm8, %v3952_v8, %v3956_v6 }
 0x171   : > { %4706 = vmatmul.mubr.msk.bf16.vlgmr.msra.gmra.mrb[0].mxu0 %vm709_vm2, %v4347_v30  ;;  %v3908_v30 = vrot.slane %v3906_v24, 5  ;;  %v4508_v10 = vcombine.low %v3943_v7, %v3957_v9 }
 0x172   : > { %4709 = vmatprep.mubr.msk.bf16.mxu0 %vm709_vm2, %v4348_v32  ;;  %4714 = vmatpush3.bf16.msra.mxu0 %v5103_v41  ;;  %v3896_v32 = vrot.slane %v3895_v26, 4  ;;  %v3928_v41 = vrot.slane %v3926_v31, 5 }
 0x174   : > { %v3901_v47 = vsel %vm5915_vm8, %v3896_v32, %v3900_v22  ;;  %v3929_v63 = vsel %vm5915_vm8, %v3924_v57, %v3928_v41 }
 0x175   : > { %v4506_v4 = vcombine.low %v3887_v39, %v3901_v47 }
 0x177   : > { %3992 = vrot.lane.b32.xlu0 %v4506_v4, %s5418_s8 }
 0x179   : > { %4710 = vmatmul.mubr.msk.bf16.gmra.mrb[4].mxu0 %vm709_vm2, %v4349_v40  ;;  %v3909_v40 = vor.u32 %v3908_v30, %v3905_v27  ;;  %v6190_v30 = vrot.slane %v2306_v21, 4 }
 0x17b   : > { %v3910_v53 = vrot.slane %v3909_v40, 4 }
 0x17d   : > { %v3915_v60 = vsel %vm5915_vm8, %v3910_v53, %v3914_v33 }
 0x17e   : > { %v4507_v3 = vcombine.low %v3915_v60, %v3929_v63 }
 0x180   : > { %3994 = vrot.lane.b32.xlu1 %v4507_v3, %s5418_s8 }
 0x184   : > { %3996 = vrot.lane.b32.xlu1 %v4508_v10, %s5418_s8 }
 0x244   : > { %v4707_v12 = vpop.f32.mrb[0].mxu0 }
 0x245   : > { %v2069_v15 = vmul.f32 %v4707_v12, %v4354_v11  ;;  %v2021_v16 = vpop.f32.mrb[1].mxu0 }
 0x246   : > { %v2067_v17 = vmul.f32 %v4354_v11, %v2021_v16  ;;  %v4708_v18 = vpop.f32.mrb[2].mxu0 }
 0x247   : > { %v2084_v19 = vadd.f32 %v6178_v13, %v2069_v15  ;;  %v2070_v20 = vmul.f32 %v4708_v18, %v4354_v11  ;;  %v2024_v38 = vpop.f32.mrb[3].mxu0 }
 0x248   : > { %v2082_v14 = vadd.f32 %v6178_v13, %v2067_v17  ;;  %v2068_v22 = vmul.f32 %v4354_v11, %v2024_v38 }
 0x249   : > { %v2092_v24 = vmax.f32 %v2084_v19, 0.0  ;;  %v2085_v25 = vadd.f32 %v6178_v13, %v2070_v20 }
 0x24a   : > { %v2090_v26 = vmax.f32 %v2082_v14, 0.0  ;;  %v2083_v27 = vadd.f32 %v6178_v13, %v2068_v22 }
 0x24b   : > { %v4521_v51 = vpack.c.bf16 %v2092_v24, %v2092_v24  ;;  %v2093_v28 = vmax.f32 %v2085_v25, 0.0 }
 0x24c   : > { %v4519_v31 = vpack.c.bf16 %v2090_v26, %v2090_v26  ;;  %v2091_v32 = vmax.f32 %v2083_v27, 0.0  ;;  %v4711_v33 = vpop.f32.mrb[4].mxu0 }
 0x24d   : > { %v2137_v37 = vshrl.u32 %v4521_v51, 16  ;;  %v2140_v39 = vshll.u32 %v4521_v51, 16  ;;  %v4522_v40 = vpack.c.bf16 %v2093_v28, %v2093_v28  ;;  %v2073_v41 = vmul.f32 %v4711_v33, %v4354_v11  ;;  %v2037_v44 = vpop.f32.mrb[5].mxu0 }
 0x24e   : > { %v2123_v45 = vshrl.u32 %v4519_v31, 16  ;;  %v2126_v46 = vshll.u32 %v4519_v31, 16  ;;  %v4520_v47 = vpack.c.bf16 %v2091_v32, %v2091_v32  ;;  %v2071_v48 = vmul.f32 %v4354_v11, %v2037_v44  ;;  %v4712_v49 = vpop.f32.mrb[6].mxu0 }
 0x24f   : > { %v2139_v50 = vrot.slane %v2137_v37, 7  ;;  %v2144_v52 = vshrl.u32 %v4522_v40, 16  ;;  %v2147_v4 = vshll.u32 %v4522_v40, 16  ;;  %v2088_v53 = vadd.f32 %v6178_v13, %v2073_v41  ;;  %v2040_v55 = vpop.f32.mrb[7].mxu0 }
 0x250   : > { %v2125_v57 = vrot.slane %v2123_v45, 7  ;;  %v2130_v58 = vshrl.u32 %v4520_v47, 16  ;;  %v2133_v59 = vshll.u32 %v4520_v47, 16  ;;  %v2086_v60 = vadd.f32 %v6178_v13, %v2071_v48 }
 0x251   : > { %v2142_v61 = vor.u32 %v2140_v39, %v2139_v50  ;;  %v2146_v63 = vrot.slane %v2144_v52, 7  ;;  %v2096_v0 = vmax.f32 %v2088_v53, 0.0  ;;  %v2074_v1 = vmul.f32 %v4712_v49, %v4354_v11 }
 0x252   : > { %v2128_v2 = vor.u32 %v2126_v46, %v2125_v57  ;;  %v2132_v3 = vrot.slane %v2130_v58, 7  ;;  %v2094_v54 = vmax.f32 %v2086_v60, 0.0  ;;  %v2072_v5 = vmul.f32 %v4354_v11, %v2040_v55 }
 0x253   : > { %v2190_v6 = vsel %vm6198_vm14, 0, %v2142_v61  ;;  %v2149_v7 = vor.u32 %v2147_v4, %v2146_v63  ;;  %v4525_v8 = vpack.c.bf16 %v2096_v0, %v2096_v0  ;;  %v2089_v9 = vadd.f32 %v6178_v13, %v2074_v1 }
 0x254   : > { %v2201_v10 = vsel %vm6205_vm15, %v2190_v6, 0  ;;  %v2188_v12 = vsel %vm6198_vm14, 0, %v2128_v2  ;;  %v2135_v15 = vor.u32 %v2133_v59, %v2132_v3  ;;  %v4523_v16 = vpack.c.bf16 %v2094_v54, %v2094_v54 }
 0x255   : > { %v4368_v17 = vcombine.low %v2201_v10, %v2201_v10  ;;  %v4369_v18 = vcombine.high %v2201_v10, %v2201_v10  ;;  %v2199_v11 = vsel %vm6205_vm15, %v2188_v12, 0  ;;  %v2191_v19 = vsel %vm6198_vm14, 0, %v2149_v7 }
 0x256   : > { %v4364_v20 = vcombine.low %v2199_v11, %v2199_v11  ;;  %v4365_v38 = vcombine.high %v2199_v11, %v2199_v11  ;;  %v2202_v21 = vsel %vm6205_vm15, %v2191_v19, 0  ;;  %v2189_v14 = vsel %vm6198_vm14, 0, %v2135_v15 }
 0x257   : > { %2270 = vst.msk [vmem:[#allocation3 + $0x18] sm:$0xf] %vm2264_vm9, %v4368_v17  ;;  %v4370_v22 = vcombine.low %v2202_v21, %v2202_v21  ;;  %v4371_v23 = vcombine.high %v2202_v21, %v2202_v21  ;;  %v2200_v24 = vsel %vm6205_vm15, %v2189_v14, 0  ;;  %v2165_v25 = vshrl.u32 %v4525_v8, 16 }
 0x258   : > { %2271 = vst.msk [vmem:[#allocation3 + $0x1c] sm:$0x1] %vm2266_vm10, %v4369_v18  ;;  %2267 = vst.msk [vmem:[#allocation3 + $0xc] sm:$0x1] %vm2266_vm10, %v4365_v38  ;;  %v4366_v26 = vcombine.low %v2200_v24, %v2200_v24  ;;  %v4367_v27 = vcombine.high %v2200_v24, %v2200_v24  ;;  %v2151_v51 = vshrl.u32 %v4523_v16, 16  ;;  %v2312_v28 = vor.u32 %v6192_v34, %v6190_v30 }
 0x259   : > { %2265 = vst.msk [vmem:[#allocation3 + $0x8] sm:$0xf] %vm2264_vm9, %v4364_v20  ;;  %2272 = vst.msk [vmem:[#allocation3 + $0x20] sm:$0xf] %vm2264_vm9, %v4370_v22  ;;  %v2167_v31 = vrot.slane %v2165_v25, 7  ;;  %v2168_v32 = vshll.u32 %v4525_v8, 16  ;;  %v2087_v37 = vadd.f32 %v6178_v13, %v2072_v5 }
 0x25a   : > { %2273 = vst.msk [vmem:[#allocation3 + $0x24] sm:$0x1] %vm2266_vm10, %v4371_v23  ;;  %v2097_v33 = vmax.f32 %v2089_v9, 0.0  ;;  %2269 = vst.msk [vmem:[#allocation3 + $0x14] sm:$0x1] %vm2266_vm10, %v4367_v27  ;;  %v2153_v39 = vrot.slane %v2151_v51, 7 }
 0x25b   : > { %2268 = vst.msk [vmem:[#allocation3 + $0x10] sm:$0xf] %vm2264_vm9, %v4366_v26  ;;  %v2154_v40 = vshll.u32 %v4523_v16, 16  ;;  %v2170_v41 = vor.u32 %v2168_v32, %v2167_v31  ;;  %v2095_v45 = vmax.f32 %v2087_v37, 0.0  ;;  %v6237_v30 = vrot.slane %v2312_v28, 4 }
 0x25c   : > { %v4526_v44 = vpack.c.bf16 %v2097_v33, %v2097_v33  ;;  %v6241_v34 = vrot.slane %v2315_v36, 5 }
 0x25d   : > { %v2156_v46 = vor.u32 %v2154_v40, %v2153_v39  ;;  %v2194_v47 = vsel %vm6198_vm14, 0, %v2170_v41  ;;  %v4524_v48 = vpack.c.bf16 %v2095_v45, %v2095_v45 }
 0x25e   : > { %v2172_v13 = vshrl.u32 %v4526_v44, 16  ;;  %v2205_v49 = vsel %vm6205_vm15, %v2194_v47, 0  ;;  %v2175_v52 = vshll.u32 %v4526_v44, 16  ;;  %v6253_v58 = vld [vmem:[#allocation3 + $0x18] sm:$0xf]  ;;  %v2318_v0 = vsel %vm5915_vm8, %v6237_v30, %v6241_v34 }
 0x25f   : > { %v2192_v50 = vsel %vm6198_vm14, 0, %v2156_v46  ;;  %v4376_v4 = vcombine.low %v2205_v49, %v2205_v49  ;;  %v4377_v53 = vcombine.high %v2205_v49, %v2205_v49  ;;  %v2158_v61 = vshrl.u32 %v4524_v48, 16  ;;  %v6255_v63 = vld [vmem:[#allocation3 + $0xc] sm:$0x1]  ;;  %v6279_v19 = vld [vmem:[#allocation3 + $0x1c] sm:$0x1] }
 0x260   : > { %v2203_v55 = vsel %vm6205_vm15, %v2192_v50, 0  ;;  %v2174_v57 = vrot.slane %v2172_v13, 7  ;;  %v6251_v36 = vld [vmem:[#allocation3 + $0x8] sm:$0xf]  ;;  %v2161_v2 = vshll.u32 %v4524_v48, 16  ;;  %v2348_v10 = vshrl.u32 %v6253_v58, 16 }
 0x261   : > { %v4372_v59 = vcombine.low %v2203_v55, %v2203_v55  ;;  %v4373_v60 = vcombine.high %v2203_v55, %v2203_v55  ;;  %2278 = vst.msk [vmem:[#allocation3 + $0x38] sm:$0xf] %vm2264_vm9, %v4376_v4  ;;  %v2320_v3 = vshrl.u32 %v6251_v36, 16  ;;  %v2323_v54 = vshll.u32 %v6251_v36, 16  ;;  %v6269_v7 = vld [vmem:[#allocation3 + $0x14] sm:$0x1] }
 0x262   : > { %2279 = vst.msk [vmem:[#allocation3 + $0x3c] sm:$0x1] %vm2266_vm10, %v4377_v53  ;;  %v2177_v1 = vor.u32 %v2175_v52, %v2174_v57  ;;  %v6265_v5 = vld [vmem:[#allocation3 + $0x10] sm:$0xf]  ;;  %v2160_v6 = vrot.slane %v2158_v61, 7  ;;  %v2329_v17 = vshll.u32 %v6255_v63, 16 }
 0x263   : > { %2274 = vst.msk [vmem:[#allocation3 + $0x28] sm:$0xf] %vm2264_vm9, %v4372_v59  ;;  %v2334_v8 = vshrl.u32 %v6265_v5, 16  ;;  %v2337_v9 = vshll.u32 %v6265_v5, 16  ;;  %v2322_v15 = vrot.slane %v2320_v3, 4  ;;  %v2325_v16 = vrot.slane %v2323_v54, 5 }
 0x264   : > { %2275 = vst.msk [vmem:[#allocation3 + $0x2c] sm:$0x1] %vm2266_vm10, %v4373_v60  ;;  %v2195_v12 = vsel %vm6198_vm14, 0, %v2177_v1  ;;  %v2163_v11 = vor.u32 %v2161_v2, %v2160_v6  ;;  %v2343_v23 = vshll.u32 %v6269_v7, 16  ;;  %v6282_v24 = vld [vmem:[#allocation3 + $0x20] sm:$0xf] }
 0x265   : > { %v2206_v18 = vsel %vm6205_vm15, %v2195_v12, 0  ;;  %v2336_v20 = vrot.slane %v2334_v8, 4  ;;  %v2339_v38 = vrot.slane %v2337_v9, 5  ;;  %v2326_v22 = vor.u32 %v2325_v16, %v2322_v15  ;;  %v6292_v41 = vld [vmem:[#allocation3 + $0x24] sm:$0x1] }
 0x266   : > { %v4378_v21 = vcombine.low %v2206_v18, %v2206_v18  ;;  %v4379_v14 = vcombine.high %v2206_v18, %v2206_v18  ;;  %v2193_v25 = vsel %vm6198_vm14, 0, %v2163_v11  ;;  %v2350_v27 = vrot.slane %v2348_v10, 4 }
 0x267   : > { %v2340_v26 = vor.u32 %v2339_v38, %v2336_v20  ;;  %v2351_v51 = vshll.u32 %v6253_v58, 16  ;;  %v2204_v28 = vsel %vm6205_vm15, %v2193_v25, 0  ;;  %v2327_v31 = vrot.slane %v2326_v22, 4 }
 0x268   : > { %2280 = vst.msk [vmem:[#allocation3 + $0x40] sm:$0xf] %vm2264_vm9, %v4378_v21  ;;  %v2331_v32 = vrot.slane %v2329_v17, 5  ;;  %v2357_v33 = vshll.u32 %v6279_v19, 16  ;;  %v4374_v37 = vcombine.low %v2204_v28, %v2204_v28  ;;  %v4375_v39 = vcombine.high %v2204_v28, %v2204_v28  ;;  %v6308_v53 = vld [vmem:[#allocation3 + $0x38] sm:$0xf] }
 0x269   : > { %2281 = vst.msk [vmem:[#allocation3 + $0x44] sm:$0x1] %vm2266_vm10, %v4379_v14  ;;  %v2341_v40 = vrot.slane %v2340_v26, 4  ;;  %v2353_v56 = vrot.slane %v2351_v51, 5  ;;  %v2345_v45 = vrot.slane %v2343_v23, 5  ;;  %v2362_v62 = vshrl.u32 %v6282_v24, 16 }
 0x26a   : > { %v2332_v44 = vsel %vm5915_vm8, %v2327_v31, %v2331_v32  ;;  %v6296_v46 = vld [vmem:[#allocation3 + $0x28] sm:$0xf]  ;;  %2276 = vst.msk [vmem:[#allocation3 + $0x30] sm:$0xf] %vm2264_vm9, %v4374_v37  ;;  %v2359_v13 = vrot.slane %v2357_v33, 5  ;;  %v2365_v48 = vshll.u32 %v6282_v24, 16 }
 0x26b   : > { %v6298_v30 = vld [vmem:[#allocation3 + $0x2c] sm:$0x1]  ;;  %2277 = vst.msk [vmem:[#allocation3 + $0x34] sm:$0x1] %vm2266_vm10, %v4375_v39  ;;  %v4380_v34 = vcombine.low %v2318_v0, %v2332_v44  ;;  %v2354_v47 = vor.u32 %v2353_v56, %v2350_v27  ;;  %v2346_v49 = vsel %vm5915_vm8, %v2341_v40, %v2345_v45  ;;  %v2364_v50 = vrot.slane %v2362_v62, 4  ;;  %v5106_v45 = vld [vmem:[#allocation12 + $0x10] sm:$0xff]  }
 0x26c   : > { %v2376_v52 = vshrl.u32 %v6296_v46, 16  ;;  %v2379_v4 = vshll.u32 %v6296_v46, 16  ;;  %v2367_v57 = vrot.slane %v2365_v48, 5  ;;  %v2371_v59 = vshll.u32 %v6292_v41, 16  ;;  %v6317_v15 = vld [vmem:[#allocation3 + $0x3c] sm:$0x1] }
 0x26d   : > { %4715 = vmatprep.mubr.msk.bf16.mxu0 %vm2438_vm0, %v4380_v34  ;;  %v2355_v55 = vrot.slane %v2354_v47, 4  ;;  %v2385_v60 = vshll.u32 %v6298_v30, 16  ;;  %v2404_v3 = vshrl.u32 %v6308_v53, 16  ;;  %v2407_v8 = vshll.u32 %v6308_v53, 16  ;;  %v2619_v34 = vld [vmem:[#allocation3] sm:$0xe] }
 0x26e   : > { %v2378_v61 = vrot.slane %v2376_v52, 4  ;;  %v2381_v0 = vrot.slane %v2379_v4, 5  ;;  %v2368_v2 = vor.u32 %v2367_v57, %v2364_v50  ;;  %v2373_v10 = vrot.slane %v2371_v59, 5  ;;  %v2620_v47 = vld [vmem:[#allocation3 + $0x8] sm:$0xe]  ;;  %v5110_v48 = vld [vmem:[#allocation12 + $0x18] sm:$0xff]  }
 0x26f   : > { %v2360_v1 = vsel %vm5915_vm8, %v2355_v55, %v2359_v13  ;;  %v2387_v12 = vrot.slane %v2385_v60, 5  ;;  %v2406_v16 = vrot.slane %v2404_v3, 4  ;;  %v2409_v20 = vrot.slane %v2407_v8, 5  ;;  %v2622_v4 = vld [vmem:[#allocation3 + $0x18] sm:$0xe] }
 0x270   : > { %v4381_v54 = vcombine.low %v2346_v49, %v2360_v1  ;;  %v2382_v6 = vor.u32 %v2381_v0, %v2378_v61  ;;  %v2369_v9 = vrot.slane %v2368_v2, 4  ;;  %v2413_v25 = vshll.u32 %v6317_v15, 16  ;;  %v2623_v59 = vld [vmem:[#allocation3 + $0x20] sm:$0xe]  ;;  %v5127_v52 = vld [vmem:[#allocation2 + $0x108] ss:$8 sps:$4 sm:$0xff]  }
 0x271   : > { %v2293_v18 = vld [vmem:[#allocation3 + $0x30] sm:$0xf]  ;;  %v2410_v23 = vor.u32 %v2409_v20, %v2406_v16  ;;  %v4389_v62 = vcombine.low %v6180_v42, %v6251_v36  ;;  %v4390_v13 = vcombine.low %v6265_v5, %v6253_v58  ;;  %v4391_v49 = vcombine.low %v6282_v24, %v6296_v46  ;;  %v2624_v46 = vld [vmem:[#allocation3 + $0x28] sm:$0xe] }
 0x272   : > { %4716 = vmatmul.mubr.msk.bf16.vlgmr.msra.gmra.mrb[8].mxu0 %vm2438_vm0, %v4381_v54  ;;  %v2383_v17 = vrot.slane %v2382_v6, 4  ;;  %v6320_v11 = vld [vmem:[#allocation3 + $0x34] sm:$0x1]  ;;  %v2390_v38 = vshrl.u32 %v2293_v18, 16  ;;  %v2393_v21 = vshll.u32 %v2293_v18, 16  ;;  %v2374_v14 = vsel %vm5915_vm8, %v2369_v9, %v2373_v10  ;;  %v5112_v10 = vld [vmem:[#allocation12 + $0x20] sm:$0xff]  }
 0x273   : > { %v2399_v28 = vshll.u32 %v6320_v11, 16  ;;  %v2411_v32 = vrot.slane %v2410_v23, 4  ;;  %v2415_v39 = vrot.slane %v2413_v25, 5  ;;  %v4398_v42 = vrot.slane %v2619_v34, 9  ;;  %v2621_v24 = vld [vmem:[#allocation3 + $0x10] sm:$0xe] }
 0x274   : > { %v2388_v22 = vsel %vm5915_vm8, %v2383_v17, %v2387_v12  ;;  %v2392_v27 = vrot.slane %v2390_v38, 4  ;;  %v2395_v51 = vrot.slane %v2393_v21, 5  ;;  %v2648_v36 = vrot.slane %v6188_v29, 5  ;;  %v2625_v54 = vld [vmem:[#allocation3 + $0x30] sm:$0xe] }
 0x275   : > { %v4382_v26 = vcombine.low %v2374_v14, %v2388_v22  ;;  %v2401_v37 = vrot.slane %v2399_v28, 5  ;;  %v2416_v56 = vsel %vm5915_vm8, %v2411_v32, %v2415_v39  ;;  %v2652_v50 = vrot.slane %v6255_v63, 5  ;;  %v2626_v9 = vld [vmem:[#allocation3 + $0x38] sm:$0xe]  ;;  %v2906_v38 = vld [vmem:[#allocation3 + $0x8] sm:$0xf] }
 0x276   : > { %v2396_v31 = vor.u32 %v2395_v51, %v2392_v27  ;;  %v2649_v58 = vsel %vm6346_vm4, %v4398_v42, %v2648_v36  ;;  %v4392_v29 = vcombine.low %v2293_v18, %v6308_v53  ;;  %v4400_v55 = vrot.slane %v2621_v24, 9  ;;  %v2908_v18 = vld [vmem:[#allocation3 + $0x10] sm:$0xf]  ;;  %v6381_v34 = vld [vmem:[#allocation3 + $0xc] sm:$0x1] }
 0x277   : > { %4719 = vmatprep.mubr.msk.bf16.mxu1 %vm2438_vm0, %v4382_v26  ;;  %v2656_v57 = vrot.slane %v6269_v7, 5  ;;  %v2668_v60 = vrot.slane %v6298_v30, 5  ;;  %v4403_v61 = vrot.slane %v2624_v46, 9  ;;  %v4401_v0 = vrot.slane %v2622_v4, 9  ;;  %v5111_v26 = vld [vmem:[#allocation3 + $0x8] ss:$8 sps:$4 sm:$0xff]  }
 0x278   : > { %v2397_v33 = vrot.slane %v2396_v31, 4  ;;  %v2660_v1 = vrot.slane %v6279_v19, 5  ;;  %v2664_v2 = vrot.slane %v6292_v41, 5  ;;  %v4402_v3 = vrot.slane %v2623_v59, 9  ;;  %v2916_v28 = vld [vmem:[#allocation3 + $0x30] sm:$0xf] }
 0x279   : > { %v2657_v53 = vsel %vm6346_vm4, %v4400_v55, %v2656_v57  ;;  %v2669_v7 = vsel %vm6346_vm4, %v4403_v61, %v2668_v60  ;;  %v4404_v12 = vrot.slane %v2625_v54, 9  ;;  %v2672_v41 = vrot.slane %v6320_v11, 5  ;;  %v6384_v36 = vld [vmem:[#allocation12 + $0x28] sm:$0xff]   ;;  %v2920_v55 = vld [vmem:[#allocation3 + $0x40] sm:$0xf] }
 0x27a   : > { %v2402_v40 = vsel %vm5915_vm8, %v2397_v33, %v2401_v37  ;;  %v2661_v30 = vsel %vm6346_vm4, %v4401_v0, %v2660_v1  ;;  %v2665_v8 = vsel %vm6346_vm4, %v4402_v3, %v2664_v2  ;;  %v4405_v16 = vrot.slane %v2626_v9, 9  ;;  %v2910_v33 = vld [vmem:[#allocation3 + $0x18] sm:$0xf]  ;;  %v6379_v37 = vld [vmem:[#allocation3 + $0x14] sm:$0x1] }
 0x27b   : > { %v4383_v44 = vcombine.low %v2402_v40, %v2416_v56  ;;  %v4407_v6 = vcombine.low %v2657_v53, %v2661_v30  ;;  %v4408_v19 = vcombine.low %v2665_v8, %v2669_v7  ;;  %v2676_v17 = vrot.slane %v6317_v15, 5  ;;  %v2912_v15 = vld [vmem:[#allocation3 + $0x20] sm:$0xf]  ;;  %v2914_v56 = vld [vmem:[#allocation3 + $0x28] sm:$0xf] }
 0x27c   : > { %v2673_v20 = vsel %vm6346_vm4, %v4404_v12, %v2672_v41  ;;  %v2937_v21 = vshrl.u32 %v2908_v18, 16  ;;  %v2940_v14 = vshll.u32 %v2908_v18, 16  ;;  %v2923_v23 = vshrl.u32 %v2906_v38, 16  ;;  %v6389_v57 = vld [vmem:[#allocation3 + $0x24] sm:$0x1] }
 0x27d   : > { %4720 = vmatmul.mubr.msk.bf16.vlgmr.msra.gmra.mrb[0].mxu1 %vm2438_vm0, %v4383_v44  ;;  %v2677_v22 = vsel %vm6346_vm4, %v4405_v16, %v2676_v17  ;;  %v2926_v25 = vshll.u32 %v2906_v38, 16  ;;  %v2965_v39 = vshrl.u32 %v2912_v15, 16  ;;  %v2968_v40 = vshll.u32 %v2912_v15, 16  ;;  %v2918_v3 = vld [vmem:[#allocation3 + $0x38] sm:$0xf] }
 0x27e   : > { %4724 = vmatpush3.bf16.msra.mxu1 %v6139_v43  ;;  %4725 = vmatprep.mubr.msk.bf16.mxu1 %vm2438_vm0, %v4389_v62  ;;  %v4399_v43 = vrot.slane %v2620_v47, 9  ;;  %v4409_v11 = vcombine.low %v2673_v20, %v2677_v22  ;;  %v2939_v27 = vrot.slane %v2937_v21, 4  ;;  %v2942_v51 = vrot.slane %v2940_v14, 5  ;;  %v6392_v53 = vld [vmem:[#allocation3 + $0x1c] sm:$0x1] }
 0x27f   : > { %4733 = vmatprep.subr.bf16.mxu1 %v5106_v45  ;;  %v2925_v31 = vrot.slane %v2923_v23, 4  ;;  %v2928_v32 = vrot.slane %v2926_v25, 5  ;;  %v2996_v62 = vshll.u32 %v2916_v28, 16  ;;  %v2951_v47 = vshrl.u32 %v2910_v33, 16  ;;  %v6394_v54 = vld [vmem:[#allocation3 + $0x34] sm:$0x1] }
 0x280   : > { %v2653_v5 = vsel %vm6346_vm4, %v4399_v43, %v2652_v50  ;;  %v2943_v44 = vor.u32 %v2942_v51, %v2939_v27  ;;  %v2946_v42 = vshll.u32 %v6379_v37, 16  ;;  %v2979_v43 = vshrl.u32 %v2914_v56, 16  ;;  %v6399_v41 = vld [vmem:[#allocation3 + $0x2c] sm:$0x1]  ;;  %v5115_v18 = vld [vmem:[#allocation3 + $0x38] ss:$8 sps:$4 sm:$0xff]  }
 0x281   : > { %v4406_v63 = vcombine.low %v2649_v58, %v2653_v5  ;;  %v2982_v50 = vshll.u32 %v2914_v56, 16  ;;  %v5114_v58 = vld [vmem:[#allocation3 + $0x28] ss:$8 sps:$4 sm:$0xff]   ;;  %v2967_v5 = vrot.slane %v2965_v39, 4  ;;  %v2970_v24 = vrot.slane %v2968_v40, 5 }
 0x282   : > { %v2932_v46 = vshll.u32 %v6381_v34, 16  ;;  %v2953_v59 = vrot.slane %v2951_v47, 4  ;;  %v2948_v0 = vrot.slane %v2946_v42, 5  ;;  %v2981_v1 = vrot.slane %v2979_v43, 4  ;;  %v6408_v39 = vld [vmem:[#allocation3 + $0x44] sm:$0x1] }
 0x283   : > { %v2984_v2 = vrot.slane %v2982_v50, 5  ;;  %v2971_v7 = vor.u32 %v2970_v24, %v2967_v5  ;;  %v3021_v30 = vshrl.u32 %v2920_v55, 16  ;;  %v2974_v12 = vshll.u32 %v6389_v57, 16  ;;  %v6414_v47 = vld [vmem:[#allocation3 + $0x3c] sm:$0x1] }
 0x284   : > { %v2934_v8 = vrot.slane %v2932_v46, 5  ;;  %v3007_v16 = vshrl.u32 %v2918_v3, 16  ;;  %v3010_v17 = vshll.u32 %v2918_v3, 16  ;;  %v2960_v38 = vshll.u32 %v6392_v53, 16  ;;  %v3141_v42 = vld [vmem:[#allocation3 + $0x10] sm:$0xe] }
 0x285   : > { %4726 = vmatmul.mubr.msk.bf16.vlgmr.msra.gmra.mrb[4].mxu1 %vm2438_vm0, %v4390_v13  ;;  %v2954_v13 = vshll.u32 %v2910_v33, 16  ;;  %v2985_v21 = vor.u32 %v2984_v2, %v2981_v1  ;;  %v3002_v14 = vshll.u32 %v6394_v54, 16  ;;  %v3023_v23 = vrot.slane %v3021_v30, 4  ;;  %v3143_v3 = vld [vmem:[#allocation3 + $0x20] sm:$0xe] }
 0x286   : > { %4734 = vmatpush3.bf16.msra.mxu1 %v5106_v45  ;;  %4729 = vmatprep.mubr.msk.bf16.mxu1 %vm2438_vm0, %v4391_v49  ;;  %v2993_v45 = vshrl.u32 %v2916_v28, 16  ;;  %v2929_v49 = vor.u32 %v2928_v32, %v2925_v31  ;;  %v2976_v15 = vrot.slane %v2974_v12, 5  ;;  %v3009_v28 = vrot.slane %v3007_v16, 4 }
 0x287   : > { %4743 = vmatprep.subr.bf16.mxu1 %v5110_v48  ;;  %v2956_v60 = vrot.slane %v2954_v13, 5  ;;  %v3012_v31 = vrot.slane %v3010_v17, 5  ;;  %v2986_v32 = vrot.slane %v2985_v21, 4  ;;  %v3004_v33 = vrot.slane %v3002_v14, 5  ;;  %v3147_v21 = vld [vmem:[#allocation3 + $0x40] sm:$0xe] }
 0x288   : > { %v2995_v4 = vrot.slane %v2993_v45, 4  ;;  %v2930_v61 = vrot.slane %v2929_v49, 4  ;;  %v2962_v40 = vrot.slane %v2960_v38, 5  ;;  %v3030_v49 = vshll.u32 %v6408_v39, 16 }
 0x289   : > { %v3016_v24 = vshll.u32 %v6414_v47, 16  ;;  %v3186_v12 = vrot.slane %v6394_v54, 5  ;;  %v3174_v17 = vrot.slane %v6392_v53, 5 }
 0x28a   : > { %v2935_v20 = vsel %vm5915_vm8, %v2930_v61, %v2934_v8  ;;  %v3166_v61 = vrot.slane %v6381_v34, 5  ;;  %v4436_v34 = vrot.slane %v3143_v3, 9 }
 0x28d   : > { %4730 = vmatmul.mubr.msk.bf16.gmra.mrb[0].mxu1 %vm2438_vm0, %v4392_v29  ;;  %v2944_v29 = vrot.slane %v2943_v44, 4 }
 0x28e   : > { %4735 = vmatprep.mubr.msk.bf16.mxu1 %vm2438_vm0, %v4406_v63  ;;  %v2998_v63 = vrot.slane %v2996_v62, 5 }
 0x28f   : > { %v2949_v9 = vsel %vm5915_vm8, %v2944_v29, %v2948_v0  ;;  %v3140_v29 = vld [vmem:[#allocation3 + $0x8] sm:$0xe]  ;;  %v3018_v0 = vrot.slane %v3016_v24, 5 }
 0x290   : > { %v4424_v22 = vcombine.low %v2935_v20, %v2949_v9  ;;  %v3178_v9 = vrot.slane %v6389_v57, 5  ;;  %v3182_v20 = vrot.slane %v6399_v41, 5 }
 0x292   : > { %v3179_v38 = vsel %vm6346_vm4, %v4436_v34, %v3178_v9  ;;  %v3437_v9 = vld [vmem:[#allocation3 + $0x40] sm:$0xf] }
 0x295   : > { %4736 = vmatmul.mubr.msk.bf16.vlgmr.msra.gmra.mrb[4].mxu1 %vm2438_vm0, %v4407_v6  ;;  %v3024_v6 = vshll.u32 %v2920_v55, 16 }
 0x296   : > { %4744 = vmatpush3.bf16.msra.mxu1 %v5110_v48  ;;  %4739 = vmatprep.mubr.msk.bf16.mxu1 %vm2438_vm0, %v4408_v19  ;;  %v5113_v48 = vld [vmem:[#allocation3 + $0x18] ss:$8 sps:$4 sm:$0xff]   ;;  %v2957_v19 = vor.u32 %v2956_v60, %v2953_v59  ;;  %v3032_v59 = vrot.slane %v3030_v49, 5  ;;  %v4433_v60 = vrot.slane %v3140_v29, 9 }
 0x297   : > { %4753 = vmatprep.subr.bf16.mxu1 %v5112_v10  ;;  %v3026_v25 = vrot.slane %v3024_v6, 5  ;;  %v3142_v6 = vld [vmem:[#allocation3 + $0x18] sm:$0xe] }
 0x298   : > { %v2958_v51 = vrot.slane %v2957_v19, 4  ;;  %v3167_v30 = vsel %vm6346_vm4, %v4433_v60, %v3166_v61  ;;  %v4435_v16 = vrot.slane %v3142_v6, 9  ;;  %v5120_v60 = vld [vmem:[#allocation3 + $0x20] ss:$8 sps:$4 sm:$0xff]  }
 0x299   : > { %v3027_v44 = vor.u32 %v3026_v25, %v3023_v23  ;;  %v5119_v23 = vld [vmem:[#allocation12 + $0x38] sm:$0xff]   ;;  %v4440_v25 = vrot.slane %v3147_v21, 9 }
 0x29a   : > { %v2963_v13 = vsel %vm5915_vm8, %v2958_v51, %v2962_v40  ;;  %v3175_v14 = vsel %vm6346_vm4, %v4435_v16, %v3174_v17  ;;  %v3425_v51 = vld [vmem:[#allocation3 + $0x10] sm:$0xf]  ;;  %v6472_v21 = vld [vmem:[#allocation3 + $0x24] sm:$0x1] }
 0x29b   : > { %v3028_v46 = vrot.slane %v3027_v44, 4  ;;  %v5118_v44 = vld [vmem:[#allocation3 + $0x10] ss:$8 sps:$4 sm:$0xff]  }
 0x29d   : > { %4740 = vmatmul.mubr.msk.bf16.gmra.mrb[0].mxu1 %vm2438_vm0, %v4409_v11  ;;  %v2972_v11 = vrot.slane %v2971_v7, 4  ;;  %v3033_v1 = vsel %vm5915_vm8, %v3028_v46, %v3032_v59  ;;  %v3439_v59 = vld [vmem:[#allocation3 + $0x48] sm:$0xf] }
 0x29e   : > { %4745 = vmatprep.mubr.msk.bf16.mxu1 %vm2438_vm0, %v5111_v26  ;;  %v2988_v26 = vshll.u32 %v6399_v41, 16  ;;  %v3194_v41 = vrot.slane %v6408_v39, 5  ;;  %v3543_v16 = vshll.u32 %v3439_v59, 16 }
 0x29f   : > { %v2977_v56 = vsel %vm5915_vm8, %v2972_v11, %v2976_v15  ;;  %v3146_v11 = vld [vmem:[#allocation3 + $0x38] sm:$0xe] }
 0x2a0   : > { %v2990_v45 = vrot.slane %v2988_v26, 5  ;;  %v4425_v43 = vcombine.low %v2963_v13, %v2977_v56  ;;  %v4439_v26 = vrot.slane %v3146_v11, 9  ;;  %v3195_v15 = vsel %vm6346_vm4, %v4440_v25, %v3194_v41  ;;  %v3433_v13 = vld [vmem:[#allocation3 + $0x30] sm:$0xf] }
 0x2a1   : > { %v3498_v46 = vshrl.u32 %v3433_v13, 16  ;;  %v3501_v29 = vshll.u32 %v3433_v13, 16  ;;  %v3529_v11 = vshll.u32 %v3437_v9, 16 }
 0x2a2   : > { %v2991_v50 = vsel %vm5915_vm8, %v2986_v32, %v2990_v45  ;;  %v3445_v32 = vshll.u32 %v3425_v51, 16 }
 0x2a3   : > { %v3503_v34 = vrot.slane %v3501_v29, 5 }
 0x2a5   : > { %4746 = vmatmul.mubr.msk.bf16.vlgmr.msra.gmra.mrb[4].mxu1 %vm2438_vm0, %v5113_v48  ;;  %v3013_v48 = vor.u32 %v3012_v31, %v3009_v28  ;;  %v3427_v28 = vld [vmem:[#allocation3 + $0x18] sm:$0xf]  ;;  %v3442_v31 = vshrl.u32 %v3425_v51, 16 }
 0x2a6   : > { %4754 = vmatpush3.bf16.msra.mxu1 %v5112_v10  ;;  %4749 = vmatprep.mubr.msk.bf16.mxu1 %vm2438_vm0, %v5114_v58  ;;  %v2999_v10 = vor.u32 %v2998_v63, %v2995_v4  ;;  %v5117_v58 = vld [vmem:[#allocation12 + $0x30] sm:$0xff]   ;;  %v4434_v4 = vrot.slane %v3141_v42, 9  ;;  %v3170_v63 = vrot.slane %v6379_v37, 5  ;;  %v3456_v40 = vshrl.u32 %v3427_v28, 16  ;;  %v3429_v42 = vld [vmem:[#allocation3 + $0x20] sm:$0xf] }
 0x2a7   : > { %4763 = vmatprep.subr.bf16.mxu1 %v6384_v36  ;;  %v3014_v55 = vrot.slane %v3013_v48, 4  ;;  %v3459_v56 = vshll.u32 %v3427_v28, 16  ;;  %v3444_v45 = vrot.slane %v3442_v31, 4  ;;  %v5122_v28 = vld [vmem:[#allocation3 + $0x40] ss:$8 sps:$4 sm:$0xff]  }
 0x2a8   : > { %v3000_v27 = vrot.slane %v2999_v10, 4  ;;  %v3171_v2 = vsel %vm6346_vm4, %v4434_v4, %v3170_v63  ;;  %v3144_v10 = vld [vmem:[#allocation3 + $0x28] sm:$0xe]  ;;  %v3458_v48 = vrot.slane %v3456_v40, 4  ;;  %v6461_v4 = vld [vmem:[#allocation3 + $0x1c] sm:$0x1] }
 0x2a9   : > { %v3019_v37 = vsel %vm5915_vm8, %v3014_v55, %v3018_v0  ;;  %v4441_v8 = vcombine.low %v3167_v30, %v3171_v2  ;;  %v3461_v49 = vrot.slane %v3459_v56, 5  ;;  %v3470_v63 = vshrl.u32 %v3429_v42, 16 }
 0x2aa   : > { %v3005_v62 = vsel %vm5915_vm8, %v3000_v27, %v3004_v33  ;;  %v4427_v7 = vcombine.low %v3019_v37, %v3033_v1  ;;  %v3190_v27 = vrot.slane %v6414_v47, 5  ;;  %v3431_v47 = vld [vmem:[#allocation3 + $0x28] sm:$0xf]  ;;  %v3473_v55 = vshll.u32 %v3429_v42, 16  ;;  %v5121_v37 = vld [vmem:[#allocation3 + $0x30] ss:$8 sps:$4 sm:$0xff]  }
 0x2ab   : > { %v4426_v5 = vcombine.low %v2991_v50, %v3005_v62  ;;  %v3447_v62 = vrot.slane %v3445_v32, 5  ;;  %v3484_v50 = vshrl.u32 %v3431_v47, 16  ;;  %v3462_v0 = vor.u32 %v3461_v49, %v3458_v48  ;;  %v6464_v1 = vld [vmem:[#allocation12 + $0x40] sm:$0xff]  }
 0x2ac   : > { %v3191_v33 = vsel %vm6346_vm4, %v4439_v26, %v3190_v27  ;;  %v3465_v6 = vshll.u32 %v6461_v4, 16  ;;  %v6479_v27 = vld [vmem:[#allocation3 + $0x3c] sm:$0x1]  ;;  %v3479_v32 = vshll.u32 %v6472_v21, 16  ;;  %v6488_v49 = vld [vmem:[#allocation3 + $0x4c] sm:$0x1] }
 0x2ad   : > { %4750 = vmatmul.mubr.msk.bf16.gmra.mrb[0].mxu1 %vm2438_vm0, %v5115_v18  ;;  %v4437_v18 = vrot.slane %v3144_v10, 9  ;;  %v4444_v39 = vcombine.low %v3191_v33, %v3195_v15  ;;  %v3448_v24 = vor.u32 %v3447_v62, %v3444_v45  ;;  %v3472_v10 = vrot.slane %v3470_v63, 4 }
 0x2ae   : > { %4755 = vmatprep.mubr.msk.bf16.mxu1 %vm2438_vm0, %v4424_v22  ;;  %v4442_v22 = vcombine.low %v3175_v14, %v3179_v38  ;;  %v3545_v15 = vrot.slane %v3543_v16, 5  ;;  %v3531_v45 = vrot.slane %v3529_v11, 5 }
 0x2af   : > { %v3183_v54 = vsel %vm6346_vm4, %v4437_v18, %v3182_v20  ;;  %v3449_v30 = vrot.slane %v3448_v24, 4  ;;  %v3463_v18 = vrot.slane %v3462_v0, 4  ;;  %v6470_v20 = vld [vmem:[#allocation3 + $0x2c] sm:$0x1]  ;;  %v3549_v24 = vshll.u32 %v6488_v49, 16 }
 0x2b0   : > { %v3493_v26 = vshll.u32 %v6470_v20, 16  ;;  %v3659_v0 = vld [vmem:[#allocation3 + $0x10] sm:$0xe]  ;;  %v3697_v11 = vrot.slane %v6470_v20, 5 }
 0x2b2   : > { %v3495_v48 = vrot.slane %v3493_v26, 5 }
 0x2b5   : > { %4756 = vmatmul.mubr.msk.bf16.vlgmr.msra.gmra.mrb[4].mxu1 %vm2438_vm0, %v4425_v43  ;;  %v6459_v43 = vld [vmem:[#allocation3 + $0x14] sm:$0x1] }
 0x2b6   : > { %4764 = vmatpush3.bf16.msra.mxu1 %v6384_v36  ;;  %4759 = vmatprep.mubr.msk.bf16.mxu1 %vm2438_vm0, %v4426_v5  ;;  %v3145_v36 = vld [vmem:[#allocation3 + $0x30] sm:$0xe]  ;;  %v3435_v5 = vld [vmem:[#allocation3 + $0x38] sm:$0xf]  ;;  %v3451_v61 = vshll.u32 %v6459_v43, 16 }
 0x2b7   : > { %4773 = vmatprep.subr.bf16.mxu1 %v5117_v58  ;;  %v4438_v19 = vrot.slane %v3145_v36, 9  ;;  %v3512_v2 = vshrl.u32 %v3435_v5, 16  ;;  %v3515_v3 = vshll.u32 %v3435_v5, 16  ;;  %v3486_v36 = vrot.slane %v3484_v50, 4 }
 0x2b8   : > { %v3453_v17 = vrot.slane %v3451_v61, 5 }
 0x2b9   : > { %v3187_v57 = vsel %vm6346_vm4, %v4438_v19, %v3186_v12  ;;  %v3475_v19 = vrot.slane %v3473_v55, 5  ;;  %v3540_v12 = vshrl.u32 %v3439_v59, 16  ;;  %v3514_v38 = vrot.slane %v3512_v2, 4 }
 0x2ba   : > { %v4443_v53 = vcombine.low %v3183_v54, %v3187_v57  ;;  %v3517_v57 = vrot.slane %v3515_v3, 5  ;;  %v3526_v54 = vshrl.u32 %v3437_v9, 16  ;;  %v3685_v9 = vrot.slane %v6459_v43, 5  ;;  %v3662_v43 = vld [vmem:[#allocation3 + $0x28] sm:$0xe] }
 0x2bb   : > { %v3476_v41 = vor.u32 %v3475_v19, %v3472_v10  ;;  %v3542_v51 = vrot.slane %v3540_v12, 4  ;;  %v3689_v12 = vrot.slane %v6461_v4, 5  ;;  %v4471_v4 = vrot.slane %v3662_v43, 9 }
 0x2bd   : > { %4760 = vmatmul.mubr.msk.bf16.gmra.mrb[0].mxu1 %vm2438_vm0, %v4427_v7  ;;  %v3477_v13 = vrot.slane %v3476_v41, 4  ;;  %v3546_v5 = vor.u32 %v3545_v15, %v3542_v51  ;;  %v3693_v41 = vrot.slane %v6472_v21, 5  ;;  %v3705_v51 = vrot.slane %v6479_v27, 5 }
 0x2be   : > { %4765 = vmatprep.mubr.msk.bf16.mxu1 %vm2438_vm0, %v4441_v8  ;;  %v3500_v8 = vrot.slane %v3498_v46, 4  ;;  %v3481_v46 = vrot.slane %v3479_v32, 5  ;;  %v3698_v15 = vsel %vm6346_vm4, %v4471_v4, %v3697_v11 }
 0x2c0   : > { %v3504_v25 = vor.u32 %v3503_v34, %v3500_v8  ;;  %v4010_v8 = vld [vmem:[#allocation15] sm:$0xf]  ;;  %v4468_v34 = vrot.slane %v3659_v0, 9 }
 0x2c2   : > { %v3505_v62 = vrot.slane %v3504_v25, 4 }
 0x2c5   : > { %4766 = vmatmul.mubr.msk.bf16.vlgmr.msra.gmra.mrb[4].mxu1 %vm2438_vm0, %v4442_v22  ;;  %v6474_v22 = vld [vmem:[#allocation3 + $0x34] sm:$0x1] }
 0x2c6   : > { %4774 = vmatpush3.bf16.msra.mxu1 %v5117_v58  ;;  %4769 = vmatprep.mubr.msk.bf16.mxu1 %vm2438_vm0, %v4443_v53  ;;  %v3487_v58 = vshll.u32 %v3431_v47, 16  ;;  %v3467_v53 = vrot.slane %v3465_v6, 5  ;;  %v3507_v33 = vshll.u32 %v6474_v22, 16  ;;  %v3521_v47 = vshll.u32 %v6479_v27, 16  ;;  %v3660_v6 = vld [vmem:[#allocation3 + $0x18] sm:$0xe] }
 0x2c7   : > { %4783 = vmatprep.subr.bf16.mxu1 %v5119_v23  ;;  %v4469_v19 = vrot.slane %v3660_v6, 9  ;;  %v3701_v35 = vrot.slane %v6474_v22, 5 }
 0x2c8   : > { %v3489_v7 = vrot.slane %v3487_v58, 5  ;;  %v3468_v31 = vsel %vm5915_vm8, %v3463_v18, %v3467_v53  ;;  %v3509_v42 = vrot.slane %v3507_v33, 5  ;;  %v6490_v58 = vld [vmem:[#allocation3 + $0x44] sm:$0x1]  ;;  %v3523_v59 = vrot.slane %v3521_v47, 5 }
 0x2c9   : > { %v3535_v61 = vshll.u32 %v6490_v58, 16  ;;  %v3686_v18 = vsel %vm6346_vm4, %v4468_v34, %v3685_v9  ;;  %v4022_v33 = vsel %vm4020_vm5, %v4010_v8, 0 }
 0x2ca   : > { %v3490_v14 = vor.u32 %v3489_v7, %v3486_v36  ;;  %v3510_v55 = vsel %vm5915_vm8, %v3505_v62, %v3509_v42  ;;  %v3551_v36 = vrot.slane %v3549_v24, 5 }
 0x2cb   : > { %v3537_v10 = vrot.slane %v3535_v61, 5 }
 0x2cc   : > { %v3491_v56 = vrot.slane %v3490_v14, 4  ;;  %v3661_v14 = vld [vmem:[#allocation3 + $0x20] sm:$0xe] }
 0x2cd   : > { %4770 = vmatmul.mubr.msk.bf16.gmra.mrb[0].mxu1 %vm2438_vm0, %v4444_v39  ;;  %v3518_v39 = vor.u32 %v3517_v57, %v3514_v38  ;;  %v3663_v38 = vld [vmem:[#allocation3 + $0x30] sm:$0xe]  ;;  %v3690_v57 = vsel %vm6346_vm4, %v4469_v19, %v3689_v12  ;;  %v4470_v25 = vrot.slane %v3661_v14, 9 }
 0x2ce   : > { %4775 = vmatprep.mubr.msk.bf16.mxu1 %vm2438_vm0, %v5118_v44  ;;  %v3528_v44 = vrot.slane %v3526_v54, 4  ;;  %v3496_v29 = vsel %vm5915_vm8, %v3491_v56, %v3495_v48  ;;  %v4476_v54 = vcombine.low %v3686_v18, %v3690_v57  ;;  %v4472_v53 = vrot.slane %v3663_v38, 9 }
 0x2cf   : > { %v3519_v50 = vrot.slane %v3518_v39, 4  ;;  %v3694_v32 = vsel %vm6346_vm4, %v4470_v25, %v3693_v41  ;;  %v3709_v56 = vrot.slane %v6490_v58, 5  ;;  %v5126_v58 = vld [vmem:[#allocation2 + $0xf8] ss:$8 sps:$4 sm:$0xff]  }
 0x2d0   : > { %v3532_v63 = vor.u32 %v3531_v45, %v3528_v44  ;;  %v3702_v20 = vsel %vm6346_vm4, %v4472_v53, %v3701_v35  ;;  %v4477_v22 = vcombine.low %v3694_v32, %v3698_v15  ;;  %v3713_v44 = vrot.slane %v6488_v49, 5  ;;  %v5124_v45 = vld [vmem:[#allocation2 + $0xd8] ss:$8 sps:$4 sm:$0xff]   ;;  %v5125_v49 = vld [vmem:[#allocation2 + $0xe8] ss:$8 sps:$4 sm:$0xff]  }
 0x2d1   : > { %v3524_v3 = vsel %vm5915_vm8, %v3519_v50, %v3523_v59 }
 0x2d2   : > { %v4461_v7 = vcombine.low %v3510_v55, %v3524_v3 }
 0x2d5   : > { %4776 = vmatmul.mubr.msk.bf16.vlgmr.msra.gmra.mrb[4].mxu1 %vm2438_vm0, %v5120_v60  ;;  %v3482_v60 = vsel %vm5915_vm8, %v3477_v13, %v3481_v46  ;;  %v3991_v13 = vpop.permute.xlu0 %3990 }
 0x2d6   : > { %4784 = vmatpush3.bf16.msra.mxu1 %v5119_v23  ;;  %4779 = vmatprep.mubr.msk.bf16.mxu1 %vm2438_vm0, %v5121_v37  ;;  %v3454_v23 = vsel %vm5915_vm8, %v3449_v30, %v3453_v17  ;;  %v4460_v2 = vcombine.low %v3482_v60, %v3496_v29  ;;  %v3547_v37 = vrot.slane %v3546_v5, 4  ;;  %v3533_v30 = vrot.slane %v3532_v63, 4  ;;  %v3995_v5 = vpop.permute.xlu1 %3994 }
 0x2d7   : > { %4793 = vmatprep.subr.bf16.mxu1 %v6464_v1  ;;  %v4459_v40 = vcombine.low %v3454_v23, %v3468_v31  ;;  %v3664_v23 = vld [vmem:[#allocation3 + $0x38] sm:$0xe]  ;;  %v3665_v31 = vld [vmem:[#allocation3 + $0x40] sm:$0xe]  ;;  %v4000_v42 = vsel %vm709_vm2, %v5124_v45, %v3991_v13  ;;  %v4006_v46 = vsel %vm709_vm2, %v5126_v58, %v3995_v5 }
 0x2d8   : > { %v3538_v16 = vsel %vm5915_vm8, %v3533_v30, %v3537_v10  ;;  %v3552_v17 = vsel %vm5915_vm8, %v3547_v37, %v3551_v36  ;;  %v4473_v26 = vrot.slane %v3664_v23, 9  ;;  %v4474_v27 = vrot.slane %v3665_v31, 9 }
 0x2d9   : > { %v3993_v50 = vpop.permute.xlu0 %3992 }
 0x2da   : > { %v3706_v21 = vsel %vm6346_vm4, %v4473_v26, %v3705_v51  ;;  %v3710_v62 = vsel %vm6346_vm4, %v4474_v27, %v3709_v56  ;;  %v4003_v24 = vsel %vm709_vm2, %v5125_v49, %v3993_v50  ;;  %v3997_v29 = vpop.permute.xlu1 %3996 }
 0x2db   : > { %v4009_v63 = vsel %vm709_vm2, %v5127_v52, %v3997_v29 }
 0x2dd   : > { %4780 = vmatmul.mubr.msk.bf16.gmra.mrb[0].mxu1 %vm2438_vm0, %v5122_v28  ;;  %v3666_v28 = vld [vmem:[#allocation3 + $0x48] sm:$0xe] }
 0x2de   : > { %4785 = vmatprep.mubr.msk.bf16.mxu1 %vm2438_vm0, %v4459_v40  ;;  %v4475_v39 = vrot.slane %v3666_v28, 9  ;;  %v4478_v40 = vcombine.low %v3702_v20, %v3706_v21 }
 0x2e0   : > { %v3714_v47 = vsel %vm6346_vm4, %v4475_v39, %v3713_v44 }
 0x2e1   : > { %v4479_v48 = vcombine.low %v3710_v62, %v3714_v47 }
 0x2e5   : > { %4786 = vmatmul.mubr.msk.bf16.vlgmr.msra.gmra.mrb[4].mxu1 %vm2438_vm0, %v4460_v2  ;;  %v4513_v2 = vld [vmem:[#allocation13] ss:$0 sm:$0xff] }
 0x2e6   : > { %4794 = vmatpush3.bf16.msra.mxu1 %v6464_v1  ;;  %4789 = vmatprep.mubr.msk.bf16.mxu1 %vm2438_vm0, %v4461_v7  ;;  %v4462_v1 = vcombine.low %v3538_v16, %v3552_v17 }
 0x2e7   : > { %4960 = vmatprep.subr.msk.bf16.mxu1 %vm4020_vm5, %v4010_v8 }
 0x2ed   : > { %4790 = vmatmul.mubr.msk.bf16.gmra.mrb[0].mxu1 %vm2438_vm0, %v4462_v1 }
 0x2ee   : > { %4795 = vmatprep.mubr.msk.bf16.mxu1 %vm2438_vm0, %v4476_v54 }
 0x2f5   : > { %4796 = vmatmul.mubr.msk.bf16.vlgmr.msra.gmra.mrb[4].mxu1 %vm2438_vm0, %v4477_v22 }
 0x2f6   : > { %4804 = vmatpush3.bf16.msra.mxu1 %v4022_v33  ;;  %4799 = vmatprep.mubr.msk.bf16.mxu1 %vm2438_vm0, %v4478_v40 }
 0x2fd   : > { %4800 = vmatmul.mubr.msk.bf16.gmra.mrb[0].mxu1 %vm2438_vm0, %v4479_v48 }
 0x2fe   : > { %4805 = vmatprep.mubr.msk.bf16.mxu1 %vm4011_vm6, %v4000_v42 }
 0x305   : > { %4806 = vmatmul.mubr.msk.bf16.vlgmr.msra.gmra.mrb[4].mxu1 %vm4011_vm6, %v4003_v24 }
 0x306   : > { %4809 = vmatprep.mubr.msk.bf16.mxu1 %vm4011_vm6, %v4006_v46 }
 0x30d   : > { %4810 = vmatmul.mubr.msk.bf16.gmra.mrb[0].mxu1 %vm4011_vm6, %v4009_v63 }
 0x345   : > { %v4717_v55 = vpop.f32.mrb[8].mxu0 }
 0x346   : > { %v2485_v59 = vpop.f32.mrb[9].mxu0 }
 0x347   : > { %v4718_v60 = vpop.f32.mrb[10].mxu0 }
 0x348   : > { %v2488_v61 = vpop.f32.mrb[11].mxu0 }
 0x3d8   : > { %v4807_v0 = vpop.f32.mrb[4].mxu1 }
 0x3d9   : > { %v4815_v3 = vadd.f32 %v4807_v0, %v4717_v55  ;;  %v4058_v37 = vpop.f32.mrb[5].mxu1 }
 0x3da   : > { %v4816_v36 = vadd.f32 %v4058_v37, %v2485_v59  ;;  %v4808_v7 = vpop.f32.mrb[6].mxu1 }
 0x3db   : > { %v4106_v30 = vadd.f32 %v4815_v3, %v4513_v2  ;;  %v4817_v6 = vadd.f32 %v4808_v7, %v4718_v60  ;;  %v4061_v8 = vpop.f32.mrb[7].mxu1 }
 0x3dc   : > { %v4104_v34 = vadd.f32 %v4816_v36, %v4513_v2  ;;  %v4818_v9 = vadd.f32 %v4061_v8, %v2488_v61 }
 0x3dd   : > { %4114 = vst.msk [vmem:[%s375_s17 + $0x10] sm:$0xff] %vm4011_vm6, %v4106_v30  ;;  %v4107_v10 = vadd.f32 %v4817_v6, %v4513_v2 }
 0x3de   : > { %4112 = vst.msk [vmem:[%s375_s17] sm:$0xff] %vm4011_vm6, %v4104_v34  ;;  %v4105_v19 = vadd.f32 %v4818_v9, %v4513_v2 }
 0x3df   : > { %4115 = vst.msk [vmem:[%s375_s17 + $0x18] sm:$0xff] %vm4011_vm6, %v4107_v10 }
 0x3e0   : > { %4113 = vst.msk [vmem:[%s375_s17 + $0x8] sm:$0xff] %vm4011_vm6, %v4105_v19  ;;  %v4811_v12 = vpop.f32.mrb[0].mxu1 }
 0x3e1   : > { %v4110_v16 = vadd.f32 %v4811_v12, %v4513_v2  ;;  %v4074_v17 = vpop.f32.mrb[1].mxu1 }
 0x3e2   : > { %v4108_v18 = vadd.f32 %v4513_v2, %v4074_v17  ;;  %v4812_v43 = vpop.f32.mrb[2].mxu1 }
 0x3e3   : > { %4118 = vst.msk [vmem:[%s375_s17 + $0x30] sm:$0xff] %vm4011_vm6, %v4110_v16  ;;  %v4111_v38 = vadd.f32 %v4812_v43, %v4513_v2  ;;  %v4077_v1 = vpop.f32.mrb[3].mxu1 }
 0x3e4   : > { %4116 = vst.msk [vmem:[%s375_s17 + $0x20] sm:$0xff] %vm4011_vm6, %v4108_v18  ;;  %v4109_v57 = vadd.f32 %v4513_v2, %v4077_v1 }
 0x3e5   : > { %4119 = vst.msk [vmem:[%s375_s17 + $0x38] sm:$0xff] %vm4011_vm6, %v4111_v38 }
 0x3e6   : > { %4117 = vst.msk [vmem:[%s375_s17 + $0x28] sm:$0xff] %vm4011_vm6, %v4109_v57 }
 0x3e7   : > { %5339 = shalt.err (!%p5336_p8)
}
 0x3e8   : > { %s5340_s18 = scalar_lea.hbm %s6558_s19, 1024  ;;  %s5344_s28 = scalar_lea.hbm %s6614_s7, 2048 }
 0x3e9   : > { %p5341_p4 = scmp.ne.s32.totalorder %s6558_s19, %s5340_s18  ;;  %p5345_p0 = scmp.lt.u32.totalorder %s6558_s19, %s6614_s7 }
 0x3ea   : > { %p5346_p6 = scmp.lt.u32.totalorder %s5344_s28, %s5340_s18  ;;  %p5348_p5 = scmp.lt.u32.totalorder %s5340_s18, %s6558_s19 }
 0x3eb   : > { %p5342_p10 = pnand %p5341_p4, %p6649_p9 }
 0x3ec   : > { %p5347_p7 = por %p5346_p6, %p5345_p0 }
 0x3ed   : > { %p5343_p11 = pneg %p5342_p10 }
 0x3ee   : > { %p5349_p12 = por %p5348_p5, %p5347_p7 }
 0x3f0   : > { %p5350_p13 = pnand %p5349_p12, %p5343_p11 }
 0x3f2   : > { %5353 = shalt.err (!%p5350_p13)
}
 0x3f3   : > { %s5420_s21 = smov 128   ;;  %s5421_s15 = smov 8  }
 0x3f4   : > { %4990 = dma.vmem_to_hbm [thread:$0]  (%p6649_p9), %s6560_s20, 1024, %s6558_s19, %s4121_s30, %s5420_s21, %s5420_s21, %s5421_s15  }
 0x3f5 PF: > { %s4149_s1 = sand.u32 1, %s5392_s24   ;;  %p6650_p1 = scmp.ne.s32.totalorder %s6628_s14, 0 }
 0x3f6   : > { %p6651_p3 = scmp.ge.s32.totalorder %s5404_s27, 2  ;;  %s4150_s23 = scalar_lea.sflag [#allocation6], %s4149_s1 }
 0x3f8   : > { %p5016_p2 = pnand %p6651_p3, %p6650_p1 }
 0x3fa   : > { %5387 = dma.done.wait (!%p5016_p2), %s4150_s23, 1024  }
 0x3fb   : > { %5389 = vsyncadd (!%p5016_p2), %s4150_s23, 4294966272  ;;  %p23_p8 = scmp.ge.s32.totalorder %s5643_s11, 4   ;;  %s6652_s24 = smov %s5396_s25 }
 0x3fc   : > { %s6653_s25 = smov %s5400_s26  ;;  %s6654_s26 = smov %s5654_s22 }
 0x3fd   : > { %s6655_s27 = smov %s5643_s11  ;;  %25 = sbr.rel (!%p23_p8) target bundleno = 10 (0xa), region = 142 }
 0x404   :  { %4155 = vsyncpa [#allocation5], 1 }
 0x405   :  { %4157 = vsyncpa [#allocation5 + $0x1], 1 }
 0x406   :  { %4158 = vsyncpa [#allocation8], 1 }
 0x407   :  { %4159 = vsyncpa [#allocation11], 1 }
 0x408   :  { %4160 = vsyncpa [#allocation14], 1 }
 0x409   :  { %4161 = vsyncpa [#allocation6], 1 }
 0x40a   :  { %4163 = vsyncpa [#allocation6 + $0x1], 1 }

</bundles_post_ra>
